<compile_context>
chip_gen: v6e
topology: v6e:2x2x1
jax: 0.10.0
libtpu: 0.0.40
codegen_flags: <defaults>
</compile_context>

<pallas_src>
import functools

import jax
import jax.numpy as jnp
from jax.experimental import pallas as pl
from jax.experimental.pallas import tpu as pltpu

LEAKY_SLOPE = 0.01          # pytorch_tools ABN default leaky_relu slope
BN_EPS = 1e-5
VMEM_LIMIT = 32 * 1024 * 1024


def _leaky(y):
    return jnp.where(y >= 0, y, y * LEAKY_SLOPE)


# ------------------------------ Pallas kernels ------------------------------ #

def _conv3x3s2_kernel(ph_ref, w_ref, shift_ref, o_ref, *, rows, wo, act):
    """3x3 stride-2 conv: 4 accumulating matmuls over a (rows*Wo)-pixel block.

    ph_ref:    (1, Ho+1, Wo+1, 4*Cin) bf16  phase (space-to-depth) tensor, one image
    w_ref:     (4, 4*Cin, Cout)       bf16  phase-group weights (BN scale folded)
    shift_ref: (1, Cout)              f32   folded bias/BN shift
    o_ref:     (1, rows*Wo, Cout)     bf16  flattened output row-block
    """
    r0 = pl.program_id(1) * rows
    cout = o_ref.shape[-1]
    acc = jnp.zeros((rows * wo, cout), jnp.float32)
    for a in range(2):
        for b in range(2):
            tap = ph_ref[0, pl.ds(r0 + a, rows), pl.ds(b, wo), :]   # (rows, Wo, 4C)
            tap = tap.reshape(rows * wo, tap.shape[-1])
            acc = acc + jnp.dot(tap, w_ref[2 * a + b],
                                preferred_element_type=jnp.float32)
    y = acc + shift_ref[...]
    if act:
        y = _leaky(y)
    o_ref[0] = y.astype(o_ref.dtype)


def _mm_kernel(a_ref, w_ref, shift_ref, o_ref, *, act):
    """1x1 conv (+ folded BN + leaky): o = act(a @ w + shift)."""
    y = jnp.dot(a_ref[...], w_ref[...], preferred_element_type=jnp.float32)
    y = y + shift_ref[...]
    if act:
        y = _leaky(y)
    o_ref[...] = y.astype(o_ref.dtype)


def _upsample_kernel(x_ref, wh_ref, wwt_ref, o_ref, *, c):
    """Fused separable bilinear upsample (align_corners=True) in NCHW.

    x_ref:   (1, C, H, W)   bf16
    wh_ref:  (hob, H)       bf16   row-block of the (Ho, H) interpolation matrix
    wwt_ref: (W, Wo)        bf16
    o_ref:   (1, C, hob, Wo)
    """
    hob, h = wh_ref.shape
    w = x_ref.shape[-1]
    wo = wwt_ref.shape[-1]
    if c == 1:
        t = jnp.dot(wh_ref[...], x_ref[0, 0],
                    preferred_element_type=jnp.float32)              # (hob, W)
    else:
        whb = jnp.broadcast_to(wh_ref[...][None], (c, hob, h))
        t = jnp.einsum('coh,chw->cow', whb, x_ref[0],
                       preferred_element_type=jnp.float32)           # (C, hob, W)
    t = t.reshape(c * hob, w).astype(jnp.bfloat16)
    out = jnp.dot(t, wwt_ref[...], preferred_element_type=jnp.float32)  # (C*hob, Wo)
    o_ref[0] = out.reshape(c, hob, wo).astype(o_ref.dtype)


def _head_kernel(x3_ref, u2_ref, u4_ref, u8_ref,
                 w1a_ref, w1b_ref, w1c_ref, w1d_ref, s1_ref,
                 w2_ref, s2_ref, o_ref):
    """Fused head: [concat over channels] -> conv1x1 -> ABN(leaky) -> conv1x1.

    Feature blocks are (1, C_i, P); the channel concat is realised as four
    accumulating matmuls, so the 120/128-wide intermediate never leaves VMEM.
    """
    h = jnp.dot(w1a_ref[...], x3_ref[0], preferred_element_type=jnp.float32)
    h = h + jnp.dot(w1b_ref[...], u2_ref[0], preferred_element_type=jnp.float32)
    h = h + jnp.dot(w1c_ref[...], u4_ref[0], preferred_element_type=jnp.float32)
    h = h + jnp.dot(w1d_ref[...], u8_ref[0], preferred_element_type=jnp.float32)
    h = _leaky(h + s1_ref[...])
    o = jnp.dot(w2_ref[...], h.astype(jnp.bfloat16),
                preferred_element_type=jnp.float32)
    o_ref[0] = (o + s2_ref[...]).astype(o_ref.dtype)


# -------------------------------- op wrappers -------------------------------- #

def _conv_rows(ho, wo, m_cap=256):
    """Largest row-block that divides Ho, keeps M=rows*Wo <= cap and 8-aligned."""
    cand = [r for r in range(1, ho + 1) if ho % r == 0]
    good = [r for r in cand if r * wo <= m_cap and (r * wo) % 8 == 0]
    return max(good) if good else ho


def conv3x3_s2(x, p, act=True):
    """3x3 conv, stride 2, pad 1, folded BN + leaky. x: (N, H, W, C) bf16 NHWC."""
    n, h, w, c = x.shape
    assert h % 2 == 0 and w % 2 == 0
    ho, wo = h // 2, w // 2
    wgrp, shift = p["w"], p["shift"]
    k4, cout = wgrp.shape[1], wgrp.shape[2]
    assert k4 == 4 * c

    # 4-phase (space-to-depth) tensor, ~1x input traffic, bf16.
    xp = jnp.pad(x.astype(jnp.bfloat16), ((0, 0), (1, 1), (1, 1), (0, 0)))
    ph = jnp.concatenate(
        [xp[:, py::2, px::2, :] for py in (0, 1) for px in (0, 1)], axis=-1)

    rows = _conv_rows(ho, wo)
    grid = (n, ho // rows)
    out = pl.pallas_call(
        functools.partial(_conv3x3s2_kernel, rows=rows, wo=wo, act=act),
        out_shape=jax.ShapeDtypeStruct((n, ho * wo, cout), jnp.bfloat16),
        grid=grid,
        in_specs=[
            pl.BlockSpec((1, ho + 1, wo + 1, k4), lambda i, j: (i, 0, 0, 0)),
            pl.BlockSpec((4, k4, cout), lambda i, j: (0, 0, 0)),
            pl.BlockSpec((1, cout), lambda i, j: (0, 0)),
        ],
        out_specs=pl.BlockSpec((1, rows * wo, cout), lambda i, j: (i, j, 0)),
        compiler_params=pltpu.CompilerParams(
            dimension_semantics=("parallel", "parallel"),
            vmem_limit_bytes=VMEM_LIMIT),
    )(ph, wgrp, shift)
    return out.reshape(n, ho, wo, cout)


def _pick_tile(m, cap=1024):
    if m > cap:
        for t in range(cap, 7, -1):
            if m % t == 0 and t % 8 == 0:
                return t
        return m
    if m >= 512 and m % 2 == 0 and (m // 2) % 8 == 0:
        return m // 2                      # keep >=2 grid steps for 2-TC chips
    return m


def conv1x1(x, p, act=True):
    """1x1 conv + folded BN + leaky. x: (N, H, W, C) bf16 NHWC."""
    n, h, w, c = x.shape
    wmat, shift = p["w"], p["shift"]
    cout = wmat.shape[1]
    m = n * h * w
    a = x.reshape(m, c)
    tm = _pick_tile(m)
    out = pl.pallas_call(
        functools.partial(_mm_kernel, act=act),
        out_shape=jax.ShapeDtypeStruct((m, cout), jnp.bfloat16),
        grid=(m // tm,),
        in_specs=[
            pl.BlockSpec((tm, c), lambda i: (i, 0)),
            pl.BlockSpec((c, cout), lambda i: (0, 0)),
            pl.BlockSpec((1, cout), lambda i: (0, 0)),
        ],
        out_specs=pl.BlockSpec((tm, cout), lambda i: (i, 0)),
        compiler_params=pltpu.CompilerParams(dimension_semantics=("parallel",)),
    )(a, wmat, shift)
    return out.reshape(n, h, w, cout)


def _bilinear_matrix(n_in, n_out):
    """1-D interpolation matrix, mode='bilinear', align_corners=True."""
    if n_in == 1:
        return jnp.ones((n_out, 1), jnp.float32)
    src = jnp.arange(n_out, dtype=jnp.float32) * (n_in - 1) / (n_out - 1)
    idx = jnp.arange(n_in, dtype=jnp.float32)
    return jnp.maximum(0.0, 1.0 - jnp.abs(src[:, None] - idx[None, :]))


def _upsample_rows(ho, c, wo, byte_cap=4 * 1024 * 1024):
    if c * ho * wo * 4 <= byte_cap:
        return ho
    cand = [r for r in range(8, ho, 8)
            if ho % r == 0 and c * r * wo * 4 <= byte_cap]
    return max(cand) if cand else ho


def bilinear_upsample_nchw(x, scale, out_dtype=jnp.bfloat16):
    """nn.Upsample(scale_factor=scale, mode='bilinear', align_corners=True), NCHW."""
    n, c, h, w = x.shape
    ho, wo = h * scale, w * scale
    wh = _bilinear_matrix(h, ho).astype(jnp.bfloat16)       # (Ho, H)
    wwt = _bilinear_matrix(w, wo).T.astype(jnp.bfloat16)    # (W, Wo)
    hob = _upsample_rows(ho, c, wo)
    grid = (n, ho // hob)
    return pl.pallas_call(
        functools.partial(_upsample_kernel, c=c),
        out_shape=jax.ShapeDtypeStruct((n, c, ho, wo), out_dtype),
        grid=grid,
        in_specs=[
            pl.BlockSpec((1, c, h, w), lambda i, j: (i, 0, 0, 0)),
            pl.BlockSpec((hob, h), lambda i, j: (j, 0)),
            pl.BlockSpec((w, wo), lambda i, j: (0, 0)),
        ],
        out_specs=pl.BlockSpec((1, c, hob, wo), lambda i, j: (i, 0, j, 0)),
        compiler_params=pltpu.CompilerParams(
            dimension_semantics=("parallel", "parallel"),
            vmem_limit_bytes=VMEM_LIMIT),
    )(x.astype(jnp.bfloat16), wh, wwt)


def _head_pixels(p, cap=256):
    if p <= cap:
        return p
    for t in range(cap, 127, -1):
        if p % t == 0 and t % 128 == 0:
            return t
    return p


def head_fused(x3, u2, u4, u8, hp):
    """Fused concat + conv1x1 + ABN(leaky) + conv1x1 head (NCHW, pixels in lanes)."""
    n, _, h4, w4 = x3.shape
    p = h4 * w4
    feats = [t.reshape(n, t.shape[1], p) for t in (x3, u2, u4, u8)]
    nc = hp["w2"].shape[0]
    pb = _head_pixels(p)
    grid = (n, p // pb)

    def fmap(i, j):
        return (i, 0, j)

    in_specs = [pl.BlockSpec((1, f.shape[1], pb), fmap) for f in feats]
    in_specs += [
        pl.BlockSpec(hp["w1a"].shape, lambda i, j: (0, 0)),
        pl.BlockSpec(hp["w1b"].shape, lambda i, j: (0, 0)),
        pl.BlockSpec(hp["w1c"].shape, lambda i, j: (0, 0)),
        pl.BlockSpec(hp["w1d"].shape, lambda i, j: (0, 0)),
        pl.BlockSpec(hp["s1"].shape, lambda i, j: (0, 0)),
        pl.BlockSpec(hp["w2"].shape, lambda i, j: (0, 0)),
        pl.BlockSpec(hp["s2"].shape, lambda i, j: (0, 0)),
    ]
    out = pl.pallas_call(
        _head_kernel,
        out_shape=jax.ShapeDtypeStruct((n, nc, p), jnp.bfloat16),
        grid=grid,
        in_specs=in_specs,
        out_specs=pl.BlockSpec((1, nc, pb), fmap),
        compiler_params=pltpu.CompilerParams(
            dimension_semantics=("parallel", "parallel"),
            vmem_limit_bytes=VMEM_LIMIT),
    )(*feats, hp["w1a"], hp["w1b"], hp["w1c"], hp["w1d"],
      hp["s1"], hp["w2"], hp["s2"])
    return out.reshape(n, nc, h4, w4)


# ------------------------------ parameter helpers ---------------------------- #

def _rand_bn(key, cout):
    kg, kb, km, kv = jax.random.split(key, 4)
    gamma = 1.0 + 0.1 * jax.random.normal(kg, (cout,), jnp.float32)
    beta = 0.1 * jax.random.normal(kb, (cout,), jnp.float32)
    mean = 0.1 * jax.random.normal(km, (cout,), jnp.float32)
    var = 1.0 + 0.1 * jnp.abs(jax.random.normal(kv, (cout,), jnp.float32))
    scale = gamma / jnp.sqrt(var + BN_EPS)
    shift = beta - mean * scale
    return scale, shift


def make_conv3x3_params(key, cin, cout):
    kw, kb, kbn = jax.random.split(key, 3)
    w = 0.1 * jax.random.normal(kw, (cout, cin, 3, 3), jnp.float32)
    b = 0.05 * jax.random.normal(kb, (cout,), jnp.float32)
    scale, shift_bn = _rand_bn(kbn, cout)
    wt = jnp.transpose(w, (2, 3, 1, 0)) * scale                       # (3,3,Cin,Cout)
    v = jnp.zeros((2, 2, 4 * cin, cout), jnp.float32)
    for dy in range(3):
        a, py = dy // 2, dy % 2
        for dx in range(3):
            bb, px = dx // 2, dx % 2
            off = (2 * py + px) * cin
            v = v.at[a, bb, off:off + cin, :].add(wt[dy, dx])
    shift = (b * scale + shift_bn).reshape(1, cout)
    return {"w": v.reshape(4, 4 * cin, cout).astype(jnp.bfloat16), "shift": shift}


def make_conv1x1_params(key, cin, cout):
    kw, kb, kbn = jax.random.split(key, 3)
    w = 0.1 * jax.random.normal(kw, (cout, cin), jnp.float32)
    b = 0.05 * jax.random.normal(kb, (cout,), jnp.float32)
    scale, shift_bn = _rand_bn(kbn, cout)
    wmat = (w.T * scale[None, :]).astype(jnp.bfloat16)                # (Cin, Cout)
    shift = (b * scale + shift_bn).reshape(1, cout)
    return {"w": wmat, "shift": shift}


def make_head_params(key, splits=(8, 16, 32, 64), num_classes=1):
    fc = sum(splits)                                                  # 120
    k1, kb1, kbn, k2 = jax.random.split(key, 4)
    w1 = 0.1 * jax.random.normal(k1, (fc, fc), jnp.float32)
    b1 = 0.05 * jax.random.normal(kb1, (fc,), jnp.float32)
    scale, shift_bn = _rand_bn(kbn, fc)
    w1f = w1 * scale[:, None]
    s1 = b1 * scale + shift_bn
    fcp = 128
    w1p = jnp.zeros((fcp, fc), jnp.float32).at[:fc].set(w1f)
    s1p = jnp.zeros((fcp, 1), jnp.float32).at[:fc, 0].set(s1)
    offs = [0]
    for s in splits:
        offs.append(offs[-1] + s)
    w1a = w1p[:, offs[0]:offs[1]].astype(jnp.bfloat16)
    w1b = w1p[:, offs[1]:offs[2]].astype(jnp.bfloat16)
    w1c = w1p[:, offs[2]:offs[3]].astype(jnp.bfloat16)
    w1d = w1p[:, offs[3]:offs[4]].astype(jnp.bfloat16)
    w2 = 0.1 * jax.random.normal(k2, (num_classes, fc), jnp.float32)
    w2p = jnp.zeros((num_classes, fcp), jnp.float32).at[:, :fc].set(w2)
    s2 = jnp.full((num_classes, 1), -4.59, jnp.float32)   # HRNet head bias init
    return {"w1a": w1a, "w1b": w1b, "w1c": w1c, "w1d": w1d,
            "s1": s1p, "w2": w2p.astype(jnp.bfloat16), "s2": s2}


def init_params(key, num_classes=1):
    ks = jax.random.split(key, 7)
    return {
        # abbreviated HRNet-style encoder: strides 4/8/16/32 -> 8/16/32/64 channels
        "stem1": make_conv3x3_params(ks[0], 3, 32),
        "stem2": make_conv3x3_params(ks[1], 32, 32),
        "br3": make_conv1x1_params(ks[2], 32, 8),
        "br2": make_conv3x3_params(ks[3], 32, 16),
        "br1": make_conv3x3_params(ks[4], 16, 32),
        "br0": make_conv3x3_params(ks[5], 32, 64),
        "head": make_head_params(ks[6], (8, 16, 32, 64), num_classes),
    }


# ----------------------------------- forward --------------------------------- #

def hrnet_forward(params, x_nchw):
    # single boundary transpose + cast to bf16 NHWC
    x = jnp.transpose(x_nchw, (0, 2, 3, 1)).astype(jnp.bfloat16)

    # --- encoder (abbreviated): features at strides 4, 8, 16, 32 ---
    f = conv3x3_s2(x, params["stem1"])                  # stride 2
    f = conv3x3_s2(f, params["stem2"])                  # stride 4
    x3 = conv1x1(f, params["br3"])                      # stride 4,  8 ch
    x2 = conv3x3_s2(f, params["br2"])                   # stride 8,  16 ch
    x1 = conv3x3_s2(x2, params["br1"])                  # stride 16, 32 ch
    x0 = conv3x3_s2(x1, params["br0"])                  # stride 32, 64 ch

    # --- decoder (matches HRNet.forward, OCR=False), run in NCHW so the small
    #     channel counts live on sublanes and pixels stay lane-dense ---
    to_chw = lambda t: jnp.transpose(t, (0, 3, 1, 2))
    x3c, x2c, x1c, x0c = (to_chw(t) for t in (x3, x2, x1, x0))

    u2 = bilinear_upsample_nchw(x2c, 2)
    u4 = bilinear_upsample_nchw(x1c, 4)
    u8 = bilinear_upsample_nchw(x0c, 8)

    # Dropout2d(drop_rate=0) -> identity; concat is fused into the head kernel.
    logits4 = head_fused(x3c, u2, u4, u8, params["head"])   # stride-4 logits
    return bilinear_upsample_nchw(logits4, 4, out_dtype=jnp.float32)  # NCHW


if __name__ == "__main__":
    key = jax.random.PRNGKey(0)
    pkey, xkey = jax.random.split(key)
    params = init_params(pkey, num_classes=1)
    # input size must be divisible by 32 (per HRNet docstring)
    x = jax.random.normal(xkey, (2, 3, 64, 64), jnp.float32)          # NCHW
    fwd = jax.jit(hrnet_forward)
    out = jax.block_until_ready(fwd(params, x))
    assert out.shape == (2, 1, 64, 64), out.shape
    assert bool(jnp.all(jnp.isfinite(out)))
    print("KERNEL_OK")
</pallas_src>

<mosaic_0001>
module attributes {stable_mosaic.version = 11 : i64} {
  func.func @_conv3x3s2_kernel(%arg0: i32, %arg1: i32, %arg2: memref<1x33x33x12xbf16, #tpu.memory_space<vmem>>, %arg3: memref<4x12x32xbf16, #tpu.memory_space<vmem>>, %arg4: memref<1x32xf32, #tpu.memory_space<vmem>>, %arg5: memref<1x256x32xbf16, #tpu.memory_space<vmem>>) attributes {dimension_semantics = [#tpu.dimension_semantics<parallel>, #tpu.dimension_semantics<parallel>], iteration_bounds = array<i64: 2, 4>, scalar_prefetch = 0 : i64, scratch_operands = 0 : i64, tpu.core_type = #tpu.core_type<tc>, window_params = [{transform_indices = @transform_0, window_bounds = array<i64: 1, 33, 33, 12>}, {pipeline_mode = #tpu.pipeline_mode<synchronous>, transform_indices = @transform_1, window_bounds = array<i64: 4, 12, 32>}, {pipeline_mode = #tpu.pipeline_mode<synchronous>, transform_indices = @transform_2, window_bounds = array<i64: 1, 32>}, {transform_indices = @transform_3, window_bounds = array<i64: 1, 256, 32>}]} {
    %c8_i32 = arith.constant 8 : i32
    %0 = arith.muli %arg1, %c8_i32 : i32
    %cst = arith.constant 0.000000e+00 : f32
    %1 = vector.broadcast %cst : f32 to vector<256x32xf32>
    %c0_i32 = arith.constant 0 : i32
    %2 = arith.addi %0, %c0_i32 : i32
    %c0 = arith.constant 0 : index
    %3 = arith.index_cast %2 : i32 to index
    %c0_0 = arith.constant 0 : index
    %c0_1 = arith.constant 0 : index
    %4 = vector.load %arg2[%c0, %3, %c0_0, %c0_1] : memref<1x33x33x12xbf16, #tpu.memory_space<vmem>>, vector<1x8x32x12xbf16>
    %5 = vector.shape_cast %4 : vector<1x8x32x12xbf16> to vector<8x32x12xbf16>
    %6 = vector.shape_cast %5 : vector<8x32x12xbf16> to vector<256x12xbf16>
    %c0_2 = arith.constant 0 : index
    %c0_3 = arith.constant 0 : index
    %c0_4 = arith.constant 0 : index
    %7 = vector.load %arg3[%c0_2, %c0_3, %c0_4] : memref<4x12x32xbf16, #tpu.memory_space<vmem>>, vector<1x12x32xbf16>
    %8 = vector.shape_cast %7 : vector<1x12x32xbf16> to vector<12x32xbf16>
    %cst_5 = arith.constant dense<0.000000e+00> : vector<256x32xf32>
    %9 = tpu.matmul %6, %8, %cst_5 {dimension_numbers = #tpu.dot_dimension_numbers<[1], [0], [0], [1], [0, 0, 1, 1], [], []>} : vector<256x12xbf16>, vector<12x32xbf16>, vector<256x32xf32> -> vector<256x32xf32>
    %10 = arith.addf %1, %9 : vector<256x32xf32>
    %c0_i32_6 = arith.constant 0 : i32
    %11 = arith.addi %0, %c0_i32_6 : i32
    %c0_7 = arith.constant 0 : index
    %12 = arith.index_cast %11 : i32 to index
    %c1 = arith.constant 1 : index
    %c0_8 = arith.constant 0 : index
    %13 = vector.load %arg2[%c0_7, %12, %c1, %c0_8] : memref<1x33x33x12xbf16, #tpu.memory_space<vmem>>, vector<1x8x32x12xbf16>
    %14 = vector.shape_cast %13 : vector<1x8x32x12xbf16> to vector<8x32x12xbf16>
    %15 = vector.shape_cast %14 : vector<8x32x12xbf16> to vector<256x12xbf16>
    %c1_9 = arith.constant 1 : index
    %c0_10 = arith.constant 0 : index
    %c0_11 = arith.constant 0 : index
    %16 = vector.load %arg3[%c1_9, %c0_10, %c0_11] : memref<4x12x32xbf16, #tpu.memory_space<vmem>>, vector<1x12x32xbf16>
    %17 = vector.shape_cast %16 : vector<1x12x32xbf16> to vector<12x32xbf16>
    %cst_12 = arith.constant dense<0.000000e+00> : vector<256x32xf32>
    %18 = tpu.matmul %15, %17, %cst_12 {dimension_numbers = #tpu.dot_dimension_numbers<[1], [0], [0], [1], [0, 0, 1, 1], [], []>} : vector<256x12xbf16>, vector<12x32xbf16>, vector<256x32xf32> -> vector<256x32xf32>
    %19 = arith.addf %10, %18 : vector<256x32xf32>
    %c1_i32 = arith.constant 1 : i32
    %20 = arith.addi %0, %c1_i32 : i32
    %c0_13 = arith.constant 0 : index
    %21 = arith.index_cast %20 : i32 to index
    %c0_14 = arith.constant 0 : index
    %c0_15 = arith.constant 0 : index
    %22 = vector.load %arg2[%c0_13, %21, %c0_14, %c0_15] : memref<1x33x33x12xbf16, #tpu.memory_space<vmem>>, vector<1x8x32x12xbf16>
    %23 = vector.shape_cast %22 : vector<1x8x32x12xbf16> to vector<8x32x12xbf16>
    %24 = vector.shape_cast %23 : vector<8x32x12xbf16> to vector<256x12xbf16>
    %c2 = arith.constant 2 : index
    %c0_16 = arith.constant 0 : index
    %c0_17 = arith.constant 0 : index
    %25 = vector.load %arg3[%c2, %c0_16, %c0_17] : memref<4x12x32xbf16, #tpu.memory_space<vmem>>, vector<1x12x32xbf16>
    %26 = vector.shape_cast %25 : vector<1x12x32xbf16> to vector<12x32xbf16>
    %cst_18 = arith.constant dense<0.000000e+00> : vector<256x32xf32>
    %27 = tpu.matmul %24, %26, %cst_18 {dimension_numbers = #tpu.dot_dimension_numbers<[1], [0], [0], [1], [0, 0, 1, 1], [], []>} : vector<256x12xbf16>, vector<12x32xbf16>, vector<256x32xf32> -> vector<256x32xf32>
    %28 = arith.addf %19, %27 : vector<256x32xf32>
    %c1_i32_19 = arith.constant 1 : i32
    %29 = arith.addi %0, %c1_i32_19 : i32
    %c0_20 = arith.constant 0 : index
    %30 = arith.index_cast %29 : i32 to index
    %c1_21 = arith.constant 1 : index
    %c0_22 = arith.constant 0 : index
    %31 = vector.load %arg2[%c0_20, %30, %c1_21, %c0_22] : memref<1x33x33x12xbf16, #tpu.memory_space<vmem>>, vector<1x8x32x12xbf16>
    %32 = vector.shape_cast %31 : vector<1x8x32x12xbf16> to vector<8x32x12xbf16>
    %33 = vector.shape_cast %32 : vector<8x32x12xbf16> to vector<256x12xbf16>
    %c3 = arith.constant 3 : index
    %c0_23 = arith.constant 0 : index
    %c0_24 = arith.constant 0 : index
    %34 = vector.load %arg3[%c3, %c0_23, %c0_24] : memref<4x12x32xbf16, #tpu.memory_space<vmem>>, vector<1x12x32xbf16>
    %35 = vector.shape_cast %34 : vector<1x12x32xbf16> to vector<12x32xbf16>
    %cst_25 = arith.constant dense<0.000000e+00> : vector<256x32xf32>
    %36 = tpu.matmul %33, %35, %cst_25 {dimension_numbers = #tpu.dot_dimension_numbers<[1], [0], [0], [1], [0, 0, 1, 1], [], []>} : vector<256x12xbf16>, vector<12x32xbf16>, vector<256x32xf32> -> vector<256x32xf32>
    %37 = arith.addf %28, %36 : vector<256x32xf32>
    %c0_26 = arith.constant 0 : index
    %c0_27 = arith.constant 0 : index
    %38 = vector.load %arg4[%c0_26, %c0_27] : memref<1x32xf32, #tpu.memory_space<vmem>>, vector<1x32xf32>
    %39 = vector.broadcast %38 : vector<1x32xf32> to vector<256x32xf32>
    %40 = arith.addf %37, %39 : vector<256x32xf32>
    %cst_28 = arith.constant 0.000000e+00 : f32
    %41 = vector.broadcast %cst_28 : f32 to vector<256x32xf32>
    %42 = arith.cmpf oge, %40, %41 : vector<256x32xf32>
    %cst_29 = arith.constant 0.00999999977 : f32
    %43 = vector.broadcast %cst_29 : f32 to vector<256x32xf32>
    %44 = arith.mulf %40, %43 : vector<256x32xf32>
    %45 = arith.select %42, %40, %44 : vector<256x32xi1>, vector<256x32xf32>
    %46 = arith.truncf %45 : vector<256x32xf32> to vector<256x32xbf16>
    %c0_30 = arith.constant 0 : index
    %c0_31 = arith.constant 0 : index
    %c0_32 = arith.constant 0 : index
    %47 = vector.load %arg5[%c0_30, %c0_31, %c0_32] : memref<1x256x32xbf16, #tpu.memory_space<vmem>>, vector<1x256x32xbf16>
    %48 = vector.shape_cast %47 : vector<1x256x32xbf16> to vector<256x32xbf16>
    %49 = vector.shape_cast %46 : vector<256x32xbf16> to vector<1x256x32xbf16>
    tpu.vector_store %arg5[%c0_30, %c0_31, %c0_32], %49 {strides = array<i32>} : memref<1x256x32xbf16, #tpu.memory_space<vmem>>, vector<1x256x32xbf16>,
    return
  }
  func.func @transform_0(%arg0: i32, %arg1: i32) -> (i32, i32, i32, i32) {
    %c0_i32 = arith.constant 0 : i32
    %c0_i32_0 = arith.constant 0 : i32
    %c0_i32_1 = arith.constant 0 : i32
    %c0_i32_2 = arith.constant 0 : i32
    return %arg0, %c0_i32, %c0_i32_0, %c0_i32_1 : i32, i32, i32, i32
  }
  func.func @transform_1(%arg0: i32, %arg1: i32) -> (i32, i32, i32) {
    %c0_i32 = arith.constant 0 : i32
    %c0_i32_0 = arith.constant 0 : i32
    %c0_i32_1 = arith.constant 0 : i32
    %c0_i32_2 = arith.constant 0 : i32
    return %c0_i32, %c0_i32_0, %c0_i32_1 : i32, i32, i32
  }
  func.func @transform_2(%arg0: i32, %arg1: i32) -> (i32, i32) {
    %c0_i32 = arith.constant 0 : i32
    %c0_i32_0 = arith.constant 0 : i32
    %c0_i32_1 = arith.constant 0 : i32
    return %c0_i32, %c0_i32_0 : i32, i32
  }
  func.func @transform_3(%arg0: i32, %arg1: i32) -> (i32, i32, i32) {
    %c0_i32 = arith.constant 0 : i32
    %c0_i32_0 = arith.constant 0 : i32
    return %arg0, %arg1, %c0_i32 : i32, i32, i32
  }
}

module attributes {stable_mosaic.version = 11 : i64} {
  func.func @_conv3x3s2_kernel(%arg0: i32, %arg1: i32, %arg2: memref<1x17x17x128xbf16, #tpu.memory_space<vmem>>, %arg3: memref<4x128x32xbf16, #tpu.memory_space<vmem>>, %arg4: memref<1x32xf32, #tpu.memory_space<vmem>>, %arg5: memref<1x256x32xbf16, #tpu.memory_space<vmem>>) attributes {dimension_semantics = [#tpu.dimension_semantics<parallel>, #tpu.dimension_semantics<parallel>], iteration_bounds = array<i64: 2, 1>, scalar_prefetch = 0 : i64, scratch_operands = 0 : i64, tpu.core_type = #tpu.core_type<tc>, window_params = [{transform_indices = @transform_0, window_bounds = array<i64: 1, 17, 17, 128>}, {pipeline_mode = #tpu.pipeline_mode<synchronous>, transform_indices = @transform_1, window_bounds = array<i64: 4, 128, 32>}, {pipeline_mode = #tpu.pipeline_mode<synchronous>, transform_indices = @transform_2, window_bounds = array<i64: 1, 32>}, {transform_indices = @transform_3, window_bounds = array<i64: 1, 256, 32>}]} {
    %c16_i32 = arith.constant 16 : i32
    %0 = arith.muli %arg1, %c16_i32 : i32
    %cst = arith.constant 0.000000e+00 : f32
    %1 = vector.broadcast %cst : f32 to vector<256x32xf32>
    %c0_i32 = arith.constant 0 : i32
    %2 = arith.addi %0, %c0_i32 : i32
    %c0 = arith.constant 0 : index
    %3 = arith.index_cast %2 : i32 to index
    %c0_0 = arith.constant 0 : index
    %c0_1 = arith.constant 0 : index
    %4 = vector.load %arg2[%c0, %3, %c0_0, %c0_1] : memref<1x17x17x128xbf16, #tpu.memory_space<vmem>>, vector<1x16x16x128xbf16>
    %5 = vector.shape_cast %4 : vector<1x16x16x128xbf16> to vector<16x16x128xbf16>
    %6 = vector.shape_cast %5 : vector<16x16x128xbf16> to vector<256x128xbf16>
    %c0_2 = arith.constant 0 : index
    %c0_3 = arith.constant 0 : index
    %c0_4 = arith.constant 0 : index
    %7 = vector.load %arg3[%c0_2, %c0_3, %c0_4] : memref<4x128x32xbf16, #tpu.memory_space<vmem>>, vector<1x128x32xbf16>
    %8 = vector.shape_cast %7 : vector<1x128x32xbf16> to vector<128x32xbf16>
    %cst_5 = arith.constant dense<0.000000e+00> : vector<256x32xf32>
    %9 = tpu.matmul %6, %8, %cst_5 {dimension_numbers = #tpu.dot_dimension_numbers<[1], [0], [0], [1], [0, 0, 1, 1], [], []>} : vector<256x128xbf16>, vector<128x32xbf16>, vector<256x32xf32> -> vector<256x32xf32>
    %10 = arith.addf %1, %9 : vector<256x32xf32>
    %c0_i32_6 = arith.constant 0 : i32
    %11 = arith.addi %0, %c0_i32_6 : i32
    %c0_7 = arith.constant 0 : index
    %12 = arith.index_cast %11 : i32 to index
    %c1 = arith.constant 1 : index
    %c0_8 = arith.constant 0 : index
    %13 = vector.load %arg2[%c0_7, %12, %c1, %c0_8] : memref<1x17x17x128xbf16, #tpu.memory_space<vmem>>, vector<1x16x16x128xbf16>
    %14 = vector.shape_cast %13 : vector<1x16x16x128xbf16> to vector<16x16x128xbf16>
    %15 = vector.shape_cast %14 : vector<16x16x128xbf16> to vector<256x128xbf16>
    %c1_9 = arith.constant 1 : index
    %c0_10 = arith.constant 0 : index
    %c0_11 = arith.constant 0 : index
    %16 = vector.load %arg3[%c1_9, %c0_10, %c0_11] : memref<4x128x32xbf16, #tpu.memory_space<vmem>>, vector<1x128x32xbf16>
    %17 = vector.shape_cast %16 : vector<1x128x32xbf16> to vector<128x32xbf16>
    %cst_12 = arith.constant dense<0.000000e+00> : vector<256x32xf32>
    %18 = tpu.matmul %15, %17, %cst_12 {dimension_numbers = #tpu.dot_dimension_numbers<[1], [0], [0], [1], [0, 0, 1, 1], [], []>} : vector<256x128xbf16>, vector<128x32xbf16>, vector<256x32xf32> -> vector<256x32xf32>
    %19 = arith.addf %10, %18 : vector<256x32xf32>
    %c1_i32 = arith.constant 1 : i32
    %20 = arith.addi %0, %c1_i32 : i32
    %c0_13 = arith.constant 0 : index
    %21 = arith.index_cast %20 : i32 to index
    %c0_14 = arith.constant 0 : index
    %c0_15 = arith.constant 0 : index
    %22 = vector.load %arg2[%c0_13, %21, %c0_14, %c0_15] : memref<1x17x17x128xbf16, #tpu.memory_space<vmem>>, vector<1x16x16x128xbf16>
    %23 = vector.shape_cast %22 : vector<1x16x16x128xbf16> to vector<16x16x128xbf16>
    %24 = vector.shape_cast %23 : vector<16x16x128xbf16> to vector<256x128xbf16>
    %c2 = arith.constant 2 : index
    %c0_16 = arith.constant 0 : index
    %c0_17 = arith.constant 0 : index
    %25 = vector.load %arg3[%c2, %c0_16, %c0_17] : memref<4x128x32xbf16, #tpu.memory_space<vmem>>, vector<1x128x32xbf16>
    %26 = vector.shape_cast %25 : vector<1x128x32xbf16> to vector<128x32xbf16>
    %cst_18 = arith.constant dense<0.000000e+00> : vector<256x32xf32>
    %27 = tpu.matmul %24, %26, %cst_18 {dimension_numbers = #tpu.dot_dimension_numbers<[1], [0], [0], [1], [0, 0, 1, 1], [], []>} : vector<256x128xbf16>, vector<128x32xbf16>, vector<256x32xf32> -> vector<256x32xf32>
    %28 = arith.addf %19, %27 : vector<256x32xf32>
    %c1_i32_19 = arith.constant 1 : i32
    %29 = arith.addi %0, %c1_i32_19 : i32
    %c0_20 = arith.constant 0 : index
    %30 = arith.index_cast %29 : i32 to index
    %c1_21 = arith.constant 1 : index
    %c0_22 = arith.constant 0 : index
    %31 = vector.load %arg2[%c0_20, %30, %c1_21, %c0_22] : memref<1x17x17x128xbf16, #tpu.memory_space<vmem>>, vector<1x16x16x128xbf16>
    %32 = vector.shape_cast %31 : vector<1x16x16x128xbf16> to vector<16x16x128xbf16>
    %33 = vector.shape_cast %32 : vector<16x16x128xbf16> to vector<256x128xbf16>
    %c3 = arith.constant 3 : index
    %c0_23 = arith.constant 0 : index
    %c0_24 = arith.constant 0 : index
    %34 = vector.load %arg3[%c3, %c0_23, %c0_24] : memref<4x128x32xbf16, #tpu.memory_space<vmem>>, vector<1x128x32xbf16>
    %35 = vector.shape_cast %34 : vector<1x128x32xbf16> to vector<128x32xbf16>
    %cst_25 = arith.constant dense<0.000000e+00> : vector<256x32xf32>
    %36 = tpu.matmul %33, %35, %cst_25 {dimension_numbers = #tpu.dot_dimension_numbers<[1], [0], [0], [1], [0, 0, 1, 1], [], []>} : vector<256x128xbf16>, vector<128x32xbf16>, vector<256x32xf32> -> vector<256x32xf32>
    %37 = arith.addf %28, %36 : vector<256x32xf32>
    %c0_26 = arith.constant 0 : index
    %c0_27 = arith.constant 0 : index
    %38 = vector.load %arg4[%c0_26, %c0_27] : memref<1x32xf32, #tpu.memory_space<vmem>>, vector<1x32xf32>
    %39 = vector.broadcast %38 : vector<1x32xf32> to vector<256x32xf32>
    %40 = arith.addf %37, %39 : vector<256x32xf32>
    %cst_28 = arith.constant 0.000000e+00 : f32
    %41 = vector.broadcast %cst_28 : f32 to vector<256x32xf32>
    %42 = arith.cmpf oge, %40, %41 : vector<256x32xf32>
    %cst_29 = arith.constant 0.00999999977 : f32
    %43 = vector.broadcast %cst_29 : f32 to vector<256x32xf32>
    %44 = arith.mulf %40, %43 : vector<256x32xf32>
    %45 = arith.select %42, %40, %44 : vector<256x32xi1>, vector<256x32xf32>
    %46 = arith.truncf %45 : vector<256x32xf32> to vector<256x32xbf16>
    %c0_30 = arith.constant 0 : index
    %c0_31 = arith.constant 0 : index
    %c0_32 = arith.constant 0 : index
    %47 = vector.load %arg5[%c0_30, %c0_31, %c0_32] : memref<1x256x32xbf16, #tpu.memory_space<vmem>>, vector<1x256x32xbf16>
    %48 = vector.shape_cast %47 : vector<1x256x32xbf16> to vector<256x32xbf16>
    %49 = vector.shape_cast %46 : vector<256x32xbf16> to vector<1x256x32xbf16>
    tpu.vector_store %arg5[%c0_30, %c0_31, %c0_32], %49 {strides = array<i32>} : memref<1x256x32xbf16, #tpu.memory_space<vmem>>, vector<1x256x32xbf16>,
    return
  }
  func.func @transform_0(%arg0: i32, %arg1: i32) -> (i32, i32, i32, i32) {
    %c0_i32 = arith.constant 0 : i32
    %c0_i32_0 = arith.constant 0 : i32
    %c0_i32_1 = arith.constant 0 : i32
    %c0_i32_2 = arith.constant 0 : i32
    return %arg0, %c0_i32, %c0_i32_0, %c0_i32_1 : i32, i32, i32, i32
  }
  func.func @transform_1(%arg0: i32, %arg1: i32) -> (i32, i32, i32) {
    %c0_i32 = arith.constant 0 : i32
    %c0_i32_0 = arith.constant 0 : i32
    %c0_i32_1 = arith.constant 0 : i32
    %c0_i32_2 = arith.constant 0 : i32
    return %c0_i32, %c0_i32_0, %c0_i32_1 : i32, i32, i32
  }
  func.func @transform_2(%arg0: i32, %arg1: i32) -> (i32, i32) {
    %c0_i32 = arith.constant 0 : i32
    %c0_i32_0 = arith.constant 0 : i32
    %c0_i32_1 = arith.constant 0 : i32
    return %c0_i32, %c0_i32_0 : i32, i32
  }
  func.func @transform_3(%arg0: i32, %arg1: i32) -> (i32, i32, i32) {
    %c0_i32 = arith.constant 0 : i32
    %c0_i32_0 = arith.constant 0 : i32
    return %arg0, %arg1, %c0_i32 : i32, i32, i32
  }
}

module attributes {stable_mosaic.version = 11 : i64} {
  func.func @_conv3x3s2_kernel(%arg0: i32, %arg1: i32, %arg2: memref<1x9x9x128xbf16, #tpu.memory_space<vmem>>, %arg3: memref<4x128x16xbf16, #tpu.memory_space<vmem>>, %arg4: memref<1x16xf32, #tpu.memory_space<vmem>>, %arg5: memref<1x64x16xbf16, #tpu.memory_space<vmem>>) attributes {dimension_semantics = [#tpu.dimension_semantics<parallel>, #tpu.dimension_semantics<parallel>], iteration_bounds = array<i64: 2, 1>, scalar_prefetch = 0 : i64, scratch_operands = 0 : i64, tpu.core_type = #tpu.core_type<tc>, window_params = [{transform_indices = @transform_0, window_bounds = array<i64: 1, 9, 9, 128>}, {pipeline_mode = #tpu.pipeline_mode<synchronous>, transform_indices = @transform_1, window_bounds = array<i64: 4, 128, 16>}, {pipeline_mode = #tpu.pipeline_mode<synchronous>, transform_indices = @transform_2, window_bounds = array<i64: 1, 16>}, {transform_indices = @transform_3, window_bounds = array<i64: 1, 64, 16>}]} {
    %c8_i32 = arith.constant 8 : i32
    %0 = arith.muli %arg1, %c8_i32 : i32
    %cst = arith.constant 0.000000e+00 : f32
    %1 = vector.broadcast %cst : f32 to vector<64x16xf32>
    %c0_i32 = arith.constant 0 : i32
    %2 = arith.addi %0, %c0_i32 : i32
    %c0 = arith.constant 0 : index
    %3 = arith.index_cast %2 : i32 to index
    %c0_0 = arith.constant 0 : index
    %c0_1 = arith.constant 0 : index
    %4 = vector.load %arg2[%c0, %3, %c0_0, %c0_1] : memref<1x9x9x128xbf16, #tpu.memory_space<vmem>>, vector<1x8x8x128xbf16>
    %5 = vector.shape_cast %4 : vector<1x8x8x128xbf16> to vector<8x8x128xbf16>
    %6 = vector.shape_cast %5 : vector<8x8x128xbf16> to vector<64x128xbf16>
    %c0_2 = arith.constant 0 : index
    %c0_3 = arith.constant 0 : index
    %c0_4 = arith.constant 0 : index
    %7 = vector.load %arg3[%c0_2, %c0_3, %c0_4] : memref<4x128x16xbf16, #tpu.memory_space<vmem>>, vector<1x128x16xbf16>
    %8 = vector.shape_cast %7 : vector<1x128x16xbf16> to vector<128x16xbf16>
    %cst_5 = arith.constant dense<0.000000e+00> : vector<64x16xf32>
    %9 = tpu.matmul %6, %8, %cst_5 {dimension_numbers = #tpu.dot_dimension_numbers<[1], [0], [0], [1], [0, 0, 1, 1], [], []>} : vector<64x128xbf16>, vector<128x16xbf16>, vector<64x16xf32> -> vector<64x16xf32>
    %10 = arith.addf %1, %9 : vector<64x16xf32>
    %c0_i32_6 = arith.constant 0 : i32
    %11 = arith.addi %0, %c0_i32_6 : i32
    %c0_7 = arith.constant 0 : index
    %12 = arith.index_cast %11 : i32 to index
    %c1 = arith.constant 1 : index
    %c0_8 = arith.constant 0 : index
    %13 = vector.load %arg2[%c0_7, %12, %c1, %c0_8] : memref<1x9x9x128xbf16, #tpu.memory_space<vmem>>, vector<1x8x8x128xbf16>
    %14 = vector.shape_cast %13 : vector<1x8x8x128xbf16> to vector<8x8x128xbf16>
    %15 = vector.shape_cast %14 : vector<8x8x128xbf16> to vector<64x128xbf16>
    %c1_9 = arith.constant 1 : index
    %c0_10 = arith.constant 0 : index
    %c0_11 = arith.constant 0 : index
    %16 = vector.load %arg3[%c1_9, %c0_10, %c0_11] : memref<4x128x16xbf16, #tpu.memory_space<vmem>>, vector<1x128x16xbf16>
    %17 = vector.shape_cast %16 : vector<1x128x16xbf16> to vector<128x16xbf16>
    %cst_12 = arith.constant dense<0.000000e+00> : vector<64x16xf32>
    %18 = tpu.matmul %15, %17, %cst_12 {dimension_numbers = #tpu.dot_dimension_numbers<[1], [0], [0], [1], [0, 0, 1, 1], [], []>} : vector<64x128xbf16>, vector<128x16xbf16>, vector<64x16xf32> -> vector<64x16xf32>
    %19 = arith.addf %10, %18 : vector<64x16xf32>
    %c1_i32 = arith.constant 1 : i32
    %20 = arith.addi %0, %c1_i32 : i32
    %c0_13 = arith.constant 0 : index
    %21 = arith.index_cast %20 : i32 to index
    %c0_14 = arith.constant 0 : index
    %c0_15 = arith.constant 0 : index
    %22 = vector.load %arg2[%c0_13, %21, %c0_14, %c0_15] : memref<1x9x9x128xbf16, #tpu.memory_space<vmem>>, vector<1x8x8x128xbf16>
    %23 = vector.shape_cast %22 : vector<1x8x8x128xbf16> to vector<8x8x128xbf16>
    %24 = vector.shape_cast %23 : vector<8x8x128xbf16> to vector<64x128xbf16>
    %c2 = arith.constant 2 : index
    %c0_16 = arith.constant 0 : index
    %c0_17 = arith.constant 0 : index
    %25 = vector.load %arg3[%c2, %c0_16, %c0_17] : memref<4x128x16xbf16, #tpu.memory_space<vmem>>, vector<1x128x16xbf16>
    %26 = vector.shape_cast %25 : vector<1x128x16xbf16> to vector<128x16xbf16>
    %cst_18 = arith.constant dense<0.000000e+00> : vector<64x16xf32>
    %27 = tpu.matmul %24, %26, %cst_18 {dimension_numbers = #tpu.dot_dimension_numbers<[1], [0], [0], [1], [0, 0, 1, 1], [], []>} : vector<64x128xbf16>, vector<128x16xbf16>, vector<64x16xf32> -> vector<64x16xf32>
    %28 = arith.addf %19, %27 : vector<64x16xf32>
    %c1_i32_19 = arith.constant 1 : i32
    %29 = arith.addi %0, %c1_i32_19 : i32
    %c0_20 = arith.constant 0 : index
    %30 = arith.index_cast %29 : i32 to index
    %c1_21 = arith.constant 1 : index
    %c0_22 = arith.constant 0 : index
    %31 = vector.load %arg2[%c0_20, %30, %c1_21, %c0_22] : memref<1x9x9x128xbf16, #tpu.memory_space<vmem>>, vector<1x8x8x128xbf16>
    %32 = vector.shape_cast %31 : vector<1x8x8x128xbf16> to vector<8x8x128xbf16>
    %33 = vector.shape_cast %32 : vector<8x8x128xbf16> to vector<64x128xbf16>
    %c3 = arith.constant 3 : index
    %c0_23 = arith.constant 0 : index
    %c0_24 = arith.constant 0 : index
    %34 = vector.load %arg3[%c3, %c0_23, %c0_24] : memref<4x128x16xbf16, #tpu.memory_space<vmem>>, vector<1x128x16xbf16>
    %35 = vector.shape_cast %34 : vector<1x128x16xbf16> to vector<128x16xbf16>
    %cst_25 = arith.constant dense<0.000000e+00> : vector<64x16xf32>
    %36 = tpu.matmul %33, %35, %cst_25 {dimension_numbers = #tpu.dot_dimension_numbers<[1], [0], [0], [1], [0, 0, 1, 1], [], []>} : vector<64x128xbf16>, vector<128x16xbf16>, vector<64x16xf32> -> vector<64x16xf32>
    %37 = arith.addf %28, %36 : vector<64x16xf32>
    %c0_26 = arith.constant 0 : index
    %c0_27 = arith.constant 0 : index
    %38 = vector.load %arg4[%c0_26, %c0_27] : memref<1x16xf32, #tpu.memory_space<vmem>>, vector<1x16xf32>
    %39 = vector.broadcast %38 : vector<1x16xf32> to vector<64x16xf32>
    %40 = arith.addf %37, %39 : vector<64x16xf32>
    %cst_28 = arith.constant 0.000000e+00 : f32
    %41 = vector.broadcast %cst_28 : f32 to vector<64x16xf32>
    %42 = arith.cmpf oge, %40, %41 : vector<64x16xf32>
    %cst_29 = arith.constant 0.00999999977 : f32
    %43 = vector.broadcast %cst_29 : f32 to vector<64x16xf32>
    %44 = arith.mulf %40, %43 : vector<64x16xf32>
    %45 = arith.select %42, %40, %44 : vector<64x16xi1>, vector<64x16xf32>
    %46 = arith.truncf %45 : vector<64x16xf32> to vector<64x16xbf16>
    %c0_30 = arith.constant 0 : index
    %c0_31 = arith.constant 0 : index
    %c0_32 = arith.constant 0 : index
    %47 = vector.load %arg5[%c0_30, %c0_31, %c0_32] : memref<1x64x16xbf16, #tpu.memory_space<vmem>>, vector<1x64x16xbf16>
    %48 = vector.shape_cast %47 : vector<1x64x16xbf16> to vector<64x16xbf16>
    %49 = vector.shape_cast %46 : vector<64x16xbf16> to vector<1x64x16xbf16>
    tpu.vector_store %arg5[%c0_30, %c0_31, %c0_32], %49 {strides = array<i32>} : memref<1x64x16xbf16, #tpu.memory_space<vmem>>, vector<1x64x16xbf16>,
    return
  }
  func.func @transform_0(%arg0: i32, %arg1: i32) -> (i32, i32, i32, i32) {
    %c0_i32 = arith.constant 0 : i32
    %c0_i32_0 = arith.constant 0 : i32
    %c0_i32_1 = arith.constant 0 : i32
    %c0_i32_2 = arith.constant 0 : i32
    return %arg0, %c0_i32, %c0_i32_0, %c0_i32_1 : i32, i32, i32, i32
  }
  func.func @transform_1(%arg0: i32, %arg1: i32) -> (i32, i32, i32) {
    %c0_i32 = arith.constant 0 : i32
    %c0_i32_0 = arith.constant 0 : i32
    %c0_i32_1 = arith.constant 0 : i32
    %c0_i32_2 = arith.constant 0 : i32
    return %c0_i32, %c0_i32_0, %c0_i32_1 : i32, i32, i32
  }
  func.func @transform_2(%arg0: i32, %arg1: i32) -> (i32, i32) {
    %c0_i32 = arith.constant 0 : i32
    %c0_i32_0 = arith.constant 0 : i32
    %c0_i32_1 = arith.constant 0 : i32
    return %c0_i32, %c0_i32_0 : i32, i32
  }
  func.func @transform_3(%arg0: i32, %arg1: i32) -> (i32, i32, i32) {
    %c0_i32 = arith.constant 0 : i32
    %c0_i32_0 = arith.constant 0 : i32
    return %arg0, %arg1, %c0_i32 : i32, i32, i32
  }
}

module attributes {stable_mosaic.version = 11 : i64} {
  func.func @_conv3x3s2_kernel(%arg0: i32, %arg1: i32, %arg2: memref<1x5x5x64xbf16, #tpu.memory_space<vmem>>, %arg3: memref<4x64x32xbf16, #tpu.memory_space<vmem>>, %arg4: memref<1x32xf32, #tpu.memory_space<vmem>>, %arg5: memref<1x16x32xbf16, #tpu.memory_space<vmem>>) attributes {dimension_semantics = [#tpu.dimension_semantics<parallel>, #tpu.dimension_semantics<parallel>], iteration_bounds = array<i64: 2, 1>, scalar_prefetch = 0 : i64, scratch_operands = 0 : i64, tpu.core_type = #tpu.core_type<tc>, window_params = [{transform_indices = @transform_0, window_bounds = array<i64: 1, 5, 5, 64>}, {pipeline_mode = #tpu.pipeline_mode<synchronous>, transform_indices = @transform_1, window_bounds = array<i64: 4, 64, 32>}, {pipeline_mode = #tpu.pipeline_mode<synchronous>, transform_indices = @transform_2, window_bounds = array<i64: 1, 32>}, {transform_indices = @transform_3, window_bounds = array<i64: 1, 16, 32>}]} {
    %c4_i32 = arith.constant 4 : i32
    %0 = arith.muli %arg1, %c4_i32 : i32
    %cst = arith.constant 0.000000e+00 : f32
    %1 = vector.broadcast %cst : f32 to vector<16x32xf32>
    %c0_i32 = arith.constant 0 : i32
    %2 = arith.addi %0, %c0_i32 : i32
    %c0 = arith.constant 0 : index
    %3 = arith.index_cast %2 : i32 to index
    %c0_0 = arith.constant 0 : index
    %c0_1 = arith.constant 0 : index
    %4 = vector.load %arg2[%c0, %3, %c0_0, %c0_1] : memref<1x5x5x64xbf16, #tpu.memory_space<vmem>>, vector<1x4x4x64xbf16>
    %5 = vector.shape_cast %4 : vector<1x4x4x64xbf16> to vector<4x4x64xbf16>
    %6 = vector.shape_cast %5 : vector<4x4x64xbf16> to vector<16x64xbf16>
    %c0_2 = arith.constant 0 : index
    %c0_3 = arith.constant 0 : index
    %c0_4 = arith.constant 0 : index
    %7 = vector.load %arg3[%c0_2, %c0_3, %c0_4] : memref<4x64x32xbf16, #tpu.memory_space<vmem>>, vector<1x64x32xbf16>
    %8 = vector.shape_cast %7 : vector<1x64x32xbf16> to vector<64x32xbf16>
    %cst_5 = arith.constant dense<0.000000e+00> : vector<16x32xf32>
    %9 = tpu.matmul %6, %8, %cst_5 {dimension_numbers = #tpu.dot_dimension_numbers<[1], [0], [0], [1], [0, 0, 1, 1], [], []>} : vector<16x64xbf16>, vector<64x32xbf16>, vector<16x32xf32> -> vector<16x32xf32>
    %10 = arith.addf %1, %9 : vector<16x32xf32>
    %c0_i32_6 = arith.constant 0 : i32
    %11 = arith.addi %0, %c0_i32_6 : i32
    %c0_7 = arith.constant 0 : index
    %12 = arith.index_cast %11 : i32 to index
    %c1 = arith.constant 1 : index
    %c0_8 = arith.constant 0 : index
    %13 = vector.load %arg2[%c0_7, %12, %c1, %c0_8] : memref<1x5x5x64xbf16, #tpu.memory_space<vmem>>, vector<1x4x4x64xbf16>
    %14 = vector.shape_cast %13 : vector<1x4x4x64xbf16> to vector<4x4x64xbf16>
    %15 = vector.shape_cast %14 : vector<4x4x64xbf16> to vector<16x64xbf16>
    %c1_9 = arith.constant 1 : index
    %c0_10 = arith.constant 0 : index
    %c0_11 = arith.constant 0 : index
    %16 = vector.load %arg3[%c1_9, %c0_10, %c0_11] : memref<4x64x32xbf16, #tpu.memory_space<vmem>>, vector<1x64x32xbf16>
    %17 = vector.shape_cast %16 : vector<1x64x32xbf16> to vector<64x32xbf16>
    %cst_12 = arith.constant dense<0.000000e+00> : vector<16x32xf32>
    %18 = tpu.matmul %15, %17, %cst_12 {dimension_numbers = #tpu.dot_dimension_numbers<[1], [0], [0], [1], [0, 0, 1, 1], [], []>} : vector<16x64xbf16>, vector<64x32xbf16>, vector<16x32xf32> -> vector<16x32xf32>
    %19 = arith.addf %10, %18 : vector<16x32xf32>
    %c1_i32 = arith.constant 1 : i32
    %20 = arith.addi %0, %c1_i32 : i32
    %c0_13 = arith.constant 0 : index
    %21 = arith.index_cast %20 : i32 to index
    %c0_14 = arith.constant 0 : index
    %c0_15 = arith.constant 0 : index
    %22 = vector.load %arg2[%c0_13, %21, %c0_14, %c0_15] : memref<1x5x5x64xbf16, #tpu.memory_space<vmem>>, vector<1x4x4x64xbf16>
    %23 = vector.shape_cast %22 : vector<1x4x4x64xbf16> to vector<4x4x64xbf16>
    %24 = vector.shape_cast %23 : vector<4x4x64xbf16> to vector<16x64xbf16>
    %c2 = arith.constant 2 : index
    %c0_16 = arith.constant 0 : index
    %c0_17 = arith.constant 0 : index
    %25 = vector.load %arg3[%c2, %c0_16, %c0_17] : memref<4x64x32xbf16, #tpu.memory_space<vmem>>, vector<1x64x32xbf16>
    %26 = vector.shape_cast %25 : vector<1x64x32xbf16> to vector<64x32xbf16>
    %cst_18 = arith.constant dense<0.000000e+00> : vector<16x32xf32>
    %27 = tpu.matmul %24, %26, %cst_18 {dimension_numbers = #tpu.dot_dimension_numbers<[1], [0], [0], [1], [0, 0, 1, 1], [], []>} : vector<16x64xbf16>, vector<64x32xbf16>, vector<16x32xf32> -> vector<16x32xf32>
    %28 = arith.addf %19, %27 : vector<16x32xf32>
    %c1_i32_19 = arith.constant 1 : i32
    %29 = arith.addi %0, %c1_i32_19 : i32
    %c0_20 = arith.constant 0 : index
    %30 = arith.index_cast %29 : i32 to index
    %c1_21 = arith.constant 1 : index
    %c0_22 = arith.constant 0 : index
    %31 = vector.load %arg2[%c0_20, %30, %c1_21, %c0_22] : memref<1x5x5x64xbf16, #tpu.memory_space<vmem>>, vector<1x4x4x64xbf16>
    %32 = vector.shape_cast %31 : vector<1x4x4x64xbf16> to vector<4x4x64xbf16>
    %33 = vector.shape_cast %32 : vector<4x4x64xbf16> to vector<16x64xbf16>
    %c3 = arith.constant 3 : index
    %c0_23 = arith.constant 0 : index
    %c0_24 = arith.constant 0 : index
    %34 = vector.load %arg3[%c3, %c0_23, %c0_24] : memref<4x64x32xbf16, #tpu.memory_space<vmem>>, vector<1x64x32xbf16>
    %35 = vector.shape_cast %34 : vector<1x64x32xbf16> to vector<64x32xbf16>
    %cst_25 = arith.constant dense<0.000000e+00> : vector<16x32xf32>
    %36 = tpu.matmul %33, %35, %cst_25 {dimension_numbers = #tpu.dot_dimension_numbers<[1], [0], [0], [1], [0, 0, 1, 1], [], []>} : vector<16x64xbf16>, vector<64x32xbf16>, vector<16x32xf32> -> vector<16x32xf32>
    %37 = arith.addf %28, %36 : vector<16x32xf32>
    %c0_26 = arith.constant 0 : index
    %c0_27 = arith.constant 0 : index
    %38 = vector.load %arg4[%c0_26, %c0_27] : memref<1x32xf32, #tpu.memory_space<vmem>>, vector<1x32xf32>
    %39 = vector.broadcast %38 : vector<1x32xf32> to vector<16x32xf32>
    %40 = arith.addf %37, %39 : vector<16x32xf32>
    %cst_28 = arith.constant 0.000000e+00 : f32
    %41 = vector.broadcast %cst_28 : f32 to vector<16x32xf32>
    %42 = arith.cmpf oge, %40, %41 : vector<16x32xf32>
    %cst_29 = arith.constant 0.00999999977 : f32
    %43 = vector.broadcast %cst_29 : f32 to vector<16x32xf32>
    %44 = arith.mulf %40, %43 : vector<16x32xf32>
    %45 = arith.select %42, %40, %44 : vector<16x32xi1>, vector<16x32xf32>
    %46 = arith.truncf %45 : vector<16x32xf32> to vector<16x32xbf16>
    %c0_30 = arith.constant 0 : index
    %c0_31 = arith.constant 0 : index
    %c0_32 = arith.constant 0 : index
    %47 = vector.load %arg5[%c0_30, %c0_31, %c0_32] : memref<1x16x32xbf16, #tpu.memory_space<vmem>>, vector<1x16x32xbf16>
    %48 = vector.shape_cast %47 : vector<1x16x32xbf16> to vector<16x32xbf16>
    %49 = vector.shape_cast %46 : vector<16x32xbf16> to vector<1x16x32xbf16>
    tpu.vector_store %arg5[%c0_30, %c0_31, %c0_32], %49 {strides = array<i32>} : memref<1x16x32xbf16, #tpu.memory_space<vmem>>, vector<1x16x32xbf16>,
    return
  }
  func.func @transform_0(%arg0: i32, %arg1: i32) -> (i32, i32, i32, i32) {
    %c0_i32 = arith.constant 0 : i32
    %c0_i32_0 = arith.constant 0 : i32
    %c0_i32_1 = arith.constant 0 : i32
    %c0_i32_2 = arith.constant 0 : i32
    return %arg0, %c0_i32, %c0_i32_0, %c0_i32_1 : i32, i32, i32, i32
  }
  func.func @transform_1(%arg0: i32, %arg1: i32) -> (i32, i32, i32) {
    %c0_i32 = arith.constant 0 : i32
    %c0_i32_0 = arith.constant 0 : i32
    %c0_i32_1 = arith.constant 0 : i32
    %c0_i32_2 = arith.constant 0 : i32
    return %c0_i32, %c0_i32_0, %c0_i32_1 : i32, i32, i32
  }
  func.func @transform_2(%arg0: i32, %arg1: i32) -> (i32, i32) {
    %c0_i32 = arith.constant 0 : i32
    %c0_i32_0 = arith.constant 0 : i32
    %c0_i32_1 = arith.constant 0 : i32
    return %c0_i32, %c0_i32_0 : i32, i32
  }
  func.func @transform_3(%arg0: i32, %arg1: i32) -> (i32, i32, i32) {
    %c0_i32 = arith.constant 0 : i32
    %c0_i32_0 = arith.constant 0 : i32
    return %arg0, %arg1, %c0_i32 : i32, i32, i32
  }
}

module attributes {stable_mosaic.version = 11 : i64} {
  func.func @_conv3x3s2_kernel(%arg0: i32, %arg1: i32, %arg2: memref<1x3x3x128xbf16, #tpu.memory_space<vmem>>, %arg3: memref<4x128x64xbf16, #tpu.memory_space<vmem>>, %arg4: memref<1x64xf32, #tpu.memory_space<vmem>>, %arg5: memref<1x4x64xbf16, #tpu.memory_space<vmem>>) attributes {dimension_semantics = [#tpu.dimension_semantics<parallel>, #tpu.dimension_semantics<parallel>], iteration_bounds = array<i64: 2, 1>, scalar_prefetch = 0 : i64, scratch_operands = 0 : i64, tpu.core_type = #tpu.core_type<tc>, window_params = [{transform_indices = @transform_0, window_bounds = array<i64: 1, 3, 3, 128>}, {pipeline_mode = #tpu.pipeline_mode<synchronous>, transform_indices = @transform_1, window_bounds = array<i64: 4, 128, 64>}, {pipeline_mode = #tpu.pipeline_mode<synchronous>, transform_indices = @transform_2, window_bounds = array<i64: 1, 64>}, {transform_indices = @transform_3, window_bounds = array<i64: 1, 4, 64>}]} {
    %c2_i32 = arith.constant 2 : i32
    %0 = arith.muli %arg1, %c2_i32 : i32
    %cst = arith.constant 0.000000e+00 : f32
    %1 = vector.broadcast %cst : f32 to vector<4x64xf32>
    %c0_i32 = arith.constant 0 : i32
    %2 = arith.addi %0, %c0_i32 : i32
    %c0 = arith.constant 0 : index
    %3 = arith.index_cast %2 : i32 to index
    %c0_0 = arith.constant 0 : index
    %c0_1 = arith.constant 0 : index
    %4 = vector.load %arg2[%c0, %3, %c0_0, %c0_1] : memref<1x3x3x128xbf16, #tpu.memory_space<vmem>>, vector<1x2x2x128xbf16>
    %5 = vector.shape_cast %4 : vector<1x2x2x128xbf16> to vector<2x2x128xbf16>
    %6 = vector.shape_cast %5 : vector<2x2x128xbf16> to vector<4x128xbf16>
    %c0_2 = arith.constant 0 : index
    %c0_3 = arith.constant 0 : index
    %c0_4 = arith.constant 0 : index
    %7 = vector.load %arg3[%c0_2, %c0_3, %c0_4] : memref<4x128x64xbf16, #tpu.memory_space<vmem>>, vector<1x128x64xbf16>
    %8 = vector.shape_cast %7 : vector<1x128x64xbf16> to vector<128x64xbf16>
    %cst_5 = arith.constant dense<0.000000e+00> : vector<4x64xf32>
    %9 = tpu.matmul %6, %8, %cst_5 {dimension_numbers = #tpu.dot_dimension_numbers<[1], [0], [0], [1], [0, 0, 1, 1], [], []>} : vector<4x128xbf16>, vector<128x64xbf16>, vector<4x64xf32> -> vector<4x64xf32>
    %10 = arith.addf %1, %9 : vector<4x64xf32>
    %c0_i32_6 = arith.constant 0 : i32
    %11 = arith.addi %0, %c0_i32_6 : i32
    %c0_7 = arith.constant 0 : index
    %12 = arith.index_cast %11 : i32 to index
    %c1 = arith.constant 1 : index
    %c0_8 = arith.constant 0 : index
    %13 = vector.load %arg2[%c0_7, %12, %c1, %c0_8] : memref<1x3x3x128xbf16, #tpu.memory_space<vmem>>, vector<1x2x2x128xbf16>
    %14 = vector.shape_cast %13 : vector<1x2x2x128xbf16> to vector<2x2x128xbf16>
    %15 = vector.shape_cast %14 : vector<2x2x128xbf16> to vector<4x128xbf16>
    %c1_9 = arith.constant 1 : index
    %c0_10 = arith.constant 0 : index
    %c0_11 = arith.constant 0 : index
    %16 = vector.load %arg3[%c1_9, %c0_10, %c0_11] : memref<4x128x64xbf16, #tpu.memory_space<vmem>>, vector<1x128x64xbf16>
    %17 = vector.shape_cast %16 : vector<1x128x64xbf16> to vector<128x64xbf16>
    %cst_12 = arith.constant dense<0.000000e+00> : vector<4x64xf32>
    %18 = tpu.matmul %15, %17, %cst_12 {dimension_numbers = #tpu.dot_dimension_numbers<[1], [0], [0], [1], [0, 0, 1, 1], [], []>} : vector<4x128xbf16>, vector<128x64xbf16>, vector<4x64xf32> -> vector<4x64xf32>
    %19 = arith.addf %10, %18 : vector<4x64xf32>
    %c1_i32 = arith.constant 1 : i32
    %20 = arith.addi %0, %c1_i32 : i32
    %c0_13 = arith.constant 0 : index
    %21 = arith.index_cast %20 : i32 to index
    %c0_14 = arith.constant 0 : index
    %c0_15 = arith.constant 0 : index
    %22 = vector.load %arg2[%c0_13, %21, %c0_14, %c0_15] : memref<1x3x3x128xbf16, #tpu.memory_space<vmem>>, vector<1x2x2x128xbf16>
    %23 = vector.shape_cast %22 : vector<1x2x2x128xbf16> to vector<2x2x128xbf16>
    %24 = vector.shape_cast %23 : vector<2x2x128xbf16> to vector<4x128xbf16>
    %c2 = arith.constant 2 : index
    %c0_16 = arith.constant 0 : index
    %c0_17 = arith.constant 0 : index
    %25 = vector.load %arg3[%c2, %c0_16, %c0_17] : memref<4x128x64xbf16, #tpu.memory_space<vmem>>, vector<1x128x64xbf16>
    %26 = vector.shape_cast %25 : vector<1x128x64xbf16> to vector<128x64xbf16>
    %cst_18 = arith.constant dense<0.000000e+00> : vector<4x64xf32>
    %27 = tpu.matmul %24, %26, %cst_18 {dimension_numbers = #tpu.dot_dimension_numbers<[1], [0], [0], [1], [0, 0, 1, 1], [], []>} : vector<4x128xbf16>, vector<128x64xbf16>, vector<4x64xf32> -> vector<4x64xf32>
    %28 = arith.addf %19, %27 : vector<4x64xf32>
    %c1_i32_19 = arith.constant 1 : i32
    %29 = arith.addi %0, %c1_i32_19 : i32
    %c0_20 = arith.constant 0 : index
    %30 = arith.index_cast %29 : i32 to index
    %c1_21 = arith.constant 1 : index
    %c0_22 = arith.constant 0 : index
    %31 = vector.load %arg2[%c0_20, %30, %c1_21, %c0_22] : memref<1x3x3x128xbf16, #tpu.memory_space<vmem>>, vector<1x2x2x128xbf16>
    %32 = vector.shape_cast %31 : vector<1x2x2x128xbf16> to vector<2x2x128xbf16>
    %33 = vector.shape_cast %32 : vector<2x2x128xbf16> to vector<4x128xbf16>
    %c3 = arith.constant 3 : index
    %c0_23 = arith.constant 0 : index
    %c0_24 = arith.constant 0 : index
    %34 = vector.load %arg3[%c3, %c0_23, %c0_24] : memref<4x128x64xbf16, #tpu.memory_space<vmem>>, vector<1x128x64xbf16>
    %35 = vector.shape_cast %34 : vector<1x128x64xbf16> to vector<128x64xbf16>
    %cst_25 = arith.constant dense<0.000000e+00> : vector<4x64xf32>
    %36 = tpu.matmul %33, %35, %cst_25 {dimension_numbers = #tpu.dot_dimension_numbers<[1], [0], [0], [1], [0, 0, 1, 1], [], []>} : vector<4x128xbf16>, vector<128x64xbf16>, vector<4x64xf32> -> vector<4x64xf32>
    %37 = arith.addf %28, %36 : vector<4x64xf32>
    %c0_26 = arith.constant 0 : index
    %c0_27 = arith.constant 0 : index
    %38 = vector.load %arg4[%c0_26, %c0_27] : memref<1x64xf32, #tpu.memory_space<vmem>>, vector<1x64xf32>
    %39 = vector.broadcast %38 : vector<1x64xf32> to vector<4x64xf32>
    %40 = arith.addf %37, %39 : vector<4x64xf32>
    %cst_28 = arith.constant 0.000000e+00 : f32
    %41 = vector.broadcast %cst_28 : f32 to vector<4x64xf32>
    %42 = arith.cmpf oge, %40, %41 : vector<4x64xf32>
    %cst_29 = arith.constant 0.00999999977 : f32
    %43 = vector.broadcast %cst_29 : f32 to vector<4x64xf32>
    %44 = arith.mulf %40, %43 : vector<4x64xf32>
    %45 = arith.select %42, %40, %44 : vector<4x64xi1>, vector<4x64xf32>
    %46 = arith.truncf %45 : vector<4x64xf32> to vector<4x64xbf16>
    %c0_30 = arith.constant 0 : index
    %c0_31 = arith.constant 0 : index
    %c0_32 = arith.constant 0 : index
    %47 = vector.load %arg5[%c0_30, %c0_31, %c0_32] : memref<1x4x64xbf16, #tpu.memory_space<vmem>>, vector<1x4x64xbf16>
    %48 = vector.shape_cast %47 : vector<1x4x64xbf16> to vector<4x64xbf16>
    %49 = vector.shape_cast %46 : vector<4x64xbf16> to vector<1x4x64xbf16>
    tpu.vector_store %arg5[%c0_30, %c0_31, %c0_32], %49 {strides = array<i32>} : memref<1x4x64xbf16, #tpu.memory_space<vmem>>, vector<1x4x64xbf16>,
    return
  }
  func.func @transform_0(%arg0: i32, %arg1: i32) -> (i32, i32, i32, i32) {
    %c0_i32 = arith.constant 0 : i32
    %c0_i32_0 = arith.constant 0 : i32
    %c0_i32_1 = arith.constant 0 : i32
    %c0_i32_2 = arith.constant 0 : i32
    return %arg0, %c0_i32, %c0_i32_0, %c0_i32_1 : i32, i32, i32, i32
  }
  func.func @transform_1(%arg0: i32, %arg1: i32) -> (i32, i32, i32) {
    %c0_i32 = arith.constant 0 : i32
    %c0_i32_0 = arith.constant 0 : i32
    %c0_i32_1 = arith.constant 0 : i32
    %c0_i32_2 = arith.constant 0 : i32
    return %c0_i32, %c0_i32_0, %c0_i32_1 : i32, i32, i32
  }
  func.func @transform_2(%arg0: i32, %arg1: i32) -> (i32, i32) {
    %c0_i32 = arith.constant 0 : i32
    %c0_i32_0 = arith.constant 0 : i32
    %c0_i32_1 = arith.constant 0 : i32
    return %c0_i32, %c0_i32_0 : i32, i32
  }
  func.func @transform_3(%arg0: i32, %arg1: i32) -> (i32, i32, i32) {
    %c0_i32 = arith.constant 0 : i32
    %c0_i32_0 = arith.constant 0 : i32
    return %arg0, %arg1, %c0_i32 : i32, i32, i32
  }
}

module attributes {stable_mosaic.version = 11 : i64} {
  func.func @_upsample_kernel(%arg0: i32, %arg1: i32, %arg2: memref<1x64x2x2xbf16, #tpu.memory_space<vmem>>, %arg3: memref<16x2xbf16, #tpu.memory_space<vmem>>, %arg4: memref<2x16xbf16, #tpu.memory_space<vmem>>, %arg5: memref<1x64x16x16xbf16, #tpu.memory_space<vmem>>) attributes {dimension_semantics = [#tpu.dimension_semantics<parallel>, #tpu.dimension_semantics<parallel>], iteration_bounds = array<i64: 2, 1>, scalar_prefetch = 0 : i64, scratch_operands = 0 : i64, tpu.core_type = #tpu.core_type<tc>, window_params = [{transform_indices = @transform_0, window_bounds = array<i64: 1, 64, 2, 2>}, {transform_indices = @transform_1, window_bounds = array<i64: 16, 2>}, {pipeline_mode = #tpu.pipeline_mode<synchronous>, transform_indices = @transform_2, window_bounds = array<i64: 2, 16>}, {transform_indices = @transform_3, window_bounds = array<i64: 1, 64, 16, 16>}]} {
    %c0 = arith.constant 0 : index
    %c0_0 = arith.constant 0 : index
    %0 = vector.load %arg3[%c0, %c0_0] : memref<16x2xbf16, #tpu.memory_space<vmem>>, vector<16x2xbf16>
    %1 = vector.shape_cast %0 : vector<16x2xbf16> to vector<1x16x2xbf16>
    %2 = vector.shape_cast %1 : vector<1x16x2xbf16> to vector<1x16x2xbf16>
    %3 = vector.broadcast %2 : vector<1x16x2xbf16> to vector<64x16x2xbf16>
    %c0_1 = arith.constant 0 : index
    %c0_2 = arith.constant 0 : index
    %c0_3 = arith.constant 0 : index
    %c0_4 = arith.constant 0 : index
    %4 = vector.load %arg2[%c0_1, %c0_2, %c0_3, %c0_4] : memref<1x64x2x2xbf16, #tpu.memory_space<vmem>>, vector<1x64x2x2xbf16>
    %5 = vector.shape_cast %4 : vector<1x64x2x2xbf16> to vector<64x2x2xbf16>
    "tpu.trace_start"() <{level = 10 : i32, message = "coh,chw->cow"}> : () -> ()
    %cst = arith.constant dense<0.000000e+00> : vector<64x16x2xf32>
    %6 = tpu.matmul %3, %5, %cst {dimension_numbers = #tpu.dot_dimension_numbers<[2], [1], [1], [2], [0, 0, 0, 1, 1, 2], [0], [0]>} : vector<64x16x2xbf16>, vector<64x2x2xbf16>, vector<64x16x2xf32> -> vector<64x16x2xf32>
    "tpu.trace_stop"() : () -> ()
    %7 = vector.shape_cast %6 : vector<64x16x2xf32> to vector<1024x2xf32>
    %8 = arith.truncf %7 : vector<1024x2xf32> to vector<1024x2xbf16>
    %c0_5 = arith.constant 0 : index
    %c0_6 = arith.constant 0 : index
    %9 = vector.load %arg4[%c0_5, %c0_6] : memref<2x16xbf16, #tpu.memory_space<vmem>>, vector<2x16xbf16>
    %cst_7 = arith.constant dense<0.000000e+00> : vector<1024x16xf32>
    %10 = tpu.matmul %8, %9, %cst_7 {dimension_numbers = #tpu.dot_dimension_numbers<[1], [0], [0], [1], [0, 0, 1, 1], [], []>} : vector<1024x2xbf16>, vector<2x16xbf16>, vector<1024x16xf32> -> vector<1024x16xf32>
    %11 = vector.shape_cast %10 : vector<1024x16xf32> to vector<64x16x16xf32>
    %12 = arith.truncf %11 : vector<64x16x16xf32> to vector<64x16x16xbf16>
    %c0_8 = arith.constant 0 : index
    %c0_9 = arith.constant 0 : index
    %c0_10 = arith.constant 0 : index
    %c0_11 = arith.constant 0 : index
    %13 = vector.load %arg5[%c0_8, %c0_9, %c0_10, %c0_11] : memref<1x64x16x16xbf16, #tpu.memory_space<vmem>>, vector<1x64x16x16xbf16>
    %14 = vector.shape_cast %13 : vector<1x64x16x16xbf16> to vector<64x16x16xbf16>
    %15 = vector.shape_cast %12 : vector<64x16x16xbf16> to vector<1x64x16x16xbf16>
    tpu.vector_store %arg5[%c0_8, %c0_9, %c0_10, %c0_11], %15 {strides = array<i32>} : memref<1x64x16x16xbf16, #tpu.memory_space<vmem>>, vector<1x64x16x16xbf16>,
    return
  }
  func.func @transform_0(%arg0: i32, %arg1: i32) -> (i32, i32, i32, i32) {
    %c0_i32 = arith.constant 0 : i32
    %c0_i32_0 = arith.constant 0 : i32
    %c0_i32_1 = arith.constant 0 : i32
    %c0_i32_2 = arith.constant 0 : i32
    return %arg0, %c0_i32, %c0_i32_0, %c0_i32_1 : i32, i32, i32, i32
  }
  func.func @transform_1(%arg0: i32, %arg1: i32) -> (i32, i32) {
    %c0_i32 = arith.constant 0 : i32
    %c0_i32_0 = arith.constant 0 : i32
    return %arg1, %c0_i32 : i32, i32
  }
  func.func @transform_2(%arg0: i32, %arg1: i32) -> (i32, i32) {
    %c0_i32 = arith.constant 0 : i32
    %c0_i32_0 = arith.constant 0 : i32
    %c0_i32_1 = arith.constant 0 : i32
    return %c0_i32, %c0_i32_0 : i32, i32
  }
  func.func @transform_3(%arg0: i32, %arg1: i32) -> (i32, i32, i32, i32) {
    %c0_i32 = arith.constant 0 : i32
    %c0_i32_0 = arith.constant 0 : i32
    %c0_i32_1 = arith.constant 0 : i32
    return %arg0, %c0_i32, %arg1, %c0_i32_0 : i32, i32, i32, i32
  }
}

module attributes {stable_mosaic.version = 11 : i64} {
  func.func @_upsample_kernel(%arg0: i32, %arg1: i32, %arg2: memref<1x32x4x4xbf16, #tpu.memory_space<vmem>>, %arg3: memref<16x4xbf16, #tpu.memory_space<vmem>>, %arg4: memref<4x16xbf16, #tpu.memory_space<vmem>>, %arg5: memref<1x32x16x16xbf16, #tpu.memory_space<vmem>>) attributes {dimension_semantics = [#tpu.dimension_semantics<parallel>, #tpu.dimension_semantics<parallel>], iteration_bounds = array<i64: 2, 1>, scalar_prefetch = 0 : i64, scratch_operands = 0 : i64, tpu.core_type = #tpu.core_type<tc>, window_params = [{transform_indices = @transform_0, window_bounds = array<i64: 1, 32, 4, 4>}, {transform_indices = @transform_1, window_bounds = array<i64: 16, 4>}, {pipeline_mode = #tpu.pipeline_mode<synchronous>, transform_indices = @transform_2, window_bounds = array<i64: 4, 16>}, {transform_indices = @transform_3, window_bounds = array<i64: 1, 32, 16, 16>}]} {
    %c0 = arith.constant 0 : index
    %c0_0 = arith.constant 0 : index
    %0 = vector.load %arg3[%c0, %c0_0] : memref<16x4xbf16, #tpu.memory_space<vmem>>, vector<16x4xbf16>
    %1 = vector.shape_cast %0 : vector<16x4xbf16> to vector<1x16x4xbf16>
    %2 = vector.shape_cast %1 : vector<1x16x4xbf16> to vector<1x16x4xbf16>
    %3 = vector.broadcast %2 : vector<1x16x4xbf16> to vector<32x16x4xbf16>
    %c0_1 = arith.constant 0 : index
    %c0_2 = arith.constant 0 : index
    %c0_3 = arith.constant 0 : index
    %c0_4 = arith.constant 0 : index
    %4 = vector.load %arg2[%c0_1, %c0_2, %c0_3, %c0_4] : memref<1x32x4x4xbf16, #tpu.memory_space<vmem>>, vector<1x32x4x4xbf16>
    %5 = vector.shape_cast %4 : vector<1x32x4x4xbf16> to vector<32x4x4xbf16>
    "tpu.trace_start"() <{level = 10 : i32, message = "coh,chw->cow"}> : () -> ()
    %cst = arith.constant dense<0.000000e+00> : vector<32x16x4xf32>
    %6 = tpu.matmul %3, %5, %cst {dimension_numbers = #tpu.dot_dimension_numbers<[2], [1], [1], [2], [0, 0, 0, 1, 1, 2], [0], [0]>} : vector<32x16x4xbf16>, vector<32x4x4xbf16>, vector<32x16x4xf32> -> vector<32x16x4xf32>
    "tpu.trace_stop"() : () -> ()
    %7 = vector.shape_cast %6 : vector<32x16x4xf32> to vector<512x4xf32>
    %8 = arith.truncf %7 : vector<512x4xf32> to vector<512x4xbf16>
    %c0_5 = arith.constant 0 : index
    %c0_6 = arith.constant 0 : index
    %9 = vector.load %arg4[%c0_5, %c0_6] : memref<4x16xbf16, #tpu.memory_space<vmem>>, vector<4x16xbf16>
    %cst_7 = arith.constant dense<0.000000e+00> : vector<512x16xf32>
    %10 = tpu.matmul %8, %9, %cst_7 {dimension_numbers = #tpu.dot_dimension_numbers<[1], [0], [0], [1], [0, 0, 1, 1], [], []>} : vector<512x4xbf16>, vector<4x16xbf16>, vector<512x16xf32> -> vector<512x16xf32>
    %11 = vector.shape_cast %10 : vector<512x16xf32> to vector<32x16x16xf32>
    %12 = arith.truncf %11 : vector<32x16x16xf32> to vector<32x16x16xbf16>
    %c0_8 = arith.constant 0 : index
    %c0_9 = arith.constant 0 : index
    %c0_10 = arith.constant 0 : index
    %c0_11 = arith.constant 0 : index
    %13 = vector.load %arg5[%c0_8, %c0_9, %c0_10, %c0_11] : memref<1x32x16x16xbf16, #tpu.memory_space<vmem>>, vector<1x32x16x16xbf16>
    %14 = vector.shape_cast %13 : vector<1x32x16x16xbf16> to vector<32x16x16xbf16>
    %15 = vector.shape_cast %12 : vector<32x16x16xbf16> to vector<1x32x16x16xbf16>
    tpu.vector_store %arg5[%c0_8, %c0_9, %c0_10, %c0_11], %15 {strides = array<i32>} : memref<1x32x16x16xbf16, #tpu.memory_space<vmem>>, vector<1x32x16x16xbf16>,
    return
  }
  func.func @transform_0(%arg0: i32, %arg1: i32) -> (i32, i32, i32, i32) {
    %c0_i32 = arith.constant 0 : i32
    %c0_i32_0 = arith.constant 0 : i32
    %c0_i32_1 = arith.constant 0 : i32
    %c0_i32_2 = arith.constant 0 : i32
    return %arg0, %c0_i32, %c0_i32_0, %c0_i32_1 : i32, i32, i32, i32
  }
  func.func @transform_1(%arg0: i32, %arg1: i32) -> (i32, i32) {
    %c0_i32 = arith.constant 0 : i32
    %c0_i32_0 = arith.constant 0 : i32
    return %arg1, %c0_i32 : i32, i32
  }
  func.func @transform_2(%arg0: i32, %arg1: i32) -> (i32, i32) {
    %c0_i32 = arith.constant 0 : i32
    %c0_i32_0 = arith.constant 0 : i32
    %c0_i32_1 = arith.constant 0 : i32
    return %c0_i32, %c0_i32_0 : i32, i32
  }
  func.func @transform_3(%arg0: i32, %arg1: i32) -> (i32, i32, i32, i32) {
    %c0_i32 = arith.constant 0 : i32
    %c0_i32_0 = arith.constant 0 : i32
    %c0_i32_1 = arith.constant 0 : i32
    return %arg0, %c0_i32, %arg1, %c0_i32_0 : i32, i32, i32, i32
  }
}

module attributes {stable_mosaic.version = 11 : i64} {
  func.func @_upsample_kernel(%arg0: i32, %arg1: i32, %arg2: memref<1x16x8x8xbf16, #tpu.memory_space<vmem>>, %arg3: memref<16x8xbf16, #tpu.memory_space<vmem>>, %arg4: memref<8x16xbf16, #tpu.memory_space<vmem>>, %arg5: memref<1x16x16x16xbf16, #tpu.memory_space<vmem>>) attributes {dimension_semantics = [#tpu.dimension_semantics<parallel>, #tpu.dimension_semantics<parallel>], iteration_bounds = array<i64: 2, 1>, scalar_prefetch = 0 : i64, scratch_operands = 0 : i64, tpu.core_type = #tpu.core_type<tc>, window_params = [{transform_indices = @transform_0, window_bounds = array<i64: 1, 16, 8, 8>}, {transform_indices = @transform_1, window_bounds = array<i64: 16, 8>}, {pipeline_mode = #tpu.pipeline_mode<synchronous>, transform_indices = @transform_2, window_bounds = array<i64: 8, 16>}, {transform_indices = @transform_3, window_bounds = array<i64: 1, 16, 16, 16>}]} {
    %c0 = arith.constant 0 : index
    %c0_0 = arith.constant 0 : index
    %0 = vector.load %arg3[%c0, %c0_0] : memref<16x8xbf16, #tpu.memory_space<vmem>>, vector<16x8xbf16>
    %1 = vector.shape_cast %0 : vector<16x8xbf16> to vector<1x16x8xbf16>
    %2 = vector.shape_cast %1 : vector<1x16x8xbf16> to vector<1x16x8xbf16>
    %3 = vector.broadcast %2 : vector<1x16x8xbf16> to vector<16x16x8xbf16>
    %c0_1 = arith.constant 0 : index
    %c0_2 = arith.constant 0 : index
    %c0_3 = arith.constant 0 : index
    %c0_4 = arith.constant 0 : index
    %4 = vector.load %arg2[%c0_1, %c0_2, %c0_3, %c0_4] : memref<1x16x8x8xbf16, #tpu.memory_space<vmem>>, vector<1x16x8x8xbf16>
    %5 = vector.shape_cast %4 : vector<1x16x8x8xbf16> to vector<16x8x8xbf16>
    "tpu.trace_start"() <{level = 10 : i32, message = "coh,chw->cow"}> : () -> ()
    %cst = arith.constant dense<0.000000e+00> : vector<16x16x8xf32>
    %6 = tpu.matmul %3, %5, %cst {dimension_numbers = #tpu.dot_dimension_numbers<[2], [1], [1], [2], [0, 0, 0, 1, 1, 2], [0], [0]>} : vector<16x16x8xbf16>, vector<16x8x8xbf16>, vector<16x16x8xf32> -> vector<16x16x8xf32>
    "tpu.trace_stop"() : () -> ()
    %7 = vector.shape_cast %6 : vector<16x16x8xf32> to vector<256x8xf32>
    %8 = arith.truncf %7 : vector<256x8xf32> to vector<256x8xbf16>
    %c0_5 = arith.constant 0 : index
    %c0_6 = arith.constant 0 : index
    %9 = vector.load %arg4[%c0_5, %c0_6] : memref<8x16xbf16, #tpu.memory_space<vmem>>, vector<8x16xbf16>
    %cst_7 = arith.constant dense<0.000000e+00> : vector<256x16xf32>
    %10 = tpu.matmul %8, %9, %cst_7 {dimension_numbers = #tpu.dot_dimension_numbers<[1], [0], [0], [1], [0, 0, 1, 1], [], []>} : vector<256x8xbf16>, vector<8x16xbf16>, vector<256x16xf32> -> vector<256x16xf32>
    %11 = vector.shape_cast %10 : vector<256x16xf32> to vector<16x16x16xf32>
    %12 = arith.truncf %11 : vector<16x16x16xf32> to vector<16x16x16xbf16>
    %c0_8 = arith.constant 0 : index
    %c0_9 = arith.constant 0 : index
    %c0_10 = arith.constant 0 : index
    %c0_11 = arith.constant 0 : index
    %13 = vector.load %arg5[%c0_8, %c0_9, %c0_10, %c0_11] : memref<1x16x16x16xbf16, #tpu.memory_space<vmem>>, vector<1x16x16x16xbf16>
    %14 = vector.shape_cast %13 : vector<1x16x16x16xbf16> to vector<16x16x16xbf16>
    %15 = vector.shape_cast %12 : vector<16x16x16xbf16> to vector<1x16x16x16xbf16>
    tpu.vector_store %arg5[%c0_8, %c0_9, %c0_10, %c0_11], %15 {strides = array<i32>} : memref<1x16x16x16xbf16, #tpu.memory_space<vmem>>, vector<1x16x16x16xbf16>,
    return
  }
  func.func @transform_0(%arg0: i32, %arg1: i32) -> (i32, i32, i32, i32) {
    %c0_i32 = arith.constant 0 : i32
    %c0_i32_0 = arith.constant 0 : i32
    %c0_i32_1 = arith.constant 0 : i32
    %c0_i32_2 = arith.constant 0 : i32
    return %arg0, %c0_i32, %c0_i32_0, %c0_i32_1 : i32, i32, i32, i32
  }
  func.func @transform_1(%arg0: i32, %arg1: i32) -> (i32, i32) {
    %c0_i32 = arith.constant 0 : i32
    %c0_i32_0 = arith.constant 0 : i32
    return %arg1, %c0_i32 : i32, i32
  }
  func.func @transform_2(%arg0: i32, %arg1: i32) -> (i32, i32) {
    %c0_i32 = arith.constant 0 : i32
    %c0_i32_0 = arith.constant 0 : i32
    %c0_i32_1 = arith.constant 0 : i32
    return %c0_i32, %c0_i32_0 : i32, i32
  }
  func.func @transform_3(%arg0: i32, %arg1: i32) -> (i32, i32, i32, i32) {
    %c0_i32 = arith.constant 0 : i32
    %c0_i32_0 = arith.constant 0 : i32
    %c0_i32_1 = arith.constant 0 : i32
    return %arg0, %c0_i32, %arg1, %c0_i32_0 : i32, i32, i32, i32
  }
}

module attributes {stable_mosaic.version = 11 : i64} {
  func.func @_mm_kernel(%arg0: i32, %arg1: memref<256x32xbf16, #tpu.memory_space<vmem>>, %arg2: memref<32x8xbf16, #tpu.memory_space<vmem>>, %arg3: memref<1x8xf32, #tpu.memory_space<vmem>>, %arg4: memref<256x8xbf16, #tpu.memory_space<vmem>>) attributes {dimension_semantics = [#tpu.dimension_semantics<parallel>], iteration_bounds = array<i64: 2>, scalar_prefetch = 0 : i64, scratch_operands = 0 : i64, tpu.core_type = #tpu.core_type<tc>, window_params = [{transform_indices = @transform_0, window_bounds = array<i64: 256, 32>}, {pipeline_mode = #tpu.pipeline_mode<synchronous>, transform_indices = @transform_1, window_bounds = array<i64: 32, 8>}, {pipeline_mode = #tpu.pipeline_mode<synchronous>, transform_indices = @transform_2, window_bounds = array<i64: 1, 8>}, {transform_indices = @transform_3, window_bounds = array<i64: 256, 8>}]} {
    %c0 = arith.constant 0 : index
    %c0_0 = arith.constant 0 : index
    %0 = vector.load %arg1[%c0, %c0_0] : memref<256x32xbf16, #tpu.memory_space<vmem>>, vector<256x32xbf16>
    %c0_1 = arith.constant 0 : index
    %c0_2 = arith.constant 0 : index
    %1 = vector.load %arg2[%c0_1, %c0_2] : memref<32x8xbf16, #tpu.memory_space<vmem>>, vector<32x8xbf16>
    %cst = arith.constant dense<0.000000e+00> : vector<256x8xf32>
    %2 = tpu.matmul %0, %1, %cst {dimension_numbers = #tpu.dot_dimension_numbers<[1], [0], [0], [1], [0, 0, 1, 1], [], []>} : vector<256x32xbf16>, vector<32x8xbf16>, vector<256x8xf32> -> vector<256x8xf32>
    %c0_3 = arith.constant 0 : index
    %c0_4 = arith.constant 0 : index
    %3 = vector.load %arg3[%c0_3, %c0_4] : memref<1x8xf32, #tpu.memory_space<vmem>>, vector<1x8xf32>
    %4 = vector.broadcast %3 : vector<1x8xf32> to vector<256x8xf32>
    %5 = arith.addf %2, %4 : vector<256x8xf32>
    %cst_5 = arith.constant 0.000000e+00 : f32
    %6 = vector.broadcast %cst_5 : f32 to vector<256x8xf32>
    %7 = arith.cmpf oge, %5, %6 : vector<256x8xf32>
    %cst_6 = arith.constant 0.00999999977 : f32
    %8 = vector.broadcast %cst_6 : f32 to vector<256x8xf32>
    %9 = arith.mulf %5, %8 : vector<256x8xf32>
    %10 = arith.select %7, %5, %9 : vector<256x8xi1>, vector<256x8xf32>
    %11 = arith.truncf %10 : vector<256x8xf32> to vector<256x8xbf16>
    %c0_7 = arith.constant 0 : index
    %c0_8 = arith.constant 0 : index
    %12 = vector.load %arg4[%c0_7, %c0_8] : memref<256x8xbf16, #tpu.memory_space<vmem>>, vector<256x8xbf16>
    tpu.vector_store %arg4[%c0_7, %c0_8], %11 {strides = array<i32>} : memref<256x8xbf16, #tpu.memory_space<vmem>>, vector<256x8xbf16>,
    return
  }
  func.func @transform_0(%arg0: i32) -> (i32, i32) {
    %c0_i32 = arith.constant 0 : i32
    %c0_i32_0 = arith.constant 0 : i32
    return %arg0, %c0_i32 : i32, i32
  }
  func.func @transform_1(%arg0: i32) -> (i32, i32) {
    %c0_i32 = arith.constant 0 : i32
    %c0_i32_0 = arith.constant 0 : i32
    %c0_i32_1 = arith.constant 0 : i32
    return %c0_i32, %c0_i32_0 : i32, i32
  }
  func.func @transform_2(%arg0: i32) -> (i32, i32) {
    %c0_i32 = arith.constant 0 : i32
    %c0_i32_0 = arith.constant 0 : i32
    %c0_i32_1 = arith.constant 0 : i32
    return %c0_i32, %c0_i32_0 : i32, i32
  }
  func.func @transform_3(%arg0: i32) -> (i32, i32) {
    %c0_i32 = arith.constant 0 : i32
    %c0_i32_0 = arith.constant 0 : i32
    return %arg0, %c0_i32 : i32, i32
  }
}

module attributes {stable_mosaic.version = 11 : i64} {
  func.func @_head_kernel(%arg0: i32, %arg1: i32, %arg2: memref<1x8x256xbf16, #tpu.memory_space<vmem>>, %arg3: memref<1x16x256xbf16, #tpu.memory_space<vmem>>, %arg4: memref<1x32x256xbf16, #tpu.memory_space<vmem>>, %arg5: memref<1x64x256xbf16, #tpu.memory_space<vmem>>, %arg6: memref<128x8xbf16, #tpu.memory_space<vmem>>, %arg7: memref<128x16xbf16, #tpu.memory_space<vmem>>, %arg8: memref<128x32xbf16, #tpu.memory_space<vmem>>, %arg9: memref<128x64xbf16, #tpu.memory_space<vmem>>, %arg10: memref<128x1xf32, #tpu.memory_space<vmem>>, %arg11: memref<1x128xbf16, #tpu.memory_space<vmem>>, %arg12: memref<1x1xf32, #tpu.memory_space<vmem>>, %arg13: memref<1x1x256xbf16, #tpu.memory_space<vmem>>) attributes {dimension_semantics = [#tpu.dimension_semantics<parallel>, #tpu.dimension_semantics<parallel>], iteration_bounds = array<i64: 2, 1>, scalar_prefetch = 0 : i64, scratch_operands = 0 : i64, tpu.core_type = #tpu.core_type<tc>, window_params = [{transform_indices = @transform_0, window_bounds = array<i64: 1, 8, 256>}, {transform_indices = @transform_1, window_bounds = array<i64: 1, 16, 256>}, {transform_indices = @transform_2, window_bounds = array<i64: 1, 32, 256>}, {transform_indices = @transform_3, window_bounds = array<i64: 1, 64, 256>}, {pipeline_mode = #tpu.pipeline_mode<synchronous>, transform_indices = @transform_4, window_bounds = array<i64: 128, 8>}, {pipeline_mode = #tpu.pipeline_mode<synchronous>, transform_indices = @transform_5, window_bounds = array<i64: 128, 16>}, {pipeline_mode = #tpu.pipeline_mode<synchronous>, transform_indices = @transform_6, window_bounds = array<i64: 128, 32>}, {pipeline_mode = #tpu.pipeline_mode<synchronous>, transform_indices = @transform_7, window_bounds = array<i64: 128, 64>}, {pipeline_mode = #tpu.pipeline_mode<synchronous>, transform_indices = @transform_8, window_bounds = array<i64: 128, 1>}, {pipeline_mode = #tpu.pipeline_mode<synchronous>, transform_indices = @transform_9, window_bounds = array<i64: 1, 128>}, {pipeline_mode = #tpu.pipeline_mode<synchronous>, transform_indices = @transform_10, window_bounds = array<i64: 1, 1>}, {transform_indices = @transform_11, window_bounds = array<i64: 1, 1, 256>}]} {
    %c0 = arith.constant 0 : index
    %c0_0 = arith.constant 0 : index
    %0 = vector.load %arg6[%c0, %c0_0] : memref<128x8xbf16, #tpu.memory_space<vmem>>, vector<128x8xbf16>
    %c0_1 = arith.constant 0 : index
    %c0_2 = arith.constant 0 : index
    %c0_3 = arith.constant 0 : index
    %1 = vector.load %arg2[%c0_1, %c0_2, %c0_3] : memref<1x8x256xbf16, #tpu.memory_space<vmem>>, vector<1x8x256xbf16>
    %2 = vector.shape_cast %1 : vector<1x8x256xbf16> to vector<8x256xbf16>
    %cst = arith.constant dense<0.000000e+00> : vector<128x256xf32>
    %3 = tpu.matmul %0, %2, %cst {dimension_numbers = #tpu.dot_dimension_numbers<[1], [0], [0], [1], [0, 0, 1, 1], [], []>} : vector<128x8xbf16>, vector<8x256xbf16>, vector<128x256xf32> -> vector<128x256xf32>
    %c0_4 = arith.constant 0 : index
    %c0_5 = arith.constant 0 : index
    %4 = vector.load %arg7[%c0_4, %c0_5] : memref<128x16xbf16, #tpu.memory_space<vmem>>, vector<128x16xbf16>
    %c0_6 = arith.constant 0 : index
    %c0_7 = arith.constant 0 : index
    %c0_8 = arith.constant 0 : index
    %5 = vector.load %arg3[%c0_6, %c0_7, %c0_8] : memref<1x16x256xbf16, #tpu.memory_space<vmem>>, vector<1x16x256xbf16>
    %6 = vector.shape_cast %5 : vector<1x16x256xbf16> to vector<16x256xbf16>
    %cst_9 = arith.constant dense<0.000000e+00> : vector<128x256xf32>
    %7 = tpu.matmul %4, %6, %cst_9 {dimension_numbers = #tpu.dot_dimension_numbers<[1], [0], [0], [1], [0, 0, 1, 1], [], []>} : vector<128x16xbf16>, vector<16x256xbf16>, vector<128x256xf32> -> vector<128x256xf32>
    %8 = arith.addf %3, %7 : vector<128x256xf32>
    %c0_10 = arith.constant 0 : index
    %c0_11 = arith.constant 0 : index
    %9 = vector.load %arg8[%c0_10, %c0_11] : memref<128x32xbf16, #tpu.memory_space<vmem>>, vector<128x32xbf16>
    %c0_12 = arith.constant 0 : index
    %c0_13 = arith.constant 0 : index
    %c0_14 = arith.constant 0 : index
    %10 = vector.load %arg4[%c0_12, %c0_13, %c0_14] : memref<1x32x256xbf16, #tpu.memory_space<vmem>>, vector<1x32x256xbf16>
    %11 = vector.shape_cast %10 : vector<1x32x256xbf16> to vector<32x256xbf16>
    %cst_15 = arith.constant dense<0.000000e+00> : vector<128x256xf32>
    %12 = tpu.matmul %9, %11, %cst_15 {dimension_numbers = #tpu.dot_dimension_numbers<[1], [0], [0], [1], [0, 0, 1, 1], [], []>} : vector<128x32xbf16>, vector<32x256xbf16>, vector<128x256xf32> -> vector<128x256xf32>
    %13 = arith.addf %8, %12 : vector<128x256xf32>
    %c0_16 = arith.constant 0 : index
    %c0_17 = arith.constant 0 : index
    %14 = vector.load %arg9[%c0_16, %c0_17] : memref<128x64xbf16, #tpu.memory_space<vmem>>, vector<128x64xbf16>
    %c0_18 = arith.constant 0 : index
    %c0_19 = arith.constant 0 : index
    %c0_20 = arith.constant 0 : index
    %15 = vector.load %arg5[%c0_18, %c0_19, %c0_20] : memref<1x64x256xbf16, #tpu.memory_space<vmem>>, vector<1x64x256xbf16>
    %16 = vector.shape_cast %15 : vector<1x64x256xbf16> to vector<64x256xbf16>
    %cst_21 = arith.constant dense<0.000000e+00> : vector<128x256xf32>
    %17 = tpu.matmul %14, %16, %cst_21 {dimension_numbers = #tpu.dot_dimension_numbers<[1], [0], [0], [1], [0, 0, 1, 1], [], []>} : vector<128x64xbf16>, vector<64x256xbf16>, vector<128x256xf32> -> vector<128x256xf32>
    %18 = arith.addf %13, %17 : vector<128x256xf32>
    %c0_22 = arith.constant 0 : index
    %c0_23 = arith.constant 0 : index
    %19 = vector.load %arg10[%c0_22, %c0_23] : memref<128x1xf32, #tpu.memory_space<vmem>>, vector<128x1xf32>
    %20 = vector.broadcast %19 : vector<128x1xf32> to vector<128x256xf32>
    %21 = arith.addf %18, %20 : vector<128x256xf32>
    %cst_24 = arith.constant 0.000000e+00 : f32
    %22 = vector.broadcast %cst_24 : f32 to vector<128x256xf32>
    %23 = arith.cmpf oge, %21, %22 : vector<128x256xf32>
    %cst_25 = arith.constant 0.00999999977 : f32
    %24 = vector.broadcast %cst_25 : f32 to vector<128x256xf32>
    %25 = arith.mulf %21, %24 : vector<128x256xf32>
    %26 = arith.select %23, %21, %25 : vector<128x256xi1>, vector<128x256xf32>
    %c0_26 = arith.constant 0 : index
    %c0_27 = arith.constant 0 : index
    %27 = vector.load %arg11[%c0_26, %c0_27] : memref<1x128xbf16, #tpu.memory_space<vmem>>, vector<1x128xbf16>
    %28 = arith.truncf %26 : vector<128x256xf32> to vector<128x256xbf16>
    %cst_28 = arith.constant dense<0.000000e+00> : vector<1x256xf32>
    %29 = tpu.matmul %27, %28, %cst_28 {dimension_numbers = #tpu.dot_dimension_numbers<[1], [0], [0], [1], [0, 0, 1, 1], [], []>} : vector<1x128xbf16>, vector<128x256xbf16>, vector<1x256xf32> -> vector<1x256xf32>
    %c0_29 = arith.constant 0 : index
    %c0_30 = arith.constant 0 : index
    %30 = vector.load %arg12[%c0_29, %c0_30] : memref<1x1xf32, #tpu.memory_space<vmem>>, vector<1x1xf32>
    %31 = vector.broadcast %30 : vector<1x1xf32> to vector<1x256xf32>
    %32 = arith.addf %29, %31 : vector<1x256xf32>
    %33 = arith.truncf %32 : vector<1x256xf32> to vector<1x256xbf16>
    %c0_31 = arith.constant 0 : index
    %c0_32 = arith.constant 0 : index
    %c0_33 = arith.constant 0 : index
    %34 = vector.load %arg13[%c0_31, %c0_32, %c0_33] : memref<1x1x256xbf16, #tpu.memory_space<vmem>>, vector<1x1x256xbf16>
    %35 = vector.shape_cast %34 : vector<1x1x256xbf16> to vector<1x256xbf16>
    %36 = vector.shape_cast %33 : vector<1x256xbf16> to vector<1x1x256xbf16>
    tpu.vector_store %arg13[%c0_31, %c0_32, %c0_33], %36 {strides = array<i32>} : memref<1x1x256xbf16, #tpu.memory_space<vmem>>, vector<1x1x256xbf16>,
    return
  }
  func.func @transform_0(%arg0: i32, %arg1: i32) -> (i32, i32, i32) {
    %c0_i32 = arith.constant 0 : i32
    %c0_i32_0 = arith.constant 0 : i32
    return %arg0, %c0_i32, %arg1 : i32, i32, i32
  }
  func.func @transform_1(%arg0: i32, %arg1: i32) -> (i32, i32, i32) {
    %c0_i32 = arith.constant 0 : i32
    %c0_i32_0 = arith.constant 0 : i32
    return %arg0, %c0_i32, %arg1 : i32, i32, i32
  }
  func.func @transform_2(%arg0: i32, %arg1: i32) -> (i32, i32, i32) {
    %c0_i32 = arith.constant 0 : i32
    %c0_i32_0 = arith.constant 0 : i32
    return %arg0, %c0_i32, %arg1 : i32, i32, i32
  }
  func.func @transform_3(%arg0: i32, %arg1: i32) -> (i32, i32, i32) {
    %c0_i32 = arith.constant 0 : i32
    %c0_i32_0 = arith.constant 0 : i32
    return %arg0, %c0_i32, %arg1 : i32, i32, i32
  }
  func.func @transform_4(%arg0: i32, %arg1: i32) -> (i32, i32) {
    %c0_i32 = arith.constant 0 : i32
    %c0_i32_0 = arith.constant 0 : i32
    %c0_i32_1 = arith.constant 0 : i32
    return %c0_i32, %c0_i32_0 : i32, i32
  }
  func.func @transform_5(%arg0: i32, %arg1: i32) -> (i32, i32) {
    %c0_i32 = arith.constant 0 : i32
    %c0_i32_0 = arith.constant 0 : i32
    %c0_i32_1 = arith.constant 0 : i32
    return %c0_i32, %c0_i32_0 : i32, i32
  }
  func.func @transform_6(%arg0: i32, %arg1: i32) -> (i32, i32) {
    %c0_i32 = arith.constant 0 : i32
    %c0_i32_0 = arith.constant 0 : i32
    %c0_i32_1 = arith.constant 0 : i32
    return %c0_i32, %c0_i32_0 : i32, i32
  }
  func.func @transform_7(%arg0: i32, %arg1: i32) -> (i32, i32) {
    %c0_i32 = arith.constant 0 : i32
    %c0_i32_0 = arith.constant 0 : i32
    %c0_i32_1 = arith.constant 0 : i32
    return %c0_i32, %c0_i32_0 : i32, i32
  }
  func.func @transform_8(%arg0: i32, %arg1: i32) -> (i32, i32) {
    %c0_i32 = arith.constant 0 : i32
    %c0_i32_0 = arith.constant 0 : i32
    %c0_i32_1 = arith.constant 0 : i32
    return %c0_i32, %c0_i32_0 : i32, i32
  }
  func.func @transform_9(%arg0: i32, %arg1: i32) -> (i32, i32) {
    %c0_i32 = arith.constant 0 : i32
    %c0_i32_0 = arith.constant 0 : i32
    %c0_i32_1 = arith.constant 0 : i32
    return %c0_i32, %c0_i32_0 : i32, i32
  }
  func.func @transform_10(%arg0: i32, %arg1: i32) -> (i32, i32) {
    %c0_i32 = arith.constant 0 : i32
    %c0_i32_0 = arith.constant 0 : i32
    %c0_i32_1 = arith.constant 0 : i32
    return %c0_i32, %c0_i32_0 : i32, i32
  }
  func.func @transform_11(%arg0: i32, %arg1: i32) -> (i32, i32, i32) {
    %c0_i32 = arith.constant 0 : i32
    %c0_i32_0 = arith.constant 0 : i32
    return %arg0, %c0_i32, %arg1 : i32, i32, i32
  }
}

module attributes {stable_mosaic.version = 11 : i64} {
  func.func @_upsample_kernel(%arg0: i32, %arg1: i32, %arg2: memref<1x1x16x16xbf16, #tpu.memory_space<vmem>>, %arg3: memref<64x16xbf16, #tpu.memory_space<vmem>>, %arg4: memref<16x64xbf16, #tpu.memory_space<vmem>>, %arg5: memref<1x1x64x64xf32, #tpu.memory_space<vmem>>) attributes {dimension_semantics = [#tpu.dimension_semantics<parallel>, #tpu.dimension_semantics<parallel>], iteration_bounds = array<i64: 2, 1>, scalar_prefetch = 0 : i64, scratch_operands = 0 : i64, tpu.core_type = #tpu.core_type<tc>, window_params = [{transform_indices = @transform_0, window_bounds = array<i64: 1, 1, 16, 16>}, {transform_indices = @transform_1, window_bounds = array<i64: 64, 16>}, {pipeline_mode = #tpu.pipeline_mode<synchronous>, transform_indices = @transform_2, window_bounds = array<i64: 16, 64>}, {transform_indices = @transform_3, window_bounds = array<i64: 1, 1, 64, 64>}]} {
    %c0 = arith.constant 0 : index
    %c0_0 = arith.constant 0 : index
    %0 = vector.load %arg3[%c0, %c0_0] : memref<64x16xbf16, #tpu.memory_space<vmem>>, vector<64x16xbf16>
    %c0_1 = arith.constant 0 : index
    %c0_2 = arith.constant 0 : index
    %c0_3 = arith.constant 0 : index
    %c0_4 = arith.constant 0 : index
    %1 = vector.load %arg2[%c0_1, %c0_2, %c0_3, %c0_4] : memref<1x1x16x16xbf16, #tpu.memory_space<vmem>>, vector<1x1x16x16xbf16>
    %2 = vector.shape_cast %1 : vector<1x1x16x16xbf16> to vector<16x16xbf16>
    %cst = arith.constant dense<0.000000e+00> : vector<64x16xf32>
    %3 = tpu.matmul %0, %2, %cst {dimension_numbers = #tpu.dot_dimension_numbers<[1], [0], [0], [1], [0, 0, 1, 1], [], []>} : vector<64x16xbf16>, vector<16x16xbf16>, vector<64x16xf32> -> vector<64x16xf32>
    %4 = arith.truncf %3 : vector<64x16xf32> to vector<64x16xbf16>
    %c0_5 = arith.constant 0 : index
    %c0_6 = arith.constant 0 : index
    %5 = vector.load %arg4[%c0_5, %c0_6] : memref<16x64xbf16, #tpu.memory_space<vmem>>, vector<16x64xbf16>
    %cst_7 = arith.constant dense<0.000000e+00> : vector<64x64xf32>
    %6 = tpu.matmul %4, %5, %cst_7 {dimension_numbers = #tpu.dot_dimension_numbers<[1], [0], [0], [1], [0, 0, 1, 1], [], []>} : vector<64x16xbf16>, vector<16x64xbf16>, vector<64x64xf32> -> vector<64x64xf32>
    %7 = vector.shape_cast %6 : vector<64x64xf32> to vector<1x64x64xf32>
    %c0_8 = arith.constant 0 : index
    %c0_9 = arith.constant 0 : index
    %c0_10 = arith.constant 0 : index
    %c0_11 = arith.constant 0 : index
    %8 = vector.load %arg5[%c0_8, %c0_9, %c0_10, %c0_11] : memref<1x1x64x64xf32, #tpu.memory_space<vmem>>, vector<1x1x64x64xf32>
    %9 = vector.shape_cast %8 : vector<1x1x64x64xf32> to vector<1x64x64xf32>
    %10 = vector.shape_cast %7 : vector<1x64x64xf32> to vector<1x1x64x64xf32>
    tpu.vector_store %arg5[%c0_8, %c0_9, %c0_10, %c0_11], %10 {strides = array<i32>} : memref<1x1x64x64xf32, #tpu.memory_space<vmem>>, vector<1x1x64x64xf32>,
    return
  }
  func.func @transform_0(%arg0: i32, %arg1: i32) -> (i32, i32, i32, i32) {
    %c0_i32 = arith.constant 0 : i32
    %c0_i32_0 = arith.constant 0 : i32
    %c0_i32_1 = arith.constant 0 : i32
    %c0_i32_2 = arith.constant 0 : i32
    return %arg0, %c0_i32, %c0_i32_0, %c0_i32_1 : i32, i32, i32, i32
  }
  func.func @transform_1(%arg0: i32, %arg1: i32) -> (i32, i32) {
    %c0_i32 = arith.constant 0 : i32
    %c0_i32_0 = arith.constant 0 : i32
    return %arg1, %c0_i32 : i32, i32
  }
  func.func @transform_2(%arg0: i32, %arg1: i32) -> (i32, i32) {
    %c0_i32 = arith.constant 0 : i32
    %c0_i32_0 = arith.constant 0 : i32
    %c0_i32_1 = arith.constant 0 : i32
    return %c0_i32, %c0_i32_0 : i32, i32
  }
  func.func @transform_3(%arg0: i32, %arg1: i32) -> (i32, i32, i32, i32) {
    %c0_i32 = arith.constant 0 : i32
    %c0_i32_0 = arith.constant 0 : i32
    %c0_i32_1 = arith.constant 0 : i32
    return %arg0, %c0_i32, %arg1, %c0_i32_0 : i32, i32, i32, i32
  }
}

</mosaic_0001>

<bundles_post_ra>
// kernel: hrnet_forward.11
= control target key start
LH: loop header
LB: loop body
LE: loop exit
PB: predicated region body
PF: predicated region fallthrough
CT: control target
= control target key end

     0   :  { %s3246_s12 = smov 0   ;;  %s3248_s13 = smov 0   ;;  %s3916_s0 = inlined_call_operand.vmem [shape: bf16[2,33,33,12], index: 0, kind: input, shape index: {}]   ;;  %s3917_s1 = inlined_call_operand.vmem [shape: bf16[4,12,32], index: 1, kind: input, shape index: {}]   ;;  %s3918_s2 = inlined_call_operand.vmem [shape: f32[1,32], index: 2, kind: input, shape index: {}]   ;;  %s3919_s3 = inlined_call_operand.vmem [shape: bf16[2,1024,32], index: 3, kind: output, shape index: {}]  }
   0x1   :  { %s3250_s14 = smov 0   ;;  %s3252_s15 = smov 0  }
   0x2   :  { %s3254_s16 = smov 0  }
   0x3 LB: > { %s22_s17 = sadd.s32 1, %s3216_s14  ;;  %s25_s18 = sadd.s32 1, %s3220_s15  ;;  %s3224_s16 = sphi %s3254_s16, %s13_s16   ;;  %s3220_s15 = sphi %s3252_s15, %s3953_s15   ;;  %s3216_s14 = sphi %s3250_s14, %s3952_s14   ;;  %s3212_s13 = sphi %s3248_s13, %s3951_s13   ;;  %s3208_s12 = sphi %s3246_s12, %s3950_s12  }
   0x4   : > { %p23_p0 = scmp.ge.s32.totalorder %s22_s17, 4  ;;  %p2613_p1 = scmp.ge.s32.totalorder %s3224_s16, 1 }
   0x5   : > { %p151_p2 = scmp.lt.s32.totalorder %s3224_s16, 9 }
   0x6   : > { %s3955_s17 = smov (%p23_p0, %s22_s17), 0  ;;  %s3957_s18 = smov (!%p23_p0, %s25_s18), %s3220_s15 }
   0x7   : > { %p152_p3 = pnand %p2613_p1, %p151_p2  ;;  %p27_p4 = scmp.ge.s32.totalorder %s3957_s18, 2 }
   0x9   : > { %s3959_s18 = smov (%p27_p4, %s3957_s18), 0  ;;  %155 = sbr.rel (%p152_p3) target bundleno = 371 (0x173), region = 32 }
   0xe   : > { %vm701_vm0 = vcmask 1045504   ;;  %p179_p5 = scmp.lt.s32.totalorder %s3212_s13, 1  ;;  %v3150_v0 = vld [vmem:[%s3917_s1] sm:$0x3f]   ;;  %v3151_v1 = vld [vmem:[%s3917_s1 + $0x8] sm:$0x3f]  }
   0xf   : > { %3106 = vmatprep.subr.msk.bf16.mxu1 %vm701_vm0, %v3150_v0  ;;  %v1000_v2 = vsel %vm701_vm0, %v3150_v0, 0  ;;  %s2868_s23 = smul.u32 160, %s3208_s12  ;;  %3105 = vmatprep.subr.msk.bf16.mxu0 %vm701_vm0, %v3151_v1  ;;  %v703_v3 = vsel %vm701_vm0, %v3151_v1, 0  ;;  %v3154_v4 = vld [vmem:[%s3917_s1 + $0x10] sm:$0x3f]   ;;  %vm652_vm1 = vcmask 97280  }
  0x10   : > { %s3961_s13 = smov (!%p179_p5, %s3212_s13), 1  ;;  %3004 = vmatpush3.bf16.msra.mxu1 %v1000_v2  ;;  %2970 = vmatpush3.bf16.msra.mxu0 %v703_v3  ;;  %v3155_v5 = vld [vmem:[%s3917_s1 + $0x18] sm:$0x3f]   ;;  %vm241_vm2 = vsmask.f32 3328  ;;  %v3305_v6 = vsel %vm701_vm0, %v3154_v4, 0 }
  0x11   : > { %s3109_s24 = smul.u32 660, %s3961_s13  ;;  %3107 = vmatprep.subr.msk.bf16.mxu0 %vm701_vm0, %v3154_v4  ;;  %vm242_vm3 = vsmask.f32 7440  ;;  %3108 = vmatprep.subr.msk.bf16.mxu1 %vm701_vm0, %v3155_v5  ;;  %v2028_v7 = vsel %vm701_vm0, %v3155_v5, 0  ;;  %s2615_s6 = sshll.u32 %s3208_s12, 5  ;;  %vm2486_vm6 = vcmask 257024  }
  0x12   : > { %vm3320_vm4 = vmor %vm241_vm2, %vm242_vm3  ;;  %p187_p6 = scmp.lt.s32.totalorder %s2615_s6, 127  ;;  %s2616_s7 = sshll.u32 %s3961_s13, 7 }
  0x13   : > { %s183_s4 = scalar_lea.vmem %s3916_s0, %s3109_s24 }
  0x14   : > { %s3302_s5 = scalar_lea.vmem %s183_s4, %s2868_s23  ;;  %s3963_s6 = smov (!%p187_p6, %s2615_s6), 127 }
  0x15   : > { %v199_v8 = vld [vmem:[%s3302_s5] sm:$0xf]  ;;  %v200_v9 = vld [vmem:[%s3302_s5 + $0x4] sm:$0xf]  ;;  %v201_v10 = vld [vmem:[%s3302_s5 + $0x8] sm:$0xf]  ;;  %s190_s10 = sadd.s32 %s2616_s7, %s3963_s6 }
  0x16   : > { %v245_v11 = vshrl.u32 %v199_v8, 16  ;;  %v248_v12 = vshll.u32 %v199_v8, 16  ;;  %v254_v13 = vshll.u32 %v200_v9, 16  ;;  %v258_v14 = vshrl.u32 %v200_v9, 16  ;;  %v202_v15 = vld [vmem:[%s3302_s5 + $0xc] sm:$0xf] }
  0x17   : > { %v2656_v16 = vcombine.low %v199_v8, %v200_v9  ;;  %v274_v17 = vshll.u32 %v202_v15, 16  ;;  %v278_v18 = vshrl.u32 %v202_v15, 16  ;;  %v2657_v19 = vcombine.low %v201_v10, %v202_v15  ;;  %v233_v20 = vld [vmem:[%s3302_s5 + $0x10] sm:$0x1]  ;;  %v203_v21 = vld [vmem:[%s3302_s5 + $0x14] sm:$0xf] }
  0x18   : > { %v247_v22 = vrot.slane %v245_v11, 4  ;;  %v250_v23 = vrot.slane %v248_v12, 5  ;;  %v256_v24 = vrot.slane %v254_v13, 5  ;;  %v260_v25 = vrot.slane %v258_v14, 4  ;;  %v204_v33 = vld [vmem:[%s3302_s5 + $0x18] sm:$0xf] }
  0x19   : > { %3005 = vmatprep.mubr.msk.bf16.mxu1 %vm652_vm1, %v2656_v16  ;;  %v276_v26 = vrot.slane %v274_v17, 5  ;;  %v280_v27 = vrot.slane %v278_v18, 4  ;;  %v264_v28 = vshll.u32 %v201_v10, 16  ;;  %v268_v29 = vshrl.u32 %v201_v10, 16  ;;  %v205_v44 = vld [vmem:[%s3302_s5 + $0x1c] sm:$0xf] }
  0x1a   : > { %3006 = vmatmul.mubr.msk.bf16.vlgmr.msra.gmra.mxu1 %vm652_vm1, %v2657_v19  ;;  %v251_v30 = vor.u32 %v250_v23, %v247_v22  ;;  %v261_v31 = vor.u32 %v260_v25, %v256_v24  ;;  %v284_v32 = vshll.u32 %v233_v20, 16  ;;  %v289_v34 = vshrl.u32 %v203_v21, 16  ;;  %v206_v49 = vld [vmem:[%s3302_s5 + $0x20] sm:$0xf]  ;;  %v234_v62 = vld [vmem:[%s3302_s5 + $0x24] sm:$0x1] }
  0x1b   : > { %v266_v36 = vrot.slane %v264_v28, 5  ;;  %v270_v37 = vrot.slane %v268_v29, 4  ;;  %v281_v38 = vor.u32 %v280_v27, %v276_v26  ;;  %3072 = vmatpush3.bf16.msra.mxu1 %v2028_v7  ;;  %v292_v39 = vshll.u32 %v203_v21, 16  ;;  %v207_v3 = vld [vmem:[%s3302_s5 + $0x28] sm:$0xf]  ;;  %s2617_s11 = sshll.u32 %s190_s10, 2 }
  0x1c   : > { %v252_v40 = vrot.slane %v251_v30, 4  ;;  %v262_v41 = vrot.slane %v261_v31, 4  ;;  %v286_v42 = vrot.slane %v284_v32, 5  ;;  %v291_v43 = vrot.slane %v289_v34, 4  ;;  %v208_v4 = vld [vmem:[%s3302_s5 + $0x2c] sm:$0xf]  ;;  %s3753_s19 = scalar_lea.vmem %s3919_s3, %s2617_s11 }
  0x1d   : > { %v271_v45 = vor.u32 %v270_v37, %v266_v36  ;;  %v282_v46 = vrot.slane %v281_v38, 4  ;;  %v294_v47 = vrot.slane %v292_v39, 5  ;;  %v298_v48 = vshll.u32 %v204_v33, 16  ;;  %v209_v22 = vld [vmem:[%s3302_s5 + $0x30] sm:$0xf] }
  0x1e   : > { %v257_v50 = vsel %vm3320_vm4, %v252_v40, %v256_v24  ;;  %v267_v51 = vsel %vm3320_vm4, %v262_v41, %v266_v36  ;;  %v302_v52 = vshrl.u32 %v204_v33, 16  ;;  %v2658_v53 = vcombine.low %v203_v21, %v204_v33  ;;  %v210_v27 = vld [vmem:[%s3302_s5 + $0x34] sm:$0xf]  ;;  %v235_v36 = vld [vmem:[%s3302_s5 + $0x38] sm:$0x1] }
  0x1f   : > { %v272_v54 = vrot.slane %v271_v45, 4  ;;  %v2623_v55 = vcombine.low %v257_v50, %v267_v51  ;;  %v287_v56 = vsel %vm3320_vm4, %v282_v46, %v286_v42  ;;  %v300_v57 = vrot.slane %v298_v48, 5  ;;  %v211_v41 = vld [vmem:[%s3302_s5 + $0x3c] sm:$0xf]  ;;  %v212_v46 = vld [vmem:[%s3302_s5 + $0x40] sm:$0xf] }
  0x20   : > { %v304_v58 = vrot.slane %v302_v52, 4  ;;  %3009 = vmatprep.mubr.msk.bf16.mxu1 %vm652_vm1, %v2658_v53  ;;  %v308_v59 = vshll.u32 %v205_v44, 16  ;;  %v312_v60 = vshrl.u32 %v205_v44, 16  ;;  %v318_v61 = vshll.u32 %v206_v49, 16 }
  0x21   : > { %2971 = vmatprep.mubr.msk.bf16.mxu0 %vm652_vm1, %v2623_v55  ;;  %v277_v63 = vsel %vm3320_vm4, %v272_v54, %v276_v26  ;;  %v322_v0 = vshrl.u32 %v206_v49, 16  ;;  %v2659_v1 = vcombine.low %v205_v44, %v206_v49  ;;  %v295_v2 = vor.u32 %v294_v47, %v291_v43 }
  0x22   : > { %v2624_v5 = vcombine.low %v277_v63, %v287_v56  ;;  %v310_v7 = vrot.slane %v308_v59, 5  ;;  %v314_v8 = vrot.slane %v312_v60, 4  ;;  %v320_v9 = vrot.slane %v318_v61, 5  ;;  %v213_v59 = vld [vmem:[%s3302_s5 + $0x44] sm:$0xf] }
  0x23   : > { %v324_v10 = vrot.slane %v322_v0, 4  ;;  %3010 = vmatmul.mubr.msk.bf16.gmra.mxu1 %vm652_vm1, %v2659_v1  ;;  %v296_v11 = vrot.slane %v295_v2, 4  ;;  %v305_v12 = vor.u32 %v304_v58, %v300_v57  ;;  %v328_v13 = vshll.u32 %v234_v62, 16  ;;  %v214_v0 = vld [vmem:[%s3302_s5 + $0x48] sm:$0xf] }
  0x24   : > { %2972 = vmatmul.mubr.msk.bf16.vlgmr.msra.gmra.mxu0 %vm652_vm1, %v2624_v5  ;;  %v315_v14 = vor.u32 %v314_v8, %v310_v7  ;;  %v333_v15 = vshrl.u32 %v207_v3, 16  ;;  %v336_v16 = vshll.u32 %v207_v3, 16  ;;  %v342_v17 = vshll.u32 %v208_v4, 16 }
  0x25   : > { %3038 = vmatpush3.bf16.msra.mxu0 %v3305_v6  ;;  %v301_v18 = vsel %vm3320_vm4, %v296_v11, %v300_v57  ;;  %v306_v19 = vrot.slane %v305_v12, 4  ;;  %v325_v20 = vor.u32 %v324_v10, %v320_v9  ;;  %v330_v21 = vrot.slane %v328_v13, 5  ;;  %v236_v10 = vld [vmem:[%s3302_s5 + $0x4c] sm:$0x1] }
  0x26   : > { %v316_v23 = vrot.slane %v315_v14, 4  ;;  %v335_v24 = vrot.slane %v333_v15, 4  ;;  %v338_v25 = vrot.slane %v336_v16, 5  ;;  %v344_v26 = vrot.slane %v342_v17, 5  ;;  %v215_v15 = vld [vmem:[%s3302_s5 + $0x50] sm:$0xf] }
  0x27   : > { %v311_v28 = vsel %vm3320_vm4, %v306_v19, %v310_v7  ;;  %v326_v29 = vrot.slane %v325_v20, 4  ;;  %v346_v30 = vshrl.u32 %v208_v4, 16  ;;  %v2660_v6 = vcombine.low %v207_v3, %v208_v4  ;;  %v216_v20 = vld [vmem:[%s3302_s5 + $0x54] sm:$0xf] }
  0x28   : > { %v2625_v31 = vcombine.low %v301_v18, %v311_v28  ;;  %v321_v32 = vsel %vm3320_vm4, %v316_v23, %v320_v9  ;;  %v352_v33 = vshll.u32 %v209_v22, 16  ;;  %v356_v34 = vshrl.u32 %v209_v22, 16 }
  0x29   : > { %v331_v37 = vsel %vm3320_vm4, %v326_v29, %v330_v21  ;;  %v348_v38 = vrot.slane %v346_v30, 4  ;;  %3013 = vmatprep.mubr.msk.bf16.mxu1 %vm652_vm1, %v2660_v6  ;;  %v362_v39 = vshll.u32 %v210_v27, 16  ;;  %v366_v40 = vshrl.u32 %v210_v27, 16  ;;  %v217_v29 = vld [vmem:[%s3302_s5 + $0x58] sm:$0xf] }
  0x2a   : > { %2975 = vmatprep.mubr.msk.bf16.mxu0 %vm652_vm1, %v2625_v31  ;;  %v2626_v42 = vcombine.low %v321_v32, %v331_v37  ;;  %v354_v43 = vrot.slane %v352_v33, 5  ;;  %v358_v44 = vrot.slane %v356_v34, 4  ;;  %v2661_v45 = vcombine.low %v209_v22, %v210_v27 }
  0x2b   : > { %v364_v47 = vrot.slane %v362_v39, 5  ;;  %v368_v48 = vrot.slane %v366_v40, 4  ;;  %v339_v49 = vor.u32 %v338_v25, %v335_v24  ;;  %v349_v50 = vor.u32 %v348_v38, %v344_v26 }
  0x2c   : > { %2976 = vmatmul.mubr.msk.bf16.gmra.mxu0 %vm652_vm1, %v2626_v42  ;;  %3014 = vmatmul.mubr.msk.bf16.gmra.mxu1 %vm652_vm1, %v2661_v45  ;;  %v359_v51 = vor.u32 %v358_v44, %v354_v43  ;;  %v372_v52 = vshll.u32 %v235_v36, 16  ;;  %v377_v53 = vshrl.u32 %v211_v41, 16  ;;  %v380_v54 = vshll.u32 %v211_v41, 16  ;;  %v218_v42 = vld [vmem:[%s3302_s5 + $0x5c] sm:$0xf] }
  0x2d   : > { %v340_v55 = vrot.slane %v339_v49, 4  ;;  %v350_v56 = vrot.slane %v349_v50, 4  ;;  %v369_v57 = vor.u32 %v368_v48, %v364_v47  ;;  %v386_v58 = vshll.u32 %v212_v46, 16 }
  0x2e   : > { %v360_v60 = vrot.slane %v359_v51, 4  ;;  %v374_v61 = vrot.slane %v372_v52, 5  ;;  %v379_v62 = vrot.slane %v377_v53, 4  ;;  %v382_v63 = vrot.slane %v380_v54, 5  ;;  %v219_v52 = vld [vmem:[%s3302_s5 + $0x64] sm:$0xf] }
  0x2f   : > { %v345_v1 = vsel %vm3320_vm4, %v340_v55, %v344_v26  ;;  %v355_v2 = vsel %vm3320_vm4, %v350_v56, %v354_v43  ;;  %v370_v3 = vrot.slane %v369_v57, 4  ;;  %v388_v4 = vrot.slane %v386_v58, 5  ;;  %v220_v53 = vld [vmem:[%s3302_s5 + $0x68] sm:$0xf] }
  0x30   : > { %v2627_v5 = vcombine.low %v345_v1, %v355_v2  ;;  %v365_v7 = vsel %vm3320_vm4, %v360_v60, %v364_v47  ;;  %v390_v8 = vshrl.u32 %v212_v46, 16  ;;  %v2662_v9 = vcombine.low %v211_v41, %v212_v46  ;;  %v237_v47 = vld [vmem:[%s3302_s5 + $0x60] sm:$0x1] }
  0x31   : > { %v375_v11 = vsel %vm3320_vm4, %v370_v3, %v374_v61  ;;  %v396_v12 = vshll.u32 %v213_v59, 16  ;;  %v400_v13 = vshrl.u32 %v213_v59, 16  ;;  %v406_v14 = vshll.u32 %v214_v0, 16 }
  0x32   : > { %2979 = vmatprep.mubr.msk.bf16.mxu0 %vm652_vm1, %v2627_v5  ;;  %v2628_v16 = vcombine.low %v365_v7, %v375_v11  ;;  %v392_v17 = vrot.slane %v390_v8, 4  ;;  %3017 = vmatprep.mubr.msk.bf16.mxu1 %vm652_vm1, %v2662_v9  ;;  %v410_v18 = vshrl.u32 %v214_v0, 16  ;;  %v2663_v19 = vcombine.low %v213_v59, %v214_v0  ;;  %v221_v11 = vld [vmem:[%s3302_s5 + $0x6c] sm:$0xf] }
  0x33   : > { %v398_v21 = vrot.slane %v396_v12, 5  ;;  %v402_v22 = vrot.slane %v400_v13, 4  ;;  %v408_v23 = vrot.slane %v406_v14, 5  ;;  %v383_v24 = vor.u32 %v382_v63, %v379_v62 }
  0x34   : > { %2980 = vmatmul.mubr.msk.bf16.gmra.mxu0 %vm652_vm1, %v2628_v16  ;;  %v412_v25 = vrot.slane %v410_v18, 4  ;;  %3018 = vmatmul.mubr.msk.bf16.gmra.mxu1 %vm652_vm1, %v2663_v19  ;;  %v393_v26 = vor.u32 %v392_v17, %v388_v4  ;;  %v416_v27 = vshll.u32 %v236_v10, 16  ;;  %v421_v28 = vshrl.u32 %v215_v15, 16  ;;  %v222_v16 = vld [vmem:[%s3302_s5 + $0x70] sm:$0xf] }
  0x35   : > { %v384_v30 = vrot.slane %v383_v24, 4  ;;  %v403_v6 = vor.u32 %v402_v22, %v398_v21  ;;  %v424_v31 = vshll.u32 %v215_v15, 16  ;;  %v430_v32 = vshll.u32 %v216_v20, 16  ;;  %v223_v22 = vld [vmem:[%s3302_s5 + $0x78] sm:$0xf] }
  0x36   : > { %v394_v33 = vrot.slane %v393_v26, 4  ;;  %v413_v34 = vor.u32 %v412_v25, %v408_v23  ;;  %v418_v36 = vrot.slane %v416_v27, 5  ;;  %v423_v37 = vrot.slane %v421_v28, 4 }
  0x37   : > { %v389_v38 = vsel %vm3320_vm4, %v384_v30, %v388_v4  ;;  %v404_v39 = vrot.slane %v403_v6, 4  ;;  %v426_v40 = vrot.slane %v424_v31, 5  ;;  %v432_v41 = vrot.slane %v430_v32, 5 }
  0x38   : > { %v399_v43 = vsel %vm3320_vm4, %v394_v33, %v398_v21  ;;  %v414_v44 = vrot.slane %v413_v34, 4  ;;  %v434_v45 = vshrl.u32 %v216_v20, 16  ;;  %v2664_v46 = vcombine.low %v215_v15, %v216_v20  ;;  %v238_v21 = vld [vmem:[%s3302_s5 + $0x74] sm:$0x1]  ;;  %v224_v34 = vld [vmem:[%s3302_s5 + $0x7c] sm:$0xf] }
  0x39   : > { %v2629_v48 = vcombine.low %v389_v38, %v399_v43  ;;  %v409_v49 = vsel %vm3320_vm4, %v404_v39, %v408_v23  ;;  %v440_v50 = vshll.u32 %v217_v29, 16  ;;  %v444_v51 = vshrl.u32 %v217_v29, 16 }
  0x3a   : > { %v419_v54 = vsel %vm3320_vm4, %v414_v44, %v418_v36  ;;  %v436_v55 = vrot.slane %v434_v45, 4  ;;  %3021 = vmatprep.mubr.msk.bf16.mxu1 %vm652_vm1, %v2664_v46  ;;  %v450_v56 = vshll.u32 %v218_v42, 16  ;;  %v454_v57 = vshrl.u32 %v218_v42, 16  ;;  %v225_v44 = vld [vmem:[%s3302_s5 + $0x80] sm:$0xf] }
  0x3b   : > { %2983 = vmatprep.mubr.msk.bf16.mxu0 %vm652_vm1, %v2629_v48  ;;  %v2630_v58 = vcombine.low %v409_v49, %v419_v54  ;;  %v442_v59 = vrot.slane %v440_v50, 5  ;;  %v446_v60 = vrot.slane %v444_v51, 4  ;;  %v2665_v61 = vcombine.low %v217_v29, %v218_v42  ;;  %v226_v49 = vld [vmem:[%s3302_s5 + $0x84] sm:$0xf] }
  0x3c   : > { %v452_v62 = vrot.slane %v450_v56, 5  ;;  %v456_v63 = vrot.slane %v454_v57, 4  ;;  %v427_v0 = vor.u32 %v426_v40, %v423_v37  ;;  %v437_v1 = vor.u32 %v436_v55, %v432_v41 }
  0x3d   : > { %2984 = vmatmul.mubr.msk.bf16.gmra.mxu0 %vm652_vm1, %v2630_v58  ;;  %3022 = vmatmul.mubr.msk.bf16.gmra.mxu1 %vm652_vm1, %v2665_v61  ;;  %v447_v2 = vor.u32 %v446_v60, %v442_v59  ;;  %v460_v3 = vshll.u32 %v237_v47, 16  ;;  %v465_v4 = vshrl.u32 %v219_v52, 16  ;;  %v468_v5 = vshll.u32 %v219_v52, 16 }
  0x3e   : > { %v428_v7 = vrot.slane %v427_v0, 4  ;;  %v438_v8 = vrot.slane %v437_v1, 4  ;;  %v457_v9 = vor.u32 %v456_v63, %v452_v62  ;;  %v474_v10 = vshll.u32 %v220_v53, 16 }
  0x3f   : > { %v448_v12 = vrot.slane %v447_v2, 4  ;;  %v462_v13 = vrot.slane %v460_v3, 5  ;;  %v467_v14 = vrot.slane %v465_v4, 4  ;;  %v470_v15 = vrot.slane %v468_v5, 5  ;;  %v239_v2 = vld [vmem:[%s3302_s5 + $0x88] sm:$0x1] }
  0x40   : > { %v433_v17 = vsel %vm3320_vm4, %v428_v7, %v432_v41  ;;  %v443_v18 = vsel %vm3320_vm4, %v438_v8, %v442_v59  ;;  %v458_v19 = vrot.slane %v457_v9, 4  ;;  %v476_v20 = vrot.slane %v474_v10, 5  ;;  %v227_v8 = vld [vmem:[%s3302_s5 + $0x8c] sm:$0xf] }
  0x41   : > { %v2631_v23 = vcombine.low %v433_v17, %v443_v18  ;;  %v453_v24 = vsel %vm3320_vm4, %v448_v12, %v452_v62  ;;  %v478_v25 = vshrl.u32 %v220_v53, 16  ;;  %v2666_v26 = vcombine.low %v219_v52, %v220_v53 }
  0x42   : > { %v463_v27 = vsel %vm3320_vm4, %v458_v19, %v462_v13  ;;  %v484_v28 = vshll.u32 %v221_v11, 16  ;;  %v488_v29 = vshrl.u32 %v221_v11, 16  ;;  %v494_v30 = vshll.u32 %v222_v16, 16  ;;  %v228_v13 = vld [vmem:[%s3302_s5 + $0x90] sm:$0xf] }
  0x43   : > { %2987 = vmatprep.mubr.msk.bf16.mxu0 %vm652_vm1, %v2631_v23  ;;  %v2632_v6 = vcombine.low %v453_v24, %v463_v27  ;;  %v480_v31 = vrot.slane %v478_v25, 4  ;;  %3025 = vmatprep.mubr.msk.bf16.mxu1 %vm652_vm1, %v2666_v26  ;;  %v498_v32 = vshrl.u32 %v222_v16, 16  ;;  %v2667_v33 = vcombine.low %v221_v11, %v222_v16 }
  0x44   : > { %v486_v36 = vrot.slane %v484_v28, 5  ;;  %v490_v37 = vrot.slane %v488_v29, 4  ;;  %v496_v38 = vrot.slane %v494_v30, 5  ;;  %v471_v39 = vor.u32 %v470_v15, %v467_v14 }
  0x45   : > { %2988 = vmatmul.mubr.msk.bf16.gmra.mxu0 %vm652_vm1, %v2632_v6  ;;  %v500_v40 = vrot.slane %v498_v32, 4  ;;  %3026 = vmatmul.mubr.msk.bf16.gmra.mxu1 %vm652_vm1, %v2667_v33  ;;  %v481_v41 = vor.u32 %v480_v31, %v476_v20  ;;  %v504_v42 = vshll.u32 %v238_v21, 16  ;;  %v509_v43 = vshrl.u32 %v223_v22, 16  ;;  %v230_v6 = vld [vmem:[%s3302_s5 + $0x98] sm:$0xf] }
  0x46   : > { %v472_v45 = vrot.slane %v471_v39, 4  ;;  %v491_v46 = vor.u32 %v490_v37, %v486_v36  ;;  %v512_v47 = vshll.u32 %v223_v22, 16  ;;  %v518_v48 = vshll.u32 %v224_v34, 16 }
  0x47   : > { %v482_v50 = vrot.slane %v481_v41, 4  ;;  %v501_v51 = vor.u32 %v500_v40, %v496_v38  ;;  %v506_v52 = vrot.slane %v504_v42, 5  ;;  %v511_v53 = vrot.slane %v509_v43, 4  ;;  %v2758_v41 = vld [vmem:[%s3302_s5 + $0x14] sm:$0xf] }
  0x48   : > { %v477_v54 = vsel %vm3320_vm4, %v472_v45, %v476_v20  ;;  %v492_v55 = vrot.slane %v491_v46, 4  ;;  %v514_v56 = vrot.slane %v512_v47, 5  ;;  %v520_v57 = vrot.slane %v518_v48, 5  ;;  %v2759_v42 = vld [vmem:[%s3302_s5 + $0x18] sm:$0xf] }
  0x49   : > { %v487_v58 = vsel %vm3320_vm4, %v482_v50, %v486_v36  ;;  %v502_v59 = vrot.slane %v501_v51, 4  ;;  %v522_v60 = vshrl.u32 %v224_v34, 16  ;;  %v2668_v61 = vcombine.low %v223_v22, %v224_v34  ;;  %v229_v22 = vld [vmem:[%s3302_s5 + $0x94] sm:$0xf]  ;;  %v240_v36 = vld [vmem:[%s3302_s5 + $0x9c] sm:$0x1] }
  0x4a   : > { %v2633_v62 = vcombine.low %v477_v54, %v487_v58  ;;  %v497_v63 = vsel %vm3320_vm4, %v492_v55, %v496_v38  ;;  %v528_v0 = vshll.u32 %v225_v44, 16  ;;  %v532_v1 = vshrl.u32 %v225_v44, 16 }
  0x4b   : > { %v507_v3 = vsel %vm3320_vm4, %v502_v59, %v506_v52  ;;  %v524_v4 = vrot.slane %v522_v60, 4  ;;  %3029 = vmatprep.mubr.msk.bf16.mxu1 %vm652_vm1, %v2668_v61  ;;  %v538_v5 = vshll.u32 %v226_v49, 16  ;;  %v542_v7 = vshrl.u32 %v226_v49, 16  ;;  %v2760_v61 = vld [vmem:[%s3302_s5 + $0x1c] sm:$0xf] }
  0x4c   : > { %2991 = vmatprep.mubr.msk.bf16.mxu0 %vm652_vm1, %v2633_v62  ;;  %v2634_v9 = vcombine.low %v497_v63, %v507_v3  ;;  %v530_v10 = vrot.slane %v528_v0, 5  ;;  %v534_v11 = vrot.slane %v532_v1, 4  ;;  %v2669_v12 = vcombine.low %v225_v44, %v226_v49 }
  0x4d   : > { %v540_v14 = vrot.slane %v538_v5, 5  ;;  %v544_v15 = vrot.slane %v542_v7, 4  ;;  %v515_v16 = vor.u32 %v514_v56, %v511_v53  ;;  %v525_v17 = vor.u32 %v524_v4, %v520_v57  ;;  %v2761_v4 = vld [vmem:[%s3302_s5 + $0x20] sm:$0xf] }
  0x4e   : > { %2992 = vmatmul.mubr.msk.bf16.gmra.mxu0 %vm652_vm1, %v2634_v9  ;;  %3030 = vmatmul.mubr.msk.bf16.gmra.mxu1 %vm652_vm1, %v2669_v12  ;;  %v535_v18 = vor.u32 %v534_v11, %v530_v10  ;;  %v548_v19 = vshll.u32 %v239_v2, 16  ;;  %v553_v20 = vshrl.u32 %v227_v8, 16  ;;  %v556_v21 = vshll.u32 %v227_v8, 16 }
  0x4f   : > { %v516_v23 = vrot.slane %v515_v16, 4  ;;  %v526_v24 = vrot.slane %v525_v17, 4  ;;  %v545_v25 = vor.u32 %v544_v15, %v540_v14  ;;  %v562_v26 = vshll.u32 %v228_v13, 16  ;;  %v2763_v15 = vld [vmem:[%s3302_s5 + $0x28] sm:$0xf] }
  0x50   : > { %v536_v27 = vrot.slane %v535_v18, 4  ;;  %v550_v28 = vrot.slane %v548_v19, 5  ;;  %v555_v29 = vrot.slane %v553_v20, 4  ;;  %v558_v30 = vrot.slane %v556_v21, 5  ;;  %v2764_v20 = vld [vmem:[%s3302_s5 + $0x2c] sm:$0xf] }
  0x51   : > { %v521_v31 = vsel %vm3320_vm4, %v516_v23, %v520_v57  ;;  %v531_v32 = vsel %vm3320_vm4, %v526_v24, %v530_v10  ;;  %v546_v33 = vrot.slane %v545_v25, 4  ;;  %v564_v34 = vrot.slane %v562_v26, 5  ;;  %v2762_v10 = vld [vmem:[%s3302_s5 + $0x24] sm:$0x1]  ;;  %v3170_v25 = vld [vmem:[%s3302_s5 + $0x14] sm:$0xff]  }
  0x52   : > { %v2635_v37 = vcombine.low %v521_v31, %v531_v32  ;;  %v541_v38 = vsel %vm3320_vm4, %v536_v27, %v540_v14  ;;  %v566_v39 = vshrl.u32 %v228_v13, 16  ;;  %v2670_v40 = vcombine.low %v227_v8, %v228_v13 }
  0x53   : > { %v551_v43 = vsel %vm3320_vm4, %v546_v33, %v550_v28  ;;  %v572_v44 = vshll.u32 %v229_v22, 16  ;;  %v576_v45 = vshrl.u32 %v229_v22, 16  ;;  %v582_v46 = vshll.u32 %v230_v6, 16 }
  0x54   : > { %2995 = vmatprep.mubr.msk.bf16.mxu0 %vm652_vm1, %v2635_v37  ;;  %v2636_v47 = vcombine.low %v541_v38, %v551_v43  ;;  %v568_v48 = vrot.slane %v566_v39, 4  ;;  %3033 = vmatprep.mubr.msk.bf16.mxu1 %vm652_vm1, %v2670_v40  ;;  %v586_v49 = vshrl.u32 %v230_v6, 16  ;;  %v2671_v50 = vcombine.low %v229_v22, %v230_v6  ;;  %v2765_v37 = vld [vmem:[%s3302_s5 + $0x30] sm:$0xf]  ;;  %v2766_v43 = vld [vmem:[%s3302_s5 + $0x34] sm:$0xf] }
  0x55   : > { %v574_v51 = vrot.slane %v572_v44, 5  ;;  %v578_v52 = vrot.slane %v576_v45, 4  ;;  %v584_v53 = vrot.slane %v582_v46, 5  ;;  %v559_v54 = vor.u32 %v558_v30, %v555_v29 }
  0x56   : > { %2996 = vmatmul.mubr.msk.bf16.gmra.mxu0 %vm652_vm1, %v2636_v47  ;;  %v588_v55 = vrot.slane %v586_v49, 4  ;;  %3034 = vmatmul.mubr.msk.bf16.gmra.mxu1 %vm652_vm1, %v2671_v50  ;;  %v569_v56 = vor.u32 %v568_v48, %v564_v34  ;;  %v592_v57 = vshll.u32 %v240_v36, 16  ;;  %v1572_v58 = vshrl.u32 %v2758_v41, 16  ;;  %v2767_v48 = vld [vmem:[%s3302_s5 + $0x38] sm:$0x1]  ;;  %v3171_v50 = vld [vmem:[%s3302_s5 + $0x1c] sm:$0xff]  }
  0x57   : > { %v560_v59 = vrot.slane %v559_v54, 4  ;;  %v579_v60 = vor.u32 %v578_v52, %v574_v51  ;;  %v1575_v62 = vshll.u32 %v2758_v41, 16  ;;  %v1581_v63 = vshll.u32 %v2759_v42, 16  ;;  %v2768_v54 = vld [vmem:[%s3302_s5 + $0x3c] sm:$0xf] }
  0x58   : > { %v570_v0 = vrot.slane %v569_v56, 4  ;;  %v589_v1 = vor.u32 %v588_v55, %v584_v53  ;;  %v594_v2 = vrot.slane %v592_v57, 5  ;;  %v1574_v3 = vrot.slane %v1572_v58, 4 }
  0x59   : > { %v565_v5 = vsel %vm3320_vm4, %v560_v59, %v564_v34  ;;  %v580_v7 = vrot.slane %v579_v60, 4  ;;  %v1577_v8 = vrot.slane %v1575_v62, 5  ;;  %v1583_v9 = vrot.slane %v1581_v63, 5  ;;  %v3172_v59 = vld [vmem:[%s3302_s5 + $0x28] sm:$0xff]  }
  0x5a   : > { %v575_v11 = vsel %vm3320_vm4, %v570_v0, %v574_v51  ;;  %v590_v12 = vrot.slane %v589_v1, 4  ;;  %v1585_v13 = vshrl.u32 %v2759_v42, 16  ;;  %v1591_v14 = vshll.u32 %v2760_v61, 16 }
  0x5b   : > { %v2637_v16 = vcombine.low %v565_v5, %v575_v11  ;;  %v585_v17 = vsel %vm3320_vm4, %v580_v7, %v584_v53  ;;  %v1578_v18 = vor.u32 %v1577_v8, %v1574_v3  ;;  %v1595_v19 = vshrl.u32 %v2760_v61, 16 }
  0x5c   : > { %v595_v21 = vsel %vm3320_vm4, %v590_v12, %v594_v2  ;;  %v1587_v22 = vrot.slane %v1585_v13, 4  ;;  %v1593_v23 = vrot.slane %v1591_v14, 5  ;;  %v1601_v24 = vshll.u32 %v2761_v4, 16 }
  0x5d   : > { %2999 = vmatprep.mubr.msk.bf16.mxu0 %vm652_vm1, %v2637_v16  ;;  %v2638_v26 = vcombine.low %v585_v17, %v595_v21  ;;  %v1579_v27 = vrot.slane %v1578_v18, 4  ;;  %v1597_v28 = vrot.slane %v1595_v19, 4  ;;  %v1605_v29 = vshrl.u32 %v2761_v4, 16  ;;  %v2769_v4 = vld [vmem:[%s3302_s5 + $0x40] sm:$0xf] }
  0x5e   : > { %v1588_v30 = vor.u32 %v1587_v22, %v1583_v9  ;;  %v1603_v6 = vrot.slane %v1601_v24, 5  ;;  %v1611_v31 = vshll.u32 %v2762_v10, 16  ;;  %v1616_v32 = vshrl.u32 %v2763_v15, 16  ;;  %v2770_v10 = vld [vmem:[%s3302_s5 + $0x44] sm:$0xf] }
  0x5f   : > { %3000 = vmatmul.mubr.msk.bf16.gmra.mxu0 %vm652_vm1, %v2638_v26  ;;  %v1584_v33 = vsel %vm3320_vm4, %v1579_v27, %v1583_v9  ;;  %v1598_v34 = vor.u32 %v1597_v28, %v1593_v23  ;;  %v1607_v36 = vrot.slane %v1605_v29, 4  ;;  %v1619_v38 = vshll.u32 %v2763_v15, 16  ;;  %v2772_v28 = vld [vmem:[%s3302_s5 + $0x4c] sm:$0x1]  ;;  %v2773_v29 = vld [vmem:[%s3302_s5 + $0x50] sm:$0xf] }
  0x60   : > { %v1589_v39 = vrot.slane %v1588_v30, 4  ;;  %v1613_v40 = vrot.slane %v1611_v31, 5  ;;  %3039 = vmatprep.mubr.msk.bf16.mxu0 %vm652_vm1, %v3170_v25  ;;  %v1618_v41 = vrot.slane %v1616_v32, 4  ;;  %v1625_v42 = vshll.u32 %v2764_v20, 16  ;;  %v3173_v31 = vld [vmem:[%s3302_s5 + $0x30] sm:$0xff]  }
  0x61   : > { %v1599_v44 = vrot.slane %v1598_v34, 4  ;;  %v1608_v45 = vor.u32 %v1607_v36, %v1603_v6  ;;  %v1621_v46 = vrot.slane %v1619_v38, 5  ;;  %v1629_v47 = vshrl.u32 %v2764_v20, 16 }
  0x62   : > { %v1594_v49 = vsel %vm3320_vm4, %v1589_v39, %v1593_v23  ;;  %v1627_v51 = vrot.slane %v1625_v42, 5  ;;  %v1635_v52 = vshll.u32 %v2765_v37, 16  ;;  %v1639_v53 = vshrl.u32 %v2765_v37, 16  ;;  %v2771_v23 = vld [vmem:[%s3302_s5 + $0x48] sm:$0xf]  ;;  %v3174_v39 = vld [vmem:[%s3302_s5 + $0x3c] sm:$0xff]  }
  0x63   : > { %v2800_v55 = vcombine.low %v1584_v33, %v1594_v49  ;;  %v1604_v56 = vsel %vm3320_vm4, %v1599_v44, %v1603_v6  ;;  %v1609_v57 = vrot.slane %v1608_v45, 4  ;;  %v1622_v58 = vor.u32 %v1621_v46, %v1618_v41  ;;  %v2775_v49 = vld [vmem:[%s3302_s5 + $0x58] sm:$0xf] }
  0x64   : > { %v1631_v60 = vrot.slane %v1629_v47, 4  ;;  %v1637_v61 = vrot.slane %v1635_v52, 5  ;;  %v1641_v62 = vrot.slane %v1639_v53, 4  ;;  %v1645_v63 = vshll.u32 %v2766_v43, 16 }
  0x65   : > { %3073 = vmatprep.mubr.msk.bf16.mxu1 %vm652_vm1, %v2800_v55  ;;  %v1614_v0 = vsel %vm3320_vm4, %v1609_v57, %v1613_v40  ;;  %v1623_v1 = vrot.slane %v1622_v58, 4  ;;  %v1649_v2 = vshrl.u32 %v2766_v43, 16  ;;  %v1655_v3 = vshll.u32 %v2767_v48, 16  ;;  %v2774_v43 = vld [vmem:[%s3302_s5 + $0x54] sm:$0xf] }
  0x66   : > { %v2801_v5 = vcombine.low %v1604_v56, %v1614_v0  ;;  %v1632_v7 = vor.u32 %v1631_v60, %v1627_v51  ;;  %v1642_v8 = vor.u32 %v1641_v62, %v1637_v61  ;;  %v1647_v9 = vrot.slane %v1645_v63, 5  ;;  %v2776_v62 = vld [vmem:[%s3302_s5 + $0x5c] sm:$0xf] }
  0x67   : > { %3040 = vmatmul.mubr.msk.bf16.vlgmr.msra.gmra.mxu0 %vm652_vm1, %v3171_v50  ;;  %v1628_v11 = vsel %vm3320_vm4, %v1623_v1, %v1627_v51  ;;  %v1651_v12 = vrot.slane %v1649_v2, 4  ;;  %v1657_v13 = vrot.slane %v1655_v3, 5  ;;  %v1660_v14 = vshrl.u32 %v2768_v54, 16  ;;  %v2777_v3 = vld [vmem:[%s3302_s5 + $0x60] sm:$0x1] }
  0x68   : > { %3074 = vmatmul.mubr.msk.bf16.vlgmr.msra.gmra.mxu1 %vm652_vm1, %v2801_v5  ;;  %v1633_v15 = vrot.slane %v1632_v7, 4  ;;  %v1643_v16 = vrot.slane %v1642_v8, 4  ;;  %3043 = vmatprep.mubr.msk.bf16.mxu0 %vm652_vm1, %v3172_v59  ;;  %v1663_v17 = vshll.u32 %v2768_v54, 16  ;;  %v1669_v18 = vshll.u32 %v2769_v4, 16  ;;  %v3175_v5 = vld [vmem:[%s3302_s5 + $0x44] sm:$0xff]  }
  0x69   : > { %v1652_v19 = vor.u32 %v1651_v12, %v1647_v9  ;;  %v1662_v20 = vrot.slane %v1660_v14, 4  ;;  %v1673_v21 = vshrl.u32 %v2769_v4, 16  ;;  %v1679_v22 = vshll.u32 %v2770_v10, 16  ;;  %v3176_v14 = vld [vmem:[%s3302_s5 + $0x50] sm:$0xff]  }
  0x6a   : > { %v1638_v24 = vsel %vm3320_vm4, %v1633_v15, %v1637_v61  ;;  %v1648_v25 = vsel %vm3320_vm4, %v1643_v16, %v1647_v9  ;;  %v1665_v26 = vrot.slane %v1663_v17, 5  ;;  %v1671_v27 = vrot.slane %v1669_v18, 5  ;;  %v2778_v15 = vld [vmem:[%s3302_s5 + $0x64] sm:$0xf] }
  0x6b   : > { %v2802_v30 = vcombine.low %v1628_v11, %v1638_v24  ;;  %v1653_v6 = vrot.slane %v1652_v19, 4  ;;  %v1675_v32 = vrot.slane %v1673_v21, 4  ;;  %v1681_v33 = vrot.slane %v1679_v22, 5 }
  0x6c   : > { %v1666_v34 = vor.u32 %v1665_v26, %v1662_v20  ;;  %v1683_v36 = vshrl.u32 %v2770_v10, 16  ;;  %v1689_v37 = vshll.u32 %v2771_v23, 16  ;;  %v1693_v38 = vshrl.u32 %v2771_v23, 16  ;;  %v2779_v20 = vld [vmem:[%s3302_s5 + $0x68] sm:$0xf] }
  0x6d   : > { %3077 = vmatprep.mubr.msk.bf16.mxu1 %vm652_vm1, %v2802_v30  ;;  %v1658_v40 = vsel %vm3320_vm4, %v1653_v6, %v1657_v13  ;;  %v1676_v41 = vor.u32 %v1675_v32, %v1671_v27  ;;  %v1699_v42 = vshll.u32 %v2772_v28, 16  ;;  %v1704_v44 = vshrl.u32 %v2773_v29, 16  ;;  %v2780_v6 = vld [vmem:[%s3302_s5 + $0x6c] sm:$0xf] }
  0x6e   : > { %v2803_v45 = vcombine.low %v1648_v25, %v1658_v40  ;;  %v1667_v46 = vrot.slane %v1666_v34, 4  ;;  %v1685_v47 = vrot.slane %v1683_v36, 4  ;;  %v1691_v48 = vrot.slane %v1689_v37, 5 }
  0x6f   : > { %3044 = vmatmul.mubr.msk.bf16.gmra.mxu0 %vm652_vm1, %v3173_v31  ;;  %v1677_v50 = vrot.slane %v1676_v41, 4  ;;  %v1695_v51 = vrot.slane %v1693_v38, 4  ;;  %v1701_v52 = vrot.slane %v1699_v42, 5  ;;  %v1706_v53 = vrot.slane %v1704_v44, 4  ;;  %v2781_v38 = vld [vmem:[%s3302_s5 + $0x70] sm:$0xf] }
  0x70   : > { %3078 = vmatmul.mubr.msk.bf16.gmra.mxu1 %vm652_vm1, %v2803_v45  ;;  %v1672_v54 = vsel %vm3320_vm4, %v1667_v46, %v1671_v27  ;;  %v1686_v55 = vor.u32 %v1685_v47, %v1681_v33  ;;  %3047 = vmatprep.mubr.msk.bf16.mxu0 %vm652_vm1, %v3174_v39  ;;  %v1707_v56 = vshll.u32 %v2773_v29, 16  ;;  %v1713_v57 = vshll.u32 %v2774_v43, 16  ;;  %v3177_v44 = vld [vmem:[%s3302_s5 + $0x58] sm:$0xff]  }
  0x71   : > { %v1682_v58 = vsel %vm3320_vm4, %v1677_v50, %v1681_v33  ;;  %v1696_v59 = vor.u32 %v1695_v51, %v1691_v48  ;;  %v1717_v60 = vshrl.u32 %v2774_v43, 16  ;;  %v1723_v61 = vshll.u32 %v2775_v49, 16 }
  0x72   : > { %v2804_v63 = vcombine.low %v1672_v54, %v1682_v58  ;;  %v1687_v0 = vrot.slane %v1686_v55, 4  ;;  %v1709_v1 = vrot.slane %v1707_v56, 5  ;;  %v1715_v2 = vrot.slane %v1713_v57, 5  ;;  %v2783_v54 = vld [vmem:[%s3302_s5 + $0x78] sm:$0xf] }
  0x73   : > { %v1697_v4 = vrot.slane %v1696_v59, 4  ;;  %v1719_v7 = vrot.slane %v1717_v60, 4  ;;  %v1725_v8 = vrot.slane %v1723_v61, 5  ;;  %v1727_v9 = vshrl.u32 %v2775_v49, 16  ;;  %v2784_v59 = vld [vmem:[%s3302_s5 + $0x7c] sm:$0xf] }
  0x74   : > { %3081 = vmatprep.mubr.msk.bf16.mxu1 %vm652_vm1, %v2804_v63  ;;  %v1692_v10 = vsel %vm3320_vm4, %v1687_v0, %v1691_v48  ;;  %v1710_v11 = vor.u32 %v1709_v1, %v1706_v53  ;;  %v1733_v12 = vshll.u32 %v2776_v62, 16  ;;  %v1737_v13 = vshrl.u32 %v2776_v62, 16  ;;  %v2782_v48 = vld [vmem:[%s3302_s5 + $0x74] sm:$0x1]  ;;  %v3178_v53 = vld [vmem:[%s3302_s5 + $0x64] sm:$0xff]  }
  0x75   : > { %v1702_v16 = vsel %vm3320_vm4, %v1697_v4, %v1701_v52  ;;  %v1720_v17 = vor.u32 %v1719_v7, %v1715_v2  ;;  %v1729_v18 = vrot.slane %v1727_v9, 4  ;;  %v1743_v19 = vshll.u32 %v2777_v3, 16 }
  0x76   : > { %v2805_v21 = vcombine.low %v1692_v10, %v1702_v16  ;;  %v1711_v22 = vrot.slane %v1710_v11, 4  ;;  %v1735_v23 = vrot.slane %v1733_v12, 5  ;;  %v1739_v24 = vrot.slane %v1737_v13, 4 }
  0x77   : > { %3048 = vmatmul.mubr.msk.bf16.gmra.mxu0 %vm652_vm1, %v3175_v5  ;;  %v1721_v25 = vrot.slane %v1720_v17, 4  ;;  %v1730_v26 = vor.u32 %v1729_v18, %v1725_v8  ;;  %v1745_v27 = vrot.slane %v1743_v19, 5  ;;  %v1748_v28 = vshrl.u32 %v2778_v15, 16 }
  0x78   : > { %3082 = vmatmul.mubr.msk.bf16.gmra.mxu1 %vm652_vm1, %v2805_v21  ;;  %v1716_v29 = vsel %vm3320_vm4, %v1711_v22, %v1715_v2  ;;  %v1740_v30 = vor.u32 %v1739_v24, %v1735_v23  ;;  %3051 = vmatprep.mubr.msk.bf16.mxu0 %vm652_vm1, %v3176_v14  ;;  %v1751_v31 = vshll.u32 %v2778_v15, 16  ;;  %v1757_v32 = vshll.u32 %v2779_v20, 16  ;;  %v2786_v14 = vld [vmem:[%s3302_s5 + $0x84] sm:$0xf]  ;;  %v2787_v24 = vld [vmem:[%s3302_s5 + $0x88] sm:$0x1] }
  0x79   : > { %v1726_v33 = vsel %vm3320_vm4, %v1721_v25, %v1725_v8  ;;  %v1731_v34 = vrot.slane %v1730_v26, 4  ;;  %v1750_v36 = vrot.slane %v1748_v28, 4  ;;  %v1761_v37 = vshrl.u32 %v2779_v20, 16  ;;  %v2785_v8 = vld [vmem:[%s3302_s5 + $0x80] sm:$0xf]  ;;  %v3179_v20 = vld [vmem:[%s3302_s5 + $0x6c] sm:$0xff]  }
  0x7a   : > { %v2806_v39 = vcombine.low %v1716_v29, %v1726_v33  ;;  %v1741_v40 = vrot.slane %v1740_v30, 4  ;;  %v1753_v41 = vrot.slane %v1751_v31, 5  ;;  %v1759_v42 = vrot.slane %v1757_v32, 5  ;;  %v3180_v29 = vld [vmem:[%s3302_s5 + $0x78] sm:$0xff]   ;;  %v2788_v30 = vld [vmem:[%s3302_s5 + $0x8c] sm:$0xf] }
  0x7b   : > { %v1736_v43 = vsel %vm3320_vm4, %v1731_v34, %v1735_v23  ;;  %v1763_v45 = vrot.slane %v1761_v37, 4  ;;  %v1767_v46 = vshll.u32 %v2780_v6, 16  ;;  %v1771_v47 = vshrl.u32 %v2780_v6, 16  ;;  %v2789_v34 = vld [vmem:[%s3302_s5 + $0x90] sm:$0xf] }
  0x7c   : > { %3085 = vmatprep.mubr.msk.bf16.mxu1 %vm652_vm1, %v2806_v39  ;;  %v1746_v49 = vsel %vm3320_vm4, %v1741_v40, %v1745_v27  ;;  %v1754_v50 = vor.u32 %v1753_v41, %v1750_v36  ;;  %v1777_v51 = vshll.u32 %v2781_v38, 16  ;;  %v1781_v52 = vshrl.u32 %v2781_v38, 16 }
  0x7d   : > { %v2807_v55 = vcombine.low %v1736_v43, %v1746_v49  ;;  %v1764_v56 = vor.u32 %v1763_v45, %v1759_v42  ;;  %v1769_v57 = vrot.slane %v1767_v46, 5  ;;  %v1773_v58 = vrot.slane %v1771_v47, 4 }
  0x7e   : > { %v1755_v60 = vrot.slane %v1754_v50, 4  ;;  %v1779_v61 = vrot.slane %v1777_v51, 5  ;;  %v1783_v62 = vrot.slane %v1781_v52, 4  ;;  %v1787_v63 = vshll.u32 %v2782_v48, 16 }
  0x7f   : > { %3052 = vmatmul.mubr.msk.bf16.gmra.mxu0 %vm652_vm1, %v3177_v44  ;;  %v1765_v0 = vrot.slane %v1764_v56, 4  ;;  %v1774_v1 = vor.u32 %v1773_v58, %v1769_v57  ;;  %v1792_v2 = vshrl.u32 %v2783_v54, 16  ;;  %v1795_v3 = vshll.u32 %v2783_v54, 16 }
  0x80   : > { %3086 = vmatmul.mubr.msk.bf16.gmra.mxu1 %vm652_vm1, %v2807_v55  ;;  %v1760_v4 = vsel %vm3320_vm4, %v1755_v60, %v1759_v42  ;;  %v1784_v5 = vor.u32 %v1783_v62, %v1779_v61  ;;  %v1789_v7 = vrot.slane %v1787_v63, 5  ;;  %3055 = vmatprep.mubr.msk.bf16.mxu0 %vm652_vm1, %v3178_v53  ;;  %v1801_v9 = vshll.u32 %v2784_v59, 16  ;;  %v2790_v42 = vld [vmem:[%s3302_s5 + $0x94] sm:$0xf]  ;;  %v2791_v53 = vld [vmem:[%s3302_s5 + $0x98] sm:$0xf] }
  0x81   : > { %v1770_v10 = vsel %vm3320_vm4, %v1765_v0, %v1769_v57  ;;  %v1775_v11 = vrot.slane %v1774_v1, 4  ;;  %v1794_v12 = vrot.slane %v1792_v2, 4  ;;  %v1797_v13 = vrot.slane %v1795_v3, 5  ;;  %v3181_v60 = vld [vmem:[%s3302_s5 + $0x80] sm:$0xff]   ;;  %v2792_v63 = vld [vmem:[%s3302_s5 + $0x9c] sm:$0x1] }
  0x82   : > { %v2808_v15 = vcombine.low %v1760_v4, %v1770_v10  ;;  %v1785_v16 = vrot.slane %v1784_v5, 4  ;;  %v1803_v17 = vrot.slane %v1801_v9, 5  ;;  %v1805_v18 = vshrl.u32 %v2784_v59, 16  ;;  %v2793_v0 = vld [vmem:[%s3302_s5 + $0xa0] sm:$0xf]  ;;  %v3182_v5 = vld [vmem:[%s3302_s5 + $0x8c] sm:$0xff]  }
  0x83   : > { %v1780_v19 = vsel %vm3320_vm4, %v1775_v11, %v1779_v61  ;;  %v1798_v21 = vor.u32 %v1797_v13, %v1794_v12  ;;  %v1811_v22 = vshll.u32 %v2785_v8, 16  ;;  %v1815_v23 = vshrl.u32 %v2785_v8, 16  ;;  %v2794_v11 = vld [vmem:[%s3302_s5 + $0xa4] sm:$0xf] }
  0x84   : > { %3089 = vmatprep.mubr.msk.bf16.mxu1 %vm652_vm1, %v2808_v15  ;;  %v1790_v25 = vsel %vm3320_vm4, %v1785_v16, %v1789_v7  ;;  %v1807_v26 = vrot.slane %v1805_v18, 4  ;;  %v1821_v27 = vshll.u32 %v2786_v14, 16  ;;  %v1825_v28 = vshrl.u32 %v2786_v14, 16 }
  0x85   : > { %v2809_v6 = vcombine.low %v1780_v19, %v1790_v25  ;;  %v1799_v31 = vrot.slane %v1798_v21, 4  ;;  %v1813_v32 = vrot.slane %v1811_v22, 5  ;;  %v1817_v33 = vrot.slane %v1815_v23, 4  ;;  %v2795_v19 = vld [vmem:[%s3302_s5 + $0xa8] sm:$0xf] }
  0x86   : > { %v1808_v36 = vor.u32 %v1807_v26, %v1803_v17  ;;  %v1823_v37 = vrot.slane %v1821_v27, 5  ;;  %v1827_v38 = vrot.slane %v1825_v28, 4  ;;  %v1831_v39 = vshll.u32 %v2787_v24, 16 }
  0x87   : > { %3056 = vmatmul.mubr.msk.bf16.gmra.mxu0 %vm652_vm1, %v3179_v20  ;;  %v1804_v40 = vsel %vm3320_vm4, %v1799_v31, %v1803_v17  ;;  %v1818_v41 = vor.u32 %v1817_v33, %v1813_v32  ;;  %v1836_v43 = vshrl.u32 %v2788_v30, 16  ;;  %v1839_v44 = vshll.u32 %v2788_v30, 16 }
  0x88   : > { %3090 = vmatmul.mubr.msk.bf16.gmra.mxu1 %vm652_vm1, %v2809_v6  ;;  %v1809_v45 = vrot.slane %v1808_v36, 4  ;;  %v1828_v46 = vor.u32 %v1827_v38, %v1823_v37  ;;  %v1833_v47 = vrot.slane %v1831_v39, 5  ;;  %3059 = vmatprep.mubr.msk.bf16.mxu0 %vm652_vm1, %v3180_v29  ;;  %v1845_v48 = vshll.u32 %v2789_v34, 16  ;;  %v2796_v29 = vld [vmem:[%s3302_s5 + $0xac] sm:$0xf] }
  0x89   : > { %v1819_v49 = vrot.slane %v1818_v41, 4  ;;  %v1838_v50 = vrot.slane %v1836_v43, 4  ;;  %v1841_v51 = vrot.slane %v1839_v44, 5  ;;  %v1849_v52 = vshrl.u32 %v2789_v34, 16  ;;  %v3183_v34 = vld [vmem:[%s3302_s5 + $0x94] sm:$0xff]   ;;  %v3184_v44 = vld [vmem:[%s3302_s5 + $0xa0] sm:$0xff]  }
  0x8a   : > { %v1814_v54 = vsel %vm3320_vm4, %v1809_v45, %v1813_v32  ;;  %v1829_v55 = vrot.slane %v1828_v46, 4  ;;  %v1847_v56 = vrot.slane %v1845_v48, 5  ;;  %v1855_v57 = vshll.u32 %v2790_v42, 16  ;;  %v2797_v39 = vld [vmem:[%s3302_s5 + $0xb0] sm:$0x1] }
  0x8b   : > { %v2810_v58 = vcombine.low %v1804_v40, %v1814_v54  ;;  %v1824_v59 = vsel %vm3320_vm4, %v1819_v49, %v1823_v37  ;;  %v1842_v61 = vor.u32 %v1841_v51, %v1838_v50  ;;  %v1851_v62 = vrot.slane %v1849_v52, 4 }
  0x8c   : > { %v1834_v1 = vsel %vm3320_vm4, %v1829_v55, %v1833_v47  ;;  %v1857_v2 = vrot.slane %v1855_v57, 5  ;;  %v1859_v3 = vshrl.u32 %v2790_v42, 16  ;;  %v1865_v4 = vshll.u32 %v2791_v53, 16 }
  0x8d   : > { %3093 = vmatprep.mubr.msk.bf16.mxu1 %vm652_vm1, %v2810_v58  ;;  %v2811_v7 = vcombine.low %v1824_v59, %v1834_v1  ;;  %v1843_v8 = vrot.slane %v1842_v61, 4  ;;  %v1852_v9 = vor.u32 %v1851_v62, %v1847_v56  ;;  %v1869_v10 = vshrl.u32 %v2791_v53, 16 }
  0x8e   : > { %v1861_v12 = vrot.slane %v1859_v3, 4  ;;  %v1867_v13 = vrot.slane %v1865_v4, 5  ;;  %v1875_v14 = vshll.u32 %v2792_v63, 16  ;;  %v1880_v15 = vshrl.u32 %v2793_v0, 16  ;;  %v3185_v63 = vld [vmem:[%s3302_s5 + $0xa8] sm:$0xff]  }
  0x8f   : > { %3060 = vmatmul.mubr.msk.bf16.gmra.mxu0 %vm652_vm1, %v3181_v60  ;;  %v1848_v16 = vsel %vm3320_vm4, %v1843_v8, %v1847_v56  ;;  %v1853_v17 = vrot.slane %v1852_v9, 4  ;;  %v1871_v18 = vrot.slane %v1869_v10, 4  ;;  %v1883_v20 = vshll.u32 %v2793_v0, 16 }
  0x90   : > { %3094 = vmatmul.mubr.msk.bf16.gmra.mxu1 %vm652_vm1, %v2811_v7  ;;  %v1862_v21 = vor.u32 %v1861_v12, %v1857_v2  ;;  %v1877_v22 = vrot.slane %v1875_v14, 5  ;;  %3063 = vmatprep.mubr.msk.bf16.mxu0 %vm652_vm1, %v3182_v5  ;;  %v1882_v23 = vrot.slane %v1880_v15, 4  ;;  %v1889_v24 = vshll.u32 %v2794_v11, 16 }
  0x91   : > { %v1858_v25 = vsel %vm3320_vm4, %v1853_v17, %v1857_v2  ;;  %v1872_v26 = vor.u32 %v1871_v18, %v1867_v13  ;;  %v1885_v27 = vrot.slane %v1883_v20, 5  ;;  %v1893_v28 = vshrl.u32 %v2794_v11, 16 }
  0x92   : > { %v2812_v30 = vcombine.low %v1848_v16, %v1858_v25  ;;  %v1863_v6 = vrot.slane %v1862_v21, 4  ;;  %v1891_v31 = vrot.slane %v1889_v24, 5  ;;  %v1899_v32 = vshll.u32 %v2795_v19, 16 }
  0x93   : > { %v1873_v33 = vrot.slane %v1872_v26, 4  ;;  %v1886_v36 = vor.u32 %v1885_v27, %v1882_v23  ;;  %v1895_v37 = vrot.slane %v1893_v28, 4  ;;  %v1903_v38 = vshrl.u32 %v2795_v19, 16 }
  0x94   : > { %3097 = vmatprep.mubr.msk.bf16.mxu1 %vm652_vm1, %v2812_v30  ;;  %v1868_v40 = vsel %vm3320_vm4, %v1863_v6, %v1867_v13  ;;  %v1901_v41 = vrot.slane %v1899_v32, 5  ;;  %v1909_v42 = vshll.u32 %v2796_v29, 16  ;;  %v1913_v43 = vshrl.u32 %v2796_v29, 16 }
  0x95   : > { %v1878_v45 = vsel %vm3320_vm4, %v1873_v33, %v1877_v22  ;;  %v1887_v46 = vrot.slane %v1886_v36, 4  ;;  %v1896_v47 = vor.u32 %v1895_v37, %v1891_v31  ;;  %v1905_v48 = vrot.slane %v1903_v38, 4 }
  0x96   : > { %v2813_v49 = vcombine.low %v1868_v40, %v1878_v45  ;;  %v1911_v50 = vrot.slane %v1909_v42, 5  ;;  %v1915_v51 = vrot.slane %v1913_v43, 4  ;;  %v1919_v52 = vshll.u32 %v2797_v39, 16 }
  0x97   : > { %3064 = vmatmul.mubr.msk.bf16.gmra.mxu0 %vm652_vm1, %v3183_v34  ;;  %v1892_v53 = vsel %vm3320_vm4, %v1887_v46, %v1891_v31  ;;  %v1897_v54 = vrot.slane %v1896_v47, 4  ;;  %v1906_v55 = vor.u32 %v1905_v48, %v1901_v41 }
  0x98   : > { %3098 = vmatmul.mubr.msk.bf16.gmra.mxu1 %vm652_vm1, %v2813_v49  ;;  %v1916_v56 = vor.u32 %v1915_v51, %v1911_v50  ;;  %v1921_v57 = vrot.slane %v1919_v52, 5  ;;  %3067 = vmatprep.mubr.msk.bf16.mxu0 %vm652_vm1, %v3184_v44 }
  0x99   : > { %v1902_v58 = vsel %vm3320_vm4, %v1897_v54, %v1901_v41  ;;  %v1907_v59 = vrot.slane %v1906_v55, 4 }
  0x9a   : > { %v2814_v60 = vcombine.low %v1892_v53, %v1902_v58  ;;  %v1917_v61 = vrot.slane %v1916_v56, 4 }
  0x9b   : > { %v1912_v62 = vsel %vm3320_vm4, %v1907_v59, %v1911_v50 }
  0x9c   : > { %3101 = vmatprep.mubr.msk.bf16.mxu1 %vm652_vm1, %v2814_v60  ;;  %v1922_v0 = vsel %vm3320_vm4, %v1917_v61, %v1921_v57 }
  0x9d   : > { %v2815_v1 = vcombine.low %v1912_v62, %v1922_v0 }
  0x9f   : > { %3068 = vmatmul.mubr.msk.bf16.gmra.mxu0 %vm652_vm1, %v3185_v63 }
  0xa0   : > { %3102 = vmatmul.mubr.msk.bf16.gmra.mxu1 %vm652_vm1, %v2815_v1 }
  0xda   : > { %v3604_v2 = vpop.f32.mrf.mxu1 }
  0xdc   : > { %v3606_v3 = vpop.f32.mrf.mxu1 }
  0xde   : > { %v3608_v4 = vpop.f32.mrf.mxu1 }
  0xe0   : > { %v3610_v5 = vpop.f32.mrf.mxu1 }
  0xe3   : > { %v3612_v7 = vpop.f32.mrf.mxu1 }
  0xe4   : > { %v2973_v8 = vpop.f32.mrf.mxu0 }
  0xe5   : > { %v3614_v9 = vpop.f32.mrf.mxu1 }
  0xe6   : > { %v3616_v35 = vpop.f32.mrf.mxu0 }
  0xe7   : > { %v3618_v10 = vpop.f32.mrf.mxu1 }
  0xe8   : > { %v3620_v11 = vpop.f32.mrf.mxu0 }
  0xe9   : > { %v3622_v12 = vpop.f32.mrf.mxu1 }
  0xea   : > { %v3624_v13 = vpop.f32.mrf.mxu0 }
  0xec   : > { %v3626_v14 = vpop.f32.mrf.mxu0  ;;  %v3628_v15 = vpop.f32.mrf.mxu1 }
  0xee   : > { %v3630_v16 = vpop.f32.mrf.mxu0  ;;  %v3632_v17 = vpop.f32.mrf.mxu1 }
  0xf0   : > { %v3634_v18 = vpop.f32.mrf.mxu0  ;;  %v3636_v19 = vpop.f32.mrf.mxu1 }
  0xf2   : > { %v3638_v20 = vpop.f32.mrf.mxu0  ;;  %v3640_v21 = vpop.f32.mrf.mxu1 }
  0xf4   : > { %v3642_v22 = vpop.f32.mrf.mxu0  ;;  %v3644_v23 = vpop.f32.mrf.mxu1 }
  0xf6   : > { %v3646_v24 = vpop.f32.mrf.mxu0  ;;  %v3648_v25 = vpop.f32.mrf.mxu1 }
  0xf8   : > { %v3650_v26 = vpop.f32.mrf.mxu0  ;;  %v3652_v27 = vpop.f32.mrf.mxu1 }
  0xfa   : > { %v3654_v28 = vpop.f32.mrf.mxu0  ;;  %v3656_v29 = vpop.f32.mrf.mxu1 }
  0xfd   : > { %v3658_v30 = vpop.f32.mrf.mxu0  ;;  %v3660_v6 = vpop.f32.mrf.mxu1 }
  0xff   : > { %v3662_v31 = vpop.f32.mrf.mxu0  ;;  %v3664_v32 = vpop.f32.mrf.mxu1 }
 0x101   : > { %v3666_v33 = vpop.f32.mrf.mxu0  ;;  %v3668_v34 = vpop.f32.mrf.mxu1 }
 0x103   : > { %v3670_v36 = vpop.f32.mrf.mxu0  ;;  %v3672_v37 = vpop.f32.mrf.mxu1 }
 0x105   : > { %v3674_v38 = vpop.f32.mrf.mxu0  ;;  %v3676_v39 = vpop.f32.mrf.mxu1 }
 0x107   : > { %v3678_v40 = vpop.f32.mrf.mxu0  ;;  %v3680_v41 = vpop.f32.mrf.mxu1 }
 0x109   : > { %v3682_v42 = vpop.f32.mrf.mxu0  ;;  %v3684_v43 = vpop.f32.mrf.mxu1 }
 0x10b   : > { %v3686_v44 = vpop.f32.mrf.mxu0  ;;  %v3688_v45 = vpop.f32.mrf.mxu1 }
 0x10e   : > { %v3690_v46 = vpop.f32.mrf.mxu0  ;;  %v3692_v47 = vpop.f32.mrf.mxu1 }
 0x110   : > { %v3694_v48 = vpop.f32.mrf.mxu0  ;;  %v3696_v49 = vpop.f32.mrf.mxu1 }
 0x111   : > { %3922 = vst [vmem:[#allocation2_spill] sm:$0xff] %v3696_v49 }
 0x112   : > { %v3698_v50 = vpop.f32.mrf.mxu0  ;;  %v3700_v51 = vpop.f32.mrf.mxu1 }
 0x113   : > { %3923 = vst [vmem:[#allocation3_spill] sm:$0xff] %v3700_v51 }
 0x114   : > { %v3702_v52 = vpop.f32.mrf.mxu0  ;;  %v3704_v53 = vpop.f32.mrf.mxu1 }
 0x115   : > { %3924 = vst [vmem:[#allocation4_spill] sm:$0xff] %v3704_v53 }
 0x116   : > { %v3706_v54 = vpop.f32.mrf.mxu0  ;;  %v3710_v56 = vpop.f32.mrf.mxu1 }
 0x117   : > { %3926 = vst [vmem:[#allocation6_spill] sm:$0xff] %v3710_v56  ;;  %v1045_v56 = vadd.f32 %v3604_v2, %v2973_v8 }
 0x118   : > { %v3708_v55 = vpop.f32.mrf.mxu0  ;;  %v3716_v59 = vpop.f32.mrf.mxu1 }
 0x119   : > { %3925 = vst [vmem:[#allocation5_spill] sm:$0xff] %v3708_v55  ;;  %3929 = vst [vmem:[#allocation9_spill] sm:$0xff] %v3716_v59  ;;  %v1037_v59 = vadd.f32 %v3606_v3, %v3616_v35 }
 0x11a   : > { %v3712_v57 = vpop.f32.mrf.mxu0  ;;  %v3721_v61 = vpop.f32.mrf.mxu1 }
 0x11b   : > { %3927 = vst [vmem:[#allocation7_spill] sm:$0xff] %v3712_v57  ;;  %3931 = vst [vmem:[#allocation11_spill] sm:$0xff] %v3721_v61  ;;  %v3738_v61 = vld [vmem:[%s3918_s2] ss:$0 sm:$0xff] }
 0x11c   : > { %v3714_v58 = vpop.f32.mrf.mxu0  ;;  %v3727_v0 = vpop.f32.mrf.mxu1 }
 0x11d   : > { %3928 = vst [vmem:[#allocation8_spill] sm:$0xff] %v3714_v58  ;;  %3934 = vst [vmem:[#allocation14_spill] sm:$0xff] %v3727_v0  ;;  %v1048_v0 = vadd.f32 %v3608_v4, %v3620_v11 }
 0x11f   : > { %v3718_v60 = vpop.f32.mrf.mxu0 }
 0x120   : > { %3930 = vst [vmem:[#allocation10_spill] sm:$0xff] %v3718_v60 }
 0x121   : > { %v3723_v62 = vpop.f32.mrf.mxu0 }
 0x122   : > { %3932 = vst [vmem:[#allocation12_spill] sm:$0xff] %v3723_v62 }
 0x123   : > { %v3725_v63 = vpop.f32.mrf.mxu0 }
 0x124   : > { %3933 = vst [vmem:[#allocation13_spill] sm:$0xff] %v3725_v63 }
 0x125   : > { %v3729_v1 = vpop.f32.mrf.mxu0 }
 0x126   : > { %3935 = vst [vmem:[#allocation15_spill] sm:$0xff] %v3729_v1 }
 0x127   : > { %v3041_v53 = vpop.f32.mrf.mxu0 }
 0x128   : > { %v3075_v60 = vpop.f32.mrf.mxu1  ;;  %v1501_v58 = vadd.f32 %v3041_v53, %v1045_v56  ;;  %v1040_v53 = vadd.f32 %v3610_v5, %v3624_v13 }
 0x129   : > { %v1372_v63 = vpop.f32.mrf.mxu0 }
 0x12a   : > { %v2064_v1 = vpop.f32.mrf.mxu1  ;;  %v2193_v2 = vadd.f32 %v3075_v60, %v1501_v58  ;;  %v1499_v8 = vadd.f32 %v1372_v63, %v1037_v59  ;;  %v1061_v58 = vadd.f32 %v3612_v7, %v3626_v14  ;;  %v1053_v59 = vadd.f32 %v3614_v9, %v3630_v16 }
 0x12b   : > { %v3042_v62 = vpop.f32.mrf.mxu0  ;;  %v1064_v7 = vadd.f32 %v3618_v10, %v3634_v18  ;;  %v1056_v10 = vadd.f32 %v3622_v12, %v3638_v20 }
 0x12c   : > { %v2232_v51 = vadd.f32 %v3738_v61, %v2193_v2  ;;  %v3076_v57 = vpop.f32.mrf.mxu1  ;;  %v2191_v3 = vadd.f32 %v2064_v1, %v1499_v8  ;;  %v1502_v35 = vadd.f32 %v3042_v62, %v1048_v0 }
 0x12d   : > { %v1375_v56 = vpop.f32.mrf.mxu0 }
 0x12e   : > { %vm2264_vm5 = vcmp.ge.f32.partialorder %v2232_v51, 0.0  ;;  %v2296_v49 = vmul.f32 0.01, %v2232_v51  ;;  %v2230_v55 = vadd.f32 %v3738_v61, %v2191_v3  ;;  %v2067_v4 = vpop.f32.mrf.mxu1  ;;  %v2194_v11 = vadd.f32 %v3076_v57, %v1502_v35 }
 0x12f   : > { %v1500_v60 = vadd.f32 %v1375_v56, %v1040_v53  ;;  %v3045_v62 = vpop.f32.mrf.mxu0 }
 0x130   : > { %v2328_v5 = vsel %vm2264_vm5, %v2232_v51, %v2296_v49  ;;  %vm2262_vm7 = vcmp.ge.f32.partialorder %v2230_v55, 0.0  ;;  %v2294_v13 = vmul.f32 0.01, %v2230_v55  ;;  %v2233_v57 = vadd.f32 %v3738_v61, %v2194_v11  ;;  %v3079_v63 = vpop.f32.mrf.mxu1 }
 0x131   : > { %v2871_v14 = vpack.c.bf16 %v2328_v5, %v2328_v5  ;;  %v2192_v9 = vadd.f32 %v2067_v4, %v1500_v60  ;;  %v1505_v16 = vadd.f32 %v3045_v62, %v1061_v58  ;;  %v1388_v0 = vpop.f32.mrf.mxu0  ;;  %v1077_v62 = vadd.f32 %v3628_v15, %v3642_v22 }
 0x132   : > { %v2326_v1 = vsel %vm2262_vm7, %v2230_v55, %v2294_v13  ;;  %vm2265_vm8 = vcmp.ge.f32.partialorder %v2233_v57, 0.0  ;;  %v2297_v2 = vmul.f32 0.01, %v2233_v57  ;;  %v2080_v8 = vpop.f32.mrf.mxu1  ;;  %v1503_v3 = vadd.f32 %v1388_v0, %v1053_v59 }
 0x133   : > { %2489 = vst.msk [vmem:[%s3753_s19 + $0x8] sm:$0xf] %vm2486_vm6, %v2871_v14  ;;  %v2869_v49 = vpack.c.bf16 %v2326_v1, %v2326_v1  ;;  %v2231_v51 = vadd.f32 %v3738_v61, %v2192_v9  ;;  %v2197_v35 = vadd.f32 %v3079_v63, %v1505_v16  ;;  %v3046_v53 = vpop.f32.mrf.mxu0  ;;  %v1080_v0 = vadd.f32 %v3636_v19, %v3650_v26 }
 0x134   : > { %v2329_v18 = vsel %vm2265_vm8, %v2233_v57, %v2297_v2  ;;  %v3080_v56 = vpop.f32.mrf.mxu1  ;;  %v2195_v4 = vadd.f32 %v2080_v8, %v1503_v3  ;;  %v1506_v11 = vadd.f32 %v3046_v53, %v1064_v7  ;;  %v1069_v57 = vadd.f32 %v3632_v17, %v3646_v24 }
 0x135   : > { %2487 = vst.msk [vmem:[%s3753_s19] sm:$0xf] %vm2486_vm6, %v2869_v49  ;;  %v2872_v55 = vpack.c.bf16 %v2329_v18, %v2329_v18  ;;  %vm2263_vm9 = vcmp.ge.f32.partialorder %v2231_v51, 0.0  ;;  %v2295_v58 = vmul.f32 0.01, %v2231_v51  ;;  %v2236_v59 = vadd.f32 %v3738_v61, %v2197_v35  ;;  %v1391_v60 = vpop.f32.mrf.mxu0 }
 0x136   : > { %v2234_v5 = vadd.f32 %v3738_v61, %v2195_v4  ;;  %v2083_v13 = vpop.f32.mrf.mxu1  ;;  %v2198_v12 = vadd.f32 %v3080_v56, %v1506_v11  ;;  %v1504_v20 = vadd.f32 %v1391_v60, %v1056_v10  ;;  %v1072_v19 = vadd.f32 %v3640_v21, %v3654_v28 }
 0x137   : > { %2490 = vst.msk [vmem:[%s3753_s19 + $0xc] sm:$0xf] %vm2486_vm6, %v2872_v55  ;;  %v2327_v63 = vsel %vm2263_vm9, %v2231_v51, %v2295_v58  ;;  %vm2268_vm10 = vcmp.ge.f32.partialorder %v2236_v59, 0.0  ;;  %v2300_v7 = vmul.f32 0.01, %v2236_v59  ;;  %v3049_v14 = vpop.f32.mrf.mxu0  ;;  %v1093_v21 = vadd.f32 %v3644_v23, %v3658_v30 }
 0x138   : > { %v2870_v9 = vpack.c.bf16 %v2327_v63, %v2327_v63  ;;  %vm2266_vm11 = vcmp.ge.f32.partialorder %v2234_v5, 0.0  ;;  %v2298_v16 = vmul.f32 0.01, %v2234_v5  ;;  %v2237_v15 = vadd.f32 %v3738_v61, %v2198_v12  ;;  %v3083_v22 = vpop.f32.mrf.mxu1 }
 0x139   : > { %v2332_v1 = vsel %vm2268_vm10, %v2236_v59, %v2300_v7  ;;  %v2196_v2 = vadd.f32 %v2083_v13, %v1504_v20  ;;  %v1509_v17 = vadd.f32 %v3049_v14, %v1077_v62  ;;  %v1404_v24 = vpop.f32.mrf.mxu0  ;;  %v1096_v23 = vadd.f32 %v3652_v27, %v3666_v33 }
 0x13a   : > { %2488 = vst.msk [vmem:[%s3753_s19 + $0x4] sm:$0xf] %vm2486_vm6, %v2870_v9  ;;  %v2875_v8 = vpack.c.bf16 %v2332_v1, %v2332_v1  ;;  %v2330_v3 = vsel %vm2266_vm11, %v2234_v5, %v2298_v16  ;;  %vm2269_vm12 = vcmp.ge.f32.partialorder %v2237_v15, 0.0  ;;  %v2301_v49 = vmul.f32 0.01, %v2237_v15  ;;  %v2096_v51 = vpop.f32.mrf.mxu1 }
 0x13b   : > { %v2873_v35 = vpack.c.bf16 %v2330_v3, %v2330_v3  ;;  %v2235_v53 = vadd.f32 %v3738_v61, %v2196_v2  ;;  %v2201_v10 = vadd.f32 %v3083_v22, %v1509_v17  ;;  %v1507_v18 = vadd.f32 %v1404_v24, %v1069_v57  ;;  %v3050_v56 = vpop.f32.mrf.mxu0 }
 0x13c   : > { %2493 = vst.msk [vmem:[%s3753_s19 + $0x18] sm:$0xf] %vm2486_vm6, %v2875_v8  ;;  %v2333_v26 = vsel %vm2269_vm12, %v2237_v15, %v2301_v49  ;;  %v3084_v4 = vpop.f32.mrf.mxu1  ;;  %v1510_v11 = vadd.f32 %v3050_v56, %v1080_v0  ;;  %v1085_v15 = vadd.f32 %v3648_v25, %v3662_v31  ;;  %v1088_v27 = vadd.f32 %v3656_v29, %v3670_v36 }
 0x13d   : > { %2491 = vst.msk [vmem:[%s3753_s19 + $0x10] sm:$0xf] %vm2486_vm6, %v2873_v35  ;;  %v2876_v55 = vpack.c.bf16 %v2333_v26, %v2333_v26  ;;  %vm2267_vm13 = vcmp.ge.f32.partialorder %v2235_v53, 0.0  ;;  %v2299_v58 = vmul.f32 0.01, %v2235_v53  ;;  %v2240_v59 = vadd.f32 %v3738_v61, %v2201_v10  ;;  %v1407_v60 = vpop.f32.mrf.mxu0 }
 0x13e   : > { %v2199_v62 = vadd.f32 %v2096_v51, %v1507_v18  ;;  %v2099_v5 = vpop.f32.mrf.mxu1  ;;  %v2202_v13 = vadd.f32 %v3084_v4, %v1510_v11  ;;  %v1508_v12 = vadd.f32 %v1407_v60, %v1072_v19  ;;  %v1109_v31 = vadd.f32 %v3660_v6, %v3674_v38 }
 0x13f   : > { %2494 = vst.msk [vmem:[%s3753_s19 + $0x1c] sm:$0xf] %vm2486_vm6, %v2876_v55  ;;  %v2331_v28 = vsel %vm2267_vm13, %v2235_v53, %v2299_v58  ;;  %vm2272_vm14 = vcmp.ge.f32.partialorder %v2240_v59, 0.0  ;;  %v2304_v20 = vmul.f32 0.01, %v2240_v59  ;;  %v3053_v57 = vpop.f32.mrf.mxu0  ;;  %v1101_v6 = vadd.f32 %v3664_v32, %v3678_v40 }
 0x140   : > { %v2874_v63 = vpack.c.bf16 %v2331_v28, %v2331_v28  ;;  %v2238_v7 = vadd.f32 %v3738_v61, %v2199_v62  ;;  %v2241_v14 = vadd.f32 %v3738_v61, %v2202_v13  ;;  %v3087_v9 = vpop.f32.mrf.mxu1  ;;  %v2200_v16 = vadd.f32 %v2099_v5, %v1508_v12 }
 0x141   : > { %v2336_v30 = vsel %vm2272_vm14, %v2240_v59, %v2304_v20  ;;  %v1513_v22 = vadd.f32 %v3053_v57, %v1093_v21  ;;  %v1420_v0 = vpop.f32.mrf.mxu0  ;;  %v1112_v38 = vadd.f32 %v3668_v34, %v3682_v42  ;;  %v1104_v32 = vadd.f32 %v3672_v37, %v3686_v44 }
 0x142   : > { %2492 = vst.msk [vmem:[%s3753_s19 + $0x14] sm:$0xf] %vm2486_vm6, %v2874_v63  ;;  %v2879_v1 = vpack.c.bf16 %v2336_v30, %v2336_v30  ;;  %vm2270_vm15 = vcmp.ge.f32.partialorder %v2238_v7, 0.0  ;;  %v2302_v2 = vmul.f32 0.01, %v2238_v7  ;;  %vm2273_vm0 = vcmp.ge.f32.partialorder %v2241_v14, 0.0  ;;  %v2112_v17 = vpop.f32.mrf.mxu1 }
 0x143   : > { %v2305_v24 = vmul.f32 0.01, %v2241_v14  ;;  %v2239_v8 = vadd.f32 %v3738_v61, %v2200_v16  ;;  %v2205_v3 = vadd.f32 %v3087_v9, %v1513_v22  ;;  %v1511_v49 = vadd.f32 %v1420_v0, %v1085_v15  ;;  %v3054_v25 = vpop.f32.mrf.mxu0 }
 0x144   : > { %2497 = vst.msk [vmem:[%s3753_s19 + $0x28] sm:$0xf] %vm2486_vm6, %v2879_v1  ;;  %v2334_v33 = vsel %vm2270_vm15, %v2238_v7, %v2302_v2  ;;  %v3088_v51 = vpop.f32.mrf.mxu1  ;;  %v1514_v35 = vadd.f32 %v3054_v25, %v1096_v23 }
 0x145   : > { %v2877_v53 = vpack.c.bf16 %v2334_v33, %v2334_v33  ;;  %v2337_v10 = vsel %vm2273_vm0, %v2241_v14, %v2305_v24  ;;  %vm2271_vm1 = vcmp.ge.f32.partialorder %v2239_v8, 0.0  ;;  %v2303_v18 = vmul.f32 0.01, %v2239_v8  ;;  %v1423_v56 = vpop.f32.mrf.mxu0 }
 0x146   : > { %v2880_v19 = vpack.c.bf16 %v2337_v10, %v2337_v10  ;;  %v2244_v26 = vadd.f32 %v3738_v61, %v2205_v3  ;;  %v2203_v4 = vadd.f32 %v2112_v17, %v1511_v49  ;;  %v2115_v29 = vpop.f32.mrf.mxu1  ;;  %v2206_v36 = vadd.f32 %v3088_v51, %v1514_v35 }
 0x147   : > { %2495 = vst.msk [vmem:[%s3753_s19 + $0x20] sm:$0xf] %vm2486_vm6, %v2877_v53  ;;  %v2335_v11 = vsel %vm2271_vm1, %v2239_v8, %v2303_v18  ;;  %v1512_v55 = vadd.f32 %v1423_v56, %v1088_v27  ;;  %v3057_v58 = vpop.f32.mrf.mxu0  ;;  %v1125_v3 = vadd.f32 %v3676_v39, %v3690_v46  ;;  %v1117_v49 = vadd.f32 %v3680_v41, %v3694_v48 }
 0x148   : > { %2498 = vst.msk [vmem:[%s3753_s19 + $0x2c] sm:$0xf] %vm2486_vm6, %v2880_v19  ;;  %v2878_v59 = vpack.c.bf16 %v2335_v11, %v2335_v11  ;;  %vm2276_vm2 = vcmp.ge.f32.partialorder %v2244_v26, 0.0  ;;  %v2308_v60 = vmul.f32 0.01, %v2244_v26  ;;  %v2242_v62 = vadd.f32 %v3738_v61, %v2203_v4  ;;  %v3091_v5 = vpop.f32.mrf.mxu1 }
 0x149   : > { %v2245_v40 = vadd.f32 %v3738_v61, %v2206_v36  ;;  %v2204_v34 = vadd.f32 %v2115_v29, %v1512_v55  ;;  %v1517_v42 = vadd.f32 %v3057_v58, %v1109_v31  ;;  %v1436_v13 = vpop.f32.mrf.mxu0  ;;  %v1128_v41 = vadd.f32 %v3684_v43, %v3698_v50  ;;  %v3937_v58 = vld [vmem:[#allocation2_spill] sm:$0xff] }
 0x14a   : > { %2496 = vst.msk [vmem:[%s3753_s19 + $0x24] sm:$0xf] %vm2486_vm6, %v2878_v59  ;;  %v2340_v12 = vsel %vm2276_vm2, %v2244_v26, %v2308_v60  ;;  %vm2274_vm3 = vcmp.ge.f32.partialorder %v2242_v62, 0.0  ;;  %v2306_v21 = vmul.f32 0.01, %v2242_v62  ;;  %v2128_v28 = vpop.f32.mrf.mxu1  ;;  %v1515_v20 = vadd.f32 %v1436_v13, %v1101_v6  ;;  %v3938_v13 = vld [vmem:[#allocation7_spill] sm:$0xff] }
 0x14b   : > { %v2883_v57 = vpack.c.bf16 %v2340_v12, %v2340_v12  ;;  %vm2277_vm4 = vcmp.ge.f32.partialorder %v2245_v40, 0.0  ;;  %v2309_v63 = vmul.f32 0.01, %v2245_v40  ;;  %v2243_v7 = vadd.f32 %v3738_v61, %v2204_v34  ;;  %v3058_v14 = vpop.f32.mrf.mxu0  ;;  %v3939_v12 = vld [vmem:[#allocation3_spill] sm:$0xff] }
 0x14c   : > { %v2338_v37 = vsel %vm2274_vm3, %v2242_v62, %v2306_v21  ;;  %v2209_v44 = vadd.f32 %v3091_v5, %v1517_v42  ;;  %v3092_v9 = vpop.f32.mrf.mxu1  ;;  %v2207_v16 = vadd.f32 %v2128_v28, %v1515_v20  ;;  %v1518_v15 = vadd.f32 %v3058_v14, %v1112_v38 }
 0x14d   : > { %2501 = vst.msk [vmem:[%s3753_s19 + $0x38] sm:$0xf] %vm2486_vm6, %v2883_v57  ;;  %v2881_v23 = vpack.c.bf16 %v2338_v37, %v2338_v37  ;;  %v2341_v30 = vsel %vm2277_vm4, %v2245_v40, %v2309_v63  ;;  %vm2275_vm5 = vcmp.ge.f32.partialorder %v2243_v7, 0.0  ;;  %v2307_v22 = vmul.f32 0.01, %v2243_v7  ;;  %v1439_v0 = vpop.f32.mrf.mxu0 }
 0x14e   : > { %v2884_v1 = vpack.c.bf16 %v2341_v30, %v2341_v30  ;;  %v2248_v2 = vadd.f32 %v3738_v61, %v2209_v44  ;;  %v2246_v17 = vadd.f32 %v3738_v61, %v2207_v16  ;;  %v2131_v24 = vpop.f32.mrf.mxu1  ;;  %v2210_v8 = vadd.f32 %v3092_v9, %v1518_v15 }
 0x14f   : > { %2499 = vst.msk [vmem:[%s3753_s19 + $0x30] sm:$0xf] %vm2486_vm6, %v2881_v23  ;;  %v2339_v25 = vsel %vm2275_vm5, %v2243_v7, %v2307_v22  ;;  %v1516_v27 = vadd.f32 %v1439_v0, %v1104_v32  ;;  %v3061_v31 = vpop.f32.mrf.mxu0  ;;  %v1120_v48 = vadd.f32 %v3688_v45, %v3702_v52  ;;  %v1141_v45 = vadd.f32 %v3692_v47, %v3706_v54  ;;  %v3936_v52 = vld [vmem:[#allocation5_spill] sm:$0xff] }
 0x150   : > { %2502 = vst.msk [vmem:[%s3753_s19 + $0x3c] sm:$0xf] %vm2486_vm6, %v2884_v1  ;;  %v2882_v33 = vpack.c.bf16 %v2339_v25, %v2339_v25  ;;  %vm2280_vm7 = vcmp.ge.f32.partialorder %v2248_v2, 0.0  ;;  %v2312_v51 = vmul.f32 0.01, %v2248_v2  ;;  %vm2278_vm8 = vcmp.ge.f32.partialorder %v2246_v17, 0.0  ;;  %v3095_v35 = vpop.f32.mrf.mxu1 }
 0x151   : > { %v2310_v53 = vmul.f32 0.01, %v2246_v17  ;;  %v2249_v10 = vadd.f32 %v3738_v61, %v2210_v8  ;;  %v2208_v39 = vadd.f32 %v2131_v24, %v1516_v27  ;;  %v1521_v46 = vadd.f32 %v3061_v31, %v1125_v3  ;;  %v1452_v18 = vpop.f32.mrf.mxu0  ;;  %v3940_v31 = vld [vmem:[#allocation8_spill] sm:$0xff] }
 0x152   : > { %2500 = vst.msk [vmem:[%s3753_s19 + $0x34] sm:$0xf] %vm2486_vm6, %v2882_v33  ;;  %v2344_v56 = vsel %vm2280_vm7, %v2248_v2, %v2312_v51  ;;  %v2144_v19 = vpop.f32.mrf.mxu1  ;;  %v1519_v26 = vadd.f32 %v1452_v18, %v1117_v49  ;;  %v1133_v59 = vadd.f32 %v3937_v58, %v3936_v52  ;;  %v1144_v47 = vadd.f32 %v3939_v12, %v3938_v13  ;;  %v3941_v33 = vld [vmem:[#allocation4_spill] sm:$0xff]  ;;  %v3948_v12 = vld [vmem:[#allocation15_spill] sm:$0xff] }
 0x153   : > { %v2887_v4 = vpack.c.bf16 %v2344_v56, %v2344_v56  ;;  %v2342_v29 = vsel %vm2278_vm8, %v2246_v17, %v2310_v53  ;;  %vm2281_vm9 = vcmp.ge.f32.partialorder %v2249_v10, 0.0  ;;  %v2313_v36 = vmul.f32 0.01, %v2249_v10  ;;  %v3062_v6 = vpop.f32.mrf.mxu0  ;;  %v3943_v53 = vld [vmem:[#allocation6_spill] sm:$0xff] }
 0x154   : > { %v2885_v38 = vpack.c.bf16 %v2342_v29, %v2342_v29  ;;  %v2247_v11 = vadd.f32 %v3738_v61, %v2208_v39  ;;  %v2213_v55 = vadd.f32 %v3095_v35, %v1521_v46  ;;  %v3096_v43 = vpop.f32.mrf.mxu1  ;;  %v2211_v50 = vadd.f32 %v2144_v19, %v1519_v26  ;;  %v3942_v35 = vld [vmem:[#allocation10_spill] sm:$0xff] }
 0x155   : > { %2505 = vst.msk [vmem:[%s3753_s19 + $0x48] sm:$0xf] %vm2486_vm6, %v2887_v4  ;;  %v2345_v60 = vsel %vm2281_vm9, %v2249_v10, %v2313_v36  ;;  %v1522_v62 = vadd.f32 %v3062_v6, %v1128_v41  ;;  %v1455_v5 = vpop.f32.mrf.mxu0  ;;  %v1136_v51 = vadd.f32 %v3941_v33, %v3940_v31  ;;  %v1157_v10 = vadd.f32 %v3943_v53, %v3942_v35  ;;  %v3944_v6 = vld [vmem:[#allocation12_spill] sm:$0xff] }
 0x156   : > { %2503 = vst.msk [vmem:[%s3753_s19 + $0x40] sm:$0xf] %vm2486_vm6, %v2885_v38  ;;  %v2888_v32 = vpack.c.bf16 %v2345_v60, %v2345_v60  ;;  %vm2279_vm10 = vcmp.ge.f32.partialorder %v2247_v11, 0.0  ;;  %v2311_v40 = vmul.f32 0.01, %v2247_v11  ;;  %v2252_v34 = vadd.f32 %v3738_v61, %v2213_v55  ;;  %v2147_v42 = vpop.f32.mrf.mxu1  ;;  %v3945_v38 = vld [vmem:[#allocation9_spill] sm:$0xff] }
 0x157   : > { %v2250_v54 = vadd.f32 %v3738_v61, %v2211_v50  ;;  %v2214_v21 = vadd.f32 %v3096_v43, %v1522_v62  ;;  %v1520_v28 = vadd.f32 %v1455_v5, %v1120_v48  ;;  %v3065_v20 = vpop.f32.mrf.mxu0 }
 0x158   : > { %2506 = vst.msk [vmem:[%s3753_s19 + $0x4c] sm:$0xf] %vm2486_vm6, %v2888_v32  ;;  %v2343_v57 = vsel %vm2279_vm10, %v2247_v11, %v2311_v40  ;;  %vm2284_vm11 = vcmp.ge.f32.partialorder %v2252_v34, 0.0  ;;  %v2316_v63 = vmul.f32 0.01, %v2252_v34  ;;  %v3099_v7 = vpop.f32.mrf.mxu1  ;;  %v1525_v14 = vadd.f32 %v3065_v20, %v1141_v45 }
 0x159   : > { %v2886_v37 = vpack.c.bf16 %v2343_v57, %v2343_v57  ;;  %vm2282_vm12 = vcmp.ge.f32.partialorder %v2250_v54, 0.0  ;;  %v2314_v44 = vmul.f32 0.01, %v2250_v54  ;;  %v2253_v9 = vadd.f32 %v3738_v61, %v2214_v21  ;;  %v1468_v16 = vpop.f32.mrf.mxu0 }
 0x15a   : > { %v2348_v15 = vsel %vm2284_vm11, %v2252_v34, %v2316_v63  ;;  %v2212_v23 = vadd.f32 %v2147_v42, %v1520_v28  ;;  %v2160_v30 = vpop.f32.mrf.mxu1  ;;  %v2217_v22 = vadd.f32 %v3099_v7, %v1525_v14  ;;  %v1523_v0 = vadd.f32 %v1468_v16, %v1133_v59  ;;  %v3946_v34 = vld [vmem:[#allocation13_spill] sm:$0xff]  ;;  %v3947_v42 = vld [vmem:[#allocation11_spill] sm:$0xff] }
 0x15b   : > { %2504 = vst.msk [vmem:[%s3753_s19 + $0x44] sm:$0xf] %vm2486_vm6, %v2886_v37  ;;  %v2891_v1 = vpack.c.bf16 %v2348_v15, %v2348_v15  ;;  %v2346_v2 = vsel %vm2282_vm12, %v2250_v54, %v2314_v44  ;;  %vm2285_vm13 = vcmp.ge.f32.partialorder %v2253_v9, 0.0  ;;  %v2317_v17 = vmul.f32 0.01, %v2253_v9  ;;  %v3066_v24 = vpop.f32.mrf.mxu0 }
 0x15c   : > { %v2889_v8 = vpack.c.bf16 %v2346_v2, %v2346_v2  ;;  %v2251_v3 = vadd.f32 %v3738_v61, %v2212_v23  ;;  %v2256_v49 = vadd.f32 %v3738_v61, %v2217_v22  ;;  %v3100_v25 = vpop.f32.mrf.mxu1  ;;  %v2215_v27 = vadd.f32 %v2160_v30, %v1523_v0 }
 0x15d   : > { %2509 = vst.msk [vmem:[%s3753_s19 + $0x58] sm:$0xf] %vm2486_vm6, %v2891_v1  ;;  %v2349_v39 = vsel %vm2285_vm13, %v2253_v9, %v2317_v17  ;;  %v1526_v46 = vadd.f32 %v3066_v24, %v1144_v47  ;;  %v1471_v18 = vpop.f32.mrf.mxu0  ;;  %v1149_v11 = vadd.f32 %v3945_v38, %v3944_v6  ;;  %v1160_v13 = vadd.f32 %v3947_v42, %v3946_v34  ;;  %v3949_v47 = vld [vmem:[#allocation14_spill] sm:$0xff] }
 0x15e   : > { %2507 = vst.msk [vmem:[%s3753_s19 + $0x50] sm:$0xf] %vm2486_vm6, %v2889_v8  ;;  %v2892_v41 = vpack.c.bf16 %v2349_v39, %v2349_v39  ;;  %vm2283_vm14 = vcmp.ge.f32.partialorder %v2251_v3, 0.0  ;;  %v2315_v48 = vmul.f32 0.01, %v2251_v3  ;;  %vm2288_vm15 = vcmp.ge.f32.partialorder %v2256_v49, 0.0  ;;  %v2163_v56 = vpop.f32.mrf.mxu1 }
 0x15f   : > { %v2320_v19 = vmul.f32 0.01, %v2256_v49  ;;  %v2254_v26 = vadd.f32 %v3738_v61, %v2215_v27  ;;  %v2218_v4 = vadd.f32 %v3100_v25, %v1526_v46  ;;  %v1524_v29 = vadd.f32 %v1471_v18, %v1136_v51  ;;  %v3069_v36 = vpop.f32.mrf.mxu0 }
 0x160   : > { %2510 = vst.msk [vmem:[%s3753_s19 + $0x5c] sm:$0xf] %vm2486_vm6, %v2892_v41  ;;  %v2347_v55 = vsel %vm2283_vm14, %v2251_v3, %v2315_v48  ;;  %v3103_v43 = vpop.f32.mrf.mxu1  ;;  %v1529_v50 = vadd.f32 %v3069_v36, %v1157_v10  ;;  %v1152_v54 = vadd.f32 %v3949_v47, %v3948_v12 }
 0x161   : > { %v2890_v45 = vpack.c.bf16 %v2347_v55, %v2347_v55  ;;  %v2352_v52 = vsel %vm2288_vm15, %v2256_v49, %v2320_v19  ;;  %vm2286_vm0 = vcmp.ge.f32.partialorder %v2254_v26, 0.0  ;;  %v2318_v58 = vmul.f32 0.01, %v2254_v26  ;;  %v1484_v59 = vpop.f32.mrf.mxu0 }
 0x162   : > { %v2895_v60 = vpack.c.bf16 %v2352_v52, %v2352_v52  ;;  %v2257_v62 = vadd.f32 %v3738_v61, %v2218_v4  ;;  %v2216_v5 = vadd.f32 %v2163_v56, %v1524_v29  ;;  %v2176_v32 = vpop.f32.mrf.mxu1  ;;  %v2221_v40 = vadd.f32 %v3103_v43, %v1529_v50 }
 0x163   : > { %2508 = vst.msk [vmem:[%s3753_s19 + $0x54] sm:$0xf] %vm2486_vm6, %v2890_v45  ;;  %v2350_v21 = vsel %vm2286_vm0, %v2254_v26, %v2318_v58  ;;  %v1527_v28 = vadd.f32 %v1484_v59, %v1149_v11  ;;  %v3070_v20 = vpop.f32.mrf.mxu0 }
 0x164   : > { %2513 = vst.msk [vmem:[%s3753_s19 + $0x68] sm:$0xf] %vm2486_vm6, %v2895_v60  ;;  %v2893_v57 = vpack.c.bf16 %v2350_v21, %v2350_v21  ;;  %vm2289_vm1 = vcmp.ge.f32.partialorder %v2257_v62, 0.0  ;;  %v2321_v63 = vmul.f32 0.01, %v2257_v62  ;;  %v2255_v7 = vadd.f32 %v3738_v61, %v2216_v5  ;;  %v3104_v14 = vpop.f32.mrf.mxu1 }
 0x165   : > { %v2260_v37 = vadd.f32 %v3738_v61, %v2221_v40  ;;  %v2219_v44 = vadd.f32 %v2176_v32, %v1527_v28  ;;  %v1530_v9 = vadd.f32 %v3070_v20, %v1160_v13  ;;  %v1487_v16 = vpop.f32.mrf.mxu0 }
 0x166   : > { %2511 = vst.msk [vmem:[%s3753_s19 + $0x60] sm:$0xf] %vm2486_vm6, %v2893_v57  ;;  %v2353_v15 = vsel %vm2289_vm1, %v2257_v62, %v2321_v63  ;;  %vm2287_vm2 = vcmp.ge.f32.partialorder %v2255_v7, 0.0  ;;  %v2319_v23 = vmul.f32 0.01, %v2255_v7  ;;  %v1528_v30 = vadd.f32 %v1487_v16, %v1152_v54  ;;  %v2179_v2 = vpop.f32.mrf.mxu1 }
 0x167   : > { %v2896_v22 = vpack.c.bf16 %v2353_v15, %v2353_v15  ;;  %vm2292_vm3 = vcmp.ge.f32.partialorder %v2260_v37, 0.0  ;;  %v2324_v0 = vmul.f32 0.01, %v2260_v37  ;;  %v2258_v1 = vadd.f32 %v3738_v61, %v2219_v44 }
 0x168   : > { %v2351_v17 = vsel %vm2287_vm2, %v2255_v7, %v2319_v23  ;;  %v2222_v24 = vadd.f32 %v3104_v14, %v1530_v9  ;;  %v2220_v8 = vadd.f32 %v2179_v2, %v1528_v30 }
 0x169   : > { %2514 = vst.msk [vmem:[%s3753_s19 + $0x6c] sm:$0xf] %vm2486_vm6, %v2896_v22  ;;  %v2894_v3 = vpack.c.bf16 %v2351_v17, %v2351_v17  ;;  %v2356_v49 = vsel %vm2292_vm3, %v2260_v37, %v2324_v0  ;;  %vm2290_vm4 = vcmp.ge.f32.partialorder %v2258_v1, 0.0  ;;  %v2322_v25 = vmul.f32 0.01, %v2258_v1 }
 0x16a   : > { %v2899_v27 = vpack.c.bf16 %v2356_v49, %v2356_v49  ;;  %v2261_v31 = vadd.f32 %v3738_v61, %v2222_v24  ;;  %v2259_v33 = vadd.f32 %v3738_v61, %v2220_v8 }
 0x16b   : > { %2512 = vst.msk [vmem:[%s3753_s19 + $0x64] sm:$0xf] %vm2486_vm6, %v2894_v3  ;;  %v2354_v51 = vsel %vm2290_vm4, %v2258_v1, %v2322_v25 }
 0x16c   : > { %2517 = vst.msk [vmem:[%s3753_s19 + $0x78] sm:$0xf] %vm2486_vm6, %v2899_v27  ;;  %v2897_v35 = vpack.c.bf16 %v2354_v51, %v2354_v51  ;;  %vm2293_vm5 = vcmp.ge.f32.partialorder %v2261_v31, 0.0  ;;  %v2325_v53 = vmul.f32 0.01, %v2261_v31  ;;  %vm2291_vm7 = vcmp.ge.f32.partialorder %v2259_v33, 0.0 }
 0x16d   : > { %v2323_v10 = vmul.f32 0.01, %v2259_v33 }
 0x16e   : > { %2515 = vst.msk [vmem:[%s3753_s19 + $0x70] sm:$0xf] %vm2486_vm6, %v2897_v35  ;;  %v2357_v39 = vsel %vm2293_vm5, %v2261_v31, %v2325_v53 }
 0x16f   : > { %v2900_v46 = vpack.c.bf16 %v2357_v39, %v2357_v39  ;;  %v2355_v18 = vsel %vm2291_vm7, %v2259_v33, %v2323_v10 }
 0x170   : > { %v2898_v41 = vpack.c.bf16 %v2355_v18, %v2355_v18 }
 0x171   : > { %2518 = vst.msk [vmem:[%s3753_s19 + $0x7c] sm:$0xf] %vm2486_vm6, %v2900_v46 }
 0x172   : > { %2516 = vst.msk [vmem:[%s3753_s19 + $0x74] sm:$0xf] %vm2486_vm6, %v2898_v41 }
 0x173 PF: > { %s13_s16 = sadd.s32 1, %s3224_s16   ;;  %s3950_s12 = smov %s3216_s14 }
 0x174   : > { %p10_p7 = scmp.ge.s32.totalorder %s13_s16, 10   ;;  %s3951_s13 = smov %s3220_s15 }
 0x175   : > { %s3952_s14 = smov %s3955_s17  ;;  %s3953_s15 = smov %s3959_s18 }
 0x176   :  { %12 = sbr.rel (!%p10_p7) target bundleno = 3 (0x3), region = 67 }

// kernel: hrnet_forward.12
= control target key start
LH: loop header
LB: loop body
LE: loop exit
PB: predicated region body
PF: predicated region fallthrough
CT: control target
= control target key end

     0   :  { %s3493_s12 = smov 0   ;;  %s3495_s13 = smov 0   ;;  %s4285_s0 = inlined_call_operand.vmem [shape: bf16[2,17,17,128], index: 0, kind: input, shape index: {}]   ;;  %s4286_s1 = inlined_call_operand.vmem [shape: bf16[4,128,32], index: 1, kind: input, shape index: {}]   ;;  %s4287_s2 = inlined_call_operand.vmem [shape: f32[1,32], index: 2, kind: input, shape index: {}]   ;;  %s4288_s3 = inlined_call_operand.vmem [shape: bf16[2,256,32], index: 3, kind: output, shape index: {}]  }
   0x1   :  { %s3497_s14 = smov 0  }
   0x2 LB: > { %s25_s15 = sadd.s32 1, %s3467_s13  ;;  %p2776_p0 = scmp.ge.s32.totalorder %s3471_s14, 1  ;;  %s3471_s14 = sphi %s3497_s14, %s13_s14   ;;  %s3467_s13 = sphi %s3495_s13, %s4322_s13   ;;  %s3463_s12 = sphi %s3493_s12, %s4321_s12  }
   0x3   : > { %p27_p1 = scmp.ge.s32.totalorder %s25_s15, 2  ;;  %p151_p2 = scmp.lt.s32.totalorder %s3471_s14, 3 }
   0x5   : > { %s4324_s15 = smov (%p27_p1, %s25_s15), 0  ;;  %p152_p3 = pnand %p2776_p0, %p151_p2 }
   0x7   : > { %155 = sbr.rel (%p152_p3) target bundleno = 378 (0x17a), region = 32 }
   0xc   : > { %v3385_v0 = vld [vmem:[%s4286_s1 + $0x78] sm:$0xff]   ;;  %p179_p4 = scmp.lt.s32.totalorder %s3463_s12, 1  ;;  %v3387_v2 = vld [vmem:[%s4286_s1 + $0x70] sm:$0xff]   ;;  %v3389_v4 = vld [vmem:[%s4286_s1 + $0x68] sm:$0xff]   ;;  %vm263_vm0 = vsmask.f32 3328 }
   0xd   : > { %v3386_v1 = vld [vmem:[%s4286_s1 + $0x38] sm:$0xff]   ;;  %3168 = vmatprep.subr.bf16.mxu0 %v3385_v0  ;;  %v3388_v3 = vld [vmem:[%s4286_s1 + $0x30] sm:$0xff]   ;;  %v3390_v5 = vld [vmem:[%s4286_s1 + $0x28] sm:$0xff]   ;;  %vm264_vm1 = vsmask.f32 7440  ;;  %vm2652_vm4 = vcmask 257024  }
   0xe   : > { %3216 = vmatprep.subr.bf16.mxu1 %v3386_v1  ;;  %3169 = vmatpush3.bf16.msra.mxu0 %v3385_v0  ;;  %s4326_s12 = smov (!%p179_p4, %s3463_s12), 1  ;;  %v3391_v6 = vld [vmem:[%s4286_s1 + $0x60] sm:$0xff]   ;;  %v3393_v8 = vld [vmem:[%s4286_s1 + $0x58] sm:$0xff]   ;;  %v3395_v10 = vld [vmem:[%s4286_s1 + $0x50] sm:$0xff]  }
   0xf   : > { %3217 = vmatpush3.bf16.msra.mxu1 %v3386_v1  ;;  %3170 = vmatprep.subr.bf16.mxu0 %v3387_v2  ;;  %v3392_v7 = vld [vmem:[%s4286_s1 + $0x20] sm:$0xff]   ;;  %s3360_s5 = smul.u32 204, %s4326_s12  ;;  %v3394_v9 = vld [vmem:[%s4286_s1 + $0x18] sm:$0xff]   ;;  %v3396_v11 = vld [vmem:[%s4286_s1 + $0x10] sm:$0xff]   ;;  %s3039_s18 = sshll.u32 %s4326_s12, 7 }
  0x10   : > { %3218 = vmatprep.subr.bf16.mxu1 %v3388_v3  ;;  %v3397_v17 = vld [vmem:[%s4286_s1 + $0x48] sm:$0xff]   ;;  %vm3577_vm2 = vmor %vm263_vm0, %vm264_vm1  ;;  %v3399_v45 = vld [vmem:[%s4286_s1 + $0x40] sm:$0xff]   ;;  %s4128_s12 = scalar_lea.vmem %s4288_s3, %s3039_s18 }
  0x11   : > { %s3547_s16 = scalar_lea.vmem %s4285_s0, %s3360_s5  ;;  %v3398_v31 = vld [vmem:[%s4286_s1 + $0x8] sm:$0xff]   ;;  %v3400_v50 = vld [vmem:[%s4286_s1] sm:$0xff]   ;;  %v3403_v1 = vld [vmem:[%s4286_s1 + $0xb8] sm:$0xff]  }
  0x12   : > { %3171 = vmatpush3.bf16.msra.mxu0 %v3387_v2  ;;  %v199_v12 = vld [vmem:[%s3547_s16] sm:$0xf]  ;;  %v200_v13 = vld [vmem:[%s3547_s16 + $0x4] sm:$0xf]  ;;  %v247_v14 = vld [vmem:[%s3547_s16 + $0x8] sm:$0x1] }
  0x13   : > { %3219 = vmatpush3.bf16.msra.mxu1 %v3388_v3  ;;  %3172 = vmatprep.subr.bf16.mxu0 %v3389_v4  ;;  %v267_v15 = vshrl.u32 %v199_v12, 16  ;;  %v270_v16 = vshll.u32 %v199_v12, 16  ;;  %v276_v18 = vshll.u32 %v200_v13, 16  ;;  %v280_v19 = vshrl.u32 %v200_v13, 16  ;;  %v3562_v22 = vld [vmem:[%s3547_s16 + $0xc] sm:$0xf] }
  0x14   : > { %3220 = vmatprep.subr.bf16.mxu1 %v3390_v5  ;;  %v286_v20 = vshll.u32 %v247_v14, 16  ;;  %v2820_v21 = vcombine.low %v199_v12, %v200_v13  ;;  %v3565_v25 = vld [vmem:[%s3547_s16 + $0x10] sm:$0xf]  ;;  %v248_v26 = vld [vmem:[%s3547_s16 + $0x14] sm:$0x1]  ;;  %v291_v30 = vshrl.u32 %v3562_v22, 16 }
  0x15   : > { %v269_v23 = vrot.slane %v267_v15, 4  ;;  %v272_v24 = vrot.slane %v270_v16, 5  ;;  %v278_v27 = vrot.slane %v276_v18, 5  ;;  %v282_v28 = vrot.slane %v280_v19, 4  ;;  %v3582_v44 = vld [vmem:[%s3547_s16 + $0x18] sm:$0xf] }
  0x16   : > { %3173 = vmatpush3.bf16.msra.mxu0 %v3389_v4  ;;  %v288_v29 = vrot.slane %v286_v20, 5  ;;  %3232 = vmatprep.mubr.bf16.mxu1 %v2820_v21  ;;  %v294_v33 = vshll.u32 %v3562_v22, 16  ;;  %v300_v34 = vshll.u32 %v3565_v25, 16  ;;  %v304_v35 = vshrl.u32 %v3565_v25, 16  ;;  %v3590_v49 = vld [vmem:[%s3547_s16 + $0x1c] sm:$0xf] }
  0x17   : > { %3221 = vmatpush3.bf16.msra.mxu1 %v3390_v5  ;;  %3174 = vmatprep.subr.bf16.mxu0 %v3391_v6  ;;  %v273_v32 = vor.u32 %v272_v24, %v269_v23  ;;  %v283_v37 = vor.u32 %v282_v28, %v278_v27  ;;  %v293_v38 = vrot.slane %v291_v30, 4  ;;  %v310_v39 = vshll.u32 %v248_v26, 16  ;;  %v249_v54 = vld [vmem:[%s3547_s16 + $0x20] sm:$0x1]  ;;  %v3600_v56 = vld [vmem:[%s3547_s16 + $0x24] sm:$0xf] }
  0x18   : > { %3222 = vmatprep.subr.bf16.mxu1 %v3392_v7  ;;  %v296_v41 = vrot.slane %v294_v33, 5  ;;  %v302_v42 = vrot.slane %v300_v34, 5  ;;  %v306_v43 = vrot.slane %v304_v35, 4  ;;  %v2821_v48 = vcombine.low %v3562_v22, %v3565_v25  ;;  %v3608_v61 = vld [vmem:[%s3547_s16 + $0x28] sm:$0xf]  ;;  %v3407_v23 = vld [vmem:[%s4286_s1 + $0xb0] sm:$0xff]  }
  0x19   : > { %v274_v40 = vrot.slane %v273_v32, 4  ;;  %v284_v46 = vrot.slane %v283_v37, 4  ;;  %v312_v47 = vrot.slane %v310_v39, 5  ;;  %v315_v55 = vshrl.u32 %v3582_v44, 16  ;;  %v250_v3 = vld [vmem:[%s3547_s16 + $0x2c] sm:$0x1] }
  0x1a   : > { %3175 = vmatpush3.bf16.msra.mxu0 %v3391_v6  ;;  %v297_v52 = vor.u32 %v296_v41, %v293_v38  ;;  %v307_v53 = vor.u32 %v306_v43, %v302_v42  ;;  %v318_v58 = vshll.u32 %v3582_v44, 16  ;;  %v324_v59 = vshll.u32 %v3590_v49, 16  ;;  %v3639_v30 = vld [vmem:[%s3547_s16 + $0x34] sm:$0xf]  ;;  %v251_v34 = vld [vmem:[%s3547_s16 + $0x38] sm:$0x1] }
  0x1b   : > { %3223 = vmatpush3.bf16.msra.mxu1 %v3392_v7  ;;  %3176 = vmatprep.subr.bf16.mxu0 %v3393_v8  ;;  %v279_v51 = vsel %vm3577_vm2, %v274_v40, %v278_v27  ;;  %v289_v57 = vsel %vm3577_vm2, %v284_v46, %v288_v29  ;;  %v328_v60 = vshrl.u32 %v3590_v49, 16  ;;  %v317_v2 = vrot.slane %v315_v55, 4  ;;  %v3408_v29 = vld [vmem:[%s4286_s1 + $0xf0] sm:$0xff]   ;;  %v3649_v41 = vld [vmem:[%s3547_s16 + $0x3c] sm:$0xf]  ;;  %v3411_v46 = vld [vmem:[%s4286_s1 + $0xa8] sm:$0xff]  }
  0x1c   : > { %3224 = vmatprep.subr.bf16.mxu1 %v3394_v9  ;;  %v2796_v62 = vcombine.low %v279_v51, %v289_v57  ;;  %v298_v63 = vrot.slane %v297_v52, 4  ;;  %v308_v0 = vrot.slane %v307_v53, 4  ;;  %v320_v4 = vrot.slane %v318_v58, 5  ;;  %v3662_v52 = vld [vmem:[%s3547_s16 + $0x40] sm:$0xf] }
  0x1d   : > { %v326_v5 = vrot.slane %v324_v59, 5  ;;  %v330_v6 = vrot.slane %v328_v60, 4  ;;  %v334_v7 = vshll.u32 %v249_v54, 16  ;;  %v339_v12 = vshrl.u32 %v3600_v56, 16  ;;  %v3412_v54 = vld [vmem:[%s4286_s1 + $0xe8] sm:$0xff]  }
  0x1e   : > { %3177 = vmatpush3.bf16.msra.mxu0 %v3393_v8  ;;  %3184 = vmatprep.mubr.bf16.mxu0 %v2796_v62  ;;  %v303_v8 = vsel %vm3577_vm2, %v298_v63, %v302_v42  ;;  %v321_v14 = vor.u32 %v320_v4, %v317_v2  ;;  %v342_v19 = vshll.u32 %v3600_v56, 16  ;;  %v348_v20 = vshll.u32 %v3608_v61, 16  ;;  %v252_v60 = vld [vmem:[%s3547_s16 + $0x44] sm:$0x1]  ;;  %v3675_v2 = vld [vmem:[%s3547_s16 + $0x48] sm:$0xf] }
  0x1f   : > { %3225 = vmatpush3.bf16.msra.mxu1 %v3394_v9  ;;  %3178 = vmatprep.subr.bf16.mxu0 %v3395_v10  ;;  %v313_v9 = vsel %vm3577_vm2, %v308_v0, %v312_v47  ;;  %v331_v15 = vor.u32 %v330_v6, %v326_v5  ;;  %v336_v16 = vrot.slane %v334_v7, 5  ;;  %v341_v18 = vrot.slane %v339_v12, 4  ;;  %v3679_v7 = vld [vmem:[%s3547_s16 + $0x4c] sm:$0xf] }
  0x20   : > { %3226 = vmatprep.subr.bf16.mxu1 %v3396_v11  ;;  %v2797_v13 = vcombine.low %v303_v8, %v313_v9  ;;  %v352_v21 = vshrl.u32 %v3608_v61, 16  ;;  %v322_v24 = vrot.slane %v321_v14, 4  ;;  %v358_v27 = vshll.u32 %v250_v3, 16  ;;  %v3415_v8 = vld [vmem:[%s4286_s1 + $0xa0] sm:$0xff]  }
  0x21   : > { %v332_v26 = vrot.slane %v331_v15, 4  ;;  %v2823_v28 = vcombine.low %v3600_v56, %v3608_v61  ;;  %v350_v32 = vrot.slane %v348_v20, 5  ;;  %v382_v22 = vshll.u32 %v251_v34, 16  ;;  %v3416_v14 = vld [vmem:[%s4286_s1 + $0xe0] sm:$0xff]   ;;  %v3419_v56 = vld [vmem:[%s4286_s1 + $0x98] sm:$0xff]  }
  0x22   : > { %3179 = vmatpush3.bf16.msra.mxu0 %v3395_v10  ;;  %v3404_v10 = vld [vmem:[%s4286_s1 + $0xf8] sm:$0xff]   ;;  %v354_v33 = vrot.slane %v352_v21, 4  ;;  %v327_v37 = vsel %vm3577_vm2, %v322_v24, %v326_v5  ;;  %v360_v39 = vrot.slane %v358_v27, 5  ;;  %v387_v53 = vshrl.u32 %v3649_v41, 16 }
  0x23   : > { %3227 = vmatpush3.bf16.msra.mxu1 %v3396_v11  ;;  %3180 = vmatprep.subr.bf16.mxu0 %v3397_v17  ;;  %v2822_v11 = vcombine.low %v3582_v44, %v3590_v49  ;;  %v337_v38 = vsel %vm3577_vm2, %v332_v26, %v336_v16  ;;  %v372_v49 = vshll.u32 %v3639_v30, 16  ;;  %v384_v59 = vrot.slane %v382_v22, 5  ;;  %v3420_v34 = vld [vmem:[%s4286_s1 + $0xd8] sm:$0xff]   ;;  %v3726_v22 = vld [vmem:[%s3547_s16 + $0x64] sm:$0xf] }
  0x24   : > { %3228 = vmatprep.subr.bf16.mxu1 %v3398_v31  ;;  %v2798_v42 = vcombine.low %v327_v37, %v337_v38  ;;  %v355_v44 = vor.u32 %v354_v33, %v350_v32  ;;  %v389_v0 = vrot.slane %v387_v53, 4  ;;  %v396_v6 = vshll.u32 %v3662_v52, 16  ;;  %v3709_v33 = vld [vmem:[%s3547_s16 + $0x58] sm:$0xf]  ;;  %v3423_v53 = vld [vmem:[%s4286_s1 + $0x90] sm:$0xff]  }
  0x25   : > { %v374_v57 = vrot.slane %v372_v49, 5  ;;  %v2825_v12 = vcombine.low %v3649_v41, %v3662_v52  ;;  %v414_v24 = vshll.u32 %v3675_v2, 16 }
  0x26   : > { %3181 = vmatpush3.bf16.msra.mxu0 %v3397_v17  ;;  %v3625_v17 = vld [vmem:[%s3547_s16 + $0x30] sm:$0xf] }
  0x27   : > { %3229 = vmatpush3.bf16.msra.mxu1 %v3398_v31  ;;  %3182 = vmatprep.subr.bf16.mxu0 %v3399_v45  ;;  %v344_v31 = vrot.slane %v342_v19, 5  ;;  %v363_v35 = vshrl.u32 %v3625_v17, 16  ;;  %v366_v40 = vshll.u32 %v3625_v17, 16  ;;  %v2824_v51 = vcombine.low %v3625_v17, %v3639_v30  ;;  %v3695_v19 = vld [vmem:[%s3547_s16 + $0x54] sm:$0xf] }
  0x28   : > { %3230 = vmatprep.subr.bf16.mxu1 %v3400_v50  ;;  %v398_v17 = vrot.slane %v396_v6, 5  ;;  %v438_v49 = vshll.u32 %v3695_v19, 16  ;;  %v3427_v6 = vld [vmem:[%s4286_s1 + $0x88] sm:$0xff]  }
  0x29   : > { %v345_v43 = vor.u32 %v344_v31, %v341_v18  ;;  %v368_v47 = vrot.slane %v366_v40, 5  ;;  %v411_v18 = vshrl.u32 %v3675_v2, 16 }
  0x2a   : > { %3183 = vmatpush3.bf16.msra.mxu0 %v3399_v45  ;;  %v365_v45 = vrot.slane %v363_v35, 4 }
  0x2b   : > { %3231 = vmatpush3.bf16.msra.mxu1 %v3400_v50  ;;  %3264 = vmatprep.subr.bf16.mxu0 %v3403_v1  ;;  %v376_v50 = vshrl.u32 %v3639_v30, 16  ;;  %v346_v25 = vrot.slane %v345_v43, 4  ;;  %v413_v27 = vrot.slane %v411_v18, 4  ;;  %v424_v30 = vshrl.u32 %v3679_v7, 16  ;;  %v254_v43 = vld [vmem:[%s3547_s16 + $0x5c] sm:$0x1] }
  0x2c   : > { %3312 = vmatprep.subr.bf16.mxu1 %v3404_v10  ;;  %v369_v55 = vor.u32 %v368_v47, %v365_v45  ;;  %v3721_v45 = vld [vmem:[%s3547_s16 + $0x60] sm:$0xf]  ;;  %v256_v18 = vld [vmem:[%s3547_s16 + $0x74] sm:$0x1] }
  0x2d   : > { %3185 = vmatmul.mubr.bf16.vlgmr.msra.gmra.mxu0 %v2797_v13  ;;  %v378_v58 = vrot.slane %v376_v50, 4  ;;  %v351_v62 = vsel %vm3577_vm2, %v346_v25, %v350_v32  ;;  %v253_v13 = vld [vmem:[%s3547_s16 + $0x50] sm:$0x1]  ;;  %v416_v32 = vrot.slane %v414_v24, 5  ;;  %v426_v37 = vrot.slane %v424_v30, 4 }
  0x2e   : > { %3233 = vmatmul.mubr.bf16.vlgmr.msra.gmra.mxu1 %v2821_v48  ;;  %3265 = vmatpush3.bf16.msra.mxu0 %v3403_v1  ;;  %v356_v48 = vrot.slane %v355_v44, 4  ;;  %v390_v1 = vshll.u32 %v3649_v41, 16  ;;  %v370_v4 = vrot.slane %v369_v55, 4  ;;  %v430_v38 = vshll.u32 %v253_v13, 16  ;;  %v3757_v13 = vld [vmem:[%s3547_s16 + $0x70] sm:$0xf] }
  0x2f   : > { %3313 = vmatpush3.bf16.msra.mxu1 %v3404_v10  ;;  %3236 = vmatprep.mubr.bf16.mxu1 %v2822_v11  ;;  %v379_v5 = vor.u32 %v378_v58, %v374_v57  ;;  %v400_v10 = vshrl.u32 %v3662_v52, 16  ;;  %v406_v11 = vshll.u32 %v252_v60, 16  ;;  %v435_v44 = vshrl.u32 %v3695_v19, 16  ;;  %v3764_v24 = vld [vmem:[%s3547_s16 + $0x78] sm:$0xf] }
  0x30   : > { %3188 = vmatprep.mubr.bf16.mxu0 %v2798_v42  ;;  %3266 = vmatprep.subr.bf16.mxu0 %v3407_v23  ;;  %v361_v63 = vsel %vm3577_vm2, %v356_v48, %v360_v39  ;;  %v392_v9 = vrot.slane %v390_v1, 5  ;;  %v375_v15 = vsel %vm3577_vm2, %v370_v4, %v374_v57  ;;  %v2826_v39 = vcombine.low %v3675_v2, %v3679_v7 }
  0x31   : > { %3314 = vmatprep.subr.bf16.mxu1 %v3408_v29  ;;  %v2799_v3 = vcombine.low %v351_v62, %v361_v63  ;;  %v380_v16 = vrot.slane %v379_v5, 4  ;;  %v402_v21 = vrot.slane %v400_v10, 4  ;;  %v417_v42 = vor.u32 %v416_v32, %v413_v27  ;;  %v3431_v32 = vld [vmem:[%s4286_s1 + $0x80] sm:$0xff]  }
  0x32   : > { %3267 = vmatpush3.bf16.msra.mxu0 %v3407_v23  ;;  %v393_v20 = vor.u32 %v392_v9, %v389_v0  ;;  %v408_v23 = vrot.slane %v406_v11, 5  ;;  %v432_v47 = vrot.slane %v430_v38, 5  ;;  %v444_v50 = vshll.u32 %v3709_v33, 16  ;;  %v3432_v38 = vld [vmem:[%s4286_s1 + $0xc0] sm:$0xff]  }
  0x33   : > { %3315 = vmatpush3.bf16.msra.mxu1 %v3408_v29  ;;  %3268 = vmatprep.subr.bf16.mxu0 %v3411_v46  ;;  %v385_v26 = vsel %vm3577_vm2, %v380_v16, %v384_v59  ;;  %v420_v29 = vshll.u32 %v3679_v7, 16  ;;  %v403_v31 = vor.u32 %v402_v21, %v398_v17  ;;  %v418_v48 = vrot.slane %v417_v42, 4  ;;  %v3424_v59 = vld [vmem:[%s4286_s1 + $0xd0] sm:$0xff]   ;;  %v3428_v7 = vld [vmem:[%s4286_s1 + $0xc8] sm:$0xff]  }
  0x34   : > { %3316 = vmatprep.subr.bf16.mxu1 %v3412_v54  ;;  %v2800_v61 = vcombine.low %v375_v15, %v385_v26  ;;  %v448_v52 = vshrl.u32 %v3709_v33, 16  ;;  %v440_v57 = vrot.slane %v438_v49, 5  ;;  %v446_v58 = vrot.slane %v444_v50, 5 }
  0x35   : > { %3189 = vmatmul.mubr.bf16.gmra.mxu0 %v2799_v3  ;;  %v422_v35 = vrot.slane %v420_v29, 5  ;;  %v404_v41 = vrot.slane %v403_v31, 4  ;;  %v454_v63 = vshll.u32 %v254_v43, 16  ;;  %v2827_v0 = vcombine.low %v3695_v19, %v3709_v33  ;;  %v255_v3 = vld [vmem:[%s3547_s16 + $0x68] sm:$0x1] }
  0x36   : > { %3237 = vmatmul.mubr.bf16.gmra.mxu1 %v2823_v28  ;;  %3269 = vmatpush3.bf16.msra.mxu0 %v3411_v46  ;;  %v394_v28 = vrot.slane %v393_v20, 4  ;;  %v450_v62 = vrot.slane %v448_v52, 4  ;;  %v459_v4 = vshrl.u32 %v3721_v45, 16  ;;  %v462_v5 = vshll.u32 %v3721_v45, 16  ;;  %v220_v43 = vld [vmem:[%s3547_s16 + $0x7c] sm:$0xf] }
  0x37   : > { %3240 = vmatprep.mubr.bf16.mxu1 %v2824_v51  ;;  %3317 = vmatpush3.bf16.msra.mxu1 %v3412_v54  ;;  %v427_v46 = vor.u32 %v426_v37, %v422_v35  ;;  %v409_v25 = vsel %vm3577_vm2, %v404_v41, %v408_v23  ;;  %v437_v51 = vrot.slane %v435_v44, 4  ;;  %v423_v60 = vsel %vm3577_vm2, %v418_v48, %v422_v35 }
  0x38   : > { %3270 = vmatprep.subr.bf16.mxu0 %v3415_v8  ;;  %3318 = vmatprep.subr.bf16.mxu1 %v3416_v14  ;;  %v399_v40 = vsel %vm3577_vm2, %v394_v28, %v398_v17  ;;  %v451_v9 = vor.u32 %v450_v62, %v446_v58  ;;  %v456_v10 = vrot.slane %v454_v63, 5  ;;  %v468_v11 = vshll.u32 %v3726_v22, 16 }
  0x39   : > { %3192 = vmatprep.mubr.bf16.mxu0 %v2800_v61  ;;  %v2801_v54 = vcombine.low %v399_v40, %v409_v25  ;;  %v428_v55 = vrot.slane %v427_v46, 4  ;;  %v441_v2 = vor.u32 %v440_v57, %v437_v51  ;;  %v461_v15 = vrot.slane %v459_v4, 4  ;;  %v3789_v51 = vld [vmem:[%s3547_s16 + $0x84] sm:$0xf]  ;;  %v3794_v57 = vld [vmem:[%s3547_s16 + $0x88] sm:$0xf] }
  0x3a   : > { %3271 = vmatpush3.bf16.msra.mxu0 %v3415_v8  ;;  %v464_v16 = vrot.slane %v462_v5, 5  ;;  %v472_v17 = vshrl.u32 %v3726_v22, 16  ;;  %v452_v19 = vrot.slane %v451_v9, 4  ;;  %v470_v20 = vrot.slane %v468_v11, 5  ;;  %v258_v9 = vld [vmem:[%s3547_s16 + $0x8c] sm:$0x1] }
  0x3b   : > { %3319 = vmatpush3.bf16.msra.mxu1 %v3416_v14  ;;  %3272 = vmatprep.subr.bf16.mxu0 %v3419_v56  ;;  %v433_v1 = vsel %vm3577_vm2, %v428_v55, %v432_v47  ;;  %v442_v14 = vrot.slane %v441_v2, 4  ;;  %v478_v21 = vshll.u32 %v255_v3, 16  ;;  %v2828_v23 = vcombine.low %v3721_v45, %v3726_v22  ;;  %v257_v47 = vld [vmem:[%s3547_s16 + $0x80] sm:$0x1] }
  0x3c   : > { %3320 = vmatprep.subr.bf16.mxu1 %v3420_v34  ;;  %v2802_v8 = vcombine.low %v423_v60, %v433_v1  ;;  %v465_v27 = vor.u32 %v464_v16, %v461_v15  ;;  %v474_v29 = vrot.slane %v472_v17, 4  ;;  %v492_v31 = vshll.u32 %v3757_v13, 16  ;;  %v223_v16 = vld [vmem:[%s3547_s16 + $0x90] sm:$0xf] }
  0x3d   : > { %3193 = vmatmul.mubr.bf16.gmra.mxu0 %v2801_v54  ;;  %v447_v26 = vsel %vm3577_vm2, %v442_v14, %v446_v58  ;;  %v480_v61 = vrot.slane %v478_v21, 5  ;;  %v496_v41 = vshrl.u32 %v3757_v13, 16  ;;  %v502_v42 = vshll.u32 %v256_v18, 16  ;;  %v224_v21 = vld [vmem:[%s3547_s16 + $0x94] sm:$0xf] }
  0x3e   : > { %3241 = vmatmul.mubr.bf16.gmra.mxu1 %v2825_v12  ;;  %3273 = vmatpush3.bf16.msra.mxu0 %v3419_v56  ;;  %v3754_v12 = vld [vmem:[%s3547_s16 + $0x6c] sm:$0xf]  ;;  %v457_v56 = vsel %vm3577_vm2, %v452_v19, %v456_v10  ;;  %v475_v35 = vor.u32 %v474_v29, %v470_v20  ;;  %v494_v40 = vrot.slane %v492_v31, 5  ;;  %v507_v49 = vshrl.u32 %v3764_v24, 16  ;;  %v259_v29 = vld [vmem:[%s3547_s16 + $0x98] sm:$0x1] }
  0x3f   : > { %3244 = vmatprep.mubr.bf16.mxu1 %v2826_v39  ;;  %3321 = vmatpush3.bf16.msra.mxu1 %v3420_v34  ;;  %v483_v30 = vshrl.u32 %v3754_v12, 16  ;;  %v486_v28 = vshll.u32 %v3754_v12, 16  ;;  %v2803_v33 = vcombine.low %v447_v26, %v457_v56  ;;  %v466_v34 = vrot.slane %v465_v27, 4 }
  0x40   : > { %3274 = vmatprep.subr.bf16.mxu0 %v3423_v53  ;;  %3322 = vmatprep.subr.bf16.mxu1 %v3424_v59  ;;  %v476_v45 = vrot.slane %v475_v35, 4  ;;  %v2829_v46 = vcombine.low %v3754_v12, %v3757_v13  ;;  %v498_v22 = vrot.slane %v496_v41, 4  ;;  %v504_v25 = vrot.slane %v502_v42, 5 }
  0x41   : > { %3196 = vmatprep.mubr.bf16.mxu0 %v2802_v8  ;;  %v485_v37 = vrot.slane %v483_v30, 4  ;;  %v488_v39 = vrot.slane %v486_v28, 5  ;;  %v471_v44 = vsel %vm3577_vm2, %v466_v34, %v470_v20  ;;  %v510_v48 = vshll.u32 %v3764_v24, 16  ;;  %v3814_v30 = vld [vmem:[%s3547_s16 + $0x9c] sm:$0xf] }
  0x42   : > { %3275 = vmatpush3.bf16.msra.mxu0 %v3423_v53  ;;  %v481_v52 = vsel %vm3577_vm2, %v476_v45, %v480_v61  ;;  %v509_v53 = vrot.slane %v507_v49, 4  ;;  %v516_v54 = vshll.u32 %v220_v43, 16  ;;  %v520_v55 = vshrl.u32 %v220_v43, 16 }
  0x43   : > { %3276 = vmatprep.subr.bf16.mxu0 %v3427_v6  ;;  %3323 = vmatpush3.bf16.msra.mxu1 %v3424_v59  ;;  %v489_v50 = vor.u32 %v488_v39, %v485_v37  ;;  %v2804_v58 = vcombine.low %v471_v44, %v481_v52  ;;  %v499_v60 = vor.u32 %v498_v22, %v494_v40  ;;  %v512_v62 = vrot.slane %v510_v48, 5 }
  0x44   : > { %3324 = vmatprep.subr.bf16.mxu1 %v3428_v7  ;;  %v518_v63 = vrot.slane %v516_v54, 5  ;;  %v526_v1 = vshll.u32 %v257_v47, 16  ;;  %v2830_v2 = vcombine.low %v3764_v24, %v220_v43  ;;  %v534_v10 = vshll.u32 %v3789_v51, 16 }
  0x45   : > { %3197 = vmatmul.mubr.bf16.gmra.mxu0 %v2803_v33  ;;  %v490_v59 = vrot.slane %v489_v50, 4  ;;  %v500_v4 = vrot.slane %v499_v60, 4  ;;  %v513_v5 = vor.u32 %v512_v62, %v509_v53  ;;  %v540_v11 = vshll.u32 %v3794_v57, 16  ;;  %v260_v50 = vld [vmem:[%s3547_s16 + $0xa4] sm:$0x1] }
  0x46   : > { %3245 = vmatmul.mubr.bf16.gmra.mxu1 %v2827_v0  ;;  %3277 = vmatpush3.bf16.msra.mxu0 %v3427_v6  ;;  %v522_v0 = vrot.slane %v520_v55, 4  ;;  %v531_v6 = vshrl.u32 %v3789_v51, 16  ;;  %v528_v8 = vrot.slane %v526_v1, 5  ;;  %v544_v15 = vshrl.u32 %v3794_v57, 16  ;;  %v227_v53 = vld [vmem:[%s3547_s16 + $0xa8] sm:$0xf] }
  0x47   : > { %3248 = vmatprep.mubr.bf16.mxu1 %v2828_v23  ;;  %3325 = vmatpush3.bf16.msra.mxu1 %v3428_v7  ;;  %v495_v3 = vsel %vm3577_vm2, %v490_v59, %v494_v40  ;;  %v505_v12 = vsel %vm3577_vm2, %v500_v4, %v504_v25  ;;  %v514_v13 = vrot.slane %v513_v5, 4  ;;  %v536_v19 = vrot.slane %v534_v10, 5  ;;  %v261_v4 = vld [vmem:[%s3547_s16 + $0xb0] sm:$0x1] }
  0x48   : > { %3278 = vmatprep.subr.bf16.mxu0 %v3431_v32  ;;  %3326 = vmatprep.subr.bf16.mxu1 %v3432_v38  ;;  %v523_v7 = vor.u32 %v522_v0, %v518_v63  ;;  %v533_v14 = vrot.slane %v531_v6, 4  ;;  %v2805_v17 = vcombine.low %v495_v3, %v505_v12  ;;  %v542_v20 = vrot.slane %v540_v11, 5  ;;  %v228_v0 = vld [vmem:[%s3547_s16 + $0xac] sm:$0xf]  ;;  %v229_v6 = vld [vmem:[%s3547_s16 + $0xb4] sm:$0xf] }
  0x49   : > { %3200 = vmatprep.mubr.bf16.mxu0 %v2804_v58  ;;  %v519_v23 = vsel %vm3577_vm2, %v514_v13, %v518_v63  ;;  %v546_v24 = vrot.slane %v544_v15, 4  ;;  %v550_v26 = vshll.u32 %v258_v9, 16  ;;  %v2831_v27 = vcombine.low %v3789_v51, %v3794_v57 }
  0x4a   : > { %3279 = vmatpush3.bf16.msra.mxu0 %v3431_v32  ;;  %v524_v18 = vrot.slane %v523_v7, 4  ;;  %v537_v61 = vor.u32 %v536_v19, %v533_v14  ;;  %v555_v28 = vshrl.u32 %v223_v16, 16  ;;  %v558_v31 = vshll.u32 %v223_v16, 16  ;;  %v226_v32 = vld [vmem:[%s3547_s16 + $0xa0] sm:$0xf] }
  0x4b   : > { %3327 = vmatpush3.bf16.msra.mxu1 %v3432_v38  ;;  %v547_v34 = vor.u32 %v546_v24, %v542_v20  ;;  %v552_v35 = vrot.slane %v550_v26, 5  ;;  %v564_v37 = vshll.u32 %v224_v21, 16  ;;  %v568_v41 = vshrl.u32 %v224_v21, 16  ;;  %v230_v19 = vld [vmem:[%s3547_s16 + $0xb8] sm:$0xf] }
  0x4c   : > { %v529_v56 = vsel %vm3577_vm2, %v524_v18, %v528_v8  ;;  %v538_v38 = vrot.slane %v537_v61, 4  ;;  %v557_v39 = vrot.slane %v555_v28, 4  ;;  %v560_v40 = vrot.slane %v558_v31, 5  ;;  %v262_v28 = vld [vmem:[%s3547_s16 + $0xbc] sm:$0x1] }
  0x4d   : > { %3201 = vmatmul.mubr.bf16.gmra.mxu0 %v2805_v17  ;;  %v2806_v33 = vcombine.low %v519_v23, %v529_v56  ;;  %v548_v42 = vrot.slane %v547_v34, 4  ;;  %v566_v43 = vrot.slane %v564_v37, 5  ;;  %v574_v44 = vshll.u32 %v259_v29, 16 }
  0x4e   : > { %3249 = vmatmul.mubr.bf16.gmra.mxu1 %v2829_v46  ;;  %v2832_v45 = vcombine.low %v223_v16, %v224_v21  ;;  %v543_v46 = vsel %vm3577_vm2, %v538_v38, %v542_v20  ;;  %v561_v47 = vor.u32 %v560_v40, %v557_v39  ;;  %v570_v49 = vrot.slane %v568_v41, 4  ;;  %v2916_v38 = vld [vmem:[%s3547_s16 + $0xc] sm:$0xf] }
  0x4f   : > { %3252 = vmatprep.mubr.bf16.mxu1 %v2830_v2  ;;  %3204 = vmatprep.mubr.bf16.mxu0 %v2806_v33  ;;  %v579_v22 = vshrl.u32 %v3814_v30, 16  ;;  %v553_v25 = vsel %vm3577_vm2, %v548_v42, %v552_v35  ;;  %v576_v48 = vrot.slane %v574_v44, 5  ;;  %v582_v51 = vshll.u32 %v3814_v30, 16 }
  0x50   : > { %v588_v52 = vshll.u32 %v226_v32, 16  ;;  %v2807_v54 = vcombine.low %v543_v46, %v553_v25  ;;  %v562_v55 = vrot.slane %v561_v47, 4  ;;  %v571_v57 = vor.u32 %v570_v49, %v566_v43 }
  0x51   : > { %v581_v58 = vrot.slane %v579_v22, 4  ;;  %v584_v59 = vrot.slane %v582_v51, 5  ;;  %v592_v62 = vshrl.u32 %v226_v32, 16  ;;  %v598_v63 = vshll.u32 %v260_v50, 16  ;;  %v2918_v22 = vld [vmem:[%s3547_s16 + $0x14] sm:$0x1] }
  0x52   : > { %v590_v60 = vrot.slane %v588_v52, 5  ;;  %v567_v1 = vsel %vm3577_vm2, %v562_v55, %v566_v43  ;;  %v572_v2 = vrot.slane %v571_v57, 4  ;;  %v2833_v3 = vcombine.low %v3814_v30, %v226_v32  ;;  %v2917_v43 = vld [vmem:[%s3547_s16 + $0x10] sm:$0xf]  ;;  %v2919_v51 = vld [vmem:[%s3547_s16 + $0x18] sm:$0xf] }
  0x53   : > { %v603_v5 = vshrl.u32 %v227_v53, 16  ;;  %v585_v7 = vor.u32 %v584_v59, %v581_v58  ;;  %v594_v8 = vrot.slane %v592_v62, 4  ;;  %v600_v9 = vrot.slane %v598_v63, 5  ;;  %v2920_v57 = vld [vmem:[%s3547_s16 + $0x1c] sm:$0xf] }
  0x54   : > { %v606_v10 = vshll.u32 %v227_v53, 16  ;;  %v577_v11 = vsel %vm3577_vm2, %v572_v2, %v576_v48  ;;  %v612_v13 = vshll.u32 %v228_v0, 16  ;;  %v616_v14 = vshrl.u32 %v228_v0, 16 }
  0x55   : > { %3205 = vmatmul.mubr.bf16.gmra.mxu0 %v2807_v54  ;;  %v605_v12 = vrot.slane %v603_v5, 4  ;;  %v2808_v15 = vcombine.low %v567_v1, %v577_v11  ;;  %v586_v16 = vrot.slane %v585_v7, 4  ;;  %v595_v17 = vor.u32 %v594_v8, %v590_v60  ;;  %v2922_v8 = vld [vmem:[%s3547_s16 + $0x24] sm:$0xf] }
  0x56   : > { %3253 = vmatmul.mubr.bf16.gmra.mxu1 %v2831_v27  ;;  %v608_v18 = vrot.slane %v606_v10, 5  ;;  %v614_v20 = vrot.slane %v612_v13, 5  ;;  %v618_v21 = vrot.slane %v616_v14, 4  ;;  %v622_v23 = vshll.u32 %v261_v4, 16  ;;  %v3433_v10 = vld [vmem:[%s3547_s16 + $0xc] sm:$0xff]  }
  0x57   : > { %3256 = vmatprep.mubr.bf16.mxu1 %v2832_v45  ;;  %v2834_v24 = vcombine.low %v227_v53, %v228_v0  ;;  %3208 = vmatprep.mubr.bf16.mxu0 %v2808_v15  ;;  %v591_v26 = vsel %vm3577_vm2, %v586_v16, %v590_v60  ;;  %v596_v27 = vrot.slane %v595_v17, 4  ;;  %v627_v30 = vshrl.u32 %v229_v6, 16 }
  0x58   : > { %v609_v29 = vor.u32 %v608_v18, %v605_v12  ;;  %v619_v56 = vor.u32 %v618_v21, %v614_v20  ;;  %v624_v61 = vrot.slane %v622_v23, 5  ;;  %v630_v31 = vshll.u32 %v229_v6, 16  ;;  %v2923_v18 = vld [vmem:[%s3547_s16 + $0x28] sm:$0xf]  ;;  %v2924_v23 = vld [vmem:[%s3547_s16 + $0x2c] sm:$0x1] }
  0x59   : > { %v636_v32 = vshll.u32 %v230_v19, 16  ;;  %v601_v33 = vsel %vm3577_vm2, %v596_v27, %v600_v9  ;;  %v629_v35 = vrot.slane %v627_v30, 4  ;;  %v640_v37 = vshrl.u32 %v230_v19, 16 }
  0x5a   : > { %v610_v34 = vrot.slane %v609_v29, 4  ;;  %v2809_v39 = vcombine.low %v591_v26, %v601_v33  ;;  %v620_v40 = vrot.slane %v619_v56, 4  ;;  %v632_v41 = vrot.slane %v630_v31, 5  ;;  %v2925_v56 = vld [vmem:[%s3547_s16 + $0x30] sm:$0xf] }
  0x5b   : > { %v638_v42 = vrot.slane %v636_v32, 5  ;;  %v642_v45 = vrot.slane %v640_v37, 4  ;;  %v646_v46 = vshll.u32 %v262_v28, 16  ;;  %v2835_v47 = vcombine.low %v229_v6, %v230_v19  ;;  %v2921_v6 = vld [vmem:[%s3547_s16 + $0x20] sm:$0x1] }
  0x5c   : > { %v615_v44 = vsel %vm3577_vm2, %v610_v34, %v614_v20  ;;  %v625_v49 = vsel %vm3577_vm2, %v620_v40, %v624_v61  ;;  %v633_v50 = vor.u32 %v632_v41, %v629_v35  ;;  %v1684_v25 = vshrl.u32 %v2916_v38, 16  ;;  %v3434_v40 = vld [vmem:[%s3547_s16 + $0x18] sm:$0xff]  }
  0x5d   : > { %3209 = vmatmul.mubr.bf16.gmra.mxu0 %v2809_v39  ;;  %v1687_v48 = vshll.u32 %v2916_v38, 16  ;;  %v2810_v52 = vcombine.low %v615_v44, %v625_v49  ;;  %v643_v53 = vor.u32 %v642_v45, %v638_v42  ;;  %v648_v54 = vrot.slane %v646_v46, 5  ;;  %v2926_v38 = vld [vmem:[%s3547_s16 + $0x34] sm:$0xf]  ;;  %v2927_v44 = vld [vmem:[%s3547_s16 + $0x38] sm:$0x1] }
  0x5e   : > { %3257 = vmatmul.mubr.bf16.gmra.mxu1 %v2833_v3  ;;  %v1693_v55 = vshll.u32 %v2917_v43, 16  ;;  %v634_v58 = vrot.slane %v633_v50, 4  ;;  %v1686_v59 = vrot.slane %v1684_v25, 4  ;;  %v1697_v62 = vshrl.u32 %v2917_v43, 16 }
  0x5f   : > { %3260 = vmatprep.mubr.bf16.mxu1 %v2834_v24  ;;  %v1689_v60 = vrot.slane %v1687_v48, 5  ;;  %3212 = vmatprep.mubr.bf16.mxu0 %v2810_v52  ;;  %v644_v63 = vrot.slane %v643_v53, 4  ;;  %v1703_v1 = vshll.u32 %v2918_v22, 16  ;;  %v1708_v2 = vshrl.u32 %v2919_v51, 16  ;;  %v3435_v22 = vld [vmem:[%s3547_s16 + $0x24] sm:$0xff]  }
  0x60   : > { %v1695_v0 = vrot.slane %v1693_v55, 5  ;;  %v639_v3 = vsel %vm3577_vm2, %v634_v58, %v638_v42  ;;  %v1699_v5 = vrot.slane %v1697_v62, 4  ;;  %v1711_v7 = vshll.u32 %v2919_v51, 16 }
  0x61   : > { %v1690_v4 = vor.u32 %v1689_v60, %v1686_v59  ;;  %v649_v9 = vsel %vm3577_vm2, %v644_v63, %v648_v54  ;;  %v1705_v11 = vrot.slane %v1703_v1, 5  ;;  %v1710_v12 = vrot.slane %v1708_v2, 4  ;;  %v2929_v63 = vld [vmem:[%s3547_s16 + $0x40] sm:$0xf] }
  0x62   : > { %v1717_v13 = vshll.u32 %v2920_v57, 16  ;;  %v2811_v14 = vcombine.low %v639_v3, %v649_v9  ;;  %v1700_v16 = vor.u32 %v1699_v5, %v1695_v0  ;;  %v1713_v17 = vrot.slane %v1711_v7, 5 }
  0x63   : > { %v1691_v15 = vrot.slane %v1690_v4, 4  ;;  %v1721_v20 = vshrl.u32 %v2920_v57, 16  ;;  %v1727_v21 = vshll.u32 %v2921_v6, 16  ;;  %v1732_v24 = vshrl.u32 %v2922_v8, 16  ;;  %v2928_v57 = vld [vmem:[%s3547_s16 + $0x3c] sm:$0xf] }
  0x64   : > { %v1719_v19 = vrot.slane %v1717_v13, 5  ;;  %v1701_v27 = vrot.slane %v1700_v16, 4  ;;  %v1714_v29 = vor.u32 %v1713_v17, %v1710_v12  ;;  %v1735_v30 = vshll.u32 %v2922_v8, 16  ;;  %v2930_v6 = vld [vmem:[%s3547_s16 + $0x44] sm:$0x1] }
  0x65   : > { %3213 = vmatmul.mubr.bf16.gmra.mxu0 %v2811_v14  ;;  %v1696_v26 = vsel %vm3577_vm2, %v1691_v15, %v1695_v0  ;;  %v1723_v61 = vrot.slane %v1721_v20, 4  ;;  %v1729_v28 = vrot.slane %v1727_v21, 5  ;;  %v1734_v31 = vrot.slane %v1732_v24, 4  ;;  %v2931_v14 = vld [vmem:[%s3547_s16 + $0x48] sm:$0xf] }
  0x66   : > { %3261 = vmatmul.mubr.bf16.gmra.mxu1 %v2835_v47  ;;  %3280 = vmatprep.mubr.bf16.mxu0 %v3433_v10  ;;  %v1741_v32 = vshll.u32 %v2923_v18, 16  ;;  %v1706_v33 = vsel %vm3577_vm2, %v1701_v27, %v1705_v11  ;;  %v1715_v34 = vrot.slane %v1714_v29, 4  ;;  %v1737_v35 = vrot.slane %v1735_v30, 5  ;;  %v3436_v10 = vld [vmem:[%s3547_s16 + $0x30] sm:$0xff]   ;;  %v2932_v15 = vld [vmem:[%s3547_s16 + $0x4c] sm:$0xf] }
  0x67   : > { %v1745_v37 = vshrl.u32 %v2923_v18, 16  ;;  %v2980_v39 = vcombine.low %v1696_v26, %v1706_v33  ;;  %v1724_v41 = vor.u32 %v1723_v61, %v1719_v19  ;;  %v1751_v43 = vshll.u32 %v2924_v23, 16  ;;  %v3437_v18 = vld [vmem:[%s3547_s16 + $0x3c] sm:$0xff]   ;;  %v2933_v30 = vld [vmem:[%s3547_s16 + $0x50] sm:$0x1] }
  0x68   : > { %v1743_v42 = vrot.slane %v1741_v32, 5  ;;  %v1720_v45 = vsel %vm3577_vm2, %v1715_v34, %v1719_v19  ;;  %v1738_v46 = vor.u32 %v1737_v35, %v1734_v31  ;;  %v1756_v49 = vshrl.u32 %v2925_v56, 16  ;;  %v2935_v35 = vld [vmem:[%s3547_s16 + $0x58] sm:$0xf] }
  0x69   : > { %v1747_v47 = vrot.slane %v1745_v37, 4  ;;  %3328 = vmatprep.mubr.bf16.mxu1 %v2980_v39  ;;  %v1725_v50 = vrot.slane %v1724_v41, 4  ;;  %v1753_v25 = vrot.slane %v1751_v43, 5  ;;  %v1759_v48 = vshll.u32 %v2925_v56, 16 }
  0x6a   : > { %v1765_v51 = vshll.u32 %v2926_v38, 16  ;;  %v1739_v52 = vrot.slane %v1738_v46, 4  ;;  %v1758_v54 = vrot.slane %v1756_v49, 4  ;;  %v1769_v55 = vshrl.u32 %v2926_v38, 16 }
  0x6b   : > { %v1748_v53 = vor.u32 %v1747_v47, %v1743_v42  ;;  %v1730_v58 = vsel %vm3577_vm2, %v1725_v50, %v1729_v28  ;;  %v1761_v59 = vrot.slane %v1759_v48, 5  ;;  %v1775_v62 = vshll.u32 %v2927_v44, 16  ;;  %v2934_v28 = vld [vmem:[%s3547_s16 + $0x54] sm:$0xf] }
  0x6c   : > { %v1767_v60 = vrot.slane %v1765_v51, 5  ;;  %v2981_v0 = vcombine.low %v1720_v45, %v1730_v58  ;;  %v1744_v1 = vsel %vm3577_vm2, %v1739_v52, %v1743_v42  ;;  %v1771_v3 = vrot.slane %v1769_v55, 4  ;;  %v2936_v45 = vld [vmem:[%s3547_s16 + $0x5c] sm:$0x1] }
  0x6d   : > { %3281 = vmatmul.mubr.bf16.vlgmr.msra.gmra.mxu0 %v3434_v40  ;;  %v1749_v2 = vrot.slane %v1748_v53, 4  ;;  %v1762_v4 = vor.u32 %v1761_v59, %v1758_v54  ;;  %v1777_v5 = vrot.slane %v1775_v62, 5  ;;  %v1780_v7 = vshrl.u32 %v2928_v57, 16  ;;  %v3438_v59 = vld [vmem:[%s3547_s16 + $0x48] sm:$0xff]   ;;  %v3439_v62 = vld [vmem:[%s3547_s16 + $0x54] sm:$0xff]  }
  0x6e   : > { %3284 = vmatprep.mubr.bf16.mxu0 %v3435_v22  ;;  %v1783_v8 = vshll.u32 %v2928_v57, 16  ;;  %3329 = vmatmul.mubr.bf16.vlgmr.msra.gmra.mxu1 %v2981_v0  ;;  %v1772_v11 = vor.u32 %v1771_v3, %v1767_v60  ;;  %v1789_v12 = vshll.u32 %v2929_v63, 16  ;;  %v1793_v13 = vshrl.u32 %v2929_v63, 16  ;;  %v2937_v22 = vld [vmem:[%s3547_s16 + $0x60] sm:$0xf] }
  0x6f   : > { %v1754_v9 = vsel %vm3577_vm2, %v1749_v2, %v1753_v25  ;;  %v1763_v17 = vrot.slane %v1762_v4, 4  ;;  %v1782_v19 = vrot.slane %v1780_v7, 4  ;;  %v1799_v26 = vshll.u32 %v2930_v6, 16  ;;  %v2938_v25 = vld [vmem:[%s3547_s16 + $0x64] sm:$0xf] }
  0x70   : > { %v2982_v16 = vcombine.low %v1744_v1, %v1754_v9  ;;  %v1785_v20 = vrot.slane %v1783_v8, 5  ;;  %v1773_v21 = vrot.slane %v1772_v11, 4  ;;  %v1791_v23 = vrot.slane %v1789_v12, 5  ;;  %v2939_v4 = vld [vmem:[%s3547_s16 + $0x68] sm:$0x1] }
  0x71   : > { %v1795_v24 = vrot.slane %v1793_v13, 4  ;;  %v1768_v27 = vsel %vm3577_vm2, %v1763_v17, %v1767_v60  ;;  %v1804_v56 = vshrl.u32 %v2931_v14, 16  ;;  %v1807_v61 = vshll.u32 %v2931_v14, 16  ;;  %v2940_v7 = vld [vmem:[%s3547_s16 + $0x6c] sm:$0xf] }
  0x72   : > { %3332 = vmatprep.mubr.bf16.mxu1 %v2982_v16  ;;  %v1786_v29 = vor.u32 %v1785_v20, %v1782_v19  ;;  %v1778_v31 = vsel %vm3577_vm2, %v1773_v21, %v1777_v5  ;;  %v1801_v33 = vrot.slane %v1799_v26, 5  ;;  %v1813_v34 = vshll.u32 %v2932_v15, 16  ;;  %v2941_v20 = vld [vmem:[%s3547_s16 + $0x70] sm:$0xf] }
  0x73   : > { %v1796_v32 = vor.u32 %v1795_v24, %v1791_v23  ;;  %v2983_v37 = vcombine.low %v1768_v27, %v1778_v31  ;;  %v1806_v39 = vrot.slane %v1804_v56, 4  ;;  %v1809_v40 = vrot.slane %v1807_v61, 5  ;;  %v2942_v27 = vld [vmem:[%s3547_s16 + $0x74] sm:$0x1] }
  0x74   : > { %v1787_v38 = vrot.slane %v1786_v29, 4  ;;  %v1815_v42 = vrot.slane %v1813_v34, 5  ;;  %v1817_v43 = vshrl.u32 %v2932_v15, 16  ;;  %v1823_v44 = vshll.u32 %v2933_v30, 16 }
  0x75   : > { %3285 = vmatmul.mubr.bf16.gmra.mxu0 %v3436_v10  ;;  %v1797_v41 = vrot.slane %v1796_v32, 4  ;;  %v1810_v47 = vor.u32 %v1809_v40, %v1806_v39  ;;  %v1828_v49 = vshrl.u32 %v2934_v28, 16  ;;  %v1831_v50 = vshll.u32 %v2934_v28, 16  ;;  %v3440_v28 = vld [vmem:[%s3547_s16 + $0x60] sm:$0xff]  }
  0x76   : > { %3288 = vmatprep.mubr.bf16.mxu0 %v3437_v18  ;;  %v1792_v46 = vsel %vm3577_vm2, %v1787_v38, %v1791_v23  ;;  %3333 = vmatmul.mubr.bf16.gmra.mxu1 %v2983_v37  ;;  %v1819_v51 = vrot.slane %v1817_v43, 4  ;;  %v1825_v52 = vrot.slane %v1823_v44, 5  ;;  %v1837_v53 = vshll.u32 %v2935_v35, 16  ;;  %v3441_v38 = vld [vmem:[%s3547_s16 + $0x6c] sm:$0xff]  }
  0x77   : > { %v1802_v48 = vsel %vm3577_vm2, %v1797_v41, %v1801_v33  ;;  %v1811_v55 = vrot.slane %v1810_v47, 4  ;;  %v1830_v57 = vrot.slane %v1828_v49, 4  ;;  %v1833_v58 = vrot.slane %v1831_v50, 5  ;;  %v2945_v47 = vld [vmem:[%s3547_s16 + $0x80] sm:$0x1] }
  0x78   : > { %v2984_v54 = vcombine.low %v1792_v46, %v1802_v48  ;;  %v1820_v60 = vor.u32 %v1819_v51, %v1815_v42  ;;  %v1839_v63 = vrot.slane %v1837_v53, 5  ;;  %v1841_v0 = vshrl.u32 %v2935_v35, 16  ;;  %v2943_v35 = vld [vmem:[%s3547_s16 + $0x78] sm:$0xf] }
  0x79   : > { %v1847_v1 = vshll.u32 %v2936_v45, 16  ;;  %v1816_v2 = vsel %vm3577_vm2, %v1811_v55, %v1815_v42  ;;  %v1834_v3 = vor.u32 %v1833_v58, %v1830_v57  ;;  %v1852_v5 = vshrl.u32 %v2937_v22, 16  ;;  %v2944_v42 = vld [vmem:[%s3547_s16 + $0x7c] sm:$0xf] }
  0x7a   : > { %3336 = vmatprep.mubr.bf16.mxu1 %v2984_v54  ;;  %v1855_v6 = vshll.u32 %v2937_v22, 16  ;;  %v1821_v8 = vrot.slane %v1820_v60, 4  ;;  %v1843_v9 = vrot.slane %v1841_v0, 4  ;;  %v1861_v11 = vshll.u32 %v2938_v25, 16  ;;  %v2946_v54 = vld [vmem:[%s3547_s16 + $0x84] sm:$0xf] }
  0x7b   : > { %v1849_v10 = vrot.slane %v1847_v1, 5  ;;  %v1835_v12 = vrot.slane %v1834_v3, 4  ;;  %v1854_v13 = vrot.slane %v1852_v5, 4  ;;  %v1865_v15 = vshrl.u32 %v2938_v25, 16  ;;  %v2947_v60 = vld [vmem:[%s3547_s16 + $0x88] sm:$0xf] }
  0x7c   : > { %v1857_v14 = vrot.slane %v1855_v6, 5  ;;  %v1826_v16 = vsel %vm3577_vm2, %v1821_v8, %v1825_v52  ;;  %v1844_v17 = vor.u32 %v1843_v9, %v1839_v63  ;;  %v1863_v18 = vrot.slane %v1861_v11, 5  ;;  %v2948_v9 = vld [vmem:[%s3547_s16 + $0x8c] sm:$0x1]  ;;  %v2949_v11 = vld [vmem:[%s3547_s16 + $0x90] sm:$0xf] }
  0x7d   : > { %3289 = vmatmul.mubr.bf16.gmra.mxu0 %v3438_v59  ;;  %v1871_v19 = vshll.u32 %v2939_v4, 16  ;;  %v2985_v21 = vcombine.low %v1816_v2, %v1826_v16  ;;  %v1840_v23 = vsel %vm3577_vm2, %v1835_v12, %v1839_v63  ;;  %v1867_v26 = vrot.slane %v1865_v15, 4 }
  0x7e   : > { %3292 = vmatprep.mubr.bf16.mxu0 %v3439_v62  ;;  %v1858_v24 = vor.u32 %v1857_v14, %v1854_v13  ;;  %v1845_v29 = vrot.slane %v1844_v17, 4  ;;  %v1876_v56 = vshrl.u32 %v2940_v7, 16  ;;  %v1879_v61 = vshll.u32 %v2940_v7, 16  ;;  %v3442_v13 = vld [vmem:[%s3547_s16 + $0x78] sm:$0xff]   ;;  %v2950_v17 = vld [vmem:[%s3547_s16 + $0x94] sm:$0xf] }
  0x7f   : > { %v1873_v30 = vrot.slane %v1871_v19, 5  ;;  %3337 = vmatmul.mubr.bf16.gmra.mxu1 %v2985_v21  ;;  %v1868_v32 = vor.u32 %v1867_v26, %v1863_v18  ;;  %v1885_v33 = vshll.u32 %v2941_v20, 16  ;;  %v1889_v34 = vshrl.u32 %v2941_v20, 16  ;;  %v3443_v21 = vld [vmem:[%s3547_s16 + $0x84] sm:$0xff]  }
  0x80   : > { %v1859_v31 = vrot.slane %v1858_v24, 4  ;;  %v1850_v37 = vsel %vm3577_vm2, %v1845_v29, %v1849_v10  ;;  %v1878_v39 = vrot.slane %v1876_v56, 4  ;;  %v1881_v40 = vrot.slane %v1879_v61, 5  ;;  %v2951_v61 = vld [vmem:[%s3547_s16 + $0x98] sm:$0x1] }
  0x81   : > { %v1895_v41 = vshll.u32 %v2942_v27, 16  ;;  %v2986_v43 = vcombine.low %v1840_v23, %v1850_v37  ;;  %v1869_v45 = vrot.slane %v1868_v32, 4  ;;  %v1887_v46 = vrot.slane %v1885_v33, 5  ;;  %v2952_v32 = vld [vmem:[%s3547_s16 + $0x9c] sm:$0xf] }
  0x82   : > { %v1864_v44 = vsel %vm3577_vm2, %v1859_v31, %v1863_v18  ;;  %v1882_v49 = vor.u32 %v1881_v40, %v1878_v39  ;;  %v1891_v50 = vrot.slane %v1889_v34, 4  ;;  %v1900_v25 = vshrl.u32 %v2943_v35, 16 }
  0x83   : > { %v1897_v22 = vrot.slane %v1895_v41, 5  ;;  %3340 = vmatprep.mubr.bf16.mxu1 %v2986_v43  ;;  %v1874_v48 = vsel %vm3577_vm2, %v1869_v45, %v1873_v30  ;;  %v1903_v51 = vshll.u32 %v2943_v35, 16  ;;  %v1909_v52 = vshll.u32 %v2944_v42, 16 }
  0x84   : > { %v1913_v53 = vshrl.u32 %v2944_v42, 16  ;;  %v2987_v55 = vcombine.low %v1864_v44, %v1874_v48  ;;  %v1883_v57 = vrot.slane %v1882_v49, 4  ;;  %v1892_v58 = vor.u32 %v1891_v50, %v1887_v46  ;;  %v2955_v48 = vld [vmem:[%s3547_s16 + $0xa8] sm:$0xf] }
  0x85   : > { %3293 = vmatmul.mubr.bf16.gmra.mxu0 %v3440_v28  ;;  %v1902_v59 = vrot.slane %v1900_v25, 4  ;;  %v1905_v62 = vrot.slane %v1903_v51, 5  ;;  %v1911_v63 = vrot.slane %v1909_v52, 5  ;;  %v1919_v1 = vshll.u32 %v2945_v47, 16  ;;  %v3444_v52 = vld [vmem:[%s3547_s16 + $0x90] sm:$0xff]  }
  0x86   : > { %3296 = vmatprep.mubr.bf16.mxu0 %v3441_v38  ;;  %v1915_v0 = vrot.slane %v1913_v53, 4  ;;  %v1888_v2 = vsel %vm3577_vm2, %v1883_v57, %v1887_v46  ;;  %v1893_v3 = vrot.slane %v1892_v58, 4  ;;  %v1924_v4 = vshrl.u32 %v2946_v54, 16  ;;  %v2953_v38 = vld [vmem:[%s3547_s16 + $0xa0] sm:$0xf] }
  0x87   : > { %v1927_v5 = vshll.u32 %v2946_v54, 16  ;;  %3341 = vmatmul.mubr.bf16.gmra.mxu1 %v2987_v55  ;;  %v1906_v6 = vor.u32 %v1905_v62, %v1902_v59  ;;  %v1921_v8 = vrot.slane %v1919_v1, 5  ;;  %v1933_v10 = vshll.u32 %v2947_v60, 16  ;;  %v2954_v46 = vld [vmem:[%s3547_s16 + $0xa4] sm:$0x1] }
  0x88   : > { %v1916_v7 = vor.u32 %v1915_v0, %v1911_v63  ;;  %v1898_v12 = vsel %vm3577_vm2, %v1893_v3, %v1897_v22  ;;  %v1926_v14 = vrot.slane %v1924_v4, 4  ;;  %v1937_v16 = vshrl.u32 %v2947_v60, 16  ;;  %v3445_v60 = vld [vmem:[%s3547_s16 + $0x9c] sm:$0xff]  }
  0x89   : > { %v1929_v15 = vrot.slane %v1927_v5, 5  ;;  %v2988_v18 = vcombine.low %v1888_v2, %v1898_v12  ;;  %v1907_v19 = vrot.slane %v1906_v6, 4  ;;  %v1935_v23 = vrot.slane %v1933_v10, 5 }
  0x8a   : > { %v1917_v20 = vrot.slane %v1916_v7, 4  ;;  %v1939_v26 = vrot.slane %v1937_v16, 4  ;;  %v1943_v27 = vshll.u32 %v2948_v9, 16  ;;  %v1948_v29 = vshrl.u32 %v2949_v11, 16  ;;  %v2957_v7 = vld [vmem:[%s3547_s16 + $0xb0] sm:$0x1] }
  0x8b   : > { %v1930_v24 = vor.u32 %v1929_v15, %v1926_v14  ;;  %3344 = vmatprep.mubr.bf16.mxu1 %v2988_v18  ;;  %v1912_v30 = vsel %vm3577_vm2, %v1907_v19, %v1911_v63  ;;  %v1951_v28 = vshll.u32 %v2949_v11, 16  ;;  %v1957_v31 = vshll.u32 %v2950_v17, 16  ;;  %v2956_v63 = vld [vmem:[%s3547_s16 + $0xac] sm:$0xf]  ;;  %v2959_v18 = vld [vmem:[%s3547_s16 + $0xb8] sm:$0xf] }
  0x8c   : > { %v1922_v56 = vsel %vm3577_vm2, %v1917_v20, %v1921_v8  ;;  %v1940_v35 = vor.u32 %v1939_v26, %v1935_v23  ;;  %v1945_v37 = vrot.slane %v1943_v27, 5  ;;  %v1950_v39 = vrot.slane %v1948_v29, 4  ;;  %v2960_v29 = vld [vmem:[%s3547_s16 + $0xbc] sm:$0x1] }
  0x8d   : > { %3297 = vmatmul.mubr.bf16.gmra.mxu0 %v3442_v13  ;;  %v2989_v33 = vcombine.low %v1912_v30, %v1922_v56  ;;  %v1931_v34 = vrot.slane %v1930_v24, 4  ;;  %v1953_v40 = vrot.slane %v1951_v28, 5  ;;  %v1959_v41 = vrot.slane %v1957_v31, 5  ;;  %v2958_v13 = vld [vmem:[%s3547_s16 + $0xb4] sm:$0xf] }
  0x8e   : > { %3300 = vmatprep.mubr.bf16.mxu0 %v3443_v21  ;;  %v1961_v42 = vshrl.u32 %v2950_v17, 16  ;;  %v1941_v44 = vrot.slane %v1940_v35, 4  ;;  %v1967_v45 = vshll.u32 %v2951_v61, 16  ;;  %v1972_v47 = vshrl.u32 %v2952_v32, 16  ;;  %v3446_v61 = vld [vmem:[%s3547_s16 + $0xa8] sm:$0xff]  }
  0x8f   : > { %v1936_v43 = vsel %vm3577_vm2, %v1931_v34, %v1935_v23  ;;  %3345 = vmatmul.mubr.bf16.gmra.mxu1 %v2989_v33  ;;  %v1954_v49 = vor.u32 %v1953_v40, %v1950_v39  ;;  %v1975_v22 = vshll.u32 %v2952_v32, 16  ;;  %v1981_v25 = vshll.u32 %v2953_v38, 16  ;;  %v2961_v33 = vld [vmem:[%s3547_s16 + $0xc0] sm:$0xf]  ;;  %v2962_v40 = vld [vmem:[%s3547_s16 + $0xc4] sm:$0xf] }
  0x90   : > { %v1963_v50 = vrot.slane %v1961_v42, 4  ;;  %v1946_v51 = vsel %vm3577_vm2, %v1941_v44, %v1945_v37  ;;  %v1969_v53 = vrot.slane %v1967_v45, 5  ;;  %v1974_v54 = vrot.slane %v1972_v47, 4 }
  0x91   : > { %v1985_v55 = vshrl.u32 %v2953_v38, 16  ;;  %v2990_v57 = vcombine.low %v1936_v43, %v1946_v51  ;;  %v1955_v58 = vrot.slane %v1954_v49, 4  ;;  %v1977_v62 = vrot.slane %v1975_v22, 5  ;;  %v3447_v38 = vld [vmem:[%s3547_s16 + $0xb4] sm:$0xff]  }
  0x92   : > { %v1964_v59 = vor.u32 %v1963_v50, %v1959_v41  ;;  %v1983_v0 = vrot.slane %v1981_v25, 5  ;;  %v1991_v2 = vshll.u32 %v2954_v46, 16  ;;  %v1996_v3 = vshrl.u32 %v2955_v48, 16 }
  0x93   : > { %v1987_v1 = vrot.slane %v1985_v55, 4  ;;  %3348 = vmatprep.mubr.bf16.mxu1 %v2990_v57  ;;  %v1960_v4 = vsel %vm3577_vm2, %v1955_v58, %v1959_v41  ;;  %v1978_v6 = vor.u32 %v1977_v62, %v1974_v54  ;;  %v1999_v8 = vshll.u32 %v2955_v48, 16  ;;  %v2963_v48 = vld [vmem:[%s3547_s16 + $0xc8] sm:$0x1] }
  0x94   : > { %v1965_v5 = vrot.slane %v1964_v59, 4  ;;  %v1993_v10 = vrot.slane %v1991_v2, 5  ;;  %v1998_v11 = vrot.slane %v1996_v3, 4  ;;  %v2005_v12 = vshll.u32 %v2956_v63, 16  ;;  %v3448_v3 = vld [vmem:[%s3547_s16 + $0xc0] sm:$0xff]  }
  0x95   : > { %3301 = vmatmul.mubr.bf16.gmra.mxu0 %v3444_v52  ;;  %v1988_v9 = vor.u32 %v1987_v1, %v1983_v0  ;;  %v1979_v15 = vrot.slane %v1978_v6, 4  ;;  %v2001_v16 = vrot.slane %v1999_v8, 5  ;;  %v2009_v17 = vshrl.u32 %v2956_v63, 16 }
  0x96   : > { %v1970_v14 = vsel %vm3577_vm2, %v1965_v5, %v1969_v53  ;;  %3304 = vmatprep.mubr.bf16.mxu0 %v3445_v60  ;;  %v2007_v21 = vrot.slane %v2005_v12, 5  ;;  %v2015_v23 = vshll.u32 %v2957_v7, 16  ;;  %v2020_v30 = vshrl.u32 %v2958_v13, 16 }
  0x97   : > { %v2991_v19 = vcombine.low %v1960_v4, %v1970_v14  ;;  %v1989_v20 = vrot.slane %v1988_v9, 4  ;;  %v1984_v24 = vsel %vm3577_vm2, %v1979_v15, %v1983_v0  ;;  %v2002_v26 = vor.u32 %v2001_v16, %v1998_v11 }
  0x98   : > { %v2011_v27 = vrot.slane %v2009_v17, 4  ;;  %v2017_v28 = vrot.slane %v2015_v23, 5  ;;  %v2023_v31 = vshll.u32 %v2958_v13, 16  ;;  %v2029_v32 = vshll.u32 %v2959_v18, 16 }
  0x99   : > { %3349 = vmatmul.mubr.bf16.gmra.mxu1 %v2991_v19  ;;  %v1994_v56 = vsel %vm3577_vm2, %v1989_v20, %v1993_v10  ;;  %v2003_v35 = vrot.slane %v2002_v26, 4  ;;  %v2022_v39 = vrot.slane %v2020_v30, 4  ;;  %v2033_v43 = vshrl.u32 %v2959_v18, 16 }
  0x9a   : > { %v2992_v34 = vcombine.low %v1984_v24, %v1994_v56  ;;  %v2012_v37 = vor.u32 %v2011_v27, %v2007_v21  ;;  %v2025_v41 = vrot.slane %v2023_v31, 5  ;;  %v2031_v42 = vrot.slane %v2029_v32, 5 }
  0x9b   : > { %v2039_v44 = vshll.u32 %v2960_v29, 16  ;;  %v2008_v45 = vsel %vm3577_vm2, %v2003_v35, %v2007_v21  ;;  %v2044_v47 = vshrl.u32 %v2961_v33, 16  ;;  %v2047_v49 = vshll.u32 %v2961_v33, 16 }
  0x9c   : > { %3352 = vmatprep.mubr.bf16.mxu1 %v2992_v34  ;;  %v2013_v46 = vrot.slane %v2012_v37, 4  ;;  %v2026_v50 = vor.u32 %v2025_v41, %v2022_v39  ;;  %v2035_v22 = vrot.slane %v2033_v43, 4  ;;  %v2053_v51 = vshll.u32 %v2962_v40, 16 }
  0x9d   : > { %3305 = vmatmul.mubr.bf16.gmra.mxu0 %v3446_v61  ;;  %v2041_v25 = vrot.slane %v2039_v44, 5  ;;  %v2046_v53 = vrot.slane %v2044_v47, 4  ;;  %v2049_v54 = vrot.slane %v2047_v49, 5  ;;  %v2057_v55 = vshrl.u32 %v2962_v40, 16 }
  0x9e   : > { %v2018_v52 = vsel %vm3577_vm2, %v2013_v46, %v2017_v28  ;;  %3308 = vmatprep.mubr.bf16.mxu0 %v3447_v38  ;;  %v2027_v58 = vrot.slane %v2026_v50, 4  ;;  %v2036_v59 = vor.u32 %v2035_v22, %v2031_v42  ;;  %v2055_v60 = vrot.slane %v2053_v51, 5 }
  0x9f   : > { %v2993_v57 = vcombine.low %v2008_v45, %v2018_v52  ;;  %v2050_v62 = vor.u32 %v2049_v54, %v2046_v53  ;;  %v2059_v63 = vrot.slane %v2057_v55, 4  ;;  %v2063_v0 = vshll.u32 %v2963_v48, 16 }
  0xa0   : > { %v2032_v1 = vsel %vm3577_vm2, %v2027_v58, %v2031_v42  ;;  %v2037_v2 = vrot.slane %v2036_v59, 4 }
  0xa1   : > { %3353 = vmatmul.mubr.bf16.gmra.mxu1 %v2993_v57  ;;  %v2051_v4 = vrot.slane %v2050_v62, 4  ;;  %v2060_v5 = vor.u32 %v2059_v63, %v2055_v60  ;;  %v2065_v6 = vrot.slane %v2063_v0, 5 }
  0xa2   : > { %v2042_v7 = vsel %vm3577_vm2, %v2037_v2, %v2041_v25 }
  0xa3   : > { %v2994_v8 = vcombine.low %v2032_v1, %v2042_v7  ;;  %v2056_v9 = vsel %vm3577_vm2, %v2051_v4, %v2055_v60  ;;  %v2061_v10 = vrot.slane %v2060_v5, 4 }
  0xa5   : > { %3309 = vmatmul.mubr.bf16.gmra.mxu0 %v3448_v3  ;;  %3356 = vmatprep.mubr.bf16.mxu1 %v2994_v8  ;;  %v2066_v11 = vsel %vm3577_vm2, %v2061_v10, %v2065_v6 }
  0xa6   : > { %v2995_v12 = vcombine.low %v2056_v9, %v2066_v11 }
  0xa9   : > { %3357 = vmatmul.mubr.bf16.gmra.mxu1 %v2995_v12 }
  0xed   : > { %v3977_v13 = vpop.f32.mrf.mxu0 }
  0xee   : > { %v3979_v14 = vpop.f32.mrf.mxu1 }
  0xef   : > { %v3981_v15 = vpop.f32.mrf.mxu0 }
  0xf0   : > { %v3983_v16 = vpop.f32.mrf.mxu1 }
  0xf1   : > { %v3985_v17 = vpop.f32.mrf.mxu0 }
  0xf2   : > { %v3987_v18 = vpop.f32.mrf.mxu1 }
  0xf3   : > { %v3989_v19 = vpop.f32.mrf.mxu0 }
  0xf4   : > { %v3991_v20 = vpop.f32.mrf.mxu1 }
  0xf5   : > { %v3993_v36 = vpop.f32.mrf.mxu0 }
  0xf6   : > { %v3995_v21 = vpop.f32.mrf.mxu1 }
  0xf7   : > { %v3997_v23 = vpop.f32.mrf.mxu0 }
  0xf8   : > { %v3999_v24 = vpop.f32.mrf.mxu1 }
  0xf9   : > { %v4001_v26 = vpop.f32.mrf.mxu0 }
  0xfa   : > { %v4003_v27 = vpop.f32.mrf.mxu1 }
  0xfb   : > { %v4005_v29 = vpop.f32.mrf.mxu0 }
  0xfc   : > { %v4007_v30 = vpop.f32.mrf.mxu1 }
  0xfd   : > { %v4011_v61 = vpop.f32.mrf.mxu0 }
  0xfe   : > { %v4009_v56 = vpop.f32.mrf.mxu1 }
  0xff   : > { %v4015_v31 = vpop.f32.mrf.mxu0 }
 0x100   : > { %v4013_v28 = vpop.f32.mrf.mxu1 }
 0x101   : > { %v4019_v33 = vpop.f32.mrf.mxu0 }
 0x102   : > { %v4017_v32 = vpop.f32.mrf.mxu1 }
 0x103   : > { %v4023_v35 = vpop.f32.mrf.mxu0 }
 0x104   : > { %v4021_v34 = vpop.f32.mrf.mxu1 }
 0x105   : > { %v4027_v38 = vpop.f32.mrf.mxu0 }
 0x106   : > { %v4025_v37 = vpop.f32.mrf.mxu1 }
 0x107   : > { %v4031_v40 = vpop.f32.mrf.mxu0 }
 0x108   : > { %v4029_v39 = vpop.f32.mrf.mxu1 }
 0x109   : > { %v4035_v42 = vpop.f32.mrf.mxu0 }
 0x10a   : > { %v4033_v41 = vpop.f32.mrf.mxu1 }
 0x10b   : > { %v4039_v44 = vpop.f32.mrf.mxu0 }
 0x10c   : > { %v4037_v43 = vpop.f32.mrf.mxu1 }
 0x10d   : > { %v4045_v47 = vpop.f32.mrf.mxu0 }
 0x10e   : > { %v4041_v45 = vpop.f32.mrf.mxu1 }
 0x10f   : > { %v4049_v50 = vpop.f32.mrf.mxu0 }
 0x110   : > { %v4043_v46 = vpop.f32.mrf.mxu1 }
 0x111   : > { %v4053_v25 = vpop.f32.mrf.mxu0 }
 0x112   : > { %v4047_v49 = vpop.f32.mrf.mxu1 }
 0x113   : > { %v4057_v51 = vpop.f32.mrf.mxu0 }
 0x114   : > { %v4051_v22 = vpop.f32.mrf.mxu1 }
 0x115   : > { %v4061_v53 = vpop.f32.mrf.mxu0 }
 0x116   : > { %v4055_v48 = vpop.f32.mrf.mxu1 }
 0x117   : > { %v4065_v55 = vpop.f32.mrf.mxu0 }
 0x118   : > { %v4059_v52 = vpop.f32.mrf.mxu1 }
 0x119   : > { %v4069_v58 = vpop.f32.mrf.mxu0 }
 0x11a   : > { %v4063_v54 = vpop.f32.mrf.mxu1 }
 0x11b   : > { %v4073_v60 = vpop.f32.mrf.mxu0 }
 0x11c   : > { %v4067_v57 = vpop.f32.mrf.mxu1 }
 0x11d   : > { %v4079_v0 = vpop.f32.mrf.mxu0 }
 0x11e   : > { %v4071_v59 = vpop.f32.mrf.mxu1 }
 0x11f   : > { %4291 = vst [vmem:[#allocation2_spill] sm:$0xff] %v4071_v59  ;;  %v4083_v2 = vpop.f32.mrf.mxu0 }
 0x120   : > { %v4075_v62 = vpop.f32.mrf.mxu1  ;;  %4295 = vst [vmem:[#allocation6_spill] sm:$0xff] %v4083_v2 }
 0x121   : > { %4292 = vst [vmem:[#allocation3_spill] sm:$0xff] %v4075_v62  ;;  %v4087_v4 = vpop.f32.mrf.mxu0 }
 0x122   : > { %v4077_v63 = vpop.f32.mrf.mxu1  ;;  %4297 = vst [vmem:[#allocation8_spill] sm:$0xff] %v4087_v4 }
 0x123   : > { %4293 = vst [vmem:[#allocation4_spill] sm:$0xff] %v4077_v63  ;;  %v4089_v5 = vpop.f32.mrf.mxu0 }
 0x124   : > { %v4081_v1 = vpop.f32.mrf.mxu1  ;;  %4298 = vst [vmem:[#allocation9_spill] sm:$0xff] %v4089_v5 }
 0x125   : > { %4294 = vst [vmem:[#allocation5_spill] sm:$0xff] %v4081_v1  ;;  %v4093_v7 = vpop.f32.mrf.mxu0 }
 0x126   : > { %v4085_v3 = vpop.f32.mrf.mxu1  ;;  %4300 = vst [vmem:[#allocation11_spill] sm:$0xff] %v4093_v7 }
 0x127   : > { %4296 = vst [vmem:[#allocation7_spill] sm:$0xff] %v4085_v3  ;;  %v4095_v8 = vpop.f32.mrf.mxu0  ;;  %v1127_v3 = vadd.f32 %v3979_v14, %v3977_v13 }
 0x128   : > { %v4091_v6 = vpop.f32.mrf.mxu1  ;;  %4301 = vst [vmem:[#allocation12_spill] sm:$0xff] %v4095_v8 }
 0x129   : > { %4299 = vst [vmem:[#allocation10_spill] sm:$0xff] %v4091_v6  ;;  %v4099_v10 = vpop.f32.mrf.mxu0  ;;  %v1119_v6 = vadd.f32 %v3983_v16, %v3981_v15  ;;  %v1122_v15 = vadd.f32 %v3991_v20, %v3989_v19 }
 0x12a   : > { %v4097_v9 = vpop.f32.mrf.mxu1  ;;  %4303 = vst [vmem:[#allocation14_spill] sm:$0xff] %v4099_v10 }
 0x12b   : > { %4302 = vst [vmem:[#allocation13_spill] sm:$0xff] %v4097_v9  ;;  %v4101_v11 = vpop.f32.mrf.mxu0  ;;  %v4112_v9 = vld [vmem:[%s4287_s2] ss:$0 sm:$0xff] }
 0x12c   : > { %4304 = vst [vmem:[#allocation15_spill] sm:$0xff] %v4101_v11  ;;  %v4103_v12 = vpop.f32.mrf.mxu1  ;;  %v1130_v11 = vadd.f32 %v3987_v18, %v3985_v17  ;;  %v1143_v17 = vadd.f32 %v3995_v21, %v3993_v36  ;;  %v1135_v18 = vadd.f32 %v3999_v24, %v3997_v23  ;;  %v1146_v36 = vadd.f32 %v4003_v27, %v4001_v26 }
 0x12d   : > { %4305 = vst [vmem:[#allocation16_spill] sm:$0xff] %v4103_v12  ;;  %v3282_v1 = vpop.f32.mrf.mxu0  ;;  %v1138_v26 = vadd.f32 %v4007_v30, %v4005_v29  ;;  %v1151_v30 = vadd.f32 %v4013_v28, %v4015_v31 }
 0x12e   : > { %v1605_v5 = vadd.f32 %v3282_v1, %v1127_v3  ;;  %v3330_v7 = vpop.f32.mrf.mxu1 }
 0x12f   : > { %v1476_v10 = vpop.f32.mrf.mxu0 }
 0x130   : > { %v2359_v12 = vadd.f32 %v3330_v7, %v1605_v5  ;;  %v1603_v8 = vadd.f32 %v1476_v10, %v1119_v6  ;;  %v2230_v63 = vpop.f32.mrf.mxu1 }
 0x131   : > { %v3283_v13 = vpop.f32.mrf.mxu0 }
 0x132   : > { %v2398_v14 = vadd.f32 %v4112_v9, %v2359_v12  ;;  %v2357_v4 = vadd.f32 %v2230_v63, %v1603_v8  ;;  %v1606_v62 = vadd.f32 %v3283_v13, %v1130_v11  ;;  %v3331_v16 = vpop.f32.mrf.mxu1 }
 0x133   : > { %v1479_v1 = vpop.f32.mrf.mxu0 }
 0x134   : > { %vm2430_vm3 = vcmp.ge.f32.partialorder %v2398_v14, 0.0  ;;  %v2462_v3 = vmul.f32 0.01, %v2398_v14  ;;  %v2396_v2 = vadd.f32 %v4112_v9, %v2357_v4  ;;  %v2360_v59 = vadd.f32 %v3331_v16, %v1606_v62  ;;  %v2233_v5 = vpop.f32.mrf.mxu1 }
 0x135   : > { %v1604_v63 = vadd.f32 %v1479_v1, %v1122_v15  ;;  %v3286_v6 = vpop.f32.mrf.mxu0 }
 0x136   : > { %v2494_v19 = vsel %vm2430_vm3, %v2398_v14, %v2462_v3  ;;  %vm2428_vm5 = vcmp.ge.f32.partialorder %v2396_v2, 0.0  ;;  %v2460_v20 = vmul.f32 0.01, %v2396_v2  ;;  %v2399_v62 = vadd.f32 %v4112_v9, %v2360_v59  ;;  %v3334_v4 = vpop.f32.mrf.mxu1 }
 0x137   : > { %v3042_v21 = vpack.c.bf16 %v2494_v19, %v2494_v19  ;;  %v2358_v23 = vadd.f32 %v2233_v5, %v1604_v63  ;;  %v1609_v24 = vadd.f32 %v3286_v6, %v1143_v17  ;;  %v1492_v7 = vpop.f32.mrf.mxu0  ;;  %v1159_v5 = vadd.f32 %v4009_v56, %v4011_v61 }
 0x138   : > { %v2492_v8 = vsel %vm2428_vm5, %v2396_v2, %v2460_v20  ;;  %vm2431_vm6 = vcmp.ge.f32.partialorder %v2399_v62, 0.0  ;;  %v2463_v10 = vmul.f32 0.01, %v2399_v62  ;;  %v1607_v11 = vadd.f32 %v1492_v7, %v1135_v18  ;;  %v2246_v59 = vpop.f32.mrf.mxu1 }
 0x139   : > { %2655 = vst.msk [vmem:[%s4128_s12 + $0x8] sm:$0xf] %vm2652_vm4, %v3042_v21  ;;  %v3040_v12 = vpack.c.bf16 %v2492_v8, %v2492_v8  ;;  %v2397_v13 = vadd.f32 %v4112_v9, %v2358_v23  ;;  %v2363_v14 = vadd.f32 %v3334_v4, %v1609_v24  ;;  %v3287_v15 = vpop.f32.mrf.mxu0  ;;  %v1162_v61 = vadd.f32 %v4017_v32, %v4019_v33 }
 0x13a   : > { %v2495_v27 = vsel %vm2431_vm6, %v2399_v62, %v2463_v10  ;;  %v2361_v16 = vadd.f32 %v2246_v59, %v1607_v11  ;;  %v1610_v1 = vadd.f32 %v3287_v15, %v1146_v36  ;;  %v3335_v18 = vpop.f32.mrf.mxu1  ;;  %v1154_v32 = vadd.f32 %v4021_v34, %v4023_v35 }
 0x13b   : > { %2653 = vst.msk [vmem:[%s4128_s12] sm:$0xf] %vm2652_vm4, %v3040_v12  ;;  %v3043_v2 = vpack.c.bf16 %v2495_v27, %v2495_v27  ;;  %vm2429_vm7 = vcmp.ge.f32.partialorder %v2397_v13, 0.0  ;;  %v2461_v3 = vmul.f32 0.01, %v2397_v13  ;;  %v2402_v17 = vadd.f32 %v4112_v9, %v2363_v14  ;;  %v1495_v63 = vpop.f32.mrf.mxu0 }
 0x13c   : > { %v2400_v6 = vadd.f32 %v4112_v9, %v2361_v16  ;;  %v2364_v19 = vadd.f32 %v3335_v18, %v1610_v1  ;;  %v1608_v29 = vadd.f32 %v1495_v63, %v1138_v26  ;;  %v2249_v36 = vpop.f32.mrf.mxu1  ;;  %v1175_v18 = vadd.f32 %v4025_v37, %v4027_v38 }
 0x13d   : > { %2656 = vst.msk [vmem:[%s4128_s12 + $0xc] sm:$0xf] %vm2652_vm4, %v3043_v2  ;;  %v2493_v20 = vsel %vm2429_vm7, %v2397_v13, %v2461_v3  ;;  %vm2434_vm8 = vcmp.ge.f32.partialorder %v2402_v17, 0.0  ;;  %v2466_v62 = vmul.f32 0.01, %v2402_v17  ;;  %v3290_v21 = vpop.f32.mrf.mxu0  ;;  %v1178_v37 = vadd.f32 %v4033_v41, %v4035_v42 }
 0x13e   : > { %v3041_v23 = vpack.c.bf16 %v2493_v20, %v2493_v20  ;;  %vm2432_vm9 = vcmp.ge.f32.partialorder %v2400_v6, 0.0  ;;  %v2464_v24 = vmul.f32 0.01, %v2400_v6  ;;  %v2403_v56 = vadd.f32 %v4112_v9, %v2364_v19 }
 0x13f   : > { %v2498_v4 = vsel %vm2434_vm8, %v2402_v17, %v2466_v62  ;;  %v2362_v7 = vadd.f32 %v2249_v36, %v1608_v29  ;;  %v1613_v28 = vadd.f32 %v3290_v21, %v1159_v5  ;;  %v1508_v31 = vpop.f32.mrf.mxu0  ;;  %v3338_v12 = vpop.f32.mrf.mxu1  ;;  %v1170_v41 = vadd.f32 %v4037_v43, %v4039_v44 }
 0x140   : > { %2654 = vst.msk [vmem:[%s4128_s12 + $0x4] sm:$0xf] %vm2652_vm4, %v3041_v23  ;;  %v3046_v8 = vpack.c.bf16 %v2498_v4, %v2498_v4  ;;  %v2496_v10 = vsel %vm2432_vm9, %v2400_v6, %v2464_v24  ;;  %vm2435_vm10 = vcmp.ge.f32.partialorder %v2403_v56, 0.0  ;;  %v2467_v11 = vmul.f32 0.01, %v2403_v56 }
 0x141   : > { %v3044_v13 = vpack.c.bf16 %v2496_v10, %v2496_v10  ;;  %v2401_v14 = vadd.f32 %v4112_v9, %v2362_v7  ;;  %v2367_v59 = vadd.f32 %v3338_v12, %v1613_v28  ;;  %v1611_v15 = vadd.f32 %v1508_v31, %v1151_v30  ;;  %v3291_v26 = vpop.f32.mrf.mxu0  ;;  %v2262_v27 = vpop.f32.mrf.mxu1 }
 0x142   : > { %2659 = vst.msk [vmem:[%s4128_s12 + $0x18] sm:$0xf] %vm2652_vm4, %v3046_v8  ;;  %v2499_v33 = vsel %vm2435_vm10, %v2403_v56, %v2467_v11  ;;  %v1614_v16 = vadd.f32 %v3291_v26, %v1162_v61  ;;  %v1167_v30 = vadd.f32 %v4029_v39, %v4031_v40  ;;  %v1191_v43 = vadd.f32 %v4041_v45, %v4045_v47 }
 0x143   : > { %2657 = vst.msk [vmem:[%s4128_s12 + $0x10] sm:$0xf] %vm2652_vm4, %v3044_v13  ;;  %v3047_v1 = vpack.c.bf16 %v2499_v33, %v2499_v33  ;;  %vm2433_vm11 = vcmp.ge.f32.partialorder %v2401_v14, 0.0  ;;  %v2465_v2 = vmul.f32 0.01, %v2401_v14  ;;  %v2406_v3 = vadd.f32 %v4112_v9, %v2367_v59  ;;  %v1511_v17 = vpop.f32.mrf.mxu0  ;;  %v3339_v5 = vpop.f32.mrf.mxu1 }
 0x144   : > { %v2365_v63 = vadd.f32 %v2262_v27, %v1611_v15  ;;  %v1612_v6 = vadd.f32 %v1511_v17, %v1154_v32  ;;  %v2368_v19 = vadd.f32 %v3339_v5, %v1614_v16  ;;  %v1183_v44 = vadd.f32 %v4043_v46, %v4049_v50 }
 0x145   : > { %2660 = vst.msk [vmem:[%s4128_s12 + $0x1c] sm:$0xf] %vm2652_vm4, %v3047_v1  ;;  %v2497_v34 = vsel %vm2433_vm11, %v2401_v14, %v2465_v2  ;;  %vm2438_vm12 = vcmp.ge.f32.partialorder %v2406_v3, 0.0  ;;  %v2470_v35 = vmul.f32 0.01, %v2406_v3  ;;  %v3294_v29 = vpop.f32.mrf.mxu0  ;;  %v2265_v36 = vpop.f32.mrf.mxu1  ;;  %v1194_v45 = vadd.f32 %v4047_v49, %v4053_v25 }
 0x146   : > { %v3045_v20 = vpack.c.bf16 %v2497_v34, %v2497_v34  ;;  %v2404_v62 = vadd.f32 %v4112_v9, %v2365_v63  ;;  %v1617_v21 = vadd.f32 %v3294_v29, %v1175_v18  ;;  %v2407_v23 = vadd.f32 %v4112_v9, %v2368_v19 }
 0x147   : > { %v2502_v38 = vsel %vm2438_vm12, %v2406_v3, %v2470_v35  ;;  %v2366_v24 = vadd.f32 %v2265_v36, %v1612_v6  ;;  %v1524_v56 = vpop.f32.mrf.mxu0  ;;  %v3342_v39 = vpop.f32.mrf.mxu1  ;;  %v1186_v49 = vadd.f32 %v4051_v22, %v4057_v51  ;;  %v1207_v22 = vadd.f32 %v4055_v48, %v4061_v53 }
 0x148   : > { %2658 = vst.msk [vmem:[%s4128_s12 + $0x14] sm:$0xf] %vm2652_vm4, %v3045_v20  ;;  %v3050_v61 = vpack.c.bf16 %v2502_v38, %v2502_v38  ;;  %vm2436_vm13 = vcmp.ge.f32.partialorder %v2404_v62, 0.0  ;;  %v2468_v4 = vmul.f32 0.01, %v2404_v62  ;;  %v1615_v40 = vadd.f32 %v1524_v56, %v1167_v30 }
 0x149   : > { %vm2439_vm14 = vcmp.ge.f32.partialorder %v2407_v23, 0.0  ;;  %v2471_v7 = vmul.f32 0.01, %v2407_v23  ;;  %v2405_v28 = vadd.f32 %v4112_v9, %v2366_v24  ;;  %v2371_v31 = vadd.f32 %v3342_v39, %v1617_v21  ;;  %v3295_v8 = vpop.f32.mrf.mxu0  ;;  %v2278_v10 = vpop.f32.mrf.mxu1 }
 0x14a   : > { %2663 = vst.msk [vmem:[%s4128_s12 + $0x28] sm:$0xf] %vm2652_vm4, %v3050_v61  ;;  %v2500_v42 = vsel %vm2436_vm13, %v2404_v62, %v2468_v4  ;;  %v1618_v11 = vadd.f32 %v3295_v8, %v1178_v37  ;;  %v2369_v32 = vadd.f32 %v2278_v10, %v1615_v40  ;;  %v1199_v51 = vadd.f32 %v4059_v52, %v4065_v55 }
 0x14b   : > { %v3048_v12 = vpack.c.bf16 %v2500_v42, %v2500_v42  ;;  %v2503_v13 = vsel %vm2439_vm14, %v2407_v23, %v2471_v7  ;;  %vm2437_vm15 = vcmp.ge.f32.partialorder %v2405_v28, 0.0  ;;  %v2469_v14 = vmul.f32 0.01, %v2405_v28  ;;  %v1527_v59 = vpop.f32.mrf.mxu0  ;;  %v3343_v33 = vpop.f32.mrf.mxu1 }
 0x14c   : > { %v3051_v15 = vpack.c.bf16 %v2503_v13, %v2503_v13  ;;  %v2410_v26 = vadd.f32 %v4112_v9, %v2371_v31  ;;  %v1616_v27 = vadd.f32 %v1527_v59, %v1170_v41  ;;  %v2372_v1 = vadd.f32 %v3343_v33, %v1618_v11 }
 0x14d   : > { %2661 = vst.msk [vmem:[%s4128_s12 + $0x20] sm:$0xf] %vm2652_vm4, %v3048_v12  ;;  %v2501_v16 = vsel %vm2437_vm15, %v2405_v28, %v2469_v14  ;;  %v3298_v2 = vpop.f32.mrf.mxu0  ;;  %v2408_v18 = vadd.f32 %v4112_v9, %v2369_v32  ;;  %v2281_v63 = vpop.f32.mrf.mxu1  ;;  %v1210_v48 = vadd.f32 %v4063_v54, %v4069_v58  ;;  %v1202_v54 = vadd.f32 %v4067_v57, %v4073_v60  ;;  %v4306_v57 = vld [vmem:[#allocation2_spill] sm:$0xff] }
 0x14e   : > { %2664 = vst.msk [vmem:[%s4128_s12 + $0x2c] sm:$0xf] %vm2652_vm4, %v3051_v15  ;;  %v3049_v3 = vpack.c.bf16 %v2501_v16, %v2501_v16  ;;  %vm2442_vm0 = vcmp.ge.f32.partialorder %v2410_v26, 0.0  ;;  %v2474_v17 = vmul.f32 0.01, %v2410_v26  ;;  %v2411_v47 = vadd.f32 %v4112_v9, %v2372_v1 }
 0x14f   : > { %v2370_v46 = vadd.f32 %v2281_v63, %v1616_v27  ;;  %v1621_v50 = vadd.f32 %v3298_v2, %v1191_v43  ;;  %v1540_v5 = vpop.f32.mrf.mxu0  ;;  %vm2440_vm1 = vcmp.ge.f32.partialorder %v2408_v18, 0.0  ;;  %v2472_v34 = vmul.f32 0.01, %v2408_v18  ;;  %v3346_v35 = vpop.f32.mrf.mxu1 }
 0x150   : > { %2662 = vst.msk [vmem:[%s4128_s12 + $0x24] sm:$0xf] %vm2652_vm4, %v3049_v3  ;;  %v2506_v6 = vsel %vm2442_vm0, %v2410_v26, %v2474_v17  ;;  %v1619_v19 = vadd.f32 %v1540_v5, %v1183_v44  ;;  %vm2443_vm2 = vcmp.ge.f32.partialorder %v2411_v47, 0.0  ;;  %v2475_v30 = vmul.f32 0.01, %v2411_v47 }
 0x151   : > { %v3054_v29 = vpack.c.bf16 %v2506_v6, %v2506_v6  ;;  %v2409_v20 = vadd.f32 %v4112_v9, %v2370_v46  ;;  %v3299_v62 = vpop.f32.mrf.mxu0  ;;  %v2504_v25 = vsel %vm2440_vm1, %v2408_v18, %v2472_v34  ;;  %v2375_v36 = vadd.f32 %v3346_v35, %v1621_v50  ;;  %v2294_v21 = vpop.f32.mrf.mxu1 }
 0x152   : > { %v1622_v37 = vadd.f32 %v3299_v62, %v1194_v45  ;;  %v3052_v38 = vpack.c.bf16 %v2504_v25, %v2504_v25  ;;  %v2507_v23 = vsel %vm2443_vm2, %v2411_v47, %v2475_v30  ;;  %v2373_v39 = vadd.f32 %v2294_v21, %v1619_v19  ;;  %v4307_v19 = vld [vmem:[#allocation6_spill] sm:$0xff] }
 0x153   : > { %2667 = vst.msk [vmem:[%s4128_s12 + $0x38] sm:$0xf] %vm2652_vm4, %v3054_v29  ;;  %vm2441_vm3 = vcmp.ge.f32.partialorder %v2409_v20, 0.0  ;;  %v2473_v24 = vmul.f32 0.01, %v2409_v20  ;;  %v1543_v56 = vpop.f32.mrf.mxu0  ;;  %v3055_v61 = vpack.c.bf16 %v2507_v23, %v2507_v23  ;;  %v2414_v4 = vadd.f32 %v4112_v9, %v2375_v36  ;;  %v3347_v40 = vpop.f32.mrf.mxu1  ;;  %v4308_v29 = vld [vmem:[#allocation3_spill] sm:$0xff] }
 0x154   : > { %v1620_v7 = vadd.f32 %v1543_v56, %v1186_v49  ;;  %2665 = vst.msk [vmem:[%s4128_s12 + $0x30] sm:$0xf] %vm2652_vm4, %v3052_v38  ;;  %v2376_v31 = vadd.f32 %v3347_v40, %v1622_v37  ;;  %v2412_v10 = vadd.f32 %v4112_v9, %v2373_v39  ;;  %v1223_v60 = vadd.f32 %v4306_v57, %v4079_v0  ;;  %v4309_v37 = vld [vmem:[#allocation8_spill] sm:$0xff]  ;;  %v4311_v40 = vld [vmem:[#allocation9_spill] sm:$0xff] }
 0x155   : > { %v2505_v28 = vsel %vm2441_vm3, %v2409_v20, %v2473_v24  ;;  %v3302_v8 = vpop.f32.mrf.mxu0  ;;  %2668 = vst.msk [vmem:[%s4128_s12 + $0x3c] sm:$0xf] %vm2652_vm4, %v3055_v61  ;;  %vm2446_vm5 = vcmp.ge.f32.partialorder %v2414_v4, 0.0  ;;  %v2478_v42 = vmul.f32 0.01, %v2414_v4  ;;  %v2297_v11 = vpop.f32.mrf.mxu1  ;;  %v1215_v30 = vadd.f32 %v4308_v29, %v4307_v19  ;;  %v4310_v38 = vld [vmem:[#allocation4_spill] sm:$0xff] }
 0x156   : > { %v3053_v41 = vpack.c.bf16 %v2505_v28, %v2505_v28  ;;  %v2415_v53 = vadd.f32 %v4112_v9, %v2376_v31  ;;  %v2374_v52 = vadd.f32 %v2297_v11, %v1620_v7  ;;  %v1625_v55 = vadd.f32 %v3302_v8, %v1207_v22  ;;  %v4312_v7 = vld [vmem:[#allocation5_spill] sm:$0xff]  ;;  %v4320_v19 = vld [vmem:[#allocation16_spill] sm:$0xff] }
 0x157   : > { %v1556_v12 = vpop.f32.mrf.mxu0  ;;  %v2510_v13 = vsel %vm2446_vm5, %v2414_v4, %v2478_v42  ;;  %vm2444_vm6 = vcmp.ge.f32.partialorder %v2412_v10, 0.0  ;;  %v2476_v14 = vmul.f32 0.01, %v2412_v10  ;;  %v1226_v23 = vadd.f32 %v4310_v38, %v4309_v37 }
 0x158   : > { %2666 = vst.msk [vmem:[%s4128_s12 + $0x34] sm:$0xf] %vm2652_vm4, %v3053_v41  ;;  %v1623_v59 = vadd.f32 %v1556_v12, %v1199_v51  ;;  %v3058_v15 = vpack.c.bf16 %v2510_v13, %v2510_v13  ;;  %vm2447_vm7 = vcmp.ge.f32.partialorder %v2415_v53, 0.0  ;;  %v2479_v26 = vmul.f32 0.01, %v2415_v53  ;;  %v4314_v12 = vld [vmem:[#allocation7_spill] sm:$0xff] }
 0x159   : > { %v2413_v32 = vadd.f32 %v4112_v9, %v2374_v52  ;;  %v3350_v33 = vpop.f32.mrf.mxu1  ;;  %v3303_v27 = vpop.f32.mrf.mxu0  ;;  %v2508_v58 = vsel %vm2444_vm6, %v2412_v10, %v2476_v14  ;;  %v1218_v22 = vadd.f32 %v4312_v7, %v4311_v40  ;;  %v4315_v14 = vld [vmem:[#allocation12_spill] sm:$0xff] }
 0x15a   : > { %v2379_v43 = vadd.f32 %v3350_v33, %v1625_v55  ;;  %v1626_v44 = vadd.f32 %v3303_v27, %v1210_v48  ;;  %2671 = vst.msk [vmem:[%s4128_s12 + $0x48] sm:$0xf] %vm2652_vm4, %v3058_v15  ;;  %v3056_v16 = vpack.c.bf16 %v2508_v58, %v2508_v58  ;;  %v2511_v1 = vsel %vm2447_vm7, %v2415_v53, %v2479_v26  ;;  %v4313_v55 = vld [vmem:[#allocation11_spill] sm:$0xff] }
 0x15b   : > { %vm2445_vm8 = vcmp.ge.f32.partialorder %v2413_v32, 0.0  ;;  %v2477_v2 = vmul.f32 0.01, %v2413_v32  ;;  %v2310_v3 = vpop.f32.mrf.mxu1  ;;  %v1559_v17 = vpop.f32.mrf.mxu0  ;;  %v3059_v18 = vpack.c.bf16 %v2511_v1, %v2511_v1  ;;  %v1239_v13 = vadd.f32 %v4314_v12, %v4313_v55 }
 0x15c   : > { %v2418_v63 = vadd.f32 %v4112_v9, %v2379_v43  ;;  %v2377_v45 = vadd.f32 %v2310_v3, %v1623_v59  ;;  %v1624_v47 = vadd.f32 %v1559_v17, %v1202_v54  ;;  %2669 = vst.msk [vmem:[%s4128_s12 + $0x40] sm:$0xf] %vm2652_vm4, %v3056_v16  ;;  %v4316_v59 = vld [vmem:[#allocation10_spill] sm:$0xff] }
 0x15d   : > { %v2509_v46 = vsel %vm2445_vm8, %v2413_v32, %v2477_v2  ;;  %v3351_v50 = vpop.f32.mrf.mxu1  ;;  %v3306_v5 = vpop.f32.mrf.mxu0  ;;  %2672 = vst.msk [vmem:[%s4128_s12 + $0x4c] sm:$0xf] %vm2652_vm4, %v3059_v18  ;;  %v1231_v15 = vadd.f32 %v4316_v59, %v4315_v14  ;;  %v4317_v18 = vld [vmem:[#allocation14_spill] sm:$0xff] }
 0x15e   : > { %v3057_v6 = vpack.c.bf16 %v2509_v46, %v2509_v46  ;;  %vm2450_vm9 = vcmp.ge.f32.partialorder %v2418_v63, 0.0  ;;  %v2482_v34 = vmul.f32 0.01, %v2418_v63  ;;  %v2416_v35 = vadd.f32 %v4112_v9, %v2377_v45 }
 0x15f   : > { %v2380_v20 = vadd.f32 %v3351_v50, %v1626_v44  ;;  %v2313_v62 = vpop.f32.mrf.mxu1  ;;  %v1629_v49 = vadd.f32 %v3306_v5, %v1223_v60  ;;  %v1572_v25 = vpop.f32.mrf.mxu0 }
 0x160   : > { %2670 = vst.msk [vmem:[%s4128_s12 + $0x44] sm:$0xf] %vm2652_vm4, %v3057_v6  ;;  %v2514_v0 = vsel %vm2450_vm9, %v2418_v63, %v2482_v34  ;;  %vm2448_vm10 = vcmp.ge.f32.partialorder %v2416_v35, 0.0  ;;  %v2480_v36 = vmul.f32 0.01, %v2416_v35  ;;  %v2378_v21 = vadd.f32 %v2313_v62, %v1624_v47  ;;  %v4318_v63 = vld [vmem:[#allocation13_spill] sm:$0xff] }
 0x161   : > { %v3062_v24 = vpack.c.bf16 %v2514_v0, %v2514_v0  ;;  %v2419_v56 = vadd.f32 %v4112_v9, %v2380_v20  ;;  %v3354_v61 = vpop.f32.mrf.mxu1  ;;  %v1627_v4 = vadd.f32 %v1572_v25, %v1215_v30  ;;  %v3307_v39 = vpop.f32.mrf.mxu0  ;;  %v1242_v45 = vadd.f32 %v4318_v63, %v4317_v18 }
 0x162   : > { %v2512_v51 = vsel %vm2448_vm10, %v2416_v35, %v2480_v36  ;;  %v2417_v28 = vadd.f32 %v4112_v9, %v2378_v21  ;;  %v2383_v31 = vadd.f32 %v3354_v61, %v1629_v49  ;;  %v1630_v10 = vadd.f32 %v3307_v39, %v1226_v23  ;;  %v4319_v35 = vld [vmem:[#allocation15_spill] sm:$0xff] }
 0x163   : > { %2675 = vst.msk [vmem:[%s4128_s12 + $0x58] sm:$0xf] %vm2652_vm4, %v3062_v24  ;;  %v3060_v8 = vpack.c.bf16 %v2512_v51, %v2512_v51  ;;  %vm2451_vm11 = vcmp.ge.f32.partialorder %v2419_v56, 0.0  ;;  %v2483_v41 = vmul.f32 0.01, %v2419_v56  ;;  %v2326_v42 = vpop.f32.mrf.mxu1  ;;  %v1575_v11 = vpop.f32.mrf.mxu0  ;;  %v1234_v29 = vadd.f32 %v4320_v19, %v4319_v35 }
 0x164   : > { %vm2449_vm12 = vcmp.ge.f32.partialorder %v2417_v28, 0.0  ;;  %v2481_v48 = vmul.f32 0.01, %v2417_v28  ;;  %v2422_v53 = vadd.f32 %v4112_v9, %v2383_v31  ;;  %v2381_v52 = vadd.f32 %v2326_v42, %v1627_v4 }
 0x165   : > { %2673 = vst.msk [vmem:[%s4128_s12 + $0x50] sm:$0xf] %vm2652_vm4, %v3060_v8  ;;  %v2515_v26 = vsel %vm2451_vm11, %v2419_v56, %v2483_v41  ;;  %v3355_v32 = vpop.f32.mrf.mxu1  ;;  %v1628_v33 = vadd.f32 %v1575_v11, %v1218_v22  ;;  %v3310_v27 = vpop.f32.mrf.mxu0 }
 0x166   : > { %v3063_v54 = vpack.c.bf16 %v2515_v26, %v2515_v26  ;;  %v2513_v58 = vsel %vm2449_vm12, %v2417_v28, %v2481_v48  ;;  %vm2454_vm13 = vcmp.ge.f32.partialorder %v2422_v53, 0.0  ;;  %v2486_v43 = vmul.f32 0.01, %v2422_v53 }
 0x167   : > { %v3061_v44 = vpack.c.bf16 %v2513_v58, %v2513_v58  ;;  %v2420_v16 = vadd.f32 %v4112_v9, %v2381_v52  ;;  %v2384_v1 = vadd.f32 %v3355_v32, %v1630_v10  ;;  %v2329_v2 = vpop.f32.mrf.mxu1  ;;  %v1633_v3 = vadd.f32 %v3310_v27, %v1239_v13  ;;  %v1588_v17 = vpop.f32.mrf.mxu0 }
 0x168   : > { %2676 = vst.msk [vmem:[%s4128_s12 + $0x5c] sm:$0xf] %vm2652_vm4, %v3063_v54  ;;  %v2518_v47 = vsel %vm2454_vm13, %v2422_v53, %v2486_v43  ;;  %v2382_v57 = vadd.f32 %v2329_v2, %v1628_v33  ;;  %v1631_v60 = vadd.f32 %v1588_v17, %v1231_v15 }
 0x169   : > { %2674 = vst.msk [vmem:[%s4128_s12 + $0x54] sm:$0xf] %vm2652_vm4, %v3061_v44  ;;  %v3066_v46 = vpack.c.bf16 %v2518_v47, %v2518_v47  ;;  %vm2452_vm14 = vcmp.ge.f32.partialorder %v2420_v16, 0.0  ;;  %v2484_v50 = vmul.f32 0.01, %v2420_v16  ;;  %v2423_v5 = vadd.f32 %v4112_v9, %v2384_v1  ;;  %v3358_v6 = vpop.f32.mrf.mxu1  ;;  %v3311_v34 = vpop.f32.mrf.mxu0 }
 0x16a   : > { %v2421_v30 = vadd.f32 %v4112_v9, %v2382_v57  ;;  %v2387_v20 = vadd.f32 %v3358_v6, %v1633_v3  ;;  %v1634_v0 = vadd.f32 %v3311_v34, %v1242_v45 }
 0x16b   : > { %2679 = vst.msk [vmem:[%s4128_s12 + $0x68] sm:$0xf] %vm2652_vm4, %v3066_v46  ;;  %v2516_v62 = vsel %vm2452_vm14, %v2420_v16, %v2484_v50  ;;  %vm2455_vm15 = vcmp.ge.f32.partialorder %v2423_v5, 0.0  ;;  %v2487_v49 = vmul.f32 0.01, %v2423_v5  ;;  %v2342_v25 = vpop.f32.mrf.mxu1  ;;  %v1591_v36 = vpop.f32.mrf.mxu0 }
 0x16c   : > { %v3064_v21 = vpack.c.bf16 %v2516_v62, %v2516_v62  ;;  %vm2453_vm0 = vcmp.ge.f32.partialorder %v2421_v30, 0.0  ;;  %v2485_v37 = vmul.f32 0.01, %v2421_v30  ;;  %v2426_v38 = vadd.f32 %v4112_v9, %v2387_v20 }
 0x16d   : > { %v2519_v23 = vsel %vm2455_vm15, %v2423_v5, %v2487_v49  ;;  %v2385_v24 = vadd.f32 %v2342_v25, %v1631_v60  ;;  %v3359_v56 = vpop.f32.mrf.mxu1  ;;  %v1632_v61 = vadd.f32 %v1591_v36, %v1234_v29 }
 0x16e   : > { %2677 = vst.msk [vmem:[%s4128_s12 + $0x60] sm:$0xf] %vm2652_vm4, %v3064_v21  ;;  %v3067_v4 = vpack.c.bf16 %v2519_v23, %v2519_v23  ;;  %v2517_v39 = vsel %vm2453_vm0, %v2421_v30, %v2485_v37  ;;  %vm2458_vm1 = vcmp.ge.f32.partialorder %v2426_v38, 0.0  ;;  %v2490_v40 = vmul.f32 0.01, %v2426_v38 }
 0x16f   : > { %v3065_v7 = vpack.c.bf16 %v2517_v39, %v2517_v39  ;;  %v2424_v22 = vadd.f32 %v4112_v9, %v2385_v24  ;;  %v2388_v51 = vadd.f32 %v3359_v56, %v1634_v0  ;;  %v2345_v28 = vpop.f32.mrf.mxu1 }
 0x170   : > { %2680 = vst.msk [vmem:[%s4128_s12 + $0x6c] sm:$0xf] %vm2652_vm4, %v3067_v4  ;;  %v2522_v31 = vsel %vm2458_vm1, %v2426_v38, %v2490_v40  ;;  %v2386_v8 = vadd.f32 %v2345_v28, %v1632_v61 }
 0x171   : > { %2678 = vst.msk [vmem:[%s4128_s12 + $0x64] sm:$0xf] %vm2652_vm4, %v3065_v7  ;;  %v3070_v41 = vpack.c.bf16 %v2522_v31, %v2522_v31  ;;  %vm2456_vm2 = vcmp.ge.f32.partialorder %v2424_v22, 0.0  ;;  %v2488_v42 = vmul.f32 0.01, %v2424_v22  ;;  %v2427_v10 = vadd.f32 %v4112_v9, %v2388_v51 }
 0x172   : > { %v2425_v11 = vadd.f32 %v4112_v9, %v2386_v8 }
 0x173   : > { %2683 = vst.msk [vmem:[%s4128_s12 + $0x78] sm:$0xf] %vm2652_vm4, %v3070_v41  ;;  %v2520_v48 = vsel %vm2456_vm2, %v2424_v22, %v2488_v42  ;;  %vm2459_vm3 = vcmp.ge.f32.partialorder %v2427_v10, 0.0  ;;  %v2491_v53 = vmul.f32 0.01, %v2427_v10 }
 0x174   : > { %v3068_v52 = vpack.c.bf16 %v2520_v48, %v2520_v48  ;;  %vm2457_vm5 = vcmp.ge.f32.partialorder %v2425_v11, 0.0  ;;  %v2489_v55 = vmul.f32 0.01, %v2425_v11 }
 0x175   : > { %v2523_v12 = vsel %vm2459_vm3, %v2427_v10, %v2491_v53 }
 0x176   : > { %2681 = vst.msk [vmem:[%s4128_s12 + $0x70] sm:$0xf] %vm2652_vm4, %v3068_v52  ;;  %v3071_v13 = vpack.c.bf16 %v2523_v12, %v2523_v12  ;;  %v2521_v14 = vsel %vm2457_vm5, %v2425_v11, %v2489_v55 }
 0x177   : > { %v3069_v59 = vpack.c.bf16 %v2521_v14, %v2521_v14 }
 0x178   : > { %2684 = vst.msk [vmem:[%s4128_s12 + $0x7c] sm:$0xf] %vm2652_vm4, %v3071_v13 }
 0x179   : > { %2682 = vst.msk [vmem:[%s4128_s12 + $0x74] sm:$0xf] %vm2652_vm4, %v3069_v59 }
 0x17a PF: > { %s13_s14 = sadd.s32 1, %s3471_s14   ;;  %s4321_s12 = smov %s3467_s13 }
 0x17b   : > { %p10_p5 = scmp.ge.s32.totalorder %s13_s14, 4   ;;  %s4322_s13 = smov %s4324_s15 }
 0x17d   :  { %12 = sbr.rel (!%p10_p5) target bundleno = 2 (0x2), region = 67 }

// kernel: hrnet_forward.14
= control target key start
LH: loop header
LB: loop body
LE: loop exit
PB: predicated region body
PF: predicated region fallthrough
CT: control target
= control target key end

     0   :  { %s1653_s12 = smov 0   ;;  %s1655_s13 = smov 0   ;;  %s1903_s0 = inlined_call_operand.vmem [shape: bf16[2,9,9,128], index: 0, kind: input, shape index: {}]   ;;  %s1904_s1 = inlined_call_operand.vmem [shape: bf16[4,128,16], index: 1, kind: input, shape index: {}]   ;;  %s1905_s2 = inlined_call_operand.vmem [shape: f32[1,16], index: 2, kind: input, shape index: {}]   ;;  %s1906_s3 = inlined_call_operand.vmem [shape: bf16[2,64,16], index: 3, kind: output, shape index: {}]  }
   0x1   :  { %s1657_s14 = smov 0  }
   0x2 LB: > { %s25_s15 = sadd.s32 1, %s1627_s13  ;;  %p1256_p0 = scmp.ge.s32.totalorder %s1631_s14, 1  ;;  %s1631_s14 = sphi %s1657_s14, %s13_s14   ;;  %s1627_s13 = sphi %s1655_s13, %s1910_s13   ;;  %s1623_s12 = sphi %s1653_s12, %s1909_s12  }
   0x3   : > { %p27_p1 = scmp.ge.s32.totalorder %s25_s15, 2  ;;  %p151_p2 = scmp.lt.s32.totalorder %s1631_s14, 3 }
   0x5   : > { %s1912_s15 = smov (%p27_p1, %s25_s15), 0  ;;  %p152_p3 = pnand %p1256_p0, %p151_p2 }
   0x6   : > { %p179_p4 = scmp.lt.s32.totalorder (!%p152_p3), %s1623_s12, 1 }
   0x7   : > { %155 = sbr.rel (%p152_p3) target bundleno = 297 (0x129), region = 32 }
   0xc   : > { %v1569_v0 = vld [vmem:[%s1904_s1 + $0x78] sm:$0xff]   ;;  %v1571_v2 = vld [vmem:[%s1904_s1 + $0x70] sm:$0xff]   ;;  %v1573_v4 = vld [vmem:[%s1904_s1 + $0x68] sm:$0xff]   ;;  %s1914_s12 = smov (!%p179_p4, %s1623_s12), 1  ;;  %vm231_vm0 = vsmask.f32 3328 }
   0xd   : > { %v1570_v1 = vld [vmem:[%s1904_s1 + $0x38] sm:$0xff]   ;;  %1448 = vmatprep.subr.bf16.mxu0 %v1569_v0  ;;  %v1572_v3 = vld [vmem:[%s1904_s1 + $0x30] sm:$0xff]   ;;  %v1574_v5 = vld [vmem:[%s1904_s1 + $0x28] sm:$0xff]   ;;  %s1544_s5 = smul.u32 72, %s1914_s12  ;;  %vm232_vm1 = vsmask.f32 7440 }
   0xe   : > { %1472 = vmatprep.subr.bf16.mxu1 %v1570_v1  ;;  %1449 = vmatpush3.bf16.msra.mxu0 %v1569_v0  ;;  %v1575_v6 = vld [vmem:[%s1904_s1 + $0x60] sm:$0xff]   ;;  %v1577_v8 = vld [vmem:[%s1904_s1 + $0x58] sm:$0xff]   ;;  %v1579_v10 = vld [vmem:[%s1904_s1 + $0x50] sm:$0xff]   ;;  %s1391_s18 = sshll.u32 %s1914_s12, 5  ;;  %vm1156_vm4 = vcmask 125952  }
   0xf   : > { %1473 = vmatpush3.bf16.msra.mxu1 %v1570_v1  ;;  %1450 = vmatprep.subr.bf16.mxu0 %v1571_v2  ;;  %v1576_v7 = vld [vmem:[%s1904_s1 + $0x20] sm:$0xff]   ;;  %v1578_v9 = vld [vmem:[%s1904_s1 + $0x18] sm:$0xff]   ;;  %s1707_s16 = scalar_lea.vmem %s1903_s0, %s1544_s5  ;;  %v1580_v11 = vld [vmem:[%s1904_s1 + $0x10] sm:$0xff]   ;;  %s1870_s21 = scalar_lea.vmem %s1906_s3, %s1391_s18 }
  0x10   : > { %1474 = vmatprep.subr.bf16.mxu1 %v1572_v3  ;;  %v199_v12 = vld [vmem:[%s1707_s16] sm:$0xf]  ;;  %v200_v13 = vld [vmem:[%s1707_s16 + $0x8] sm:$0xf]  ;;  %v223_v14 = vld [vmem:[%s1707_s16 + $0x4] sm:$0x1] }
  0x11   : > { %v224_v15 = vld [vmem:[%s1707_s16 + $0xc] sm:$0x1]  ;;  %v1288_v16 = vcombine.low %v199_v12, %v200_v13  ;;  %v235_v18 = vshrl.u32 %v199_v12, 16  ;;  %v238_v19 = vshll.u32 %v199_v12, 16  ;;  %v244_v20 = vshll.u32 %v223_v14, 16  ;;  %v1583_v41 = vld [vmem:[%s1904_s1 + $0x40] sm:$0xff]   ;;  %vm1742_vm2 = vmor %vm231_vm0, %vm232_vm1 }
  0x12   : > { %1451 = vmatpush3.bf16.msra.mxu0 %v1571_v2  ;;  %v1581_v17 = vld [vmem:[%s1904_s1 + $0x48] sm:$0xff]   ;;  %v249_v21 = vshrl.u32 %v200_v13, 16  ;;  %v1723_v22 = vld [vmem:[%s1707_s16 + $0x10] sm:$0xf]  ;;  %v252_v24 = vshll.u32 %v200_v13, 16  ;;  %v258_v25 = vshll.u32 %v224_v15, 16 }
  0x13   : > { %1475 = vmatpush3.bf16.msra.mxu1 %v1572_v3  ;;  %1452 = vmatprep.subr.bf16.mxu0 %v1573_v4  ;;  %v1582_v23 = vld [vmem:[%s1904_s1 + $0x8] sm:$0xff]   ;;  %v1729_v26 = vld [vmem:[%s1707_s16 + $0x18] sm:$0xf]  ;;  %v225_v27 = vld [vmem:[%s1707_s16 + $0x14] sm:$0x1]  ;;  %v237_v28 = vrot.slane %v235_v18, 4 }
  0x14   : > { %1476 = vmatprep.subr.bf16.mxu1 %v1574_v5  ;;  %1488 = vmatprep.mubr.bf16.mxu1 %v1288_v16  ;;  %v240_v29 = vrot.slane %v238_v19, 5  ;;  %v246_v30 = vrot.slane %v244_v20, 5  ;;  %v251_v31 = vrot.slane %v249_v21, 4  ;;  %v226_v32 = vld [vmem:[%s1707_s16 + $0x1c] sm:$0x1]  ;;  %v254_v33 = vrot.slane %v252_v24, 5 }
  0x15   : > { %v260_v34 = vrot.slane %v258_v25, 5  ;;  %v263_v35 = vshrl.u32 %v1723_v22, 16  ;;  %v266_v36 = vshll.u32 %v1723_v22, 16  ;;  %v272_v38 = vshll.u32 %v225_v27, 16  ;;  %v1584_v47 = vld [vmem:[%s1904_s1] sm:$0xff]   ;;  %v1587_v61 = vld [vmem:[%s1904_s1 + $0xb8] sm:$0xff]  }
  0x16   : > { %1453 = vmatpush3.bf16.msra.mxu0 %v1573_v4  ;;  %v241_v37 = vor.u32 %v240_v29, %v237_v28  ;;  %v277_v39 = vshrl.u32 %v1729_v26, 16  ;;  %v280_v40 = vshll.u32 %v1729_v26, 16  ;;  %v255_v43 = vor.u32 %v254_v33, %v251_v31  ;;  %v1588_v63 = vld [vmem:[%s1904_s1 + $0xf8] sm:$0xff]   ;;  %v1589_v3 = vld [vmem:[%s1904_s1 + $0xb0] sm:$0xff]   ;;  %v1592_v13 = vld [vmem:[%s1904_s1 + $0xe8] sm:$0xff]  }
  0x17   : > { %1477 = vmatpush3.bf16.msra.mxu1 %v1574_v5  ;;  %1454 = vmatprep.subr.bf16.mxu0 %v1575_v6  ;;  %v265_v44 = vrot.slane %v263_v35, 4  ;;  %v268_v45 = vrot.slane %v266_v36, 5  ;;  %v286_v46 = vshll.u32 %v226_v32, 16  ;;  %v274_v53 = vrot.slane %v272_v38, 5  ;;  %v1590_v4 = vld [vmem:[%s1904_s1 + $0xf0] sm:$0xff]   ;;  %v1593_v36 = vld [vmem:[%s1904_s1 + $0xa0] sm:$0xff]  }
  0x18   : > { %1478 = vmatprep.subr.bf16.mxu1 %v1576_v7  ;;  %v242_v48 = vrot.slane %v241_v37, 4  ;;  %v279_v49 = vrot.slane %v277_v39, 4  ;;  %v282_v50 = vrot.slane %v280_v40, 5  ;;  %v256_v51 = vrot.slane %v255_v43, 4  ;;  %v203_v5 = vld [vmem:[%s1707_s16 + $0x20] sm:$0xf] }
  0x19   : > { %v269_v52 = vor.u32 %v268_v45, %v265_v44  ;;  %v288_v56 = vrot.slane %v286_v46, 5  ;;  %v1289_v2 = vcombine.low %v1723_v22, %v1729_v26  ;;  %v205_v18 = vld [vmem:[%s1707_s16 + $0x30] sm:$0xf]  ;;  %v206_v21 = vld [vmem:[%s1707_s16 + $0x38] sm:$0xf]  ;;  %v1594_v40 = vld [vmem:[%s1904_s1 + $0xe0] sm:$0xff]  }
  0x1a   : > { %1455 = vmatpush3.bf16.msra.mxu0 %v1575_v6  ;;  %v247_v54 = vsel %vm1742_vm2, %v242_v48, %v246_v30  ;;  %v283_v55 = vor.u32 %v282_v50, %v279_v49  ;;  %v261_v57 = vsel %vm1742_vm2, %v256_v51, %v260_v34  ;;  %v204_v6 = vld [vmem:[%s1707_s16 + $0x28] sm:$0xf]  ;;  %v229_v22 = vld [vmem:[%s1707_s16 + $0x34] sm:$0x1]  ;;  %v230_v27 = vld [vmem:[%s1707_s16 + $0x3c] sm:$0x1]  ;;  %v1291_v48 = vcombine.low %v205_v18, %v206_v21 }
  0x1b   : > { %1479 = vmatpush3.bf16.msra.mxu1 %v1576_v7  ;;  %1456 = vmatprep.subr.bf16.mxu0 %v1577_v8  ;;  %v270_v58 = vrot.slane %v269_v52, 4  ;;  %v1276_v59 = vcombine.low %v247_v54, %v261_v57  ;;  %v1591_v7 = vld [vmem:[%s1904_s1 + $0xa8] sm:$0xff]   ;;  %v1290_v12 = vcombine.low %v203_v5, %v204_v6  ;;  %v305_v15 = vshrl.u32 %v204_v6, 16  ;;  %v1595_v52 = vld [vmem:[%s1904_s1 + $0x98] sm:$0xff]  }
  0x1c   : > { %1480 = vmatprep.subr.bf16.mxu1 %v1578_v9  ;;  %v284_v60 = vrot.slane %v283_v55, 4  ;;  %v308_v16 = vshll.u32 %v204_v6, 16  ;;  %v319_v29 = vshrl.u32 %v205_v18, 16  ;;  %v322_v30 = vshll.u32 %v205_v18, 16  ;;  %v1596_v55 = vld [vmem:[%s1904_s1 + $0xd8] sm:$0xff]  }
  0x1d   : > { %v275_v62 = vsel %vm1742_vm2, %v270_v58, %v274_v53  ;;  %1464 = vmatprep.mubr.bf16.mxu0 %v1276_v59  ;;  %v307_v24 = vrot.slane %v305_v15, 4  ;;  %v328_v31 = vshll.u32 %v229_v22, 16  ;;  %v333_v33 = vshrl.u32 %v206_v21, 16  ;;  %v1605_v58 = vld [vmem:[%s1707_s16 + $0x8] ss:$8 sps:$4 sm:$0xff]  }
  0x1e   : > { %1457 = vmatpush3.bf16.msra.mxu0 %v1577_v8  ;;  %v289_v0 = vsel %vm1742_vm2, %v284_v60, %v288_v56  ;;  %v227_v8 = vld [vmem:[%s1707_s16 + $0x24] sm:$0x1]  ;;  %v310_v25 = vrot.slane %v308_v16, 5  ;;  %v336_v34 = vshll.u32 %v206_v21, 16  ;;  %v342_v35 = vshll.u32 %v230_v27, 16 }
  0x1f   : > { %1481 = vmatpush3.bf16.msra.mxu1 %v1578_v9  ;;  %1458 = vmatprep.subr.bf16.mxu0 %v1579_v10  ;;  %v1277_v1 = vcombine.low %v275_v62, %v289_v0  ;;  %v228_v9 = vld [vmem:[%s1707_s16 + $0x2c] sm:$0x1]  ;;  %v300_v14 = vshll.u32 %v227_v8, 16  ;;  %v321_v38 = vrot.slane %v319_v29, 4  ;;  %v324_v39 = vrot.slane %v322_v30, 5  ;;  %v1599_v0 = vld [vmem:[%s1904_s1 + $0x90] sm:$0xff]  }
  0x20   : > { %1482 = vmatprep.subr.bf16.mxu1 %v1580_v11  ;;  %v311_v32 = vor.u32 %v310_v25, %v307_v24  ;;  %v335_v43 = vrot.slane %v333_v33, 4  ;;  %v338_v44 = vrot.slane %v336_v34, 5  ;;  %v344_v51 = vrot.slane %v342_v35, 5  ;;  %v1336_v60 = vld [vmem:[%s1707_s16 + $0x8] sm:$0xf]  ;;  %v1603_v34 = vld [vmem:[%s1904_s1 + $0x80] sm:$0xff]  }
  0x21   : > { %v325_v46 = vor.u32 %v324_v39, %v321_v38  ;;  %v1338_v62 = vld [vmem:[%s1707_s16 + $0x10] sm:$0xf]  ;;  %v1341_v18 = vld [vmem:[%s1707_s16 + $0x1c] sm:$0x1]  ;;  %v1343_v22 = vld [vmem:[%s1707_s16 + $0x24] sm:$0x1] }
  0x22   : > { %1459 = vmatpush3.bf16.msra.mxu0 %v1579_v10  ;;  %v291_v10 = vshrl.u32 %v203_v5, 16  ;;  %v339_v50 = vor.u32 %v338_v44, %v335_v43  ;;  %v834_v6 = vshrl.u32 %v1338_v62, 16  ;;  %v857_v25 = vshll.u32 %v1341_v18, 16  ;;  %v1604_v35 = vld [vmem:[%s1904_s1 + $0xc0] sm:$0xff]   ;;  %v1344_v43 = vld [vmem:[%s1707_s16 + $0x28] sm:$0xf] }
  0x23   : > { %1483 = vmatpush3.bf16.msra.mxu1 %v1580_v11  ;;  %1460 = vmatprep.subr.bf16.mxu0 %v1581_v17  ;;  %v294_v11 = vshll.u32 %v203_v5, 16  ;;  %v326_v54 = vrot.slane %v325_v46, 4  ;;  %v1600_v5 = vld [vmem:[%s1904_s1 + $0xd0] sm:$0xff]   ;;  %v871_v29 = vshll.u32 %v1343_v22, 16  ;;  %v1345_v44 = vld [vmem:[%s1707_s16 + $0x2c] sm:$0x1] }
  0x24   : > { %1484 = vmatprep.subr.bf16.mxu1 %v1582_v23  ;;  %v293_v19 = vrot.slane %v291_v10, 4  ;;  %v340_v56 = vrot.slane %v339_v50, 4  ;;  %v859_v33 = vrot.slane %v857_v25, 5  ;;  %v879_v50 = vshll.u32 %v1344_v43, 16 }
  0x25   : > { %v296_v20 = vrot.slane %v294_v11, 5  ;;  %v1601_v11 = vld [vmem:[%s1904_s1 + $0x88] sm:$0xff]   ;;  %v873_v39 = vrot.slane %v871_v29, 5 }
  0x26   : > { %1461 = vmatpush3.bf16.msra.mxu0 %v1581_v17  ;;  %v314_v17 = vshll.u32 %v228_v9, 16  ;;  %v345_v59 = vsel %vm1742_vm2, %v340_v56, %v344_v51 }
  0x27   : > { %1485 = vmatpush3.bf16.msra.mxu1 %v1582_v23  ;;  %1462 = vmatprep.subr.bf16.mxu0 %v1583_v41  ;;  %v302_v23 = vrot.slane %v300_v14, 5  ;;  %v297_v28 = vor.u32 %v296_v20, %v293_v19  ;;  %v1342_v19 = vld [vmem:[%s1707_s16 + $0x20] sm:$0xf]  ;;  %v1602_v20 = vld [vmem:[%s1904_s1 + $0xc8] sm:$0xff]  }
  0x28   : > { %1486 = vmatprep.subr.bf16.mxu1 %v1584_v47  ;;  %v316_v26 = vrot.slane %v314_v17, 5  ;;  %v1340_v17 = vld [vmem:[%s1707_s16 + $0x18] sm:$0xf]  ;;  %v862_v27 = vshrl.u32 %v1342_v19, 16 }
  0x29   : > { %v298_v37 = vrot.slane %v297_v28, 4  ;;  %v851_v24 = vshll.u32 %v1340_v17, 16  ;;  %v865_v28 = vshll.u32 %v1342_v19, 16 }
  0x2a   : > { %1463 = vmatpush3.bf16.msra.mxu0 %v1583_v41  ;;  %v312_v41 = vrot.slane %v311_v32, 4 }
  0x2b   : > { %1487 = vmatpush3.bf16.msra.mxu1 %v1584_v47  ;;  %1496 = vmatprep.subr.bf16.mxu0 %v1587_v61  ;;  %v303_v45 = vsel %vm1742_vm2, %v298_v37, %v302_v23  ;;  %v330_v47 = vrot.slane %v328_v31, 5  ;;  %v848_v23 = vshrl.u32 %v1340_v17, 16  ;;  %v853_v32 = vrot.slane %v851_v24, 5 }
  0x2c   : > { %1520 = vmatprep.subr.bf16.mxu1 %v1588_v63  ;;  %v317_v49 = vsel %vm1742_vm2, %v312_v41, %v316_v26  ;;  %v864_v37 = vrot.slane %v862_v27, 4  ;;  %v867_v38 = vrot.slane %v865_v28, 5 }
  0x2d   : > { %1465 = vmatmul.mubr.bf16.vlgmr.msra.gmra.mxu0 %v1277_v1  ;;  %v1278_v53 = vcombine.low %v303_v45, %v317_v49  ;;  %v331_v57 = vsel %vm1742_vm2, %v326_v54, %v330_v47  ;;  %v1339_v1 = vld [vmem:[%s1707_s16 + $0x14] sm:$0x1]  ;;  %v850_v31 = vrot.slane %v848_v23, 4  ;;  %v1346_v45 = vld [vmem:[%s1707_s16 + $0x30] sm:$0xf]  ;;  %v876_v49 = vshrl.u32 %v1344_v43, 16 }
  0x2e   : > { %1489 = vmatmul.mubr.bf16.vlgmr.msra.gmra.mxu1 %v1289_v2  ;;  %1497 = vmatpush3.bf16.msra.mxu0 %v1587_v61  ;;  %v1337_v61 = vld [vmem:[%s1707_s16 + $0xc] sm:$0x1]  ;;  %v820_v2 = vshrl.u32 %v1336_v60, 16  ;;  %v843_v8 = vshll.u32 %v1339_v1, 16  ;;  %v868_v47 = vor.u32 %v867_v38, %v864_v37  ;;  %v893_v54 = vshll.u32 %v1346_v45, 16 }
  0x2f   : > { %1521 = vmatpush3.bf16.msra.mxu1 %v1588_v63  ;;  %1498 = vmatprep.subr.bf16.mxu0 %v1589_v3  ;;  %v1279_v63 = vcombine.low %v331_v57, %v345_v59  ;;  %v854_v41 = vor.u32 %v853_v32, %v850_v31  ;;  %v878_v57 = vrot.slane %v876_v49, 4 }
  0x30   : > { %1522 = vmatprep.subr.bf16.mxu1 %v1590_v4  ;;  %1492 = vmatprep.mubr.bf16.mxu1 %v1290_v12  ;;  %v822_v9 = vrot.slane %v820_v2, 4  ;;  %v845_v15 = vrot.slane %v843_v8, 5  ;;  %v869_v56 = vrot.slane %v868_v47, 4  ;;  %v1607_v8 = vld [vmem:[%s1707_s16 + $0x28] ss:$8 sps:$4 sm:$0xff]  }
  0x31   : > { %1468 = vmatprep.mubr.bf16.mxu0 %v1278_v53  ;;  %v855_v51 = vrot.slane %v854_v41, 4  ;;  %v890_v53 = vshrl.u32 %v1346_v45, 16 }
  0x32   : > { %1499 = vmatpush3.bf16.msra.mxu0 %v1589_v3  ;;  %v823_v3 = vshll.u32 %v1336_v60, 16  ;;  %v874_v1 = vsel %vm1742_vm2, %v869_v56, %v873_v39  ;;  %v1862_v56 = vld [vmem:[%s1905_s2] ss:$0 sm:$0xff] }
  0x33   : > { %1523 = vmatpush3.bf16.msra.mxu1 %v1590_v4  ;;  %1500 = vmatprep.subr.bf16.mxu0 %v1591_v7  ;;  %v829_v4 = vshll.u32 %v1337_v61, 16  ;;  %v860_v60 = vsel %vm1742_vm2, %v855_v51, %v859_v33 }
  0x34   : > { %1524 = vmatprep.subr.bf16.mxu1 %v1592_v13  ;;  %v825_v10 = vrot.slane %v823_v3, 5 }
  0x35   : > { %1469 = vmatmul.mubr.bf16.gmra.mxu0 %v1279_v63  ;;  %v831_v12 = vrot.slane %v829_v4, 5  ;;  %v895_v63 = vrot.slane %v893_v54, 5  ;;  %v1349_v4 = vld [vmem:[%s1707_s16 + $0x3c] sm:$0x1] }
  0x36   : > { %1501 = vmatpush3.bf16.msra.mxu0 %v1591_v7  ;;  %1493 = vmatmul.mubr.bf16.gmra.mxu1 %v1291_v48  ;;  %v837_v7 = vshll.u32 %v1338_v62, 16  ;;  %v826_v16 = vor.u32 %v825_v10, %v822_v9  ;;  %v1347_v48 = vld [vmem:[%s1707_s16 + $0x34] sm:$0x1]  ;;  %v892_v62 = vrot.slane %v890_v53, 4  ;;  %v1351_v10 = vld [vmem:[%s1707_s16 + $0x44] sm:$0x1] }
  0x37   : > { %1525 = vmatpush3.bf16.msra.mxu1 %v1592_v13  ;;  %1502 = vmatprep.subr.bf16.mxu0 %v1593_v36  ;;  %v836_v13 = vrot.slane %v834_v6, 4  ;;  %v899_v59 = vshll.u32 %v1347_v48, 16  ;;  %v927_v19 = vshll.u32 %v1351_v10, 16 }
  0x38   : > { %1526 = vmatprep.subr.bf16.mxu1 %v1594_v40  ;;  %1512 = vmatprep.mubr.bf16.mxu0 %v1605_v58  ;;  %v839_v14 = vrot.slane %v837_v7, 5  ;;  %v827_v26 = vrot.slane %v826_v16, 4  ;;  %v881_v58 = vrot.slane %v879_v50, 5  ;;  %v1369_v7 = vcombine.low %v860_v60, %v874_v1 }
  0x39   : > { %v901_v3 = vrot.slane %v899_v59, 5  ;;  %v896_v9 = vor.u32 %v895_v63, %v892_v62  ;;  %v929_v28 = vrot.slane %v927_v19, 5 }
  0x3a   : > { %1503 = vmatpush3.bf16.msra.mxu0 %v1593_v36  ;;  %v840_v21 = vor.u32 %v839_v14, %v836_v13  ;;  %v832_v36 = vsel %vm1742_vm2, %v827_v26, %v831_v12  ;;  %v882_v2 = vor.u32 %v881_v58, %v878_v57  ;;  %v913_v12 = vshll.u32 %v1349_v4, 16 }
  0x3b   : > { %1527 = vmatpush3.bf16.msra.mxu1 %v1594_v40  ;;  %1504 = vmatprep.subr.bf16.mxu0 %v1595_v52  ;;  %v897_v17 = vrot.slane %v896_v9, 4 }
  0x3c   : > { %1528 = vmatprep.subr.bf16.mxu1 %v1596_v55  ;;  %v841_v30 = vrot.slane %v840_v21, 4  ;;  %v883_v13 = vrot.slane %v882_v2, 4  ;;  %v915_v25 = vrot.slane %v913_v12, 5 }
  0x3d   : > { %v902_v23 = vsel %vm1742_vm2, %v897_v17, %v901_v3 }
  0x3e   : > { %1505 = vmatpush3.bf16.msra.mxu0 %v1595_v52  ;;  %v846_v40 = vsel %vm1742_vm2, %v841_v30, %v845_v15  ;;  %v885_v52 = vshll.u32 %v1345_v44, 16  ;;  %v1608_v30 = vld [vmem:[%s1707_s16 + $0x38] ss:$8 sps:$4 sm:$0xff]  }
  0x3f   : > { %1529 = vmatpush3.bf16.msra.mxu1 %v1596_v55  ;;  %1506 = vmatprep.subr.bf16.mxu0 %v1599_v0  ;;  %v1368_v46 = vcombine.low %v832_v36, %v846_v40  ;;  %v1606_v55 = vld [vmem:[%s1707_s16 + $0x18] ss:$8 sps:$4 sm:$0xff]  }
  0x40   : > { %1530 = vmatprep.subr.bf16.mxu1 %v1600_v5  ;;  %v887_v61 = vrot.slane %v885_v52, 5 }
  0x41   : > { %1536 = vmatprep.mubr.bf16.mxu1 %v1368_v46 }
  0x42   : > { %1507 = vmatpush3.bf16.msra.mxu0 %v1599_v0  ;;  %v1348_v0 = vld [vmem:[%s1707_s16 + $0x38] sm:$0xf] }
  0x43   : > { %1531 = vmatpush3.bf16.msra.mxu1 %v1600_v5  ;;  %1508 = vmatprep.subr.bf16.mxu0 %v1601_v11  ;;  %v1350_v5 = vld [vmem:[%s1707_s16 + $0x40] sm:$0xf]  ;;  %v904_v6 = vshrl.u32 %v1348_v0, 16 }
  0x44   : > { %1532 = vmatprep.subr.bf16.mxu1 %v1602_v20  ;;  %v918_v15 = vshrl.u32 %v1350_v5, 16  ;;  %v921_v16 = vshll.u32 %v1350_v5, 16 }
  0x45   : > { %v906_v14 = vrot.slane %v904_v6, 4 }
  0x46   : > { %1509 = vmatpush3.bf16.msra.mxu0 %v1601_v11  ;;  %v907_v11 = vshll.u32 %v1348_v0, 16  ;;  %v920_v21 = vrot.slane %v918_v15, 4  ;;  %v923_v22 = vrot.slane %v921_v16, 5 }
  0x47   : > { %1533 = vmatpush3.bf16.msra.mxu1 %v1602_v20  ;;  %1510 = vmatprep.subr.bf16.mxu0 %v1603_v34  ;;  %v888_v20 = vsel %vm1742_vm2, %v883_v13, %v887_v61 }
  0x48   : > { %1534 = vmatprep.subr.bf16.mxu1 %v1604_v35  ;;  %v909_v18 = vrot.slane %v907_v11, 5  ;;  %v1370_v26 = vcombine.low %v888_v20, %v902_v23  ;;  %v924_v27 = vor.u32 %v923_v22, %v920_v21 }
  0x4a   : > { %1511 = vmatpush3.bf16.msra.mxu0 %v1603_v34  ;;  %v910_v24 = vor.u32 %v909_v18, %v906_v14  ;;  %v925_v31 = vrot.slane %v924_v27, 4 }
  0x4b   : > { %1535 = vmatpush3.bf16.msra.mxu1 %v1604_v35 }
  0x4c   : > { %v911_v29 = vrot.slane %v910_v24, 4  ;;  %v930_v33 = vsel %vm1742_vm2, %v925_v31, %v929_v28 }
  0x4d   : > { %1513 = vmatmul.mubr.bf16.vlgmr.msra.gmra.mxu0 %v1606_v55 }
  0x4e   : > { %1537 = vmatmul.mubr.bf16.vlgmr.msra.gmra.mxu1 %v1369_v7  ;;  %1516 = vmatprep.mubr.bf16.mxu0 %v1607_v8  ;;  %v916_v32 = vsel %vm1742_vm2, %v911_v29, %v915_v25 }
  0x4f   : > { %1540 = vmatprep.mubr.bf16.mxu1 %v1370_v26  ;;  %v1371_v34 = vcombine.low %v916_v32, %v930_v33 }
  0x55   : > { %1517 = vmatmul.mubr.bf16.gmra.mxu0 %v1608_v30 }
  0x56   : > { %1541 = vmatmul.mubr.bf16.gmra.mxu1 %v1371_v34 }
  0xed   : > { %v1466_v35 = vpop.f32.mrf.mxu0 }
  0xee   : > { %v1490_v36 = vpop.f32.mrf.mxu1 }
  0xef   : > { %v461_v37 = vpop.f32.mrf.mxu0  ;;  %v607_v42 = vadd.f32 %v1490_v36, %v1466_v35 }
  0xf0   : > { %v598_v38 = vpop.f32.mrf.mxu1 }
  0xf1   : > { %v1467_v39 = vpop.f32.mrf.mxu0  ;;  %v599_v53 = vadd.f32 %v598_v38, %v461_v37 }
  0xf2   : > { %v1491_v40 = vpop.f32.mrf.mxu1 }
  0xf3   : > { %v464_v41 = vpop.f32.mrf.mxu0  ;;  %v610_v58 = vadd.f32 %v1491_v40, %v1467_v39 }
  0xf4   : > { %v601_v43 = vpop.f32.mrf.mxu1 }
  0xf5   : > { %v1470_v44 = vpop.f32.mrf.mxu0  ;;  %v602_v3 = vadd.f32 %v601_v43, %v464_v41 }
  0xf6   : > { %v1494_v45 = vpop.f32.mrf.mxu1 }
  0xf7   : > { %v477_v46 = vpop.f32.mrf.mxu0  ;;  %v623_v9 = vadd.f32 %v1494_v45, %v1470_v44 }
  0xf8   : > { %v614_v47 = vpop.f32.mrf.mxu1 }
  0xf9   : > { %v1471_v48 = vpop.f32.mrf.mxu0  ;;  %v615_v10 = vadd.f32 %v614_v47, %v477_v46 }
  0xfa   : > { %v1495_v49 = vpop.f32.mrf.mxu1 }
  0xfb   : > { %v480_v50 = vpop.f32.mrf.mxu0  ;;  %v626_v17 = vadd.f32 %v1495_v49, %v1471_v48 }
  0xfc   : > { %v617_v51 = vpop.f32.mrf.mxu1 }
  0xfd   : > { %v618_v30 = vadd.f32 %v617_v51, %v480_v50 }
 0x10d   : > { %v1514_v52 = vpop.f32.mrf.mxu0 }
 0x10e   : > { %v797_v54 = vadd.f32 %v1514_v52, %v607_v42  ;;  %v1538_v55 = vpop.f32.mrf.mxu1 }
 0x10f   : > { %v764_v57 = vpop.f32.mrf.mxu0 }
 0x110   : > { %v1079_v59 = vadd.f32 %v1538_v55, %v797_v54  ;;  %v795_v60 = vadd.f32 %v764_v57, %v599_v53  ;;  %v1046_v61 = vpop.f32.mrf.mxu1 }
 0x111   : > { %v1515_v62 = vpop.f32.mrf.mxu0 }
 0x112   : > { %v1094_v63 = vadd.f32 %v1862_v56, %v1079_v59  ;;  %v1077_v0 = vadd.f32 %v1046_v61, %v795_v60  ;;  %v798_v1 = vadd.f32 %v1515_v62, %v610_v58  ;;  %v1539_v2 = vpop.f32.mrf.mxu1 }
 0x113   : > { %v767_v4 = vpop.f32.mrf.mxu0 }
 0x114   : > { %vm1102_vm3 = vcmp.ge.f32.partialorder %v1094_v63, 0.0  ;;  %v1110_v5 = vmul.f32 0.01, %v1094_v63  ;;  %v1092_v6 = vadd.f32 %v1862_v56, %v1077_v0  ;;  %v1080_v7 = vadd.f32 %v1539_v2, %v798_v1  ;;  %v1049_v8 = vpop.f32.mrf.mxu1 }
 0x115   : > { %v796_v11 = vadd.f32 %v767_v4, %v602_v3  ;;  %v1518_v12 = vpop.f32.mrf.mxu0 }
 0x116   : > { %v1118_v13 = vsel %vm1102_vm3, %v1094_v63, %v1110_v5  ;;  %vm1100_vm5 = vcmp.ge.f32.partialorder %v1092_v6, 0.0  ;;  %v1108_v14 = vmul.f32 0.01, %v1092_v6  ;;  %v1095_v15 = vadd.f32 %v1862_v56, %v1080_v7  ;;  %v1542_v16 = vpop.f32.mrf.mxu1 }
 0x117   : > { %v1394_v18 = vpack.c.bf16 %v1118_v13, %v1118_v13  ;;  %v1078_v19 = vadd.f32 %v1049_v8, %v796_v11  ;;  %v801_v20 = vadd.f32 %v1518_v12, %v623_v9  ;;  %v780_v21 = vpop.f32.mrf.mxu0 }
 0x118   : > { %v1116_v22 = vsel %vm1100_vm5, %v1092_v6, %v1108_v14  ;;  %vm1103_vm6 = vcmp.ge.f32.partialorder %v1095_v15, 0.0  ;;  %v1111_v23 = vmul.f32 0.01, %v1095_v15  ;;  %v799_v24 = vadd.f32 %v780_v21, %v615_v10  ;;  %v1062_v25 = vpop.f32.mrf.mxu1 }
 0x119   : > { %1159 = vst.msk [vmem:[%s1870_s21 + $0x8] sm:$0xf] %vm1156_vm4, %v1394_v18  ;;  %v1392_v26 = vpack.c.bf16 %v1116_v22, %v1116_v22  ;;  %v1093_v27 = vadd.f32 %v1862_v56, %v1078_v19  ;;  %v1083_v28 = vadd.f32 %v1542_v16, %v801_v20  ;;  %v1519_v29 = vpop.f32.mrf.mxu0 }
 0x11a   : > { %v1119_v31 = vsel %vm1103_vm6, %v1095_v15, %v1111_v23  ;;  %v1081_v32 = vadd.f32 %v1062_v25, %v799_v24  ;;  %v802_v33 = vadd.f32 %v1519_v29, %v626_v17  ;;  %v1543_v34 = vpop.f32.mrf.mxu1 }
 0x11b   : > { %1157 = vst.msk [vmem:[%s1870_s21] sm:$0xf] %vm1156_vm4, %v1392_v26  ;;  %v1395_v35 = vpack.c.bf16 %v1119_v31, %v1119_v31  ;;  %vm1101_vm7 = vcmp.ge.f32.partialorder %v1093_v27, 0.0  ;;  %v1109_v36 = vmul.f32 0.01, %v1093_v27  ;;  %v1098_v37 = vadd.f32 %v1862_v56, %v1083_v28  ;;  %v783_v38 = vpop.f32.mrf.mxu0 }
 0x11c   : > { %v1096_v39 = vadd.f32 %v1862_v56, %v1081_v32  ;;  %v1084_v40 = vadd.f32 %v1543_v34, %v802_v33  ;;  %v800_v41 = vadd.f32 %v783_v38, %v618_v30  ;;  %v1065_v48 = vpop.f32.mrf.mxu1 }
 0x11d   : > { %1160 = vst.msk [vmem:[%s1870_s21 + $0xc] sm:$0xf] %vm1156_vm4, %v1395_v35  ;;  %v1117_v43 = vsel %vm1101_vm7, %v1093_v27, %v1109_v36  ;;  %vm1106_vm8 = vcmp.ge.f32.partialorder %v1098_v37, 0.0  ;;  %v1114_v44 = vmul.f32 0.01, %v1098_v37 }
 0x11e   : > { %v1393_v45 = vpack.c.bf16 %v1117_v43, %v1117_v43  ;;  %vm1104_vm9 = vcmp.ge.f32.partialorder %v1096_v39, 0.0  ;;  %v1112_v46 = vmul.f32 0.01, %v1096_v39  ;;  %v1099_v47 = vadd.f32 %v1862_v56, %v1084_v40 }
 0x11f   : > { %v1122_v49 = vsel %vm1106_vm8, %v1098_v37, %v1114_v44  ;;  %v1082_v50 = vadd.f32 %v1065_v48, %v800_v41 }
 0x120   : > { %1158 = vst.msk [vmem:[%s1870_s21 + $0x4] sm:$0xf] %vm1156_vm4, %v1393_v45  ;;  %v1398_v42 = vpack.c.bf16 %v1122_v49, %v1122_v49  ;;  %v1120_v51 = vsel %vm1104_vm9, %v1096_v39, %v1112_v46  ;;  %vm1107_vm10 = vcmp.ge.f32.partialorder %v1099_v47, 0.0  ;;  %v1115_v52 = vmul.f32 0.01, %v1099_v47 }
 0x121   : > { %v1396_v53 = vpack.c.bf16 %v1120_v51, %v1120_v51  ;;  %v1097_v54 = vadd.f32 %v1862_v56, %v1082_v50 }
 0x122   : > { %1163 = vst.msk [vmem:[%s1870_s21 + $0x18] sm:$0xf] %vm1156_vm4, %v1398_v42  ;;  %v1123_v55 = vsel %vm1107_vm10, %v1099_v47, %v1115_v52 }
 0x123   : > { %1161 = vst.msk [vmem:[%s1870_s21 + $0x10] sm:$0xf] %vm1156_vm4, %v1396_v53  ;;  %v1399_v57 = vpack.c.bf16 %v1123_v55, %v1123_v55  ;;  %vm1105_vm11 = vcmp.ge.f32.partialorder %v1097_v54, 0.0  ;;  %v1113_v58 = vmul.f32 0.01, %v1097_v54 }
 0x125   : > { %1164 = vst.msk [vmem:[%s1870_s21 + $0x1c] sm:$0xf] %vm1156_vm4, %v1399_v57  ;;  %v1121_v59 = vsel %vm1105_vm11, %v1097_v54, %v1113_v58 }
 0x126   : > { %v1397_v60 = vpack.c.bf16 %v1121_v59, %v1121_v59 }
 0x128   : > { %1162 = vst.msk [vmem:[%s1870_s21 + $0x14] sm:$0xf] %vm1156_vm4, %v1397_v60 }
 0x129 PF: > { %s13_s14 = sadd.s32 1, %s1631_s14   ;;  %s1909_s12 = smov %s1627_s13 }
 0x12a   : > { %p10_p5 = scmp.ge.s32.totalorder %s13_s14, 4   ;;  %s1910_s13 = smov %s1912_s15 }
 0x12c   :  { %12 = sbr.rel (!%p10_p5) target bundleno = 2 (0x2), region = 67 }

// kernel: hrnet_forward.15
= control target key start
LH: loop header
LB: loop body
LE: loop exit
PB: predicated region body
PF: predicated region fallthrough
CT: control target
= control target key end

     0   :  { %s1152_s12 = smov 0   ;;  %s1154_s13 = smov 0   ;;  %s1307_s0 = inlined_call_operand.vmem [shape: bf16[2,5,5,64], index: 0, kind: input, shape index: {}]   ;;  %s1308_s1 = inlined_call_operand.vmem [shape: bf16[4,64,32], index: 1, kind: input, shape index: {}]   ;;  %s1309_s2 = inlined_call_operand.vmem [shape: f32[1,32], index: 2, kind: input, shape index: {}]   ;;  %s1310_s3 = inlined_call_operand.vmem [shape: bf16[2,16,32], index: 3, kind: output, shape index: {}]  }
   0x1   :  { %s1156_s14 = smov 0  }
   0x2 LB: > { %s25_s15 = sadd.s32 1, %s1123_s13  ;;  %p913_p0 = scmp.ge.s32.totalorder %s1127_s14, 1  ;;  %s1127_s14 = sphi %s1156_s14, %s13_s14   ;;  %s1123_s13 = sphi %s1154_s13, %s1316_s13   ;;  %s1119_s12 = sphi %s1152_s12, %s1315_s12  }
   0x3   : > { %p27_p1 = scmp.ge.s32.totalorder %s25_s15, 2  ;;  %p151_p2 = scmp.lt.s32.totalorder %s1127_s14, 3 }
   0x5   : > { %s1318_s15 = smov (%p27_p1, %s25_s15), 0  ;;  %p152_p3 = pnand %p913_p0, %p151_p2 }
   0x6   : > { %p179_p4 = scmp.lt.s32.totalorder (!%p152_p3), %s1119_s12, 1 }
   0x7   : > { %155 = sbr.rel (%p152_p3) target bundleno = 265 (0x109), region = 32 }
   0xc   : > { %v1081_v0 = vld [vmem:[%s1308_s1 + $0x18] sm:$0xff]   ;;  %v1129_v1 = vmov 0.0   ;;  %v1083_v3 = vld [vmem:[%s1308_s1 + $0x10] sm:$0xff]   ;;  %vm1130_vm0 = vmmov 0   ;;  %v327_v5 = vlaneseq  ;;  %s1320_s12 = smov (!%p179_p4, %s1119_s12), 1  ;;  %v1085_v6 = vld [vmem:[%s1308_s1 + $0x8] sm:$0xff]  }
   0xd   : > { %1017 = vmatprep.subr.bf16.mxu1 %v1129_v1  ;;  %1005 = vmatprep.subr.bf16.mxu0 %v1129_v1  ;;  %v1082_v2 = vld [vmem:[%s1308_s1 + $0x38] sm:$0xff]   ;;  %v1084_v4 = vld [vmem:[%s1308_s1 + $0x30] sm:$0xff]   ;;  %s1053_s26 = smul.u32 20, %s1320_s12  ;;  %v1086_v7 = vld [vmem:[%s1308_s1 + $0x28] sm:$0xff]   ;;  %v1131_v10 = vmov 1983009808  }
   0xe   : > { %1018 = vmatpush3.bf16.msra.mxu1 %v1081_v0  ;;  %1025 = vmatprep.mubr.msk.bf16.mxu1 %vm1130_vm0, %v1129_v1  ;;  %v328_v8 = vshrl.u32 %v327_v5, 7  ;;  %v1087_v9 = vld [vmem:[%s1308_s1] sm:$0xff]   ;;  %v325_v11 = vunpack.c.l.s4 %v1131_v10  ;;  %vm363_vm1 = vcmask 523264   ;;  %vm250_vm2 = vsmask.f32 1280  ;;  %v1091_v22 = vld [vmem:[%s1308_s1 + $0x78] sm:$0xff]  }
   0xf   : > { %1019 = vmatprep.subr.bf16.mxu1 %v1129_v1  ;;  %1006 = vmatpush3.bf16.msra.mxu0 %v1082_v2  ;;  %s1207_s6 = scalar_lea.vmem %s1307_s0, %s1053_s26  ;;  %v1088_v12 = vld [vmem:[%s1308_s1 + $0x20] sm:$0xff]   ;;  %vm251_vm3 = vsmask.f32 3336  ;;  %vm253_vm4 = vsmask.f32 5392  ;;  %v1093_v46 = vld [vmem:[%s1308_s1 + $0x70] sm:$0xff]  }
  0x10   : > { %1007 = vmatprep.subr.bf16.mxu0 %v1129_v1  ;;  %1013 = vmatprep.mubr.msk.bf16.mxu0 %vm1130_vm0, %v1129_v1  ;;  %v1101_v13 = vld.sshfl [vmem:[%s1207_s6] sm:$0xf pattern:$0x76325410]  ;;  %v326_v14 = vunpack.c.0.s8 %v325_v11  ;;  %vm252_vm5 = vmor %vm250_vm2, %vm251_vm3  ;;  %vm255_vm6 = vsmask.f32 7448 }
  0x11   : > { %v1102_v15 = vld.sshfl [vmem:[%s1207_s6 + $0x8] sm:$0xf pattern:$0x76325410]  ;;  %vm1228_vm7 = vmor %vm252_vm5, %vm253_vm4  ;;  %v977_v47 = vld [vmem:[%s1309_s2] ss:$0 sm:$0xff] }
  0x12   : > { %1020 = vmatpush3.bf16.msra.mxu1 %v1083_v3  ;;  %v917_v16 = vld.sshfl [vmem:[%s1207_s6] sm:$0x13 pattern:$0x76325410]  ;;  %v1218_v19 = vsub.s32 %v326_v14, %v328_v8  ;;  %v428_v30 = vcombine.low %v1101_v13, %v1102_v15  ;;  %vm1242_vm8 = vmor %vm1228_vm7, %vm255_vm6  ;;  %v1095_v61 = vld [vmem:[%s1308_s1 + $0x68] sm:$0xff]   ;;  %s982_s4 = sshll.u32 %s1320_s12, 3 }
  0x13   : > { %1021 = vmatprep.subr.bf16.mxu1 %v1129_v1  ;;  %1008 = vmatpush3.bf16.msra.mxu0 %v1084_v4  ;;  %v918_v17 = vld.sshfl [vmem:[%s1207_s6 + $0x4] sm:$0x13 pattern:$0x76325410]  ;;  %v225_v18 = vcombine.high %v917_v16, %v917_v16  ;;  %v258_v26 = vshrl.u32 %v917_v16, 16  ;;  %v261_v27 = vshll.u32 %v917_v16, 16  ;;  %s192_s7 = scalar_lea.vmem %s1310_s3, %s982_s4 }
  0x14   : > { %1009 = vmatprep.subr.bf16.mxu0 %v1129_v1  ;;  %v919_v20 = vld.sshfl [vmem:[%s1207_s6 + $0x8] sm:$0x13 pattern:$0x76325410]  ;;  %v233_v21 = vcombine.high %v918_v17, %v918_v17  ;;  %v272_v29 = vshrl.u32 %v918_v17, 16  ;;  %v275_v31 = vshll.u32 %v918_v17, 16 }
  0x15   : > { %v920_v23 = vld.sshfl [vmem:[%s1207_s6 + $0xc] sm:$0x13 pattern:$0x76325410]  ;;  %v241_v24 = vcombine.high %v919_v20, %v919_v20  ;;  %v267_v28 = vshll.u32 %v225_v18, 16  ;;  %v286_v33 = vshrl.u32 %v919_v20, 16 }
  0x16   : > { %1022 = vmatpush3.bf16.msra.mxu1 %v1085_v6  ;;  %v249_v25 = vcombine.high %v920_v23, %v920_v23  ;;  %v281_v32 = vshll.u32 %v233_v21, 16  ;;  %v260_v35 = vrot.slane %v258_v26, 6  ;;  %v263_v36 = vrot.slane %v261_v27, 7  ;;  %v1092_v18 = vld [vmem:[%s1308_s1 + $0x58] sm:$0xff]  }
  0x17   : > { %1023 = vmatprep.subr.bf16.mxu1 %v1129_v1  ;;  %1010 = vmatpush3.bf16.msra.mxu0 %v1086_v7  ;;  %v274_v37 = vrot.slane %v272_v29, 6  ;;  %v269_v38 = vrot.slane %v267_v28, 7  ;;  %v277_v39 = vrot.slane %v275_v31, 7  ;;  %v288_v40 = vrot.slane %v286_v33, 6 }
  0x18   : > { %1011 = vmatprep.subr.bf16.mxu0 %v1129_v1  ;;  %v289_v41 = vshll.u32 %v919_v20, 16  ;;  %v264_v42 = vor.u32 %v263_v36, %v260_v35  ;;  %v295_v43 = vshll.u32 %v241_v24, 16  ;;  %v300_v44 = vshrl.u32 %v920_v23, 16  ;;  %v1094_v24 = vld [vmem:[%s1308_s1 + $0x50] sm:$0xff]  }
  0x19   : > { %v303_v45 = vshll.u32 %v920_v23, 16  ;;  %v278_v48 = vor.u32 %v277_v39, %v274_v37  ;;  %v283_v49 = vrot.slane %v281_v32, 7  ;;  %v309_v51 = vshll.u32 %v249_v25, 16  ;;  %v1098_v32 = vld [vmem:[%s1308_s1 + $0x40] sm:$0xff]  }
  0x1a   : > { %1024 = vmatpush3.bf16.msra.mxu1 %v1087_v9  ;;  %v291_v50 = vrot.slane %v289_v41, 7  ;;  %v265_v52 = vrot.slane %v264_v42, 2  ;;  %v302_v53 = vrot.slane %v300_v44, 6  ;;  %v297_v57 = vrot.slane %v295_v43, 7  ;;  %v1097_v9 = vld [vmem:[%s1308_s1 + $0x60] sm:$0xff]  }
  0x1b   : > { %1041 = vmatprep.subr.bf16.mxu1 %v1129_v1  ;;  %1012 = vmatpush3.bf16.msra.mxu0 %v1088_v12  ;;  %v305_v54 = vrot.slane %v303_v45, 7  ;;  %v279_v55 = vrot.slane %v278_v48, 2  ;;  %v311_v60 = vrot.slane %v309_v51, 7  ;;  %vm819_vm10 = vcmask 257024  }
  0x1c   : > { %1029 = vmatprep.subr.bf16.mxu0 %v1129_v1  ;;  %v292_v56 = vor.u32 %v291_v50, %v288_v40  ;;  %v270_v58 = vsel %vm1242_vm8, %v265_v52, %v269_v38  ;;  %v963_v0 = vld.sshfl [vmem:[%s1207_s6 + $0x10] sm:$0x13 pattern:$0x76325410] }
  0x1d   : > { %1026 = vmatmul.mubr.msk.bf16.vlgmr.msra.gmra.mxu1 %vm363_vm1, %v428_v30  ;;  %v306_v59 = vor.u32 %v305_v54, %v302_v53  ;;  %v284_v62 = vsel %vm1242_vm8, %v279_v55, %v283_v49  ;;  %v643_v4 = vcombine.high %v963_v0, %v963_v0  ;;  %v687_v5 = vshrl.u32 %v963_v0, 16  ;;  %v1103_v28 = vld.sshfl [vmem:[%s1207_s6 + $0x4] sm:$0xf pattern:$0x76325410] }
  0x1e   : > { %1042 = vmatpush3.bf16.msra.mxu1 %v1091_v22  ;;  %1049 = vmatprep.mubr.msk.bf16.mxu1 %vm1130_vm0, %v1129_v1  ;;  %v293_v63 = vrot.slane %v292_v56, 2  ;;  %v322_v3 = vcombine.low %v270_v58, %v284_v62  ;;  %v690_v7 = vshll.u32 %v963_v0, 16  ;;  %v1104_v29 = vld.sshfl [vmem:[%s1207_s6 + $0xc] sm:$0xf pattern:$0x76325410] }
  0x1f   : > { %1043 = vmatprep.subr.bf16.mxu1 %v1129_v1  ;;  %v307_v2 = vrot.slane %v306_v59, 2  ;;  %v689_v10 = vrot.slane %v687_v5, 6  ;;  %v696_v11 = vshll.u32 %v643_v4, 16  ;;  %v1096_v30 = vld [vmem:[%s1308_s1 + $0x48] sm:$0xff]  }
  0x20   : > { %v298_v6 = vsel %vm1242_vm8, %v293_v63, %v297_v57  ;;  %v330_v13 = vrot.slane %v322_v3, %v1218_v19  ;;  %v692_v14 = vrot.slane %v690_v7, 7 }
  0x21   : > { %v312_v8 = vsel %vm1242_vm8, %v307_v2, %v311_v60  ;;  %v698_v17 = vrot.slane %v696_v11, 7  ;;  %v709_v20 = vcombine.low %v284_v62, %v298_v6 }
  0x22   : > { %1044 = vmatpush3.bf16.msra.mxu1 %v1093_v46  ;;  %v323_v12 = vcombine.low %v298_v6, %v312_v8  ;;  %v693_v16 = vor.u32 %v692_v14, %v689_v10 }
  0x23   : > { %1045 = vmatprep.subr.bf16.mxu1 %v1129_v1  ;;  %v717_v26 = vrot.slane %v709_v20, %v1218_v19 }
  0x24   : > { %v337_v15 = vrot.slane %v323_v12, %v1218_v19  ;;  %v694_v22 = vrot.slane %v693_v16, 2 }
  0x26   : > { %1046 = vmatpush3.bf16.msra.mxu1 %v1095_v61  ;;  %v338_v21 = vcombine.low %v330_v13, %v337_v15  ;;  %v699_v23 = vsel %vm1242_vm8, %v694_v22, %v698_v17 }
  0x27   : > { %1047 = vmatprep.subr.bf16.mxu1 %v1129_v1  ;;  %v710_v25 = vcombine.low %v312_v8, %v699_v23 }
  0x28   : > { %1014 = vmatmul.mubr.msk.bf16.vlgmr.msra.gmra.mxu0 %vm363_vm1, %v338_v21 }
  0x29   : > { %1030 = vmatpush3.bf16.msra.mxu0 %v1092_v18  ;;  %1037 = vmatprep.mubr.msk.bf16.mxu0 %vm1130_vm0, %v1129_v1  ;;  %v724_v27 = vrot.slane %v710_v25, %v1218_v19  ;;  %v533_v19 = vcombine.low %v1103_v28, %v1104_v29 }
  0x2a   : > { %1048 = vmatpush3.bf16.msra.mxu1 %v1097_v9  ;;  %1031 = vmatprep.subr.bf16.mxu0 %v1129_v1 }
  0x2b   : > { %v725_v31 = vcombine.low %v717_v26, %v724_v27 }
  0x2d   : > { %1032 = vmatpush3.bf16.msra.mxu0 %v1094_v24  ;;  %1050 = vmatmul.mubr.msk.bf16.vlgmr.msra.gmra.mxu1 %vm363_vm1, %v725_v31 }
  0x2e   : > { %1033 = vmatprep.subr.bf16.mxu0 %v1129_v1 }
  0x31   : > { %1034 = vmatpush3.bf16.msra.mxu0 %v1096_v30 }
  0x32   : > { %1035 = vmatprep.subr.bf16.mxu0 %v1129_v1 }
  0x35   : > { %1036 = vmatpush3.bf16.msra.mxu0 %v1098_v32 }
  0x38   : > { %1038 = vmatmul.mubr.msk.bf16.vlgmr.msra.gmra.mxu0 %vm363_vm1, %v533_v19 }
  0xdd   : > { %v490_v33 = vpop.f32.mrf.mxu1 }
  0xdf   : > { %v1027_v34 = vpop.f32.mrf.mxu1 }
  0xe1   : > { %v493_v35 = vpop.f32.mrf.mxu1 }
  0xe3   : > { %v1028_v36 = vpop.f32.mrf.mxu1 }
  0xe8   : > { %v401_v37 = vpop.f32.mrf.mxu0 }
  0xe9   : > { %v491_v45 = vadd.f32 %v490_v33, %v401_v37 }
  0xea   : > { %v1015_v38 = vpop.f32.mrf.mxu0 }
  0xec   : > { %v404_v39 = vpop.f32.mrf.mxu0 }
  0xed   : > { %v787_v41 = vpop.f32.mrf.mxu1  ;;  %v494_v49 = vadd.f32 %v493_v35, %v404_v39 }
  0xee   : > { %v1016_v40 = vpop.f32.mrf.mxu0 }
  0xef   : > { %v1051_v42 = vpop.f32.mrf.mxu1 }
  0xf1   : > { %v790_v43 = vpop.f32.mrf.mxu1 }
  0xf3   : > { %v1052_v44 = vpop.f32.mrf.mxu1 }
  0xf8   : > { %v595_v46 = vpop.f32.mrf.mxu0 }
  0xf9   : > { %v602_v1 = vadd.f32 %v595_v46, %v491_v45 }
  0xfa   : > { %v1039_v48 = vpop.f32.mrf.mxu0 }
  0xfb   : > { %v794_v50 = vadd.f32 %v787_v41, %v602_v1 }
  0xfc   : > { %v598_v51 = vpop.f32.mrf.mxu0 }
  0xfd   : > { %v803_v52 = vadd.f32 %v977_v47, %v794_v50  ;;  %v603_v53 = vadd.f32 %v598_v51, %v494_v49 }
  0xfe   : > { %v1040_v54 = vpop.f32.mrf.mxu0 }
  0xff   : > { %vm805_vm9 = vcmp.ge.f32.partialorder %v803_v52, 0.0  ;;  %v807_v55 = vmul.f32 0.01, %v803_v52  ;;  %v795_v56 = vadd.f32 %v790_v43, %v603_v53 }
 0x101   : > { %v809_v57 = vsel %vm805_vm9, %v803_v52, %v807_v55  ;;  %v804_v58 = vadd.f32 %v977_v47, %v795_v56 }
 0x102   : > { %v983_v59 = vpack.c.bf16 %v809_v57, %v809_v57 }
 0x103   : > { %vm806_vm11 = vcmp.ge.f32.partialorder %v804_v58, 0.0  ;;  %v808_v60 = vmul.f32 0.01, %v804_v58 }
 0x104   : > { %820 = vst.msk [vmem:[%s192_s7] sm:$0xf] %vm819_vm10, %v983_v59 }
 0x105   : > { %v810_v61 = vsel %vm806_vm11, %v804_v58, %v808_v60 }
 0x106   : > { %v984_v62 = vpack.c.bf16 %v810_v61, %v810_v61 }
 0x108   : > { %821 = vst.msk [vmem:[%s192_s7 + $0x4] sm:$0xf] %vm819_vm10, %v984_v62 }
 0x109 PF: > { %s13_s14 = sadd.s32 1, %s1127_s14   ;;  %s1315_s12 = smov %s1123_s13 }
 0x10a   : > { %p10_p5 = scmp.ge.s32.totalorder %s13_s14, 4   ;;  %s1316_s13 = smov %s1318_s15 }
 0x10c   :  { %12 = sbr.rel (!%p10_p5) target bundleno = 2 (0x2), region = 67 }

// kernel: hrnet_forward.16
= control target key start
LH: loop header
LB: loop body
LE: loop exit
PB: predicated region body
PF: predicated region fallthrough
CT: control target
= control target key end

     0   :  { %s1196_s12 = smov 0   ;;  %s1198_s13 = smov 0   ;;  %s1409_s0 = inlined_call_operand.vmem [shape: bf16[2,3,3,128], index: 0, kind: input, shape index: {}]   ;;  %s1410_s1 = inlined_call_operand.vmem [shape: bf16[4,128,64], index: 1, kind: input, shape index: {}]   ;;  %s1411_s2 = inlined_call_operand.vmem [shape: f32[1,64], index: 2, kind: input, shape index: {}]   ;;  %s1412_s3 = inlined_call_operand.vmem [shape: bf16[2,4,64], index: 3, kind: output, shape index: {}]  }
   0x1   :  { %s1200_s14 = smov 0  }
   0x2 LB: > { %s25_s15 = sadd.s32 1, %s1167_s13  ;;  %p875_p0 = scmp.ge.s32.totalorder %s1171_s14, 1  ;;  %s1171_s14 = sphi %s1200_s14, %s13_s14   ;;  %s1167_s13 = sphi %s1198_s13, %s1416_s13   ;;  %s1163_s12 = sphi %s1196_s12, %s1415_s12  }
   0x3   : > { %p27_p1 = scmp.ge.s32.totalorder %s25_s15, 2  ;;  %p151_p2 = scmp.lt.s32.totalorder %s1171_s14, 3 }
   0x5   : > { %s1418_s15 = smov (%p27_p1, %s25_s15), 0  ;;  %p152_p3 = pnand %p875_p0, %p151_p2 }
   0x6   : > { %p177_p4 = scmp.lt.s32.totalorder (!%p152_p3), %s1163_s12, 1 }
   0x7   : > { %155 = sbr.rel (%p152_p3) target bundleno = 282 (0x11a), region = 32 }
   0xc   : > { %v1117_v0 = vld [vmem:[%s1410_s1 + $0x78] sm:$0xff]   ;;  %v1173_v1 = vmov 0.0   ;;  %v1119_v3 = vld [vmem:[%s1410_s1 + $0x70] sm:$0xff]   ;;  %vm1174_vm0 = vmmov 0   ;;  %s1420_s12 = smov (!%p177_p4, %s1163_s12), 1  ;;  %v1121_v5 = vld [vmem:[%s1410_s1 + $0x68] sm:$0xff]   ;;  %v285_v16 = vlaneseq }
   0xd   : > { %1009 = vmatprep.subr.bf16.mxu0 %v1173_v1  ;;  %1029 = vmatprep.subr.bf16.mxu1 %v1173_v1  ;;  %v1118_v2 = vld [vmem:[%s1410_s1 + $0x38] sm:$0xff]   ;;  %v1120_v4 = vld [vmem:[%s1410_s1 + $0x30] sm:$0xff]   ;;  %v1122_v6 = vld [vmem:[%s1410_s1 + $0x28] sm:$0xff]   ;;  %s1089_s28 = smul.u32 6, %s1420_s12  ;;  %vm231_vm1 = vsmask.f32 256 }
   0xe   : > { %1010 = vmatpush3.bf16.msra.mxu0 %v1117_v0  ;;  %1025 = vmatprep.mubr.msk.bf16.mxu0 %vm1174_vm0, %v1173_v1  ;;  %v1123_v7 = vld [vmem:[%s1410_s1 + $0x60] sm:$0xff]   ;;  %v1125_v9 = vld [vmem:[%s1410_s1 + $0x58] sm:$0xff]   ;;  %v1127_v11 = vld [vmem:[%s1410_s1 + $0x50] sm:$0xff]   ;;  %vm232_vm2 = vsmask.f32 1284  ;;  %v286_v28 = vshrl.u32 %v285_v16, 7 }
   0xf   : > { %1030 = vmatpush3.bf16.msra.mxu1 %v1118_v2  ;;  %1011 = vmatprep.subr.bf16.mxu0 %v1173_v1  ;;  %v1124_v8 = vld [vmem:[%s1410_s1 + $0x20] sm:$0xff]   ;;  %s1256_s8 = scalar_lea.vmem %s1409_s0, %s1089_s28  ;;  %v1126_v10 = vld [vmem:[%s1410_s1 + $0x18] sm:$0xff]   ;;  %v1128_v13 = vld [vmem:[%s1410_s1 + $0x10] sm:$0xff]   ;;  %vm234_vm4 = vsmask.f32 2312  ;;  %s877_s18 = sshll.u32 %s1420_s12, 1 }
  0x10   : > { %1031 = vmatprep.subr.bf16.mxu1 %v1173_v1  ;;  %1045 = vmatprep.mubr.msk.bf16.mxu1 %vm1174_vm0, %v1173_v1  ;;  %v878_v12 = vld.sshfl [vmem:[%s1256_s8] sm:$0x11 pattern:$0x75316420]  ;;  %vm233_vm3 = vmor %vm231_vm1, %vm232_vm2  ;;  %vm236_vm5 = vsmask.f32 3340  ;;  %s188_s21 = scalar_lea.vmem %s1412_s3, %s877_s18 }
  0x11   : > { %v879_v14 = vld.sshfl [vmem:[%s1256_s8 + $0x2] sm:$0x11 pattern:$0x75316420]  ;;  %v222_v15 = vcombine.high %v878_v12, %v878_v12  ;;  %vm238_vm6 = vsmask.f32 4368  ;;  %vm235_vm7 = vmor %vm233_vm3, %vm234_vm4 }
  0x12   : > { %1012 = vmatpush3.bf16.msra.mxu0 %v1119_v3  ;;  %v230_v17 = vcombine.high %v879_v14, %v879_v14  ;;  %vm240_vm8 = vsmask.f32 5396  ;;  %vm242_vm9 = vsmask.f32 6424  ;;  %vm244_vm10 = vsmask.f32 7452  ;;  %vm237_vm11 = vmor %vm235_vm7, %vm236_vm5 }
  0x13   : > { %1032 = vmatpush3.bf16.msra.mxu1 %v1120_v4  ;;  %1013 = vmatprep.subr.bf16.mxu0 %v1173_v1  ;;  %v1129_v18 = vld [vmem:[%s1410_s1 + $0x48] sm:$0xff]   ;;  %v247_v19 = vshrl.u32 %v878_v12, 16  ;;  %v252_v20 = vshll.u32 %v222_v15, 16  ;;  %v256_v21 = vshrl.u32 %v879_v14, 16  ;;  %v193_v23 = vld [vmem:[%s1256_s8] sm:$0x1]  ;;  %vm239_vm12 = vmor %vm237_vm11, %vm238_vm6 }
  0x14   : > { %1033 = vmatprep.subr.bf16.mxu1 %v1173_v1  ;;  %v261_v22 = vshll.u32 %v230_v17, 16  ;;  %v194_v24 = vld [vmem:[%s1256_s8 + $0x2] sm:$0x1]  ;;  %v1130_v25 = vld [vmem:[%s1410_s1 + $0x8] sm:$0xff]   ;;  %vm241_vm13 = vmor %vm239_vm12, %vm240_vm8  ;;  %v1175_v26 = vmov 1966171168  }
  0x15   : > { %v283_v27 = vunpack.c.l.s4 %v1175_v26  ;;  %vm243_vm14 = vmor %vm241_vm13, %vm242_vm9  ;;  %v387_v31 = vcombine.low %v193_v23, %v194_v24  ;;  %v1131_v34 = vld [vmem:[%s1410_s1 + $0x40] sm:$0xff]   ;;  %v1133_v42 = vld [vmem:[%s1410_s1 + $0xb8] sm:$0xff]   ;;  %vm792_vm1 = vcmask 517120  }
  0x16   : > { %1014 = vmatpush3.bf16.msra.mxu0 %v1121_v5  ;;  %vm1290_vm15 = vmor %vm243_vm14, %vm244_vm10  ;;  %v1132_v37 = vld [vmem:[%s1410_s1] sm:$0xff]   ;;  %v1134_v43 = vld [vmem:[%s1410_s1 + $0xf8] sm:$0xff]  }
  0x17   : > { %1034 = vmatpush3.bf16.msra.mxu1 %v1122_v6  ;;  %1015 = vmatprep.subr.bf16.mxu0 %v1173_v1  ;;  %v284_v30 = vunpack.c.0.s8 %v283_v27  ;;  %v254_v32 = vsel %vm1290_vm15, %v247_v19, %v252_v20  ;;  %v1298_v33 = vsel %vm1290_vm15, %v256_v21, %v261_v22  ;;  %v1135_v44 = vld [vmem:[%s1410_s1 + $0xb0] sm:$0xff]   ;;  %v1137_v46 = vld [vmem:[%s1410_s1 + $0xa8] sm:$0xff]   ;;  %v943_v48 = vld.sshfl [vmem:[%s1256_s8 + $0x4] sm:$0x11 pattern:$0x75316420] }
  0x18   : > { %1035 = vmatprep.subr.bf16.mxu1 %v1173_v1  ;;  %v281_v35 = vcombine.low %v254_v32, %v1298_v33  ;;  %v1136_v45 = vld [vmem:[%s1410_s1 + $0xf0] sm:$0xff]   ;;  %v1138_v47 = vld [vmem:[%s1410_s1 + $0xe8] sm:$0xff]   ;;  %v1139_v49 = vld [vmem:[%s1410_s1 + $0xa0] sm:$0xff]   ;;  %v639_v51 = vcombine.high %v943_v48, %v943_v48  ;;  %v650_v54 = vshrl.u32 %v943_v48, 16 }
  0x19   : > { %v1304_v36 = vsub.s32 %v284_v30, %v286_v28  ;;  %v1140_v50 = vld [vmem:[%s1410_s1 + $0xe0] sm:$0xff]   ;;  %v1141_v52 = vld [vmem:[%s1410_s1 + $0x98] sm:$0xff]   ;;  %v1143_v56 = vld [vmem:[%s1410_s1 + $0x90] sm:$0xff]  }
  0x1a   : > { %1016 = vmatpush3.bf16.msra.mxu0 %v1123_v7  ;;  %v1142_v53 = vld [vmem:[%s1410_s1 + $0xd8] sm:$0xff]   ;;  %v655_v55 = vshll.u32 %v639_v51, 16  ;;  %v914_v57 = vld [vmem:[%s1256_s8 + $0x2] sm:$0x1]  ;;  %v915_v58 = vld [vmem:[%s1256_s8 + $0x4] sm:$0x1] }
  0x1b   : > { %1036 = vmatpush3.bf16.msra.mxu1 %v1124_v8  ;;  %1017 = vmatprep.subr.bf16.mxu0 %v1173_v1  ;;  %v288_v38 = vrot.slane %v281_v35, %v1304_v36  ;;  %v394_v39 = vrot.slane %v387_v31, %v1304_v36  ;;  %v1144_v59 = vld [vmem:[%s1410_s1 + $0xd0] sm:$0xff]   ;;  %v515_v61 = vcombine.low %v914_v57, %v915_v58  ;;  %v1145_v62 = vld [vmem:[%s1410_s1 + $0x88] sm:$0xff]   ;;  %v1147_v3 = vld [vmem:[%s1410_s1 + $0x80] sm:$0xff]  }
  0x1c   : > { %1037 = vmatprep.subr.bf16.mxu1 %v1173_v1  ;;  %v657_v60 = vsel %vm1290_vm15, %v650_v54, %v655_v55  ;;  %v1146_v0 = vld [vmem:[%s1410_s1 + $0xc8] sm:$0xff]   ;;  %v1148_v5 = vld [vmem:[%s1410_s1 + $0xc0] sm:$0xff]  }
  0x1d   : > { %v295_v40 = vrot.slane %v288_v38, %v1304_v36  ;;  %v401_v41 = vrot.slane %v394_v39, %v1304_v36  ;;  %v675_v63 = vcombine.low %v1298_v33, %v657_v60  ;;  %v522_v2 = vrot.slane %v515_v61, %v1304_v36  ;;  %v970_v19 = vld [vmem:[%s1411_s2] ss:$0 sm:$0xff] }
  0x1e   : > { %1018 = vmatpush3.bf16.msra.mxu0 %v1125_v9 }
  0x1f   : > { %1038 = vmatpush3.bf16.msra.mxu1 %v1126_v10  ;;  %1019 = vmatprep.subr.bf16.mxu0 %v1173_v1  ;;  %v682_v4 = vrot.slane %v675_v63, %v1304_v36  ;;  %v529_v6 = vrot.slane %v522_v2, %v1304_v36 }
  0x20   : > { %1039 = vmatprep.subr.bf16.mxu1 %v1173_v1 }
  0x21   : > { %v689_v7 = vrot.slane %v682_v4, %v1304_v36 }
  0x22   : > { %1020 = vmatpush3.bf16.msra.mxu0 %v1127_v11 }
  0x23   : > { %1040 = vmatpush3.bf16.msra.mxu1 %v1128_v13  ;;  %1021 = vmatprep.subr.bf16.mxu0 %v1173_v1 }
  0x24   : > { %1041 = vmatprep.subr.bf16.mxu1 %v1173_v1 }
  0x26   : > { %1022 = vmatpush3.bf16.msra.mxu0 %v1129_v18 }
  0x27   : > { %1042 = vmatpush3.bf16.msra.mxu1 %v1130_v25  ;;  %1023 = vmatprep.subr.bf16.mxu0 %v1173_v1 }
  0x28   : > { %1043 = vmatprep.subr.bf16.mxu1 %v1173_v1 }
  0x2a   : > { %1024 = vmatpush3.bf16.msra.mxu0 %v1131_v34 }
  0x2b   : > { %1044 = vmatpush3.bf16.msra.mxu1 %v1132_v37  ;;  %1049 = vmatprep.subr.bf16.mxu0 %v1173_v1 }
  0x2c   : > { %1069 = vmatprep.subr.bf16.mxu1 %v1173_v1 }
  0x2d   : > { %1026 = vmatmul.mubr.bf16.vlgmr.msra.gmra.mxu0 %v295_v40 }
  0x2e   : > { %1046 = vmatmul.mubr.bf16.vlgmr.msra.gmra.mxu1 %v401_v41  ;;  %1050 = vmatpush3.bf16.msra.mxu0 %v1133_v42 }
  0x2f   : > { %1070 = vmatpush3.bf16.msra.mxu1 %v1134_v43  ;;  %1051 = vmatprep.subr.bf16.mxu0 %v1173_v1 }
  0x30   : > { %1071 = vmatprep.subr.bf16.mxu1 %v1173_v1  ;;  %1065 = vmatprep.mubr.msk.bf16.mxu0 %vm1174_vm0, %v1173_v1 }
  0x31   : > { %1085 = vmatprep.mubr.msk.bf16.mxu1 %vm1174_vm0, %v1173_v1 }
  0x32   : > { %1052 = vmatpush3.bf16.msra.mxu0 %v1135_v44 }
  0x33   : > { %1072 = vmatpush3.bf16.msra.mxu1 %v1136_v45  ;;  %1053 = vmatprep.subr.bf16.mxu0 %v1173_v1 }
  0x34   : > { %1073 = vmatprep.subr.bf16.mxu1 %v1173_v1 }
  0x36   : > { %1054 = vmatpush3.bf16.msra.mxu0 %v1137_v46 }
  0x37   : > { %1074 = vmatpush3.bf16.msra.mxu1 %v1138_v47  ;;  %1055 = vmatprep.subr.bf16.mxu0 %v1173_v1 }
  0x38   : > { %1075 = vmatprep.subr.bf16.mxu1 %v1173_v1 }
  0x3a   : > { %1056 = vmatpush3.bf16.msra.mxu0 %v1139_v49 }
  0x3b   : > { %1076 = vmatpush3.bf16.msra.mxu1 %v1140_v50  ;;  %1057 = vmatprep.subr.bf16.mxu0 %v1173_v1 }
  0x3c   : > { %1077 = vmatprep.subr.bf16.mxu1 %v1173_v1 }
  0x3e   : > { %1058 = vmatpush3.bf16.msra.mxu0 %v1141_v52 }
  0x3f   : > { %1078 = vmatpush3.bf16.msra.mxu1 %v1142_v53  ;;  %1059 = vmatprep.subr.bf16.mxu0 %v1173_v1 }
  0x40   : > { %1079 = vmatprep.subr.bf16.mxu1 %v1173_v1 }
  0x42   : > { %1060 = vmatpush3.bf16.msra.mxu0 %v1143_v56 }
  0x43   : > { %1080 = vmatpush3.bf16.msra.mxu1 %v1144_v59  ;;  %1061 = vmatprep.subr.bf16.mxu0 %v1173_v1 }
  0x44   : > { %1081 = vmatprep.subr.bf16.mxu1 %v1173_v1 }
  0x46   : > { %1062 = vmatpush3.bf16.msra.mxu0 %v1145_v62 }
  0x47   : > { %1082 = vmatpush3.bf16.msra.mxu1 %v1146_v0  ;;  %1063 = vmatprep.subr.bf16.mxu0 %v1173_v1 }
  0x48   : > { %1083 = vmatprep.subr.bf16.mxu1 %v1173_v1 }
  0x4a   : > { %1064 = vmatpush3.bf16.msra.mxu0 %v1147_v3 }
  0x4b   : > { %1084 = vmatpush3.bf16.msra.mxu1 %v1148_v5 }
  0x4d   : > { %1066 = vmatmul.mubr.bf16.vlgmr.msra.gmra.mxu0 %v529_v6 }
  0x4e   : > { %1086 = vmatmul.mubr.bf16.vlgmr.msra.gmra.mxu1 %v689_v7 }
  0xed   : > { %v379_v8 = vpop.f32.mrf.mxu0 }
  0xee   : > { %v485_v9 = vpop.f32.mrf.mxu1 }
  0xef   : > { %v1027_v10 = vpop.f32.mrf.mxu0  ;;  %v486_v16 = vadd.f32 %v485_v9, %v379_v8 }
  0xf0   : > { %v1047_v11 = vpop.f32.mrf.mxu1 }
  0xf1   : > { %v382_v12 = vpop.f32.mrf.mxu0 }
  0xf2   : > { %v488_v13 = vpop.f32.mrf.mxu1 }
  0xf3   : > { %v1028_v14 = vpop.f32.mrf.mxu0 }
  0xf4   : > { %v1048_v15 = vpop.f32.mrf.mxu1 }
 0x10d   : > { %v613_v17 = vpop.f32.mrf.mxu0 }
 0x10e   : > { %v619_v1 = vadd.f32 %v613_v17, %v486_v16  ;;  %v773_v18 = vpop.f32.mrf.mxu1 }
 0x10f   : > { %v1067_v20 = vpop.f32.mrf.mxu0 }
 0x110   : > { %v779_v21 = vadd.f32 %v773_v18, %v619_v1  ;;  %v1087_v22 = vpop.f32.mrf.mxu1 }
 0x111   : > { %v616_v23 = vpop.f32.mrf.mxu0 }
 0x112   : > { %v787_v24 = vadd.f32 %v970_v19, %v779_v21  ;;  %v776_v25 = vpop.f32.mrf.mxu1 }
 0x113   : > { %v1068_v26 = vpop.f32.mrf.mxu0 }
 0x114   : > { %vm788_vm0 = vcmp.ge.f32.partialorder %v787_v24, 0.0  ;;  %v789_v27 = vmul.f32 0.01, %v787_v24  ;;  %v1088_v28 = vpop.f32.mrf.mxu1 }
 0x116   : > { %v790_v29 = vsel %vm788_vm0, %v787_v24, %v789_v27 }
 0x117   : > { %v791_v30 = vpack.c.bf16 %v790_v29, %v790_v29 }
 0x119   : > { %793 = vst.msk [vmem:[%s188_s21] sm:$0x3] %vm792_vm1, %v791_v30 }
 0x11a PF: > { %s13_s14 = sadd.s32 1, %s1171_s14   ;;  %s1415_s12 = smov %s1167_s13 }
 0x11b   : > { %p10_p5 = scmp.ge.s32.totalorder %s13_s14, 4   ;;  %s1416_s13 = smov %s1418_s15 }
 0x11d   :  { %12 = sbr.rel (!%p10_p5) target bundleno = 2 (0x2), region = 67 }

// kernel: hrnet_forward.19
= control target key start
LH: loop header
LB: loop body
LE: loop exit
PB: predicated region body
PF: predicated region fallthrough
CT: control target
= control target key end

     0   :  { %s5829_s12 = smov 0   ;;  %s5831_s13 = smov 0   ;;  %s6841_s0 = inlined_call_operand.vmem [shape: bf16[2,64,2,2], index: 0, kind: input, shape index: {}]   ;;  %s6842_s1 = inlined_call_operand.vmem [shape: bf16[16,2], index: 1, kind: input, shape index: {}]   ;;  %s6843_s2 = inlined_call_operand.vmem [shape: bf16[2,16], index: 2, kind: input, shape index: {}]   ;;  %s6844_s3 = inlined_call_operand.vmem [shape: bf16[2,64,16,16], index: 3, kind: output, shape index: {}]  }
   0x1   :  { %s5833_s14 = smov 0  }
   0x2 LB: > { %s25_s15 = sadd.s32 1, %s5801_s13  ;;  %p4653_p0 = scmp.ge.s32.totalorder %s5805_s14, 1  ;;  %s5805_s14 = sphi %s5833_s14, %s13_s14   ;;  %s5801_s13 = sphi %s5831_s13, %s6846_s13   ;;  %s5797_s12 = sphi %s5829_s12, %s6845_s12  }
   0x3   : > { %p27_p1 = scmp.ge.s32.totalorder %s25_s15, 2  ;;  %p161_p2 = scmp.lt.s32.totalorder %s5805_s14, 3 }
   0x5   : > { %s6848_s15 = smov (%p27_p1, %s25_s15), 0  ;;  %p162_p3 = pnand %p4653_p0, %p161_p2 }
   0x6   : > { %p193_p4 = scmp.lt.s32.totalorder (!%p162_p3), %s5797_s12, 1 }
   0x7   : > { %165 = sbr.rel (%p162_p3) target bundleno = 670 (0x29e), region = 32 }
   0xc   : > { %v5807_v0 = vmov 0.0   ;;  %s6850_s12 = smov (!%p193_p4, %s5797_s12), 1  ;;  %vm5808_vm0 = vmmov 0   ;;  %vm289_vm1 = vcmask 1040384   ;;  %v5869_v6 = vld [vmem:[%s6842_s1] sm:$0xff]   ;;  %vm285_vm2 = vcmask 15360  }
   0xd   : > { %5238 = vmatprep.subr.bf16.mxu0 %v5807_v0  ;;  %5244 = vmatprep.subr.bf16.mxu1 %v5807_v0  ;;  %s4654_s16 = sshll.u32 %s6850_s12, 6  ;;  %s4916_s24 = sshll.u32 %s6850_s12, 9  ;;  %vm4423_vm3 = vcmask 125952  }
   0xe   : > { %5240 = vmatprep.mubr.msk.bf16.mxu0 %vm5808_vm0, %v5807_v0  ;;  %5246 = vmatprep.mubr.msk.bf16.mxu1 %vm5808_vm0, %v5807_v0  ;;  %s5859_s19 = scalar_lea.vmem %s6841_s0, %s4654_s16  ;;  %s6573_s27 = scalar_lea.vmem %s6844_s3, %s4916_s24 }
   0xf   : > { %v216_v1 = vld [vmem:[%s5859_s19] sm:$0x1]  ;;  %v217_v2 = vld [vmem:[%s5859_s19 + $0x1] sm:$0x1]  ;;  %v218_v3 = vld [vmem:[%s5859_s19 + $0x2] sm:$0x1] }
  0x10   : > { %v291_v4 = vsel %vm289_vm1, %v216_v1, 0  ;;  %v335_v5 = vsel %vm289_vm1, %v217_v2, 0  ;;  %v219_v7 = vld [vmem:[%s5859_s19 + $0x3] sm:$0x1]  ;;  %v379_v8 = vsel %vm289_vm1, %v218_v3, 0 }
  0x11   : > { %5239 = vmatpush3.bf16.msra.mxu0 %v291_v4  ;;  %5245 = vmatpush3.bf16.msra.mxu1 %v335_v5  ;;  %v423_v9 = vsel %vm289_vm1, %v219_v7, 0  ;;  %v220_v10 = vld [vmem:[%s5859_s19 + $0x4] sm:$0x1]  ;;  %v221_v11 = vld [vmem:[%s5859_s19 + $0x5] sm:$0x1] }
  0x12   : > { %5250 = vmatprep.subr.bf16.mxu0 %v5807_v0  ;;  %5256 = vmatprep.subr.bf16.mxu1 %v5807_v0  ;;  %v467_v12 = vsel %vm289_vm1, %v220_v10, 0  ;;  %v511_v13 = vsel %vm289_vm1, %v221_v11, 0  ;;  %v222_v14 = vld [vmem:[%s5859_s19 + $0x6] sm:$0x1]  ;;  %v223_v15 = vld [vmem:[%s5859_s19 + $0x7] sm:$0x1] }
  0x13   : > { %v555_v16 = vsel %vm289_vm1, %v222_v14, 0  ;;  %v599_v17 = vsel %vm289_vm1, %v223_v15, 0  ;;  %v224_v18 = vld [vmem:[%s5859_s19 + $0x8] sm:$0x1]  ;;  %v225_v19 = vld [vmem:[%s5859_s19 + $0x9] sm:$0x1] }
  0x14   : > { %5241 = vmatmul.mubr.msk.bf16.vlgmr.msra.gmra.mxu0 %vm285_vm2, %v5869_v6  ;;  %5247 = vmatmul.mubr.msk.bf16.vlgmr.msra.gmra.mxu1 %vm285_vm2, %v5869_v6  ;;  %v643_v20 = vsel %vm289_vm1, %v224_v18, 0  ;;  %v687_v21 = vsel %vm289_vm1, %v225_v19, 0  ;;  %v226_v22 = vld [vmem:[%s5859_s19 + $0xa] sm:$0x1]  ;;  %v227_v23 = vld [vmem:[%s5859_s19 + $0xb] sm:$0x1] }
  0x15   : > { %5251 = vmatpush3.bf16.msra.mxu0 %v379_v8  ;;  %5257 = vmatpush3.bf16.msra.mxu1 %v423_v9  ;;  %v731_v24 = vsel %vm289_vm1, %v226_v22, 0  ;;  %v775_v25 = vsel %vm289_vm1, %v227_v23, 0  ;;  %v228_v26 = vld [vmem:[%s5859_s19 + $0xc] sm:$0x1]  ;;  %v229_v27 = vld [vmem:[%s5859_s19 + $0xd] sm:$0x1] }
  0x16   : > { %5252 = vmatprep.mubr.msk.bf16.mxu0 %vm5808_vm0, %v5807_v0  ;;  %5258 = vmatprep.mubr.msk.bf16.mxu1 %vm5808_vm0, %v5807_v0  ;;  %v819_v28 = vsel %vm289_vm1, %v228_v26, 0  ;;  %v863_v29 = vsel %vm289_vm1, %v229_v27, 0  ;;  %v230_v30 = vld [vmem:[%s5859_s19 + $0xe] sm:$0x1]  ;;  %v231_v31 = vld [vmem:[%s5859_s19 + $0xf] sm:$0x1] }
  0x17   : > { %5262 = vmatprep.subr.bf16.mxu0 %v5807_v0  ;;  %5268 = vmatprep.subr.bf16.mxu1 %v5807_v0  ;;  %v907_v32 = vsel %vm289_vm1, %v230_v30, 0  ;;  %v951_v33 = vsel %vm289_vm1, %v231_v31, 0  ;;  %v232_v34 = vld [vmem:[%s5859_s19 + $0x10] sm:$0x1]  ;;  %v233_v35 = vld [vmem:[%s5859_s19 + $0x11] sm:$0x1] }
  0x18   : > { %v995_v36 = vsel %vm289_vm1, %v232_v34, 0  ;;  %v1039_v37 = vsel %vm289_vm1, %v233_v35, 0  ;;  %v234_v38 = vld [vmem:[%s5859_s19 + $0x12] sm:$0x1]  ;;  %v235_v39 = vld [vmem:[%s5859_s19 + $0x13] sm:$0x1] }
  0x19   : > { %v1083_v40 = vsel %vm289_vm1, %v234_v38, 0  ;;  %v1127_v41 = vsel %vm289_vm1, %v235_v39, 0  ;;  %v236_v42 = vld [vmem:[%s5859_s19 + $0x14] sm:$0x1]  ;;  %v237_v43 = vld [vmem:[%s5859_s19 + $0x15] sm:$0x1] }
  0x1a   : > { %v1171_v44 = vsel %vm289_vm1, %v236_v42, 0  ;;  %v1215_v45 = vsel %vm289_vm1, %v237_v43, 0  ;;  %v238_v46 = vld [vmem:[%s5859_s19 + $0x16] sm:$0x1]  ;;  %v239_v47 = vld [vmem:[%s5859_s19 + $0x17] sm:$0x1] }
  0x1b   : > { %v1259_v48 = vsel %vm289_vm1, %v238_v46, 0  ;;  %v1303_v49 = vsel %vm289_vm1, %v239_v47, 0  ;;  %v240_v50 = vld [vmem:[%s5859_s19 + $0x18] sm:$0x1]  ;;  %v241_v51 = vld [vmem:[%s5859_s19 + $0x19] sm:$0x1] }
  0x1c   : > { %5253 = vmatmul.mubr.msk.bf16.vlgmr.msra.gmra.mxu0 %vm285_vm2, %v5869_v6  ;;  %5259 = vmatmul.mubr.msk.bf16.vlgmr.msra.gmra.mxu1 %vm285_vm2, %v5869_v6  ;;  %v1347_v52 = vsel %vm289_vm1, %v240_v50, 0  ;;  %v1391_v53 = vsel %vm289_vm1, %v241_v51, 0  ;;  %v242_v54 = vld [vmem:[%s5859_s19 + $0x1a] sm:$0x1]  ;;  %v243_v55 = vld [vmem:[%s5859_s19 + $0x1b] sm:$0x1] }
  0x1d   : > { %5263 = vmatpush3.bf16.msra.mxu0 %v467_v12  ;;  %5269 = vmatpush3.bf16.msra.mxu1 %v511_v13  ;;  %v1435_v56 = vsel %vm289_vm1, %v242_v54, 0  ;;  %v1479_v57 = vsel %vm289_vm1, %v243_v55, 0  ;;  %v244_v58 = vld [vmem:[%s5859_s19 + $0x1c] sm:$0x1]  ;;  %v245_v59 = vld [vmem:[%s5859_s19 + $0x1d] sm:$0x1] }
  0x1e   : > { %5264 = vmatprep.mubr.msk.bf16.mxu0 %vm5808_vm0, %v5807_v0  ;;  %5270 = vmatprep.mubr.msk.bf16.mxu1 %vm5808_vm0, %v5807_v0  ;;  %v1523_v60 = vsel %vm289_vm1, %v244_v58, 0  ;;  %v1567_v61 = vsel %vm289_vm1, %v245_v59, 0  ;;  %v246_v62 = vld [vmem:[%s5859_s19 + $0x1e] sm:$0x1]  ;;  %v247_v63 = vld [vmem:[%s5859_s19 + $0x1f] sm:$0x1] }
  0x1f   : > { %5274 = vmatprep.subr.bf16.mxu0 %v5807_v0  ;;  %5280 = vmatprep.subr.bf16.mxu1 %v5807_v0  ;;  %v1611_v1 = vsel %vm289_vm1, %v246_v62, 0  ;;  %v1655_v2 = vsel %vm289_vm1, %v247_v63, 0  ;;  %v248_v3 = vld [vmem:[%s5859_s19 + $0x20] sm:$0x1]  ;;  %v249_v4 = vld [vmem:[%s5859_s19 + $0x21] sm:$0x1] }
  0x20   : > { %v1699_v5 = vsel %vm289_vm1, %v248_v3, 0  ;;  %v1743_v7 = vsel %vm289_vm1, %v249_v4, 0  ;;  %v250_v8 = vld [vmem:[%s5859_s19 + $0x22] sm:$0x1]  ;;  %v251_v9 = vld [vmem:[%s5859_s19 + $0x23] sm:$0x1] }
  0x21   : > { %v1787_v10 = vsel %vm289_vm1, %v250_v8, 0  ;;  %v1831_v11 = vsel %vm289_vm1, %v251_v9, 0  ;;  %v252_v12 = vld [vmem:[%s5859_s19 + $0x24] sm:$0x1]  ;;  %v253_v13 = vld [vmem:[%s5859_s19 + $0x25] sm:$0x1] }
  0x22   : > { %v1875_v14 = vsel %vm289_vm1, %v252_v12, 0  ;;  %v1919_v15 = vsel %vm289_vm1, %v253_v13, 0 }
  0x24   : > { %5265 = vmatmul.mubr.msk.bf16.vlgmr.msra.gmra.mxu0 %vm285_vm2, %v5869_v6  ;;  %5271 = vmatmul.mubr.msk.bf16.vlgmr.msra.gmra.mxu1 %vm285_vm2, %v5869_v6 }
  0x25   : > { %5275 = vmatpush3.bf16.msra.mxu0 %v555_v16  ;;  %5281 = vmatpush3.bf16.msra.mxu1 %v599_v17  ;;  %v254_v16 = vld [vmem:[%s5859_s19 + $0x26] sm:$0x1]  ;;  %v255_v17 = vld [vmem:[%s5859_s19 + $0x27] sm:$0x1] }
  0x26   : > { %5276 = vmatprep.mubr.msk.bf16.mxu0 %vm5808_vm0, %v5807_v0  ;;  %5282 = vmatprep.mubr.msk.bf16.mxu1 %vm5808_vm0, %v5807_v0  ;;  %v1963_v18 = vsel %vm289_vm1, %v254_v16, 0  ;;  %v2007_v19 = vsel %vm289_vm1, %v255_v17, 0 }
  0x27   : > { %5286 = vmatprep.subr.bf16.mxu0 %v5807_v0  ;;  %5292 = vmatprep.subr.bf16.mxu1 %v5807_v0 }
  0x2c   : > { %5277 = vmatmul.mubr.msk.bf16.vlgmr.msra.gmra.mxu0 %vm285_vm2, %v5869_v6  ;;  %5283 = vmatmul.mubr.msk.bf16.vlgmr.msra.gmra.mxu1 %vm285_vm2, %v5869_v6 }
  0x2d   : > { %5287 = vmatpush3.bf16.msra.mxu0 %v643_v20  ;;  %5293 = vmatpush3.bf16.msra.mxu1 %v687_v21  ;;  %v256_v20 = vld [vmem:[%s5859_s19 + $0x28] sm:$0x1]  ;;  %v257_v21 = vld [vmem:[%s5859_s19 + $0x29] sm:$0x1] }
  0x2e   : > { %5288 = vmatprep.mubr.msk.bf16.mxu0 %vm5808_vm0, %v5807_v0  ;;  %5294 = vmatprep.mubr.msk.bf16.mxu1 %vm5808_vm0, %v5807_v0  ;;  %v2051_v22 = vsel %vm289_vm1, %v256_v20, 0  ;;  %v2095_v23 = vsel %vm289_vm1, %v257_v21, 0 }
  0x2f   : > { %5298 = vmatprep.subr.bf16.mxu0 %v5807_v0  ;;  %5304 = vmatprep.subr.bf16.mxu1 %v5807_v0 }
  0x34   : > { %5289 = vmatmul.mubr.msk.bf16.vlgmr.msra.gmra.mxu0 %vm285_vm2, %v5869_v6  ;;  %5295 = vmatmul.mubr.msk.bf16.vlgmr.msra.gmra.mxu1 %vm285_vm2, %v5869_v6 }
  0x35   : > { %5299 = vmatpush3.bf16.msra.mxu0 %v731_v24  ;;  %5305 = vmatpush3.bf16.msra.mxu1 %v775_v25  ;;  %v258_v24 = vld [vmem:[%s5859_s19 + $0x2a] sm:$0x1]  ;;  %v259_v25 = vld [vmem:[%s5859_s19 + $0x2b] sm:$0x1] }
  0x36   : > { %5300 = vmatprep.mubr.msk.bf16.mxu0 %vm5808_vm0, %v5807_v0  ;;  %5306 = vmatprep.mubr.msk.bf16.mxu1 %vm5808_vm0, %v5807_v0  ;;  %v2139_v26 = vsel %vm289_vm1, %v258_v24, 0  ;;  %v2183_v27 = vsel %vm289_vm1, %v259_v25, 0 }
  0x37   : > { %5310 = vmatprep.subr.bf16.mxu0 %v5807_v0  ;;  %5316 = vmatprep.subr.bf16.mxu1 %v5807_v0 }
  0x3c   : > { %5301 = vmatmul.mubr.msk.bf16.vlgmr.msra.gmra.mxu0 %vm285_vm2, %v5869_v6  ;;  %5307 = vmatmul.mubr.msk.bf16.vlgmr.msra.gmra.mxu1 %vm285_vm2, %v5869_v6 }
  0x3d   : > { %5311 = vmatpush3.bf16.msra.mxu0 %v819_v28  ;;  %5317 = vmatpush3.bf16.msra.mxu1 %v863_v29  ;;  %v260_v28 = vld [vmem:[%s5859_s19 + $0x2c] sm:$0x1]  ;;  %v261_v29 = vld [vmem:[%s5859_s19 + $0x2d] sm:$0x1] }
  0x3e   : > { %5312 = vmatprep.mubr.msk.bf16.mxu0 %vm5808_vm0, %v5807_v0  ;;  %5318 = vmatprep.mubr.msk.bf16.mxu1 %vm5808_vm0, %v5807_v0  ;;  %v2227_v30 = vsel %vm289_vm1, %v260_v28, 0  ;;  %v2271_v31 = vsel %vm289_vm1, %v261_v29, 0 }
  0x3f   : > { %5322 = vmatprep.subr.bf16.mxu0 %v5807_v0  ;;  %5328 = vmatprep.subr.bf16.mxu1 %v5807_v0 }
  0x44   : > { %5313 = vmatmul.mubr.msk.bf16.vlgmr.msra.gmra.mxu0 %vm285_vm2, %v5869_v6  ;;  %5319 = vmatmul.mubr.msk.bf16.vlgmr.msra.gmra.mxu1 %vm285_vm2, %v5869_v6 }
  0x45   : > { %5323 = vmatpush3.bf16.msra.mxu0 %v907_v32  ;;  %5329 = vmatpush3.bf16.msra.mxu1 %v951_v33  ;;  %v262_v32 = vld [vmem:[%s5859_s19 + $0x2e] sm:$0x1]  ;;  %v263_v33 = vld [vmem:[%s5859_s19 + $0x2f] sm:$0x1] }
  0x46   : > { %5324 = vmatprep.mubr.msk.bf16.mxu0 %vm5808_vm0, %v5807_v0  ;;  %5330 = vmatprep.mubr.msk.bf16.mxu1 %vm5808_vm0, %v5807_v0  ;;  %v2315_v34 = vsel %vm289_vm1, %v262_v32, 0  ;;  %v2359_v35 = vsel %vm289_vm1, %v263_v33, 0 }
  0x47   : > { %5334 = vmatprep.subr.bf16.mxu0 %v5807_v0  ;;  %5340 = vmatprep.subr.bf16.mxu1 %v5807_v0 }
  0x4c   : > { %5325 = vmatmul.mubr.msk.bf16.vlgmr.msra.gmra.mxu0 %vm285_vm2, %v5869_v6  ;;  %5331 = vmatmul.mubr.msk.bf16.vlgmr.msra.gmra.mxu1 %vm285_vm2, %v5869_v6 }
  0x4d   : > { %5335 = vmatpush3.bf16.msra.mxu0 %v995_v36  ;;  %5341 = vmatpush3.bf16.msra.mxu1 %v1039_v37  ;;  %v264_v36 = vld [vmem:[%s5859_s19 + $0x30] sm:$0x1]  ;;  %v265_v37 = vld [vmem:[%s5859_s19 + $0x31] sm:$0x1] }
  0x4e   : > { %5336 = vmatprep.mubr.msk.bf16.mxu0 %vm5808_vm0, %v5807_v0  ;;  %5342 = vmatprep.mubr.msk.bf16.mxu1 %vm5808_vm0, %v5807_v0  ;;  %v2403_v38 = vsel %vm289_vm1, %v264_v36, 0  ;;  %v2447_v39 = vsel %vm289_vm1, %v265_v37, 0 }
  0x4f   : > { %5346 = vmatprep.subr.bf16.mxu0 %v5807_v0  ;;  %5352 = vmatprep.subr.bf16.mxu1 %v5807_v0 }
  0x54   : > { %5337 = vmatmul.mubr.msk.bf16.vlgmr.msra.gmra.mxu0 %vm285_vm2, %v5869_v6  ;;  %5343 = vmatmul.mubr.msk.bf16.vlgmr.msra.gmra.mxu1 %vm285_vm2, %v5869_v6 }
  0x55   : > { %5347 = vmatpush3.bf16.msra.mxu0 %v1083_v40  ;;  %5353 = vmatpush3.bf16.msra.mxu1 %v1127_v41  ;;  %v266_v40 = vld [vmem:[%s5859_s19 + $0x32] sm:$0x1]  ;;  %v267_v41 = vld [vmem:[%s5859_s19 + $0x33] sm:$0x1] }
  0x56   : > { %5348 = vmatprep.mubr.msk.bf16.mxu0 %vm5808_vm0, %v5807_v0  ;;  %5354 = vmatprep.mubr.msk.bf16.mxu1 %vm5808_vm0, %v5807_v0  ;;  %v2491_v42 = vsel %vm289_vm1, %v266_v40, 0  ;;  %v2535_v43 = vsel %vm289_vm1, %v267_v41, 0 }
  0x57   : > { %5358 = vmatprep.subr.bf16.mxu0 %v5807_v0  ;;  %5364 = vmatprep.subr.bf16.mxu1 %v5807_v0 }
  0x5c   : > { %5349 = vmatmul.mubr.msk.bf16.vlgmr.msra.gmra.mxu0 %vm285_vm2, %v5869_v6  ;;  %5355 = vmatmul.mubr.msk.bf16.vlgmr.msra.gmra.mxu1 %vm285_vm2, %v5869_v6 }
  0x5d   : > { %5359 = vmatpush3.bf16.msra.mxu0 %v1171_v44  ;;  %5365 = vmatpush3.bf16.msra.mxu1 %v1215_v45 }
  0x5e   : > { %5360 = vmatprep.mubr.msk.bf16.mxu0 %vm5808_vm0, %v5807_v0  ;;  %5366 = vmatprep.mubr.msk.bf16.mxu1 %vm5808_vm0, %v5807_v0 }
  0x5f   : > { %5370 = vmatprep.subr.bf16.mxu0 %v5807_v0  ;;  %5376 = vmatprep.subr.bf16.mxu1 %v5807_v0 }
  0x64   : > { %5361 = vmatmul.mubr.msk.bf16.vlgmr.msra.gmra.mxu0 %vm285_vm2, %v5869_v6  ;;  %5367 = vmatmul.mubr.msk.bf16.vlgmr.msra.gmra.mxu1 %vm285_vm2, %v5869_v6 }
  0x65   : > { %5371 = vmatpush3.bf16.msra.mxu0 %v1259_v48  ;;  %5377 = vmatpush3.bf16.msra.mxu1 %v1303_v49  ;;  %v268_v48 = vld [vmem:[%s5859_s19 + $0x34] sm:$0x1]  ;;  %v269_v49 = vld [vmem:[%s5859_s19 + $0x35] sm:$0x1] }
  0x66   : > { %5372 = vmatprep.mubr.msk.bf16.mxu0 %vm5808_vm0, %v5807_v0  ;;  %5378 = vmatprep.mubr.msk.bf16.mxu1 %vm5808_vm0, %v5807_v0  ;;  %v2579_v54 = vsel %vm289_vm1, %v268_v48, 0  ;;  %v2623_v55 = vsel %vm289_vm1, %v269_v49, 0  ;;  %v278_v48 = vld [vmem:[%s5859_s19 + $0x3e] sm:$0x1]  ;;  %v279_v49 = vld [vmem:[%s5859_s19 + $0x3f] sm:$0x1] }
  0x67   : > { %5382 = vmatprep.subr.bf16.mxu0 %v5807_v0  ;;  %5388 = vmatprep.subr.bf16.mxu1 %v5807_v0 }
  0x6c   : > { %5373 = vmatmul.mubr.msk.bf16.vlgmr.msra.gmra.mxu0 %vm285_vm2, %v5869_v6  ;;  %5379 = vmatmul.mubr.msk.bf16.vlgmr.msra.gmra.mxu1 %vm285_vm2, %v5869_v6 }
  0x6d   : > { %5383 = vmatpush3.bf16.msra.mxu0 %v1347_v52  ;;  %5389 = vmatpush3.bf16.msra.mxu1 %v1391_v53 }
  0x6e   : > { %5384 = vmatprep.mubr.msk.bf16.mxu0 %vm5808_vm0, %v5807_v0  ;;  %5390 = vmatprep.mubr.msk.bf16.mxu1 %vm5808_vm0, %v5807_v0 }
  0x6f   : > { %5394 = vmatprep.subr.bf16.mxu0 %v5807_v0  ;;  %5400 = vmatprep.subr.bf16.mxu1 %v5807_v0 }
  0x74   : > { %5385 = vmatmul.mubr.msk.bf16.vlgmr.msra.gmra.mxu0 %vm285_vm2, %v5869_v6  ;;  %5391 = vmatmul.mubr.msk.bf16.vlgmr.msra.gmra.mxu1 %vm285_vm2, %v5869_v6 }
  0x75   : > { %5395 = vmatpush3.bf16.msra.mxu0 %v1435_v56  ;;  %5401 = vmatpush3.bf16.msra.mxu1 %v1479_v57 }
  0x76   : > { %5396 = vmatprep.mubr.msk.bf16.mxu0 %vm5808_vm0, %v5807_v0  ;;  %5402 = vmatprep.mubr.msk.bf16.mxu1 %vm5808_vm0, %v5807_v0 }
  0x77   : > { %5406 = vmatprep.subr.bf16.mxu0 %v5807_v0  ;;  %5412 = vmatprep.subr.bf16.mxu1 %v5807_v0 }
  0x7c   : > { %5397 = vmatmul.mubr.msk.bf16.vlgmr.msra.gmra.mxu0 %vm285_vm2, %v5869_v6  ;;  %5403 = vmatmul.mubr.msk.bf16.vlgmr.msra.gmra.mxu1 %vm285_vm2, %v5869_v6 }
  0x7d   : > { %5407 = vmatpush3.bf16.msra.mxu0 %v1523_v60  ;;  %5413 = vmatpush3.bf16.msra.mxu1 %v1567_v61  ;;  %v270_v60 = vld [vmem:[%s5859_s19 + $0x36] sm:$0x1]  ;;  %v271_v61 = vld [vmem:[%s5859_s19 + $0x37] sm:$0x1] }
  0x7e   : > { %5408 = vmatprep.mubr.msk.bf16.mxu0 %vm5808_vm0, %v5807_v0  ;;  %5414 = vmatprep.mubr.msk.bf16.mxu1 %vm5808_vm0, %v5807_v0  ;;  %v2667_v3 = vsel %vm289_vm1, %v270_v60, 0  ;;  %v2711_v4 = vsel %vm289_vm1, %v271_v61, 0 }
  0x7f   : > { %5418 = vmatprep.subr.bf16.mxu0 %v5807_v0  ;;  %5424 = vmatprep.subr.bf16.mxu1 %v5807_v0 }
  0x84   : > { %5409 = vmatmul.mubr.msk.bf16.vlgmr.msra.gmra.mxu0 %vm285_vm2, %v5869_v6  ;;  %5415 = vmatmul.mubr.msk.bf16.vlgmr.msra.gmra.mxu1 %vm285_vm2, %v5869_v6 }
  0x85   : > { %5419 = vmatpush3.bf16.msra.mxu0 %v1611_v1  ;;  %5425 = vmatpush3.bf16.msra.mxu1 %v1655_v2 }
  0x86   : > { %5420 = vmatprep.mubr.msk.bf16.mxu0 %vm5808_vm0, %v5807_v0  ;;  %5426 = vmatprep.mubr.msk.bf16.mxu1 %vm5808_vm0, %v5807_v0 }
  0x87   : > { %5430 = vmatprep.subr.bf16.mxu0 %v5807_v0  ;;  %5436 = vmatprep.subr.bf16.mxu1 %v5807_v0 }
  0x8c   : > { %5421 = vmatmul.mubr.msk.bf16.vlgmr.msra.gmra.mxu0 %vm285_vm2, %v5869_v6  ;;  %5427 = vmatmul.mubr.msk.bf16.vlgmr.msra.gmra.mxu1 %vm285_vm2, %v5869_v6 }
  0x8d   : > { %5431 = vmatpush3.bf16.msra.mxu0 %v1699_v5  ;;  %5437 = vmatpush3.bf16.msra.mxu1 %v1743_v7 }
  0x8e   : > { %5432 = vmatprep.mubr.msk.bf16.mxu0 %vm5808_vm0, %v5807_v0  ;;  %5438 = vmatprep.mubr.msk.bf16.mxu1 %vm5808_vm0, %v5807_v0 }
  0x8f   : > { %5442 = vmatprep.subr.bf16.mxu0 %v5807_v0  ;;  %5448 = vmatprep.subr.bf16.mxu1 %v5807_v0 }
  0x94   : > { %5433 = vmatmul.mubr.msk.bf16.vlgmr.msra.gmra.mxu0 %vm285_vm2, %v5869_v6  ;;  %5439 = vmatmul.mubr.msk.bf16.vlgmr.msra.gmra.mxu1 %vm285_vm2, %v5869_v6 }
  0x95   : > { %5443 = vmatpush3.bf16.msra.mxu0 %v1787_v10  ;;  %5449 = vmatpush3.bf16.msra.mxu1 %v1831_v11  ;;  %v272_v10 = vld [vmem:[%s5859_s19 + $0x38] sm:$0x1]  ;;  %v273_v11 = vld [vmem:[%s5859_s19 + $0x39] sm:$0x1] }
  0x96   : > { %5444 = vmatprep.mubr.msk.bf16.mxu0 %vm5808_vm0, %v5807_v0  ;;  %5450 = vmatprep.mubr.msk.bf16.mxu1 %vm5808_vm0, %v5807_v0  ;;  %v2755_v16 = vsel %vm289_vm1, %v272_v10, 0  ;;  %v2799_v17 = vsel %vm289_vm1, %v273_v11, 0 }
  0x97   : > { %5454 = vmatprep.subr.bf16.mxu0 %v5807_v0  ;;  %5460 = vmatprep.subr.bf16.mxu1 %v5807_v0 }
  0x9c   : > { %5445 = vmatmul.mubr.msk.bf16.vlgmr.msra.gmra.mxu0 %vm285_vm2, %v5869_v6  ;;  %5451 = vmatmul.mubr.msk.bf16.vlgmr.msra.gmra.mxu1 %vm285_vm2, %v5869_v6 }
  0x9d   : > { %5455 = vmatpush3.bf16.msra.mxu0 %v1875_v14  ;;  %5461 = vmatpush3.bf16.msra.mxu1 %v1919_v15 }
  0x9e   : > { %5456 = vmatprep.mubr.msk.bf16.mxu0 %vm5808_vm0, %v5807_v0  ;;  %5462 = vmatprep.mubr.msk.bf16.mxu1 %vm5808_vm0, %v5807_v0 }
  0x9f   : > { %5466 = vmatprep.subr.bf16.mxu0 %v5807_v0  ;;  %5472 = vmatprep.subr.bf16.mxu1 %v5807_v0 }
  0xa4   : > { %5457 = vmatmul.mubr.msk.bf16.vlgmr.msra.gmra.mxu0 %vm285_vm2, %v5869_v6  ;;  %5463 = vmatmul.mubr.msk.bf16.vlgmr.msra.gmra.mxu1 %vm285_vm2, %v5869_v6 }
  0xa5   : > { %5467 = vmatpush3.bf16.msra.mxu0 %v1963_v18  ;;  %5473 = vmatpush3.bf16.msra.mxu1 %v2007_v19 }
  0xa6   : > { %5468 = vmatprep.mubr.msk.bf16.mxu0 %vm5808_vm0, %v5807_v0  ;;  %5474 = vmatprep.mubr.msk.bf16.mxu1 %vm5808_vm0, %v5807_v0 }
  0xa7   : > { %5478 = vmatprep.subr.bf16.mxu0 %v5807_v0  ;;  %5484 = vmatprep.subr.bf16.mxu1 %v5807_v0 }
  0xac   : > { %5469 = vmatmul.mubr.msk.bf16.vlgmr.msra.gmra.mxu0 %vm285_vm2, %v5869_v6  ;;  %5475 = vmatmul.mubr.msk.bf16.vlgmr.msra.gmra.mxu1 %vm285_vm2, %v5869_v6 }
  0xad   : > { %5479 = vmatpush3.bf16.msra.mxu0 %v2051_v22  ;;  %5485 = vmatpush3.bf16.msra.mxu1 %v2095_v23  ;;  %v274_v22 = vld [vmem:[%s5859_s19 + $0x3a] sm:$0x1]  ;;  %v275_v23 = vld [vmem:[%s5859_s19 + $0x3b] sm:$0x1] }
  0xae   : > { %5480 = vmatprep.mubr.msk.bf16.mxu0 %vm5808_vm0, %v5807_v0  ;;  %5486 = vmatprep.mubr.msk.bf16.mxu1 %vm5808_vm0, %v5807_v0  ;;  %v2843_v28 = vsel %vm289_vm1, %v274_v22, 0  ;;  %v2887_v29 = vsel %vm289_vm1, %v275_v23, 0 }
  0xaf   : > { %5490 = vmatprep.subr.bf16.mxu0 %v5807_v0  ;;  %5496 = vmatprep.subr.bf16.mxu1 %v5807_v0 }
  0xb4   : > { %5481 = vmatmul.mubr.msk.bf16.vlgmr.msra.gmra.mxu0 %vm285_vm2, %v5869_v6  ;;  %5487 = vmatmul.mubr.msk.bf16.vlgmr.msra.gmra.mxu1 %vm285_vm2, %v5869_v6 }
  0xb5   : > { %5491 = vmatpush3.bf16.msra.mxu0 %v2139_v26  ;;  %5497 = vmatpush3.bf16.msra.mxu1 %v2183_v27 }
  0xb6   : > { %5492 = vmatprep.mubr.msk.bf16.mxu0 %vm5808_vm0, %v5807_v0  ;;  %5498 = vmatprep.mubr.msk.bf16.mxu1 %vm5808_vm0, %v5807_v0 }
  0xb7   : > { %5502 = vmatprep.subr.bf16.mxu0 %v5807_v0  ;;  %5508 = vmatprep.subr.bf16.mxu1 %v5807_v0 }
  0xbc   : > { %5493 = vmatmul.mubr.msk.bf16.vlgmr.msra.gmra.mxu0 %vm285_vm2, %v5869_v6  ;;  %5499 = vmatmul.mubr.msk.bf16.vlgmr.msra.gmra.mxu1 %vm285_vm2, %v5869_v6 }
  0xbd   : > { %5503 = vmatpush3.bf16.msra.mxu0 %v2227_v30  ;;  %5509 = vmatpush3.bf16.msra.mxu1 %v2271_v31 }
  0xbe   : > { %5504 = vmatprep.mubr.msk.bf16.mxu0 %vm5808_vm0, %v5807_v0  ;;  %5510 = vmatprep.mubr.msk.bf16.mxu1 %vm5808_vm0, %v5807_v0 }
  0xbf   : > { %5514 = vmatprep.subr.bf16.mxu0 %v5807_v0  ;;  %5520 = vmatprep.subr.bf16.mxu1 %v5807_v0 }
  0xc4   : > { %5505 = vmatmul.mubr.msk.bf16.vlgmr.msra.gmra.mxu0 %vm285_vm2, %v5869_v6  ;;  %5511 = vmatmul.mubr.msk.bf16.vlgmr.msra.gmra.mxu1 %vm285_vm2, %v5869_v6 }
  0xc5   : > { %5515 = vmatpush3.bf16.msra.mxu0 %v2315_v34  ;;  %5521 = vmatpush3.bf16.msra.mxu1 %v2359_v35  ;;  %v276_v34 = vld [vmem:[%s5859_s19 + $0x3c] sm:$0x1]  ;;  %v277_v35 = vld [vmem:[%s5859_s19 + $0x3d] sm:$0x1] }
  0xc6   : > { %5516 = vmatprep.mubr.msk.bf16.mxu0 %vm5808_vm0, %v5807_v0  ;;  %5522 = vmatprep.mubr.msk.bf16.mxu1 %vm5808_vm0, %v5807_v0  ;;  %v2931_v40 = vsel %vm289_vm1, %v276_v34, 0  ;;  %v2975_v41 = vsel %vm289_vm1, %v277_v35, 0 }
  0xc7   : > { %5526 = vmatprep.subr.bf16.mxu0 %v5807_v0  ;;  %5532 = vmatprep.subr.bf16.mxu1 %v5807_v0 }
  0xcc   : > { %5517 = vmatmul.mubr.msk.bf16.vlgmr.msra.gmra.mxu0 %vm285_vm2, %v5869_v6  ;;  %5523 = vmatmul.mubr.msk.bf16.vlgmr.msra.gmra.mxu1 %vm285_vm2, %v5869_v6 }
  0xcd   : > { %5527 = vmatpush3.bf16.msra.mxu0 %v2403_v38  ;;  %5533 = vmatpush3.bf16.msra.mxu1 %v2447_v39 }
  0xce   : > { %5528 = vmatprep.mubr.msk.bf16.mxu0 %vm5808_vm0, %v5807_v0  ;;  %5534 = vmatprep.mubr.msk.bf16.mxu1 %vm5808_vm0, %v5807_v0 }
  0xcf   : > { %5538 = vmatprep.subr.bf16.mxu0 %v5807_v0  ;;  %5544 = vmatprep.subr.bf16.mxu1 %v5807_v0 }
  0xd4   : > { %v6212_v44 = vpop.f32.mrf.mxu0  ;;  %v6214_v45 = vpop.f32.mrf.mxu1  ;;  %5529 = vmatmul.mubr.msk.bf16.vlgmr.msra.gmra.mxu0 %vm285_vm2, %v5869_v6  ;;  %5535 = vmatmul.mubr.msk.bf16.vlgmr.msra.gmra.mxu1 %vm285_vm2, %v5869_v6 }
  0xd5   : > { %5539 = vmatpush3.bf16.msra.mxu0 %v2491_v42  ;;  %5545 = vmatpush3.bf16.msra.mxu1 %v2535_v43 }
  0xd6   : > { %v5242_v46 = vpop.f32.mrf.mxu0  ;;  %v5248_v47 = vpop.f32.mrf.mxu1  ;;  %5540 = vmatprep.mubr.msk.bf16.mxu0 %vm5808_vm0, %v5807_v0  ;;  %5546 = vmatprep.mubr.msk.bf16.mxu1 %vm5808_vm0, %v5807_v0 }
  0xd7   : > { %5550 = vmatprep.subr.bf16.mxu0 %v5807_v0  ;;  %5556 = vmatprep.subr.bf16.mxu1 %v5807_v0 }
  0xd8   : > { %v6228_v50 = vpop.f32.mrf.mxu0  ;;  %v6230_v51 = vpop.f32.mrf.mxu1 }
  0xda   : > { %v5243_v52 = vpop.f32.mrf.mxu0  ;;  %v5249_v53 = vpop.f32.mrf.mxu1 }
  0xdc   : > { %v6234_v56 = vpop.f32.mrf.mxu0  ;;  %v6236_v57 = vpop.f32.mrf.mxu1  ;;  %5541 = vmatmul.mubr.msk.bf16.vlgmr.msra.gmra.mxu0 %vm285_vm2, %v5869_v6  ;;  %5547 = vmatmul.mubr.msk.bf16.vlgmr.msra.gmra.mxu1 %vm285_vm2, %v5869_v6 }
  0xdd   : > { %5551 = vmatpush3.bf16.msra.mxu0 %v2579_v54  ;;  %5557 = vmatpush3.bf16.msra.mxu1 %v2623_v55 }
  0xde   : > { %v5254_v58 = vpop.f32.mrf.mxu0  ;;  %v5260_v59 = vpop.f32.mrf.mxu1  ;;  %5552 = vmatprep.mubr.msk.bf16.mxu0 %vm5808_vm0, %v5807_v0  ;;  %5558 = vmatprep.mubr.msk.bf16.mxu1 %vm5808_vm0, %v5807_v0 }
  0xdf   : > { %5562 = vmatprep.subr.bf16.mxu0 %v5807_v0  ;;  %5568 = vmatprep.subr.bf16.mxu1 %v5807_v0  ;;  %v3019_v58 = vsel %vm289_vm1, %v278_v48, 0  ;;  %v3063_v59 = vsel %vm289_vm1, %v279_v49, 0 }
  0xe0   : > { %v6250_v62 = vpop.f32.mrf.mxu0  ;;  %v6252_v63 = vpop.f32.mrf.mxu1 }
  0xe1   : > { %v3108_v23 = vpack.c.bf16 %v6250_v62, %v6234_v56 }
  0xe2   : > { %v5255_v1 = vpop.f32.mrf.mxu0  ;;  %v5261_v2 = vpop.f32.mrf.mxu1 }
  0xe3   : > { %v3170_v1 = vld [vmem:[%s6843_s2] sm:$0x1] }
  0xe4   : > { %v6256_v5 = vpop.f32.mrf.mxu0  ;;  %v6258_v7 = vpop.f32.mrf.mxu1  ;;  %5553 = vmatmul.mubr.msk.bf16.vlgmr.msra.gmra.mxu0 %vm285_vm2, %v5869_v6  ;;  %5559 = vmatmul.mubr.msk.bf16.vlgmr.msra.gmra.mxu1 %vm285_vm2, %v5869_v6  ;;  %v3364_v11 = vsel %vm289_vm1, %v3170_v1, 0 }
  0xe5   : > { %5563 = vmatpush3.bf16.msra.mxu0 %v2667_v3  ;;  %5569 = vmatpush3.bf16.msra.mxu1 %v2711_v4 }
  0xe6   : > { %v5266_v8 = vpop.f32.mrf.mxu0  ;;  %v5272_v9 = vpop.f32.mrf.mxu1  ;;  %5564 = vmatprep.mubr.msk.bf16.mxu0 %vm5808_vm0, %v5807_v0  ;;  %5570 = vmatprep.mubr.msk.bf16.mxu1 %vm5808_vm0, %v5807_v0 }
  0xe7   : > { %5574 = vmatprep.subr.bf16.mxu0 %v5807_v0  ;;  %5580 = vmatprep.subr.bf16.mxu1 %v5807_v0 }
  0xe8   : > { %v6272_v12 = vpop.f32.mrf.mxu0  ;;  %v6274_v13 = vpop.f32.mrf.mxu1 }
  0xe9   : > { %v3110_v56 = vpack.c.bf16 %v6272_v12, %v6256_v5 }
  0xea   : > { %v5267_v14 = vpop.f32.mrf.mxu0  ;;  %v5273_v15 = vpop.f32.mrf.mxu1 }
  0xeb   : > { %v3106_v14 = vpack.c.bf16 %v6228_v50, %v6212_v44  ;;  %v3107_v44 = vpack.c.bf16 %v6230_v51, %v6214_v45  ;;  %v3109_v45 = vpack.c.bf16 %v6252_v63, %v6236_v57  ;;  %v3111_v57 = vpack.c.bf16 %v6274_v13, %v6258_v7 }
  0xec   : > { %v6278_v18 = vpop.f32.mrf.mxu0  ;;  %v6280_v19 = vpop.f32.mrf.mxu1  ;;  %5565 = vmatmul.mubr.msk.bf16.vlgmr.msra.gmra.mxu0 %vm285_vm2, %v5869_v6  ;;  %5571 = vmatmul.mubr.msk.bf16.vlgmr.msra.gmra.mxu1 %vm285_vm2, %v5869_v6 }
  0xed   : > { %5575 = vmatpush3.bf16.msra.mxu0 %v2755_v16  ;;  %5581 = vmatpush3.bf16.msra.mxu1 %v2799_v17 }
  0xee   : > { %v5278_v20 = vpop.f32.mrf.mxu0  ;;  %v5284_v21 = vpop.f32.mrf.mxu1  ;;  %5576 = vmatprep.mubr.msk.bf16.mxu0 %vm5808_vm0, %v5807_v0  ;;  %5582 = vmatprep.mubr.msk.bf16.mxu1 %vm5808_vm0, %v5807_v0 }
  0xef   : > { %5586 = vmatprep.subr.bf16.mxu0 %v5807_v0  ;;  %5592 = vmatprep.subr.bf16.mxu1 %v5807_v0 }
  0xf0   : > { %v6294_v24 = vpop.f32.mrf.mxu0  ;;  %v6296_v25 = vpop.f32.mrf.mxu1 }
  0xf1   : > { %v3112_v5 = vpack.c.bf16 %v6294_v24, %v6278_v18  ;;  %v3113_v7 = vpack.c.bf16 %v6296_v25, %v6280_v19 }
  0xf2   : > { %v5279_v26 = vpop.f32.mrf.mxu0  ;;  %v5285_v27 = vpop.f32.mrf.mxu1 }
  0xf4   : > { %v6300_v30 = vpop.f32.mrf.mxu0  ;;  %v6302_v31 = vpop.f32.mrf.mxu1  ;;  %5577 = vmatmul.mubr.msk.bf16.vlgmr.msra.gmra.mxu0 %vm285_vm2, %v5869_v6  ;;  %5583 = vmatmul.mubr.msk.bf16.vlgmr.msra.gmra.mxu1 %vm285_vm2, %v5869_v6 }
  0xf5   : > { %5587 = vmatpush3.bf16.msra.mxu0 %v2843_v28  ;;  %5593 = vmatpush3.bf16.msra.mxu1 %v2887_v29 }
  0xf6   : > { %v5290_v32 = vpop.f32.mrf.mxu0  ;;  %v5296_v33 = vpop.f32.mrf.mxu1  ;;  %5588 = vmatprep.mubr.msk.bf16.mxu0 %vm5808_vm0, %v5807_v0  ;;  %5594 = vmatprep.mubr.msk.bf16.mxu1 %vm5808_vm0, %v5807_v0 }
  0xf7   : > { %5598 = vmatprep.subr.bf16.mxu0 %v5807_v0  ;;  %5604 = vmatprep.subr.bf16.mxu1 %v5807_v0 }
  0xf8   : > { %v6316_v36 = vpop.f32.mrf.mxu0  ;;  %v6318_v37 = vpop.f32.mrf.mxu1 }
  0xf9   : > { %v3114_v18 = vpack.c.bf16 %v6316_v36, %v6300_v30  ;;  %v3115_v19 = vpack.c.bf16 %v6318_v37, %v6302_v31 }
  0xfa   : > { %v5291_v38 = vpop.f32.mrf.mxu0  ;;  %v5297_v39 = vpop.f32.mrf.mxu1 }
  0xfc   : > { %v6322_v42 = vpop.f32.mrf.mxu0  ;;  %v6324_v43 = vpop.f32.mrf.mxu1  ;;  %5589 = vmatmul.mubr.msk.bf16.vlgmr.msra.gmra.mxu0 %vm285_vm2, %v5869_v6  ;;  %5595 = vmatmul.mubr.msk.bf16.vlgmr.msra.gmra.mxu1 %vm285_vm2, %v5869_v6 }
  0xfd   : > { %5599 = vmatpush3.bf16.msra.mxu0 %v2931_v40  ;;  %5605 = vmatpush3.bf16.msra.mxu1 %v2975_v41 }
  0xfe   : > { %v5302_v46 = vpop.f32.mrf.mxu0  ;;  %v5308_v47 = vpop.f32.mrf.mxu1  ;;  %5600 = vmatprep.mubr.msk.bf16.mxu0 %vm5808_vm0, %v5807_v0  ;;  %5606 = vmatprep.mubr.msk.bf16.mxu1 %vm5808_vm0, %v5807_v0 }
  0xff   : > { %5610 = vmatprep.subr.bf16.mxu0 %v5807_v0  ;;  %5616 = vmatprep.subr.bf16.mxu1 %v5807_v0 }
 0x100   : > { %v6338_v52 = vpop.f32.mrf.mxu0  ;;  %v6340_v53 = vpop.f32.mrf.mxu1 }
 0x101   : > { %v3116_v30 = vpack.c.bf16 %v6338_v52, %v6322_v42  ;;  %v3117_v31 = vpack.c.bf16 %v6340_v53, %v6324_v43 }
 0x102   : > { %v5303_v54 = vpop.f32.mrf.mxu0  ;;  %v5309_v55 = vpop.f32.mrf.mxu1 }
 0x104   : > { %v6344_v60 = vpop.f32.mrf.mxu0  ;;  %v6346_v61 = vpop.f32.mrf.mxu1  ;;  %5601 = vmatmul.mubr.msk.bf16.vlgmr.msra.gmra.mxu0 %vm285_vm2, %v5869_v6  ;;  %5607 = vmatmul.mubr.msk.bf16.vlgmr.msra.gmra.mxu1 %vm285_vm2, %v5869_v6 }
 0x105   : > { %5611 = vmatpush3.bf16.msra.mxu0 %v3019_v58  ;;  %5617 = vmatpush3.bf16.msra.mxu1 %v3063_v59 }
 0x106   : > { %v5314_v2 = vpop.f32.mrf.mxu0  ;;  %v5320_v3 = vpop.f32.mrf.mxu1  ;;  %5612 = vmatprep.mubr.msk.bf16.mxu0 %vm5808_vm0, %v5807_v0  ;;  %5618 = vmatprep.mubr.msk.bf16.mxu1 %vm5808_vm0, %v5807_v0 }
 0x107   : > { %5754 = vmatprep.subr.msk.bf16.mxu0 %vm289_vm1, %v3170_v1  ;;  %5755 = vmatprep.subr.msk.bf16.mxu1 %vm289_vm1, %v3170_v1 }
 0x108   : > { %v6361_v4 = vpop.f32.mrf.mxu0  ;;  %v6363_v8 = vpop.f32.mrf.mxu1 }
 0x109   : > { %v3118_v42 = vpack.c.bf16 %v6361_v4, %v6344_v60  ;;  %v3119_v43 = vpack.c.bf16 %v6363_v8, %v6346_v61 }
 0x10a   : > { %v5315_v9 = vpop.f32.mrf.mxu0  ;;  %v5321_v10 = vpop.f32.mrf.mxu1 }
 0x10c   : > { %v6368_v15 = vpop.f32.mrf.mxu0  ;;  %v6370_v16 = vpop.f32.mrf.mxu1  ;;  %5613 = vmatmul.mubr.msk.bf16.vlgmr.msra.gmra.mxu0 %vm285_vm2, %v5869_v6  ;;  %5619 = vmatmul.mubr.msk.bf16.vlgmr.msra.gmra.mxu1 %vm285_vm2, %v5869_v6 }
 0x10d   : > { %5624 = vmatprep.mubr.msk.bf16.mxu0 %vm285_vm2, %v3106_v14  ;;  %5623 = vmatpush3.bf16.msra.mxu0 %v3364_v11 }
 0x10e   : > { %v5326_v0 = vpop.f32.mrf.mxu0  ;;  %v5332_v17 = vpop.f32.mrf.mxu1  ;;  %5753 = vmatpush3.bf16.msra.mxu1 %v3364_v11 }
 0x110   : > { %v6377_v20 = vpop.f32.mrf.mxu0  ;;  %v6379_v21 = vpop.f32.mrf.mxu1 }
 0x111   : > { %v3120_v60 = vpack.c.bf16 %v6377_v20, %v6368_v15  ;;  %v3121_v61 = vpack.c.bf16 %v6379_v21, %v6370_v16 }
 0x112   : > { %v5327_v50 = vpop.f32.mrf.mxu0  ;;  %v5333_v22 = vpop.f32.mrf.mxu1 }
 0x114   : > { %v6385_v26 = vpop.f32.mrf.mxu0  ;;  %v6387_v6 = vpop.f32.mrf.mxu1  ;;  %5625 = vmatmul.mubr.msk.bf16.vlgmr.msra.gmra.mxu0 %vm285_vm2, %v3107_v44 }
 0x115   : > { %5628 = vmatprep.mubr.msk.bf16.mxu0 %vm285_vm2, %v3108_v23 }
 0x116   : > { %v5338_v27 = vpop.f32.mrf.mxu0  ;;  %v5344_v28 = vpop.f32.mrf.mxu1 }
 0x118   : > { %v6391_v29 = vpop.f32.mrf.mxu0  ;;  %v6393_v32 = vpop.f32.mrf.mxu1 }
 0x119   : > { %v3122_v15 = vpack.c.bf16 %v6391_v29, %v6385_v26  ;;  %v3123_v16 = vpack.c.bf16 %v6393_v32, %v6387_v6 }
 0x11a   : > { %v5339_v51 = vpop.f32.mrf.mxu0  ;;  %v5345_v33 = vpop.f32.mrf.mxu1 }
 0x11c   : > { %v6399_v62 = vpop.f32.mrf.mxu0  ;;  %v6401_v34 = vpop.f32.mrf.mxu1  ;;  %5629 = vmatmul.mubr.msk.bf16.gmra.mxu0 %vm285_vm2, %v3109_v45 }
 0x11d   : > { %5632 = vmatprep.mubr.msk.bf16.mxu0 %vm285_vm2, %v3110_v56 }
 0x11e   : > { %v5350_v35 = vpop.f32.mrf.mxu0  ;;  %v5356_v38 = vpop.f32.mrf.mxu1 }
 0x120   : > { %v6405_v39 = vpop.f32.mrf.mxu0  ;;  %v6407_v40 = vpop.f32.mrf.mxu1 }
 0x121   : > { %v3124_v26 = vpack.c.bf16 %v6405_v39, %v6399_v62  ;;  %v3125_v6 = vpack.c.bf16 %v6407_v40, %v6401_v34 }
 0x122   : > { %v5351_v63 = vpop.f32.mrf.mxu0  ;;  %v5357_v41 = vpop.f32.mrf.mxu1 }
 0x124   : > { %v6413_v12 = vpop.f32.mrf.mxu0  ;;  %v6415_v46 = vpop.f32.mrf.mxu1  ;;  %5633 = vmatmul.mubr.msk.bf16.gmra.mxu0 %vm285_vm2, %v3111_v57 }
 0x125   : > { %5636 = vmatprep.mubr.msk.bf16.mxu0 %vm285_vm2, %v3112_v5 }
 0x126   : > { %v5362_v47 = vpop.f32.mrf.mxu0  ;;  %v5368_v48 = vpop.f32.mrf.mxu1 }
 0x128   : > { %v6419_v49 = vpop.f32.mrf.mxu0  ;;  %v6421_v54 = vpop.f32.mrf.mxu1 }
 0x129   : > { %v3126_v62 = vpack.c.bf16 %v6419_v49, %v6413_v12 }
 0x12a   : > { %v5363_v13 = vpop.f32.mrf.mxu0  ;;  %v5369_v55 = vpop.f32.mrf.mxu1 }
 0x12c   : > { %v6427_v24 = vpop.f32.mrf.mxu0  ;;  %v6429_v58 = vpop.f32.mrf.mxu1  ;;  %5637 = vmatmul.mubr.msk.bf16.gmra.mxu0 %vm285_vm2, %v3113_v7 }
 0x12d   : > { %5640 = vmatprep.mubr.msk.bf16.mxu0 %vm285_vm2, %v3114_v18 }
 0x12e   : > { %v5374_v59 = vpop.f32.mrf.mxu0  ;;  %v5380_v1 = vpop.f32.mrf.mxu1 }
 0x130   : > { %v6433_v2 = vpop.f32.mrf.mxu0  ;;  %v6435_v3 = vpop.f32.mrf.mxu1 }
 0x132   : > { %v5375_v25 = vpop.f32.mrf.mxu0  ;;  %v5381_v9 = vpop.f32.mrf.mxu1 }
 0x134   : > { %v6441_v36 = vpop.f32.mrf.mxu0  ;;  %v6443_v10 = vpop.f32.mrf.mxu1  ;;  %5641 = vmatmul.mubr.msk.bf16.gmra.mxu0 %vm285_vm2, %v3115_v19 }
 0x135   : > { %5644 = vmatprep.mubr.msk.bf16.mxu0 %vm285_vm2, %v3116_v30 }
 0x136   : > { %v5386_v11 = vpop.f32.mrf.mxu0  ;;  %v5392_v14 = vpop.f32.mrf.mxu1 }
 0x138   : > { %v6447_v0 = vpop.f32.mrf.mxu0  ;;  %v6449_v17 = vpop.f32.mrf.mxu1 }
 0x13a   : > { %v5387_v37 = vpop.f32.mrf.mxu0  ;;  %v5393_v44 = vpop.f32.mrf.mxu1 }
 0x13b   : > { %v3127_v44 = vpack.c.bf16 %v6421_v54, %v6415_v46 }
 0x13c   : > { %v6455_v52 = vpop.f32.mrf.mxu0  ;;  %v6457_v50 = vpop.f32.mrf.mxu1  ;;  %5645 = vmatmul.mubr.msk.bf16.gmra.mxu0 %vm285_vm2, %v3117_v31 }
 0x13d   : > { %5648 = vmatprep.mubr.msk.bf16.mxu0 %vm285_vm2, %v3118_v42  ;;  %v3128_v42 = vpack.c.bf16 %v6433_v2, %v6427_v24 }
 0x13e   : > { %v5398_v22 = vpop.f32.mrf.mxu0  ;;  %v5404_v23 = vpop.f32.mrf.mxu1 }
 0x140   : > { %v6461_v27 = vpop.f32.mrf.mxu0  ;;  %v6463_v28 = vpop.f32.mrf.mxu1 }
 0x142   : > { %v5399_v53 = vpop.f32.mrf.mxu0  ;;  %v5405_v45 = vpop.f32.mrf.mxu1 }
 0x144   : > { %v6469_v4 = vpop.f32.mrf.mxu0  ;;  %v6471_v51 = vpop.f32.mrf.mxu1  ;;  %5649 = vmatmul.mubr.msk.bf16.gmra.mxu0 %vm285_vm2, %v3119_v43 }
 0x145   : > { %5652 = vmatprep.mubr.msk.bf16.mxu0 %vm285_vm2, %v3120_v60 }
 0x146   : > { %v5410_v33 = vpop.f32.mrf.mxu0  ;;  %v5416_v56 = vpop.f32.mrf.mxu1 }
 0x147   : > { %v3129_v33 = vpack.c.bf16 %v6435_v3, %v6429_v58  ;;  %v3130_v56 = vpack.c.bf16 %v6447_v0, %v6441_v36 }
 0x148   : > { %v6475_v35 = vpop.f32.mrf.mxu0  ;;  %v6477_v38 = vpop.f32.mrf.mxu1 }
 0x14a   : > { %v5411_v8 = vpop.f32.mrf.mxu0  ;;  %v5417_v57 = vpop.f32.mrf.mxu1 }
 0x14c   : > { %v6483_v20 = vpop.f32.mrf.mxu0  ;;  %v6485_v63 = vpop.f32.mrf.mxu1  ;;  %5653 = vmatmul.mubr.msk.bf16.gmra.mxu0 %vm285_vm2, %v3121_v61 }
 0x14d   : > { %5656 = vmatprep.mubr.msk.bf16.mxu0 %vm285_vm2, %v3122_v15 }
 0x14e   : > { %v5422_v41 = vpop.f32.mrf.mxu0  ;;  %v5428_v5 = vpop.f32.mrf.mxu1 }
 0x150   : > { %v6489_v47 = vpop.f32.mrf.mxu0  ;;  %v6491_v48 = vpop.f32.mrf.mxu1 }
 0x152   : > { %v5423_v21 = vpop.f32.mrf.mxu0  ;;  %v5429_v7 = vpop.f32.mrf.mxu1 }
 0x153   : > { %v3132_v21 = vpack.c.bf16 %v6461_v27, %v6455_v52 }
 0x154   : > { %v1735_v29 = vpop.f32.mrf.mxu0  ;;  %v1779_v13 = vpop.f32.mrf.mxu1  ;;  %5657 = vmatmul.mubr.msk.bf16.gmra.mxu0 %vm285_vm2, %v3123_v16  ;;  %v3131_v16 = vpack.c.bf16 %v6449_v17, %v6443_v10 }
 0x155   : > { %5660 = vmatprep.mubr.msk.bf16.mxu0 %vm285_vm2, %v3124_v26 }
 0x156   : > { %v5434_v55 = vpop.f32.mrf.mxu0  ;;  %v5440_v18 = vpop.f32.mrf.mxu1 }
 0x158   : > { %v1738_v59 = vpop.f32.mrf.mxu0  ;;  %v1782_v1 = vpop.f32.mrf.mxu1 }
 0x159   : > { %v3138_v19 = vpack.c.bf16 %v1738_v59, %v1735_v29  ;;  %v3139_v25 = vpack.c.bf16 %v1782_v1, %v1779_v13  ;;  %v3133_v59 = vpack.c.bf16 %v6463_v28, %v6457_v50  ;;  %v3134_v1 = vpack.c.bf16 %v6475_v35, %v6469_v4 }
 0x15a   : > { %v5435_v32 = vpop.f32.mrf.mxu0  ;;  %v5441_v9 = vpop.f32.mrf.mxu1 }
 0x15b   : > { %5688 = vmatprep.mubr.msk.bf16.mxu1 %vm285_vm2, %v3138_v19 }
 0x15c   : > { %v1823_v39 = vpop.f32.mrf.mxu0  ;;  %v1867_v30 = vpop.f32.mrf.mxu1  ;;  %5661 = vmatmul.mubr.msk.bf16.gmra.mxu0 %vm285_vm2, %v3125_v6  ;;  %5689 = vmatmul.mubr.msk.bf16.vlgmr.msra.gmra.mxu1 %vm285_vm2, %v3139_v25 }
 0x15d   : > { %5664 = vmatprep.mubr.msk.bf16.mxu0 %vm285_vm2, %v3126_v62 }
 0x15e   : > { %v5446_v11 = vpop.f32.mrf.mxu0  ;;  %v5452_v14 = vpop.f32.mrf.mxu1 }
 0x160   : > { %v1826_v31 = vpop.f32.mrf.mxu0  ;;  %v1870_v37 = vpop.f32.mrf.mxu1 }
 0x161   : > { %v3140_v34 = vpack.c.bf16 %v1826_v31, %v1823_v39  ;;  %v3141_v40 = vpack.c.bf16 %v1870_v37, %v1867_v30  ;;  %v3135_v39 = vpack.c.bf16 %v6477_v38, %v6471_v51  ;;  %v3136_v30 = vpack.c.bf16 %v6489_v47, %v6483_v20 }
 0x162   : > { %v5447_v12 = vpop.f32.mrf.mxu0  ;;  %v5453_v49 = vpop.f32.mrf.mxu1 }
 0x163   : > { %5692 = vmatprep.mubr.msk.bf16.mxu1 %vm285_vm2, %v3140_v34 }
 0x164   : > { %v1911_v22 = vpop.f32.mrf.mxu0  ;;  %v1955_v23 = vpop.f32.mrf.mxu1  ;;  %5665 = vmatmul.mubr.msk.bf16.gmra.mxu0 %vm285_vm2, %v3127_v44  ;;  %5693 = vmatmul.mubr.msk.bf16.gmra.mxu1 %vm285_vm2, %v3141_v40  ;;  %v3137_v44 = vpack.c.bf16 %v6491_v48, %v6485_v63 }
 0x165   : > { %5668 = vmatprep.mubr.msk.bf16.mxu0 %vm285_vm2, %v3128_v42 }
 0x166   : > { %v5458_v43 = vpop.f32.mrf.mxu0  ;;  %v5464_v53 = vpop.f32.mrf.mxu1 }
 0x168   : > { %v1914_v45 = vpop.f32.mrf.mxu0  ;;  %v1958_v60 = vpop.f32.mrf.mxu1 }
 0x169   : > { %v3142_v46 = vpack.c.bf16 %v1914_v45, %v1911_v22  ;;  %v3143_v54 = vpack.c.bf16 %v1958_v60, %v1955_v23 }
 0x16a   : > { %v5459_v24 = vpop.f32.mrf.mxu0  ;;  %v5465_v2 = vpop.f32.mrf.mxu1 }
 0x16b   : > { %5696 = vmatprep.mubr.msk.bf16.mxu1 %vm285_vm2, %v3142_v46 }
 0x16c   : > { %v1999_v61 = vpop.f32.mrf.mxu0  ;;  %v2043_v8 = vpop.f32.mrf.mxu1  ;;  %5669 = vmatmul.mubr.msk.bf16.gmra.mxu0 %vm285_vm2, %v3129_v33  ;;  %5697 = vmatmul.mubr.msk.bf16.gmra.mxu1 %vm285_vm2, %v3143_v54 }
 0x16d   : > { %5672 = vmatprep.mubr.msk.bf16.mxu0 %vm285_vm2, %v3130_v56 }
 0x16e   : > { %v5470_v57 = vpop.f32.mrf.mxu0  ;;  %v5476_v15 = vpop.f32.mrf.mxu1 }
 0x170   : > { %v2002_v41 = vpop.f32.mrf.mxu0  ;;  %v2046_v5 = vpop.f32.mrf.mxu1 }
 0x171   : > { %v3144_v58 = vpack.c.bf16 %v2002_v41, %v1999_v61  ;;  %v3145_v3 = vpack.c.bf16 %v2046_v5, %v2043_v8 }
 0x172   : > { %v5471_v36 = vpop.f32.mrf.mxu0  ;;  %v5477_v0 = vpop.f32.mrf.mxu1 }
 0x173   : > { %5700 = vmatprep.mubr.msk.bf16.mxu1 %vm285_vm2, %v3144_v58 }
 0x174   : > { %v2087_v7 = vpop.f32.mrf.mxu0  ;;  %v2131_v26 = vpop.f32.mrf.mxu1  ;;  %5673 = vmatmul.mubr.msk.bf16.gmra.mxu0 %vm285_vm2, %v3131_v16  ;;  %5701 = vmatmul.mubr.msk.bf16.gmra.mxu1 %vm285_vm2, %v3145_v3 }
 0x175   : > { %5676 = vmatprep.mubr.msk.bf16.mxu0 %vm285_vm2, %v3132_v21 }
 0x176   : > { %v5482_v29 = vpop.f32.mrf.mxu0  ;;  %v5488_v13 = vpop.f32.mrf.mxu1 }
 0x178   : > { %v2090_v55 = vpop.f32.mrf.mxu0  ;;  %v2134_v18 = vpop.f32.mrf.mxu1 }
 0x179   : > { %v3146_v10 = vpack.c.bf16 %v2090_v55, %v2087_v7  ;;  %v3147_v17 = vpack.c.bf16 %v2134_v18, %v2131_v26 }
 0x17a   : > { %v5483_v52 = vpop.f32.mrf.mxu0  ;;  %v5489_v27 = vpop.f32.mrf.mxu1 }
 0x17b   : > { %5704 = vmatprep.mubr.msk.bf16.mxu1 %vm285_vm2, %v3146_v10 }
 0x17c   : > { %v2175_v19 = vpop.f32.mrf.mxu0  ;;  %v2219_v25 = vpop.f32.mrf.mxu1  ;;  %5677 = vmatmul.mubr.msk.bf16.gmra.mxu0 %vm285_vm2, %v3133_v59  ;;  %5705 = vmatmul.mubr.msk.bf16.gmra.mxu1 %vm285_vm2, %v3147_v17 }
 0x17d   : > { %5680 = vmatprep.mubr.msk.bf16.mxu0 %vm285_vm2, %v3134_v1 }
 0x17e   : > { %v5494_v6 = vpop.f32.mrf.mxu0  ;;  %v5500_v32 = vpop.f32.mrf.mxu1 }
 0x180   : > { %v2178_v9 = vpop.f32.mrf.mxu0  ;;  %v2222_v62 = vpop.f32.mrf.mxu1 }
 0x181   : > { %v3148_v50 = vpack.c.bf16 %v2178_v9, %v2175_v19  ;;  %v3149_v28 = vpack.c.bf16 %v2222_v62, %v2219_v25 }
 0x182   : > { %v5495_v4 = vpop.f32.mrf.mxu0  ;;  %v5501_v35 = vpop.f32.mrf.mxu1 }
 0x183   : > { %5708 = vmatprep.mubr.msk.bf16.mxu1 %vm285_vm2, %v3148_v50 }
 0x184   : > { %v2263_v11 = vpop.f32.mrf.mxu0  ;;  %v2307_v14 = vpop.f32.mrf.mxu1  ;;  %5681 = vmatmul.mubr.msk.bf16.gmra.mxu0 %vm285_vm2, %v3135_v39  ;;  %5709 = vmatmul.mubr.msk.bf16.gmra.mxu1 %vm285_vm2, %v3149_v28 }
 0x185   : > { %5684 = vmatprep.mubr.msk.bf16.mxu0 %vm285_vm2, %v3136_v30 }
 0x186   : > { %v5506_v31 = vpop.f32.mrf.mxu0  ;;  %v5512_v37 = vpop.f32.mrf.mxu1 }
 0x188   : > { %v2266_v34 = vpop.f32.mrf.mxu0  ;;  %v2310_v40 = vpop.f32.mrf.mxu1 }
 0x189   : > { %v3150_v51 = vpack.c.bf16 %v2266_v34, %v2263_v11  ;;  %v3151_v38 = vpack.c.bf16 %v2310_v40, %v2307_v14 }
 0x18a   : > { %v5507_v20 = vpop.f32.mrf.mxu0  ;;  %v5513_v47 = vpop.f32.mrf.mxu1 }
 0x18b   : > { %5712 = vmatprep.mubr.msk.bf16.mxu1 %vm285_vm2, %v3150_v51 }
 0x18c   : > { %v2351_v12 = vpop.f32.mrf.mxu0  ;;  %v2395_v49 = vpop.f32.mrf.mxu1  ;;  %5685 = vmatmul.mubr.msk.bf16.gmra.mxu0 %vm285_vm2, %v3137_v44  ;;  %5713 = vmatmul.mubr.msk.bf16.gmra.mxu1 %vm285_vm2, %v3151_v38 }
 0x18e   : > { %v5518_v42 = vpop.f32.mrf.mxu0  ;;  %v5524_v22 = vpop.f32.mrf.mxu1 }
 0x190   : > { %v2354_v23 = vpop.f32.mrf.mxu0  ;;  %v2398_v43 = vpop.f32.mrf.mxu1 }
 0x191   : > { %v3152_v53 = vpack.c.bf16 %v2354_v23, %v2351_v12  ;;  %v3153_v45 = vpack.c.bf16 %v2398_v43, %v2395_v49 }
 0x192   : > { %v5519_v60 = vpop.f32.mrf.mxu0  ;;  %v5525_v46 = vpop.f32.mrf.mxu1 }
 0x193   : > { %5716 = vmatprep.mubr.msk.bf16.mxu1 %vm285_vm2, %v3152_v53 }
 0x194   : > { %v2439_v63 = vpop.f32.mrf.mxu0  ;;  %v2483_v48 = vpop.f32.mrf.mxu1  ;;  %5717 = vmatmul.mubr.msk.bf16.gmra.mxu1 %vm285_vm2, %v3153_v45 }
 0x196   : > { %v5530_v54 = vpop.f32.mrf.mxu0  ;;  %v5536_v33 = vpop.f32.mrf.mxu1 }
 0x198   : > { %v2442_v24 = vpop.f32.mrf.mxu0  ;;  %v2486_v2 = vpop.f32.mrf.mxu1 }
 0x199   : > { %v3154_v56 = vpack.c.bf16 %v2442_v24, %v2439_v63  ;;  %v3155_v61 = vpack.c.bf16 %v2486_v2, %v2483_v48 }
 0x19a   : > { %v5531_v8 = vpop.f32.mrf.mxu0  ;;  %v5537_v57 = vpop.f32.mrf.mxu1 }
 0x19b   : > { %5720 = vmatprep.mubr.msk.bf16.mxu1 %vm285_vm2, %v3154_v56 }
 0x19c   : > { %v2527_v15 = vpop.f32.mrf.mxu0  ;;  %v2571_v41 = vpop.f32.mrf.mxu1  ;;  %5721 = vmatmul.mubr.msk.bf16.gmra.mxu1 %vm285_vm2, %v3155_v61 }
 0x19e   : > { %v5542_v5 = vpop.f32.mrf.mxu0  ;;  %v5548_v58 = vpop.f32.mrf.mxu1 }
 0x1a0   : > { %v2530_v3 = vpop.f32.mrf.mxu0  ;;  %v2574_v16 = vpop.f32.mrf.mxu1 }
 0x1a1   : > { %v3156_v36 = vpack.c.bf16 %v2530_v3, %v2527_v15  ;;  %v3157_v0 = vpack.c.bf16 %v2574_v16, %v2571_v41 }
 0x1a2   : > { %v5543_v21 = vpop.f32.mrf.mxu0  ;;  %v5549_v7 = vpop.f32.mrf.mxu1 }
 0x1a3   : > { %5724 = vmatprep.mubr.msk.bf16.mxu1 %vm285_vm2, %v3156_v36 }
 0x1a4   : > { %v2615_v26 = vpop.f32.mrf.mxu0  ;;  %v2659_v29 = vpop.f32.mrf.mxu1  ;;  %5725 = vmatmul.mubr.msk.bf16.gmra.mxu1 %vm285_vm2, %v3157_v0 }
 0x1a6   : > { %v5554_v13 = vpop.f32.mrf.mxu0  ;;  %v5560_v55 = vpop.f32.mrf.mxu1 }
 0x1a8   : > { %v2618_v18 = vpop.f32.mrf.mxu0  ;;  %v2662_v10 = vpop.f32.mrf.mxu1 }
 0x1a9   : > { %v3158_v17 = vpack.c.bf16 %v2618_v18, %v2615_v26  ;;  %v3159_v59 = vpack.c.bf16 %v2662_v10, %v2659_v29 }
 0x1aa   : > { %v5555_v52 = vpop.f32.mrf.mxu0  ;;  %v5561_v27 = vpop.f32.mrf.mxu1 }
 0x1ab   : > { %5728 = vmatprep.mubr.msk.bf16.mxu1 %vm285_vm2, %v3158_v17 }
 0x1ac   : > { %v2703_v1 = vpop.f32.mrf.mxu0  ;;  %v2747_v19 = vpop.f32.mrf.mxu1  ;;  %5729 = vmatmul.mubr.msk.bf16.gmra.mxu1 %vm285_vm2, %v3159_v59 }
 0x1ae   : > { %v5566_v25 = vpop.f32.mrf.mxu0  ;;  %v5572_v6 = vpop.f32.mrf.mxu1 }
 0x1b0   : > { %v2706_v32 = vpop.f32.mrf.mxu0  ;;  %v2750_v9 = vpop.f32.mrf.mxu1 }
 0x1b1   : > { %v3160_v62 = vpack.c.bf16 %v2706_v32, %v2703_v1  ;;  %v3161_v50 = vpack.c.bf16 %v2750_v9, %v2747_v19 }
 0x1b2   : > { %v5567_v28 = vpop.f32.mrf.mxu0  ;;  %v5573_v39 = vpop.f32.mrf.mxu1 }
 0x1b3   : > { %5732 = vmatprep.mubr.msk.bf16.mxu1 %vm285_vm2, %v3160_v62 }
 0x1b4   : > { %v2791_v4 = vpop.f32.mrf.mxu0  ;;  %v2835_v35 = vpop.f32.mrf.mxu1  ;;  %5733 = vmatmul.mubr.msk.bf16.gmra.mxu1 %vm285_vm2, %v3161_v50 }
 0x1b6   : > { %v5578_v30 = vpop.f32.mrf.mxu0  ;;  %v5584_v11 = vpop.f32.mrf.mxu1 }
 0x1b8   : > { %v2794_v14 = vpop.f32.mrf.mxu0  ;;  %v2838_v31 = vpop.f32.mrf.mxu1 }
 0x1b9   : > { %v3162_v37 = vpack.c.bf16 %v2794_v14, %v2791_v4  ;;  %v3163_v34 = vpack.c.bf16 %v2838_v31, %v2835_v35 }
 0x1ba   : > { %v5579_v40 = vpop.f32.mrf.mxu0  ;;  %v5585_v51 = vpop.f32.mrf.mxu1 }
 0x1bb   : > { %5736 = vmatprep.mubr.msk.bf16.mxu1 %vm285_vm2, %v3162_v37 }
 0x1bc   : > { %v2879_v38 = vpop.f32.mrf.mxu0  ;;  %v2923_v44 = vpop.f32.mrf.mxu1  ;;  %5737 = vmatmul.mubr.msk.bf16.gmra.mxu1 %vm285_vm2, %v3163_v34 }
 0x1be   : > { %v5590_v20 = vpop.f32.mrf.mxu0  ;;  %v5596_v47 = vpop.f32.mrf.mxu1 }
 0x1c0   : > { %v2882_v12 = vpop.f32.mrf.mxu0  ;;  %v2926_v49 = vpop.f32.mrf.mxu1 }
 0x1c1   : > { %v3164_v42 = vpack.c.bf16 %v2882_v12, %v2879_v38  ;;  %v3165_v22 = vpack.c.bf16 %v2926_v49, %v2923_v44 }
 0x1c2   : > { %v5591_v23 = vpop.f32.mrf.mxu0  ;;  %v5597_v43 = vpop.f32.mrf.mxu1 }
 0x1c3   : > { %5740 = vmatprep.mubr.msk.bf16.mxu1 %vm285_vm2, %v3164_v42 }
 0x1c4   : > { %v2967_v53 = vpop.f32.mrf.mxu0  ;;  %v3011_v45 = vpop.f32.mrf.mxu1  ;;  %5741 = vmatmul.mubr.msk.bf16.gmra.mxu1 %vm285_vm2, %v3165_v22 }
 0x1c6   : > { %v5602_v60 = vpop.f32.mrf.mxu0  ;;  %v5608_v46 = vpop.f32.mrf.mxu1 }
 0x1c8   : > { %v2970_v63 = vpop.f32.mrf.mxu0  ;;  %v3014_v48 = vpop.f32.mrf.mxu1 }
 0x1c9   : > { %v3166_v54 = vpack.c.bf16 %v2970_v63, %v2967_v53  ;;  %v3167_v33 = vpack.c.bf16 %v3014_v48, %v3011_v45 }
 0x1ca   : > { %v5603_v24 = vpop.f32.mrf.mxu0  ;;  %v5609_v2 = vpop.f32.mrf.mxu1 }
 0x1cb   : > { %5744 = vmatprep.mubr.msk.bf16.mxu1 %vm285_vm2, %v3166_v54 }
 0x1cc   : > { %v3055_v56 = vpop.f32.mrf.mxu0  ;;  %v3099_v61 = vpop.f32.mrf.mxu1  ;;  %5745 = vmatmul.mubr.msk.bf16.gmra.mxu1 %vm285_vm2, %v3167_v33 }
 0x1ce   : > { %v5614_v8 = vpop.f32.mrf.mxu0  ;;  %v5620_v57 = vpop.f32.mrf.mxu1 }
 0x1d0   : > { %v3058_v15 = vpop.f32.mrf.mxu0  ;;  %v3102_v41 = vpop.f32.mrf.mxu1 }
 0x1d1   : > { %v3168_v5 = vpack.c.bf16 %v3058_v15, %v3055_v56  ;;  %v3169_v58 = vpack.c.bf16 %v3102_v41, %v3099_v61 }
 0x1d2   : > { %v5615_v3 = vpop.f32.mrf.mxu0  ;;  %v5621_v16 = vpop.f32.mrf.mxu1 }
 0x1d3   : > { %5748 = vmatprep.mubr.msk.bf16.mxu1 %vm285_vm2, %v3168_v5 }
 0x1d4   : > { %v5626_v36 = vpop.f32.mrf.mxu0  ;;  %5749 = vmatmul.mubr.msk.bf16.gmra.mxu1 %vm285_vm2, %v3169_v58 }
 0x1d5   : > { %v4919_v0 = vpack.c.bf16 %v5626_v36, %v5626_v36 }
 0x1d6   : > { %v3400_v21 = vpop.f32.mrf.mxu0 }
 0x1d7   : > { %4426 = vst.msk [vmem:[%s6573_s27 + $0x8] sm:$0xf] %vm4423_vm3, %v4919_v0  ;;  %v4917_v7 = vpack.c.bf16 %v3400_v21, %v3400_v21 }
 0x1d8   : > { %v5627_v26 = vpop.f32.mrf.mxu0 }
 0x1d9   : > { %4424 = vst.msk [vmem:[%s6573_s27] sm:$0xf] %vm4423_vm3, %v4917_v7  ;;  %v4920_v29 = vpack.c.bf16 %v5627_v26, %v5627_v26 }
 0x1da   : > { %v3403_v13 = vpop.f32.mrf.mxu0 }
 0x1db   : > { %4427 = vst.msk [vmem:[%s6573_s27 + $0xc] sm:$0xf] %vm4423_vm3, %v4920_v29  ;;  %v4918_v55 = vpack.c.bf16 %v3403_v13, %v3403_v13 }
 0x1dc   : > { %v5630_v18 = vpop.f32.mrf.mxu0 }
 0x1dd   : > { %4425 = vst.msk [vmem:[%s6573_s27 + $0x4] sm:$0xf] %vm4423_vm3, %v4918_v55  ;;  %v4923_v10 = vpack.c.bf16 %v5630_v18, %v5630_v18 }
 0x1de   : > { %v3416_v17 = vpop.f32.mrf.mxu0 }
 0x1df   : > { %4430 = vst.msk [vmem:[%s6573_s27 + $0x18] sm:$0xf] %vm4423_vm3, %v4923_v10  ;;  %v4921_v59 = vpack.c.bf16 %v3416_v17, %v3416_v17 }
 0x1e0   : > { %v5631_v52 = vpop.f32.mrf.mxu0 }
 0x1e1   : > { %4428 = vst.msk [vmem:[%s6573_s27 + $0x10] sm:$0xf] %vm4423_vm3, %v4921_v59  ;;  %v4924_v27 = vpack.c.bf16 %v5631_v52, %v5631_v52 }
 0x1e2   : > { %v3419_v1 = vpop.f32.mrf.mxu0 }
 0x1e3   : > { %4431 = vst.msk [vmem:[%s6573_s27 + $0x1c] sm:$0xf] %vm4423_vm3, %v4924_v27  ;;  %v4922_v19 = vpack.c.bf16 %v3419_v1, %v3419_v1 }
 0x1e4   : > { %v5634_v25 = vpop.f32.mrf.mxu0 }
 0x1e5   : > { %4429 = vst.msk [vmem:[%s6573_s27 + $0x14] sm:$0xf] %vm4423_vm3, %v4922_v19  ;;  %v4927_v6 = vpack.c.bf16 %v5634_v25, %v5634_v25 }
 0x1e6   : > { %v3432_v32 = vpop.f32.mrf.mxu0 }
 0x1e7   : > { %4434 = vst.msk [vmem:[%s6573_s27 + $0x28] sm:$0xf] %vm4423_vm3, %v4927_v6  ;;  %v4925_v9 = vpack.c.bf16 %v3432_v32, %v3432_v32 }
 0x1e8   : > { %v5635_v62 = vpop.f32.mrf.mxu0 }
 0x1e9   : > { %4432 = vst.msk [vmem:[%s6573_s27 + $0x20] sm:$0xf] %vm4423_vm3, %v4925_v9  ;;  %v4928_v50 = vpack.c.bf16 %v5635_v62, %v5635_v62 }
 0x1ea   : > { %v3435_v28 = vpop.f32.mrf.mxu0 }
 0x1eb   : > { %4435 = vst.msk [vmem:[%s6573_s27 + $0x2c] sm:$0xf] %vm4423_vm3, %v4928_v50  ;;  %v4926_v39 = vpack.c.bf16 %v3435_v28, %v3435_v28 }
 0x1ec   : > { %v5638_v4 = vpop.f32.mrf.mxu0 }
 0x1ed   : > { %4433 = vst.msk [vmem:[%s6573_s27 + $0x24] sm:$0xf] %vm4423_vm3, %v4926_v39  ;;  %v4931_v35 = vpack.c.bf16 %v5638_v4, %v5638_v4 }
 0x1ee   : > { %v3448_v30 = vpop.f32.mrf.mxu0 }
 0x1ef   : > { %4438 = vst.msk [vmem:[%s6573_s27 + $0x38] sm:$0xf] %vm4423_vm3, %v4931_v35  ;;  %v4929_v11 = vpack.c.bf16 %v3448_v30, %v3448_v30 }
 0x1f0   : > { %v5639_v14 = vpop.f32.mrf.mxu0 }
 0x1f1   : > { %4436 = vst.msk [vmem:[%s6573_s27 + $0x30] sm:$0xf] %vm4423_vm3, %v4929_v11  ;;  %v4932_v31 = vpack.c.bf16 %v5639_v14, %v5639_v14 }
 0x1f2   : > { %v3451_v37 = vpop.f32.mrf.mxu0 }
 0x1f3   : > { %4439 = vst.msk [vmem:[%s6573_s27 + $0x3c] sm:$0xf] %vm4423_vm3, %v4932_v31  ;;  %v4930_v34 = vpack.c.bf16 %v3451_v37, %v3451_v37 }
 0x1f4   : > { %v5642_v40 = vpop.f32.mrf.mxu0 }
 0x1f5   : > { %4437 = vst.msk [vmem:[%s6573_s27 + $0x34] sm:$0xf] %vm4423_vm3, %v4930_v34  ;;  %v4935_v51 = vpack.c.bf16 %v5642_v40, %v5642_v40 }
 0x1f6   : > { %v3464_v38 = vpop.f32.mrf.mxu0 }
 0x1f7   : > { %4442 = vst.msk [vmem:[%s6573_s27 + $0x48] sm:$0xf] %vm4423_vm3, %v4935_v51  ;;  %v4933_v44 = vpack.c.bf16 %v3464_v38, %v3464_v38 }
 0x1f8   : > { %v5643_v20 = vpop.f32.mrf.mxu0 }
 0x1f9   : > { %4440 = vst.msk [vmem:[%s6573_s27 + $0x40] sm:$0xf] %vm4423_vm3, %v4933_v44  ;;  %v4936_v47 = vpack.c.bf16 %v5643_v20, %v5643_v20 }
 0x1fa   : > { %v3467_v12 = vpop.f32.mrf.mxu0 }
 0x1fb   : > { %4443 = vst.msk [vmem:[%s6573_s27 + $0x4c] sm:$0xf] %vm4423_vm3, %v4936_v47  ;;  %v4934_v49 = vpack.c.bf16 %v3467_v12, %v3467_v12 }
 0x1fc   : > { %v5646_v42 = vpop.f32.mrf.mxu0 }
 0x1fd   : > { %4441 = vst.msk [vmem:[%s6573_s27 + $0x44] sm:$0xf] %vm4423_vm3, %v4934_v49  ;;  %v4939_v22 = vpack.c.bf16 %v5646_v42, %v5646_v42 }
 0x1fe   : > { %v3480_v23 = vpop.f32.mrf.mxu0 }
 0x1ff   : > { %4446 = vst.msk [vmem:[%s6573_s27 + $0x58] sm:$0xf] %vm4423_vm3, %v4939_v22  ;;  %v4937_v43 = vpack.c.bf16 %v3480_v23, %v3480_v23 }
 0x200   : > { %v5647_v53 = vpop.f32.mrf.mxu0 }
 0x201   : > { %4444 = vst.msk [vmem:[%s6573_s27 + $0x50] sm:$0xf] %vm4423_vm3, %v4937_v43  ;;  %v4940_v45 = vpack.c.bf16 %v5647_v53, %v5647_v53 }
 0x202   : > { %v3483_v60 = vpop.f32.mrf.mxu0 }
 0x203   : > { %4447 = vst.msk [vmem:[%s6573_s27 + $0x5c] sm:$0xf] %vm4423_vm3, %v4940_v45  ;;  %v4938_v46 = vpack.c.bf16 %v3483_v60, %v3483_v60 }
 0x204   : > { %v5650_v63 = vpop.f32.mrf.mxu0 }
 0x205   : > { %4445 = vst.msk [vmem:[%s6573_s27 + $0x54] sm:$0xf] %vm4423_vm3, %v4938_v46  ;;  %v4943_v48 = vpack.c.bf16 %v5650_v63, %v5650_v63 }
 0x206   : > { %v3496_v54 = vpop.f32.mrf.mxu0 }
 0x207   : > { %4450 = vst.msk [vmem:[%s6573_s27 + $0x68] sm:$0xf] %vm4423_vm3, %v4943_v48  ;;  %v4941_v33 = vpack.c.bf16 %v3496_v54, %v3496_v54 }
 0x208   : > { %v5651_v24 = vpop.f32.mrf.mxu0 }
 0x209   : > { %4448 = vst.msk [vmem:[%s6573_s27 + $0x60] sm:$0xf] %vm4423_vm3, %v4941_v33  ;;  %v4944_v2 = vpack.c.bf16 %v5651_v24, %v5651_v24 }
 0x20a   : > { %v3499_v56 = vpop.f32.mrf.mxu0 }
 0x20b   : > { %4451 = vst.msk [vmem:[%s6573_s27 + $0x6c] sm:$0xf] %vm4423_vm3, %v4944_v2  ;;  %v4942_v61 = vpack.c.bf16 %v3499_v56, %v3499_v56 }
 0x20c   : > { %v5654_v8 = vpop.f32.mrf.mxu0 }
 0x20d   : > { %4449 = vst.msk [vmem:[%s6573_s27 + $0x64] sm:$0xf] %vm4423_vm3, %v4942_v61  ;;  %v4947_v57 = vpack.c.bf16 %v5654_v8, %v5654_v8 }
 0x20e   : > { %v3512_v15 = vpop.f32.mrf.mxu0 }
 0x20f   : > { %4454 = vst.msk [vmem:[%s6573_s27 + $0x78] sm:$0xf] %vm4423_vm3, %v4947_v57  ;;  %v4945_v41 = vpack.c.bf16 %v3512_v15, %v3512_v15 }
 0x210   : > { %v5655_v5 = vpop.f32.mrf.mxu0 }
 0x211   : > { %4452 = vst.msk [vmem:[%s6573_s27 + $0x70] sm:$0xf] %vm4423_vm3, %v4945_v41  ;;  %v4948_v58 = vpack.c.bf16 %v5655_v5, %v5655_v5 }
 0x212   : > { %v3515_v3 = vpop.f32.mrf.mxu0 }
 0x213   : > { %4455 = vst.msk [vmem:[%s6573_s27 + $0x7c] sm:$0xf] %vm4423_vm3, %v4948_v58  ;;  %v4946_v16 = vpack.c.bf16 %v3515_v3, %v3515_v3 }
 0x214   : > { %v5658_v36 = vpop.f32.mrf.mxu0 }
 0x215   : > { %4453 = vst.msk [vmem:[%s6573_s27 + $0x74] sm:$0xf] %vm4423_vm3, %v4946_v16  ;;  %v4951_v0 = vpack.c.bf16 %v5658_v36, %v5658_v36 }
 0x216   : > { %v3528_v21 = vpop.f32.mrf.mxu0 }
 0x217   : > { %4458 = vst.msk [vmem:[%s6573_s27 + $0x88] sm:$0xf] %vm4423_vm3, %v4951_v0  ;;  %v4949_v7 = vpack.c.bf16 %v3528_v21, %v3528_v21 }
 0x218   : > { %v5659_v26 = vpop.f32.mrf.mxu0 }
 0x219   : > { %4456 = vst.msk [vmem:[%s6573_s27 + $0x80] sm:$0xf] %vm4423_vm3, %v4949_v7  ;;  %v4952_v29 = vpack.c.bf16 %v5659_v26, %v5659_v26 }
 0x21a   : > { %v3531_v13 = vpop.f32.mrf.mxu0 }
 0x21b   : > { %4459 = vst.msk [vmem:[%s6573_s27 + $0x8c] sm:$0xf] %vm4423_vm3, %v4952_v29  ;;  %v4950_v55 = vpack.c.bf16 %v3531_v13, %v3531_v13 }
 0x21c   : > { %v5662_v18 = vpop.f32.mrf.mxu0  ;;  %v5690_v10 = vpop.f32.mrf.mxu1 }
 0x21d   : > { %4457 = vst.msk [vmem:[%s6573_s27 + $0x84] sm:$0xf] %vm4423_vm3, %v4950_v55  ;;  %v4955_v17 = vpack.c.bf16 %v5662_v18, %v5662_v18  ;;  %v4983_v59 = vpack.c.bf16 %v5690_v10, %v5690_v10 }
 0x21e   : > { %v3544_v52 = vpop.f32.mrf.mxu0  ;;  %v3656_v27 = vpop.f32.mrf.mxu1 }
 0x21f   : > { %4462 = vst.msk [vmem:[%s6573_s27 + $0x98] sm:$0xf] %vm4423_vm3, %v4955_v17  ;;  %4490 = vst.msk [vmem:[%s6573_s27 + $0x108] sm:$0xf] %vm4423_vm3, %v4983_v59  ;;  %v4953_v1 = vpack.c.bf16 %v3544_v52, %v3544_v52  ;;  %v4981_v19 = vpack.c.bf16 %v3656_v27, %v3656_v27 }
 0x220   : > { %v5663_v25 = vpop.f32.mrf.mxu0  ;;  %v5691_v6 = vpop.f32.mrf.mxu1 }
 0x221   : > { %4460 = vst.msk [vmem:[%s6573_s27 + $0x90] sm:$0xf] %vm4423_vm3, %v4953_v1  ;;  %4488 = vst.msk [vmem:[%s6573_s27 + $0x100] sm:$0xf] %vm4423_vm3, %v4981_v19  ;;  %v4956_v32 = vpack.c.bf16 %v5663_v25, %v5663_v25  ;;  %v4984_v9 = vpack.c.bf16 %v5691_v6, %v5691_v6 }
 0x222   : > { %v3547_v62 = vpop.f32.mrf.mxu0  ;;  %v3659_v50 = vpop.f32.mrf.mxu1 }
 0x223   : > { %4463 = vst.msk [vmem:[%s6573_s27 + $0x9c] sm:$0xf] %vm4423_vm3, %v4956_v32  ;;  %4491 = vst.msk [vmem:[%s6573_s27 + $0x10c] sm:$0xf] %vm4423_vm3, %v4984_v9  ;;  %v4954_v28 = vpack.c.bf16 %v3547_v62, %v3547_v62  ;;  %v4982_v39 = vpack.c.bf16 %v3659_v50, %v3659_v50 }
 0x224   : > { %v5666_v4 = vpop.f32.mrf.mxu0  ;;  %v5694_v35 = vpop.f32.mrf.mxu1 }
 0x225   : > { %4461 = vst.msk [vmem:[%s6573_s27 + $0x94] sm:$0xf] %vm4423_vm3, %v4954_v28  ;;  %4489 = vst.msk [vmem:[%s6573_s27 + $0x104] sm:$0xf] %vm4423_vm3, %v4982_v39  ;;  %v4959_v30 = vpack.c.bf16 %v5666_v4, %v5666_v4  ;;  %v4987_v11 = vpack.c.bf16 %v5694_v35, %v5694_v35 }
 0x226   : > { %v3560_v14 = vpop.f32.mrf.mxu0  ;;  %v3672_v31 = vpop.f32.mrf.mxu1 }
 0x227   : > { %4466 = vst.msk [vmem:[%s6573_s27 + $0xa8] sm:$0xf] %vm4423_vm3, %v4959_v30  ;;  %4494 = vst.msk [vmem:[%s6573_s27 + $0x118] sm:$0xf] %vm4423_vm3, %v4987_v11  ;;  %v4957_v37 = vpack.c.bf16 %v3560_v14, %v3560_v14  ;;  %v4985_v34 = vpack.c.bf16 %v3672_v31, %v3672_v31 }
 0x228   : > { %v5667_v40 = vpop.f32.mrf.mxu0  ;;  %v5695_v51 = vpop.f32.mrf.mxu1 }
 0x229   : > { %4464 = vst.msk [vmem:[%s6573_s27 + $0xa0] sm:$0xf] %vm4423_vm3, %v4957_v37  ;;  %4492 = vst.msk [vmem:[%s6573_s27 + $0x110] sm:$0xf] %vm4423_vm3, %v4985_v34  ;;  %v4960_v38 = vpack.c.bf16 %v5667_v40, %v5667_v40  ;;  %v4988_v44 = vpack.c.bf16 %v5695_v51, %v5695_v51 }
 0x22a   : > { %v3563_v20 = vpop.f32.mrf.mxu0  ;;  %v3675_v47 = vpop.f32.mrf.mxu1 }
 0x22b   : > { %4467 = vst.msk [vmem:[%s6573_s27 + $0xac] sm:$0xf] %vm4423_vm3, %v4960_v38  ;;  %4495 = vst.msk [vmem:[%s6573_s27 + $0x11c] sm:$0xf] %vm4423_vm3, %v4988_v44  ;;  %v4958_v12 = vpack.c.bf16 %v3563_v20, %v3563_v20  ;;  %v4986_v49 = vpack.c.bf16 %v3675_v47, %v3675_v47 }
 0x22c   : > { %v5670_v42 = vpop.f32.mrf.mxu0  ;;  %v5698_v22 = vpop.f32.mrf.mxu1 }
 0x22d   : > { %4465 = vst.msk [vmem:[%s6573_s27 + $0xa4] sm:$0xf] %vm4423_vm3, %v4958_v12  ;;  %4493 = vst.msk [vmem:[%s6573_s27 + $0x114] sm:$0xf] %vm4423_vm3, %v4986_v49  ;;  %v4963_v23 = vpack.c.bf16 %v5670_v42, %v5670_v42  ;;  %v4991_v43 = vpack.c.bf16 %v5698_v22, %v5698_v22 }
 0x22e   : > { %v3576_v53 = vpop.f32.mrf.mxu0  ;;  %v3688_v45 = vpop.f32.mrf.mxu1 }
 0x22f   : > { %4470 = vst.msk [vmem:[%s6573_s27 + $0xb8] sm:$0xf] %vm4423_vm3, %v4963_v23  ;;  %4498 = vst.msk [vmem:[%s6573_s27 + $0x128] sm:$0xf] %vm4423_vm3, %v4991_v43  ;;  %v4961_v60 = vpack.c.bf16 %v3576_v53, %v3576_v53  ;;  %v4989_v46 = vpack.c.bf16 %v3688_v45, %v3688_v45 }
 0x230   : > { %v5671_v63 = vpop.f32.mrf.mxu0  ;;  %v5699_v48 = vpop.f32.mrf.mxu1 }
 0x231   : > { %4468 = vst.msk [vmem:[%s6573_s27 + $0xb0] sm:$0xf] %vm4423_vm3, %v4961_v60  ;;  %4496 = vst.msk [vmem:[%s6573_s27 + $0x120] sm:$0xf] %vm4423_vm3, %v4989_v46  ;;  %v4964_v54 = vpack.c.bf16 %v5671_v63, %v5671_v63  ;;  %v4992_v33 = vpack.c.bf16 %v5699_v48, %v5699_v48 }
 0x232   : > { %v3579_v24 = vpop.f32.mrf.mxu0  ;;  %v3691_v2 = vpop.f32.mrf.mxu1 }
 0x233   : > { %4471 = vst.msk [vmem:[%s6573_s27 + $0xbc] sm:$0xf] %vm4423_vm3, %v4964_v54  ;;  %4499 = vst.msk [vmem:[%s6573_s27 + $0x12c] sm:$0xf] %vm4423_vm3, %v4992_v33  ;;  %v4962_v56 = vpack.c.bf16 %v3579_v24, %v3579_v24  ;;  %v4990_v61 = vpack.c.bf16 %v3691_v2, %v3691_v2 }
 0x234   : > { %v5674_v8 = vpop.f32.mrf.mxu0  ;;  %v5702_v57 = vpop.f32.mrf.mxu1 }
 0x235   : > { %4469 = vst.msk [vmem:[%s6573_s27 + $0xb4] sm:$0xf] %vm4423_vm3, %v4962_v56  ;;  %4497 = vst.msk [vmem:[%s6573_s27 + $0x124] sm:$0xf] %vm4423_vm3, %v4990_v61  ;;  %v4967_v15 = vpack.c.bf16 %v5674_v8, %v5674_v8  ;;  %v4995_v41 = vpack.c.bf16 %v5702_v57, %v5702_v57 }
 0x236   : > { %v3592_v5 = vpop.f32.mrf.mxu0  ;;  %v3704_v58 = vpop.f32.mrf.mxu1 }
 0x237   : > { %4474 = vst.msk [vmem:[%s6573_s27 + $0xc8] sm:$0xf] %vm4423_vm3, %v4967_v15  ;;  %4502 = vst.msk [vmem:[%s6573_s27 + $0x138] sm:$0xf] %vm4423_vm3, %v4995_v41  ;;  %v4965_v3 = vpack.c.bf16 %v3592_v5, %v3592_v5  ;;  %v4993_v16 = vpack.c.bf16 %v3704_v58, %v3704_v58 }
 0x238   : > { %v5675_v36 = vpop.f32.mrf.mxu0  ;;  %v5703_v0 = vpop.f32.mrf.mxu1 }
 0x239   : > { %4472 = vst.msk [vmem:[%s6573_s27 + $0xc0] sm:$0xf] %vm4423_vm3, %v4965_v3  ;;  %4500 = vst.msk [vmem:[%s6573_s27 + $0x130] sm:$0xf] %vm4423_vm3, %v4993_v16  ;;  %v4968_v21 = vpack.c.bf16 %v5675_v36, %v5675_v36  ;;  %v4996_v7 = vpack.c.bf16 %v5703_v0, %v5703_v0 }
 0x23a   : > { %v3595_v26 = vpop.f32.mrf.mxu0  ;;  %v3707_v29 = vpop.f32.mrf.mxu1 }
 0x23b   : > { %4475 = vst.msk [vmem:[%s6573_s27 + $0xcc] sm:$0xf] %vm4423_vm3, %v4968_v21  ;;  %4503 = vst.msk [vmem:[%s6573_s27 + $0x13c] sm:$0xf] %vm4423_vm3, %v4996_v7  ;;  %v4966_v13 = vpack.c.bf16 %v3595_v26, %v3595_v26  ;;  %v4994_v55 = vpack.c.bf16 %v3707_v29, %v3707_v29 }
 0x23c   : > { %v5678_v18 = vpop.f32.mrf.mxu0  ;;  %v5706_v10 = vpop.f32.mrf.mxu1 }
 0x23d   : > { %4473 = vst.msk [vmem:[%s6573_s27 + $0xc4] sm:$0xf] %vm4423_vm3, %v4966_v13  ;;  %4501 = vst.msk [vmem:[%s6573_s27 + $0x134] sm:$0xf] %vm4423_vm3, %v4994_v55  ;;  %v4971_v17 = vpack.c.bf16 %v5678_v18, %v5678_v18  ;;  %v4999_v59 = vpack.c.bf16 %v5706_v10, %v5706_v10 }
 0x23e   : > { %v3608_v52 = vpop.f32.mrf.mxu0  ;;  %v3720_v27 = vpop.f32.mrf.mxu1 }
 0x23f   : > { %4478 = vst.msk [vmem:[%s6573_s27 + $0xd8] sm:$0xf] %vm4423_vm3, %v4971_v17  ;;  %4506 = vst.msk [vmem:[%s6573_s27 + $0x148] sm:$0xf] %vm4423_vm3, %v4999_v59  ;;  %v4969_v1 = vpack.c.bf16 %v3608_v52, %v3608_v52  ;;  %v4997_v19 = vpack.c.bf16 %v3720_v27, %v3720_v27 }
 0x240   : > { %v5679_v25 = vpop.f32.mrf.mxu0  ;;  %v5707_v6 = vpop.f32.mrf.mxu1 }
 0x241   : > { %4476 = vst.msk [vmem:[%s6573_s27 + $0xd0] sm:$0xf] %vm4423_vm3, %v4969_v1  ;;  %4504 = vst.msk [vmem:[%s6573_s27 + $0x140] sm:$0xf] %vm4423_vm3, %v4997_v19  ;;  %v4972_v32 = vpack.c.bf16 %v5679_v25, %v5679_v25  ;;  %v5000_v9 = vpack.c.bf16 %v5707_v6, %v5707_v6 }
 0x242   : > { %v3611_v62 = vpop.f32.mrf.mxu0  ;;  %v3723_v50 = vpop.f32.mrf.mxu1 }
 0x243   : > { %4479 = vst.msk [vmem:[%s6573_s27 + $0xdc] sm:$0xf] %vm4423_vm3, %v4972_v32  ;;  %4507 = vst.msk [vmem:[%s6573_s27 + $0x14c] sm:$0xf] %vm4423_vm3, %v5000_v9  ;;  %v4970_v28 = vpack.c.bf16 %v3611_v62, %v3611_v62  ;;  %v4998_v39 = vpack.c.bf16 %v3723_v50, %v3723_v50 }
 0x244   : > { %v5682_v4 = vpop.f32.mrf.mxu0  ;;  %v5710_v35 = vpop.f32.mrf.mxu1 }
 0x245   : > { %4477 = vst.msk [vmem:[%s6573_s27 + $0xd4] sm:$0xf] %vm4423_vm3, %v4970_v28  ;;  %4505 = vst.msk [vmem:[%s6573_s27 + $0x144] sm:$0xf] %vm4423_vm3, %v4998_v39  ;;  %v4975_v30 = vpack.c.bf16 %v5682_v4, %v5682_v4  ;;  %v5003_v11 = vpack.c.bf16 %v5710_v35, %v5710_v35 }
 0x246   : > { %v3624_v14 = vpop.f32.mrf.mxu0  ;;  %v3736_v31 = vpop.f32.mrf.mxu1 }
 0x247   : > { %4482 = vst.msk [vmem:[%s6573_s27 + $0xe8] sm:$0xf] %vm4423_vm3, %v4975_v30  ;;  %4510 = vst.msk [vmem:[%s6573_s27 + $0x158] sm:$0xf] %vm4423_vm3, %v5003_v11  ;;  %v4973_v37 = vpack.c.bf16 %v3624_v14, %v3624_v14  ;;  %v5001_v34 = vpack.c.bf16 %v3736_v31, %v3736_v31 }
 0x248   : > { %v5683_v40 = vpop.f32.mrf.mxu0  ;;  %v5711_v51 = vpop.f32.mrf.mxu1 }
 0x249   : > { %4480 = vst.msk [vmem:[%s6573_s27 + $0xe0] sm:$0xf] %vm4423_vm3, %v4973_v37  ;;  %4508 = vst.msk [vmem:[%s6573_s27 + $0x150] sm:$0xf] %vm4423_vm3, %v5001_v34  ;;  %v4976_v38 = vpack.c.bf16 %v5683_v40, %v5683_v40  ;;  %v5004_v44 = vpack.c.bf16 %v5711_v51, %v5711_v51 }
 0x24a   : > { %v3627_v20 = vpop.f32.mrf.mxu0  ;;  %v3739_v47 = vpop.f32.mrf.mxu1 }
 0x24b   : > { %4483 = vst.msk [vmem:[%s6573_s27 + $0xec] sm:$0xf] %vm4423_vm3, %v4976_v38  ;;  %4511 = vst.msk [vmem:[%s6573_s27 + $0x15c] sm:$0xf] %vm4423_vm3, %v5004_v44  ;;  %v4974_v12 = vpack.c.bf16 %v3627_v20, %v3627_v20  ;;  %v5002_v49 = vpack.c.bf16 %v3739_v47, %v3739_v47 }
 0x24c   : > { %v5686_v42 = vpop.f32.mrf.mxu0  ;;  %v5714_v22 = vpop.f32.mrf.mxu1 }
 0x24d   : > { %4481 = vst.msk [vmem:[%s6573_s27 + $0xe4] sm:$0xf] %vm4423_vm3, %v4974_v12  ;;  %4509 = vst.msk [vmem:[%s6573_s27 + $0x154] sm:$0xf] %vm4423_vm3, %v5002_v49  ;;  %v4979_v23 = vpack.c.bf16 %v5686_v42, %v5686_v42  ;;  %v5007_v43 = vpack.c.bf16 %v5714_v22, %v5714_v22 }
 0x24e   : > { %v3640_v53 = vpop.f32.mrf.mxu0  ;;  %v3752_v45 = vpop.f32.mrf.mxu1 }
 0x24f   : > { %4486 = vst.msk [vmem:[%s6573_s27 + $0xf8] sm:$0xf] %vm4423_vm3, %v4979_v23  ;;  %4514 = vst.msk [vmem:[%s6573_s27 + $0x168] sm:$0xf] %vm4423_vm3, %v5007_v43  ;;  %v4977_v60 = vpack.c.bf16 %v3640_v53, %v3640_v53  ;;  %v5005_v46 = vpack.c.bf16 %v3752_v45, %v3752_v45 }
 0x250   : > { %v5687_v63 = vpop.f32.mrf.mxu0  ;;  %v5715_v48 = vpop.f32.mrf.mxu1 }
 0x251   : > { %4484 = vst.msk [vmem:[%s6573_s27 + $0xf0] sm:$0xf] %vm4423_vm3, %v4977_v60  ;;  %4512 = vst.msk [vmem:[%s6573_s27 + $0x160] sm:$0xf] %vm4423_vm3, %v5005_v46  ;;  %v4980_v54 = vpack.c.bf16 %v5687_v63, %v5687_v63  ;;  %v5008_v33 = vpack.c.bf16 %v5715_v48, %v5715_v48 }
 0x252   : > { %v3643_v24 = vpop.f32.mrf.mxu0  ;;  %v3755_v2 = vpop.f32.mrf.mxu1 }
 0x253   : > { %4487 = vst.msk [vmem:[%s6573_s27 + $0xfc] sm:$0xf] %vm4423_vm3, %v4980_v54  ;;  %4515 = vst.msk [vmem:[%s6573_s27 + $0x16c] sm:$0xf] %vm4423_vm3, %v5008_v33  ;;  %v4978_v56 = vpack.c.bf16 %v3643_v24, %v3643_v24  ;;  %v5006_v61 = vpack.c.bf16 %v3755_v2, %v3755_v2 }
 0x254   : > { %v5718_v8 = vpop.f32.mrf.mxu1 }
 0x255   : > { %4485 = vst.msk [vmem:[%s6573_s27 + $0xf4] sm:$0xf] %vm4423_vm3, %v4978_v56  ;;  %4513 = vst.msk [vmem:[%s6573_s27 + $0x164] sm:$0xf] %vm4423_vm3, %v5006_v61  ;;  %v5011_v57 = vpack.c.bf16 %v5718_v8, %v5718_v8 }
 0x256   : > { %v3768_v15 = vpop.f32.mrf.mxu1 }
 0x257   : > { %4518 = vst.msk [vmem:[%s6573_s27 + $0x178] sm:$0xf] %vm4423_vm3, %v5011_v57  ;;  %v5009_v41 = vpack.c.bf16 %v3768_v15, %v3768_v15 }
 0x258   : > { %v5719_v5 = vpop.f32.mrf.mxu1 }
 0x259   : > { %4516 = vst.msk [vmem:[%s6573_s27 + $0x170] sm:$0xf] %vm4423_vm3, %v5009_v41  ;;  %v5012_v58 = vpack.c.bf16 %v5719_v5, %v5719_v5 }
 0x25a   : > { %v3771_v3 = vpop.f32.mrf.mxu1 }
 0x25b   : > { %4519 = vst.msk [vmem:[%s6573_s27 + $0x17c] sm:$0xf] %vm4423_vm3, %v5012_v58  ;;  %v5010_v16 = vpack.c.bf16 %v3771_v3, %v3771_v3 }
 0x25c   : > { %v5722_v36 = vpop.f32.mrf.mxu1 }
 0x25d   : > { %4517 = vst.msk [vmem:[%s6573_s27 + $0x174] sm:$0xf] %vm4423_vm3, %v5010_v16  ;;  %v5015_v0 = vpack.c.bf16 %v5722_v36, %v5722_v36 }
 0x25e   : > { %v3784_v21 = vpop.f32.mrf.mxu1 }
 0x25f   : > { %4522 = vst.msk [vmem:[%s6573_s27 + $0x188] sm:$0xf] %vm4423_vm3, %v5015_v0  ;;  %v5013_v7 = vpack.c.bf16 %v3784_v21, %v3784_v21 }
 0x260   : > { %v5723_v26 = vpop.f32.mrf.mxu1 }
 0x261   : > { %4520 = vst.msk [vmem:[%s6573_s27 + $0x180] sm:$0xf] %vm4423_vm3, %v5013_v7  ;;  %v5016_v29 = vpack.c.bf16 %v5723_v26, %v5723_v26 }
 0x262   : > { %v3787_v13 = vpop.f32.mrf.mxu1 }
 0x263   : > { %4523 = vst.msk [vmem:[%s6573_s27 + $0x18c] sm:$0xf] %vm4423_vm3, %v5016_v29  ;;  %v5014_v55 = vpack.c.bf16 %v3787_v13, %v3787_v13 }
 0x264   : > { %v5726_v18 = vpop.f32.mrf.mxu1 }
 0x265   : > { %4521 = vst.msk [vmem:[%s6573_s27 + $0x184] sm:$0xf] %vm4423_vm3, %v5014_v55  ;;  %v5019_v10 = vpack.c.bf16 %v5726_v18, %v5726_v18 }
 0x266   : > { %v3800_v17 = vpop.f32.mrf.mxu1 }
 0x267   : > { %4526 = vst.msk [vmem:[%s6573_s27 + $0x198] sm:$0xf] %vm4423_vm3, %v5019_v10  ;;  %v5017_v59 = vpack.c.bf16 %v3800_v17, %v3800_v17 }
 0x268   : > { %v5727_v52 = vpop.f32.mrf.mxu1 }
 0x269   : > { %4524 = vst.msk [vmem:[%s6573_s27 + $0x190] sm:$0xf] %vm4423_vm3, %v5017_v59  ;;  %v5020_v27 = vpack.c.bf16 %v5727_v52, %v5727_v52 }
 0x26a   : > { %v3803_v1 = vpop.f32.mrf.mxu1 }
 0x26b   : > { %4527 = vst.msk [vmem:[%s6573_s27 + $0x19c] sm:$0xf] %vm4423_vm3, %v5020_v27  ;;  %v5018_v19 = vpack.c.bf16 %v3803_v1, %v3803_v1 }
 0x26c   : > { %v5730_v25 = vpop.f32.mrf.mxu1 }
 0x26d   : > { %4525 = vst.msk [vmem:[%s6573_s27 + $0x194] sm:$0xf] %vm4423_vm3, %v5018_v19  ;;  %v5023_v6 = vpack.c.bf16 %v5730_v25, %v5730_v25 }
 0x26e   : > { %v3816_v32 = vpop.f32.mrf.mxu1 }
 0x26f   : > { %4530 = vst.msk [vmem:[%s6573_s27 + $0x1a8] sm:$0xf] %vm4423_vm3, %v5023_v6  ;;  %v5021_v9 = vpack.c.bf16 %v3816_v32, %v3816_v32 }
 0x270   : > { %v5731_v62 = vpop.f32.mrf.mxu1 }
 0x271   : > { %4528 = vst.msk [vmem:[%s6573_s27 + $0x1a0] sm:$0xf] %vm4423_vm3, %v5021_v9  ;;  %v5024_v50 = vpack.c.bf16 %v5731_v62, %v5731_v62 }
 0x272   : > { %v3819_v28 = vpop.f32.mrf.mxu1 }
 0x273   : > { %4531 = vst.msk [vmem:[%s6573_s27 + $0x1ac] sm:$0xf] %vm4423_vm3, %v5024_v50  ;;  %v5022_v39 = vpack.c.bf16 %v3819_v28, %v3819_v28 }
 0x274   : > { %v5734_v4 = vpop.f32.mrf.mxu1 }
 0x275   : > { %4529 = vst.msk [vmem:[%s6573_s27 + $0x1a4] sm:$0xf] %vm4423_vm3, %v5022_v39  ;;  %v5027_v35 = vpack.c.bf16 %v5734_v4, %v5734_v4 }
 0x276   : > { %v3832_v30 = vpop.f32.mrf.mxu1 }
 0x277   : > { %4534 = vst.msk [vmem:[%s6573_s27 + $0x1b8] sm:$0xf] %vm4423_vm3, %v5027_v35  ;;  %v5025_v11 = vpack.c.bf16 %v3832_v30, %v3832_v30 }
 0x278   : > { %v5735_v14 = vpop.f32.mrf.mxu1 }
 0x279   : > { %4532 = vst.msk [vmem:[%s6573_s27 + $0x1b0] sm:$0xf] %vm4423_vm3, %v5025_v11  ;;  %v5028_v31 = vpack.c.bf16 %v5735_v14, %v5735_v14 }
 0x27a   : > { %v3835_v37 = vpop.f32.mrf.mxu1 }
 0x27b   : > { %4535 = vst.msk [vmem:[%s6573_s27 + $0x1bc] sm:$0xf] %vm4423_vm3, %v5028_v31  ;;  %v5026_v34 = vpack.c.bf16 %v3835_v37, %v3835_v37 }
 0x27c   : > { %v5738_v40 = vpop.f32.mrf.mxu1 }
 0x27d   : > { %4533 = vst.msk [vmem:[%s6573_s27 + $0x1b4] sm:$0xf] %vm4423_vm3, %v5026_v34  ;;  %v5031_v51 = vpack.c.bf16 %v5738_v40, %v5738_v40 }
 0x27e   : > { %v3848_v38 = vpop.f32.mrf.mxu1 }
 0x27f   : > { %4538 = vst.msk [vmem:[%s6573_s27 + $0x1c8] sm:$0xf] %vm4423_vm3, %v5031_v51  ;;  %v5029_v44 = vpack.c.bf16 %v3848_v38, %v3848_v38 }
 0x280   : > { %v5739_v20 = vpop.f32.mrf.mxu1 }
 0x281   : > { %4536 = vst.msk [vmem:[%s6573_s27 + $0x1c0] sm:$0xf] %vm4423_vm3, %v5029_v44  ;;  %v5032_v47 = vpack.c.bf16 %v5739_v20, %v5739_v20 }
 0x282   : > { %v3851_v12 = vpop.f32.mrf.mxu1 }
 0x283   : > { %4539 = vst.msk [vmem:[%s6573_s27 + $0x1cc] sm:$0xf] %vm4423_vm3, %v5032_v47  ;;  %v5030_v49 = vpack.c.bf16 %v3851_v12, %v3851_v12 }
 0x284   : > { %v5742_v42 = vpop.f32.mrf.mxu1 }
 0x285   : > { %4537 = vst.msk [vmem:[%s6573_s27 + $0x1c4] sm:$0xf] %vm4423_vm3, %v5030_v49  ;;  %v5035_v22 = vpack.c.bf16 %v5742_v42, %v5742_v42 }
 0x286   : > { %v3864_v23 = vpop.f32.mrf.mxu1 }
 0x287   : > { %4542 = vst.msk [vmem:[%s6573_s27 + $0x1d8] sm:$0xf] %vm4423_vm3, %v5035_v22  ;;  %v5033_v43 = vpack.c.bf16 %v3864_v23, %v3864_v23 }
 0x288   : > { %v5743_v53 = vpop.f32.mrf.mxu1 }
 0x289   : > { %4540 = vst.msk [vmem:[%s6573_s27 + $0x1d0] sm:$0xf] %vm4423_vm3, %v5033_v43  ;;  %v5036_v45 = vpack.c.bf16 %v5743_v53, %v5743_v53 }
 0x28a   : > { %v3867_v60 = vpop.f32.mrf.mxu1 }
 0x28b   : > { %4543 = vst.msk [vmem:[%s6573_s27 + $0x1dc] sm:$0xf] %vm4423_vm3, %v5036_v45  ;;  %v5034_v46 = vpack.c.bf16 %v3867_v60, %v3867_v60 }
 0x28c   : > { %v5746_v63 = vpop.f32.mrf.mxu1 }
 0x28d   : > { %4541 = vst.msk [vmem:[%s6573_s27 + $0x1d4] sm:$0xf] %vm4423_vm3, %v5034_v46  ;;  %v5039_v48 = vpack.c.bf16 %v5746_v63, %v5746_v63 }
 0x28e   : > { %v3880_v54 = vpop.f32.mrf.mxu1 }
 0x28f   : > { %4546 = vst.msk [vmem:[%s6573_s27 + $0x1e8] sm:$0xf] %vm4423_vm3, %v5039_v48  ;;  %v5037_v33 = vpack.c.bf16 %v3880_v54, %v3880_v54 }
 0x290   : > { %v5747_v24 = vpop.f32.mrf.mxu1 }
 0x291   : > { %4544 = vst.msk [vmem:[%s6573_s27 + $0x1e0] sm:$0xf] %vm4423_vm3, %v5037_v33  ;;  %v5040_v2 = vpack.c.bf16 %v5747_v24, %v5747_v24 }
 0x292   : > { %v3883_v56 = vpop.f32.mrf.mxu1 }
 0x293   : > { %4547 = vst.msk [vmem:[%s6573_s27 + $0x1ec] sm:$0xf] %vm4423_vm3, %v5040_v2  ;;  %v5038_v61 = vpack.c.bf16 %v3883_v56, %v3883_v56 }
 0x294   : > { %v5750_v8 = vpop.f32.mrf.mxu1 }
 0x295   : > { %4545 = vst.msk [vmem:[%s6573_s27 + $0x1e4] sm:$0xf] %vm4423_vm3, %v5038_v61  ;;  %v5043_v57 = vpack.c.bf16 %v5750_v8, %v5750_v8 }
 0x296   : > { %v3896_v15 = vpop.f32.mrf.mxu1 }
 0x297   : > { %4550 = vst.msk [vmem:[%s6573_s27 + $0x1f8] sm:$0xf] %vm4423_vm3, %v5043_v57  ;;  %v5041_v41 = vpack.c.bf16 %v3896_v15, %v3896_v15 }
 0x298   : > { %v5751_v5 = vpop.f32.mrf.mxu1 }
 0x299   : > { %4548 = vst.msk [vmem:[%s6573_s27 + $0x1f0] sm:$0xf] %vm4423_vm3, %v5041_v41  ;;  %v5044_v58 = vpack.c.bf16 %v5751_v5, %v5751_v5 }
 0x29a   : > { %v3899_v3 = vpop.f32.mrf.mxu1 }
 0x29b   : > { %4551 = vst.msk [vmem:[%s6573_s27 + $0x1fc] sm:$0xf] %vm4423_vm3, %v5044_v58  ;;  %v5042_v16 = vpack.c.bf16 %v3899_v3, %v3899_v3 }
 0x29d   : > { %4549 = vst.msk [vmem:[%s6573_s27 + $0x1f4] sm:$0xf] %vm4423_vm3, %v5042_v16 }
 0x29e PF: > { %s13_s14 = sadd.s32 1, %s5805_s14   ;;  %s6845_s12 = smov %s5801_s13 }
 0x29f   : > { %p10_p5 = scmp.ge.s32.totalorder %s13_s14, 4   ;;  %s6846_s13 = smov %s6848_s15 }
 0x2a1   :  { %12 = sbr.rel (!%p10_p5) target bundleno = 2 (0x2), region = 65 }

// kernel: hrnet_forward.18
= control target key start
LH: loop header
LB: loop body
LE: loop exit
PB: predicated region body
PF: predicated region fallthrough
CT: control target
= control target key end

     0   :  { %s3146_s12 = smov 0   ;;  %s3148_s13 = smov 0   ;;  %s3582_s0 = inlined_call_operand.vmem [shape: bf16[2,32,4,4], index: 0, kind: input, shape index: {}]   ;;  %s3583_s1 = inlined_call_operand.vmem [shape: bf16[16,4], index: 1, kind: input, shape index: {}]   ;;  %s3584_s2 = inlined_call_operand.vmem [shape: bf16[4,16], index: 2, kind: input, shape index: {}]   ;;  %s3585_s3 = inlined_call_operand.vmem [shape: bf16[2,32,16,16], index: 3, kind: output, shape index: {}]  }
   0x1   :  { %s3150_s14 = smov 0  }
   0x2 LB: > { %s25_s15 = sadd.s32 1, %s3118_s13  ;;  %p2512_p0 = scmp.ge.s32.totalorder %s3122_s14, 1  ;;  %s3122_s14 = sphi %s3150_s14, %s13_s14   ;;  %s3118_s13 = sphi %s3148_s13, %s3587_s13   ;;  %s3114_s12 = sphi %s3146_s12, %s3586_s12  }
   0x3   : > { %p27_p1 = scmp.ge.s32.totalorder %s25_s15, 2  ;;  %p162_p2 = scmp.lt.s32.totalorder %s3122_s14, 3 }
   0x5   : > { %s3589_s15 = smov (%p27_p1, %s25_s15), 0  ;;  %p163_p3 = pnand %p2512_p0, %p162_p2 }
   0x6   : > { %p195_p4 = scmp.lt.s32.totalorder (!%p163_p3), %s3114_s12, 1 }
   0x7   : > { %166 = sbr.rel (%p163_p3) target bundleno = 542 (0x21e), region = 32 }
   0xc   : > { %v3124_v0 = vmov 0.0   ;;  %s3591_s12 = smov (!%p195_p4, %s3114_s12), 1  ;;  %vm3125_vm0 = vmmov 0   ;;  %vm260_vm1 = vcmask 1041408   ;;  %v3186_v6 = vld [vmem:[%s3583_s1] sm:$0xff]   ;;  %vm256_vm2 = vcmask 31744  }
   0xd   : > { %2811 = vmatprep.subr.bf16.mxu0 %v3124_v0  ;;  %2817 = vmatprep.subr.bf16.mxu1 %v3124_v0  ;;  %s2648_s16 = sshll.u32 %s3591_s12, 6  ;;  %s2649_s24 = sshll.u32 %s3591_s12, 8  ;;  %vm2346_vm3 = vcmask 125952  }
   0xe   : > { %2813 = vmatprep.mubr.msk.bf16.mxu0 %vm3125_vm0, %v3124_v0  ;;  %2819 = vmatprep.mubr.msk.bf16.mxu1 %vm3125_vm0, %v3124_v0  ;;  %s3176_s19 = scalar_lea.vmem %s3582_s0, %s2648_s16  ;;  %s3443_s27 = scalar_lea.vmem %s3585_s3, %s2649_s24 }
   0xf   : > { %v219_v1 = vld [vmem:[%s3176_s19] sm:$0x3]  ;;  %v220_v2 = vld [vmem:[%s3176_s19 + $0x2] sm:$0x3]  ;;  %v221_v3 = vld [vmem:[%s3176_s19 + $0x4] sm:$0x3] }
  0x10   : > { %v262_v4 = vsel %vm260_vm1, %v219_v1, 0  ;;  %v306_v5 = vsel %vm260_vm1, %v220_v2, 0  ;;  %v222_v7 = vld [vmem:[%s3176_s19 + $0x6] sm:$0x3]  ;;  %v350_v8 = vsel %vm260_vm1, %v221_v3, 0 }
  0x11   : > { %2812 = vmatpush3.bf16.msra.mxu0 %v262_v4  ;;  %2818 = vmatpush3.bf16.msra.mxu1 %v306_v5  ;;  %v394_v9 = vsel %vm260_vm1, %v222_v7, 0  ;;  %v223_v10 = vld [vmem:[%s3176_s19 + $0x8] sm:$0x3]  ;;  %v224_v11 = vld [vmem:[%s3176_s19 + $0xa] sm:$0x3] }
  0x12   : > { %2823 = vmatprep.subr.bf16.mxu0 %v3124_v0  ;;  %2829 = vmatprep.subr.bf16.mxu1 %v3124_v0  ;;  %v438_v12 = vsel %vm260_vm1, %v223_v10, 0  ;;  %v482_v13 = vsel %vm260_vm1, %v224_v11, 0  ;;  %v225_v14 = vld [vmem:[%s3176_s19 + $0xc] sm:$0x3]  ;;  %v226_v15 = vld [vmem:[%s3176_s19 + $0xe] sm:$0x3] }
  0x13   : > { %v526_v16 = vsel %vm260_vm1, %v225_v14, 0  ;;  %v570_v17 = vsel %vm260_vm1, %v226_v15, 0  ;;  %v227_v18 = vld [vmem:[%s3176_s19 + $0x10] sm:$0x3]  ;;  %v228_v19 = vld [vmem:[%s3176_s19 + $0x12] sm:$0x3] }
  0x14   : > { %2814 = vmatmul.mubr.msk.bf16.vlgmr.msra.gmra.mxu0 %vm256_vm2, %v3186_v6  ;;  %2820 = vmatmul.mubr.msk.bf16.vlgmr.msra.gmra.mxu1 %vm256_vm2, %v3186_v6  ;;  %v614_v20 = vsel %vm260_vm1, %v227_v18, 0  ;;  %v658_v21 = vsel %vm260_vm1, %v228_v19, 0  ;;  %v229_v22 = vld [vmem:[%s3176_s19 + $0x14] sm:$0x3]  ;;  %v230_v23 = vld [vmem:[%s3176_s19 + $0x16] sm:$0x3] }
  0x15   : > { %2824 = vmatpush3.bf16.msra.mxu0 %v350_v8  ;;  %2830 = vmatpush3.bf16.msra.mxu1 %v394_v9  ;;  %v702_v24 = vsel %vm260_vm1, %v229_v22, 0  ;;  %v746_v25 = vsel %vm260_vm1, %v230_v23, 0  ;;  %v231_v26 = vld [vmem:[%s3176_s19 + $0x18] sm:$0x3]  ;;  %v232_v27 = vld [vmem:[%s3176_s19 + $0x1a] sm:$0x3] }
  0x16   : > { %2825 = vmatprep.mubr.msk.bf16.mxu0 %vm3125_vm0, %v3124_v0  ;;  %2831 = vmatprep.mubr.msk.bf16.mxu1 %vm3125_vm0, %v3124_v0  ;;  %v790_v28 = vsel %vm260_vm1, %v231_v26, 0  ;;  %v834_v29 = vsel %vm260_vm1, %v232_v27, 0  ;;  %v233_v30 = vld [vmem:[%s3176_s19 + $0x1c] sm:$0x3]  ;;  %v234_v31 = vld [vmem:[%s3176_s19 + $0x1e] sm:$0x3] }
  0x17   : > { %2835 = vmatprep.subr.bf16.mxu0 %v3124_v0  ;;  %2841 = vmatprep.subr.bf16.mxu1 %v3124_v0  ;;  %v878_v32 = vsel %vm260_vm1, %v233_v30, 0  ;;  %v922_v33 = vsel %vm260_vm1, %v234_v31, 0  ;;  %v235_v34 = vld [vmem:[%s3176_s19 + $0x20] sm:$0x3]  ;;  %v236_v35 = vld [vmem:[%s3176_s19 + $0x22] sm:$0x3] }
  0x18   : > { %v966_v36 = vsel %vm260_vm1, %v235_v34, 0  ;;  %v1010_v37 = vsel %vm260_vm1, %v236_v35, 0  ;;  %v237_v38 = vld [vmem:[%s3176_s19 + $0x24] sm:$0x3]  ;;  %v238_v39 = vld [vmem:[%s3176_s19 + $0x26] sm:$0x3] }
  0x19   : > { %v1054_v40 = vsel %vm260_vm1, %v237_v38, 0  ;;  %v1098_v41 = vsel %vm260_vm1, %v238_v39, 0  ;;  %v239_v42 = vld [vmem:[%s3176_s19 + $0x28] sm:$0x3]  ;;  %v240_v43 = vld [vmem:[%s3176_s19 + $0x2a] sm:$0x3] }
  0x1a   : > { %v1142_v44 = vsel %vm260_vm1, %v239_v42, 0  ;;  %v1186_v45 = vsel %vm260_vm1, %v240_v43, 0  ;;  %v241_v46 = vld [vmem:[%s3176_s19 + $0x2c] sm:$0x3]  ;;  %v242_v47 = vld [vmem:[%s3176_s19 + $0x2e] sm:$0x3] }
  0x1b   : > { %v1230_v48 = vsel %vm260_vm1, %v241_v46, 0  ;;  %v1274_v49 = vsel %vm260_vm1, %v242_v47, 0  ;;  %v243_v50 = vld [vmem:[%s3176_s19 + $0x30] sm:$0x3]  ;;  %v244_v51 = vld [vmem:[%s3176_s19 + $0x32] sm:$0x3] }
  0x1c   : > { %2826 = vmatmul.mubr.msk.bf16.vlgmr.msra.gmra.mxu0 %vm256_vm2, %v3186_v6  ;;  %2832 = vmatmul.mubr.msk.bf16.vlgmr.msra.gmra.mxu1 %vm256_vm2, %v3186_v6  ;;  %v1318_v52 = vsel %vm260_vm1, %v243_v50, 0  ;;  %v1362_v53 = vsel %vm260_vm1, %v244_v51, 0  ;;  %v245_v54 = vld [vmem:[%s3176_s19 + $0x34] sm:$0x3]  ;;  %v246_v55 = vld [vmem:[%s3176_s19 + $0x36] sm:$0x3] }
  0x1d   : > { %2836 = vmatpush3.bf16.msra.mxu0 %v438_v12  ;;  %2842 = vmatpush3.bf16.msra.mxu1 %v482_v13  ;;  %v1406_v56 = vsel %vm260_vm1, %v245_v54, 0  ;;  %v1450_v57 = vsel %vm260_vm1, %v246_v55, 0  ;;  %v247_v58 = vld [vmem:[%s3176_s19 + $0x38] sm:$0x3]  ;;  %v248_v59 = vld [vmem:[%s3176_s19 + $0x3a] sm:$0x3] }
  0x1e   : > { %2837 = vmatprep.mubr.msk.bf16.mxu0 %vm3125_vm0, %v3124_v0  ;;  %2843 = vmatprep.mubr.msk.bf16.mxu1 %vm3125_vm0, %v3124_v0  ;;  %v1494_v60 = vsel %vm260_vm1, %v247_v58, 0  ;;  %v1538_v61 = vsel %vm260_vm1, %v248_v59, 0  ;;  %v249_v62 = vld [vmem:[%s3176_s19 + $0x3c] sm:$0x3]  ;;  %v250_v63 = vld [vmem:[%s3176_s19 + $0x3e] sm:$0x3] }
  0x1f   : > { %2847 = vmatprep.subr.bf16.mxu0 %v3124_v0  ;;  %2853 = vmatprep.subr.bf16.mxu1 %v3124_v0  ;;  %v1582_v1 = vsel %vm260_vm1, %v249_v62, 0  ;;  %v1626_v2 = vsel %vm260_vm1, %v250_v63, 0  ;;  %v1701_v3 = vld [vmem:[%s3584_s2] sm:$0x3] }
  0x20   : > { %v1799_v4 = vsel %vm260_vm1, %v1701_v3, 0 }
  0x24   : > { %2838 = vmatmul.mubr.msk.bf16.vlgmr.msra.gmra.mxu0 %vm256_vm2, %v3186_v6  ;;  %2844 = vmatmul.mubr.msk.bf16.vlgmr.msra.gmra.mxu1 %vm256_vm2, %v3186_v6 }
  0x25   : > { %2848 = vmatpush3.bf16.msra.mxu0 %v526_v16  ;;  %2854 = vmatpush3.bf16.msra.mxu1 %v570_v17 }
  0x26   : > { %2849 = vmatprep.mubr.msk.bf16.mxu0 %vm3125_vm0, %v3124_v0  ;;  %2855 = vmatprep.mubr.msk.bf16.mxu1 %vm3125_vm0, %v3124_v0 }
  0x27   : > { %2859 = vmatprep.subr.bf16.mxu0 %v3124_v0  ;;  %2865 = vmatprep.subr.bf16.mxu1 %v3124_v0 }
  0x2c   : > { %2850 = vmatmul.mubr.msk.bf16.vlgmr.msra.gmra.mxu0 %vm256_vm2, %v3186_v6  ;;  %2856 = vmatmul.mubr.msk.bf16.vlgmr.msra.gmra.mxu1 %vm256_vm2, %v3186_v6 }
  0x2d   : > { %2860 = vmatpush3.bf16.msra.mxu0 %v614_v20  ;;  %2866 = vmatpush3.bf16.msra.mxu1 %v658_v21 }
  0x2e   : > { %2861 = vmatprep.mubr.msk.bf16.mxu0 %vm3125_vm0, %v3124_v0  ;;  %2867 = vmatprep.mubr.msk.bf16.mxu1 %vm3125_vm0, %v3124_v0 }
  0x2f   : > { %2871 = vmatprep.subr.bf16.mxu0 %v3124_v0  ;;  %2877 = vmatprep.subr.bf16.mxu1 %v3124_v0 }
  0x34   : > { %2862 = vmatmul.mubr.msk.bf16.vlgmr.msra.gmra.mxu0 %vm256_vm2, %v3186_v6  ;;  %2868 = vmatmul.mubr.msk.bf16.vlgmr.msra.gmra.mxu1 %vm256_vm2, %v3186_v6 }
  0x35   : > { %2872 = vmatpush3.bf16.msra.mxu0 %v702_v24  ;;  %2878 = vmatpush3.bf16.msra.mxu1 %v746_v25 }
  0x36   : > { %2873 = vmatprep.mubr.msk.bf16.mxu0 %vm3125_vm0, %v3124_v0  ;;  %2879 = vmatprep.mubr.msk.bf16.mxu1 %vm3125_vm0, %v3124_v0 }
  0x37   : > { %2883 = vmatprep.subr.bf16.mxu0 %v3124_v0  ;;  %2889 = vmatprep.subr.bf16.mxu1 %v3124_v0 }
  0x3c   : > { %2874 = vmatmul.mubr.msk.bf16.vlgmr.msra.gmra.mxu0 %vm256_vm2, %v3186_v6  ;;  %2880 = vmatmul.mubr.msk.bf16.vlgmr.msra.gmra.mxu1 %vm256_vm2, %v3186_v6 }
  0x3d   : > { %2884 = vmatpush3.bf16.msra.mxu0 %v790_v28  ;;  %2890 = vmatpush3.bf16.msra.mxu1 %v834_v29 }
  0x3e   : > { %2885 = vmatprep.mubr.msk.bf16.mxu0 %vm3125_vm0, %v3124_v0  ;;  %2891 = vmatprep.mubr.msk.bf16.mxu1 %vm3125_vm0, %v3124_v0 }
  0x3f   : > { %2895 = vmatprep.subr.bf16.mxu0 %v3124_v0  ;;  %2901 = vmatprep.subr.bf16.mxu1 %v3124_v0 }
  0x44   : > { %2886 = vmatmul.mubr.msk.bf16.vlgmr.msra.gmra.mxu0 %vm256_vm2, %v3186_v6  ;;  %2892 = vmatmul.mubr.msk.bf16.vlgmr.msra.gmra.mxu1 %vm256_vm2, %v3186_v6 }
  0x45   : > { %2896 = vmatpush3.bf16.msra.mxu0 %v878_v32  ;;  %2902 = vmatpush3.bf16.msra.mxu1 %v922_v33 }
  0x46   : > { %2897 = vmatprep.mubr.msk.bf16.mxu0 %vm3125_vm0, %v3124_v0  ;;  %2903 = vmatprep.mubr.msk.bf16.mxu1 %vm3125_vm0, %v3124_v0 }
  0x47   : > { %2907 = vmatprep.subr.bf16.mxu0 %v3124_v0  ;;  %2913 = vmatprep.subr.bf16.mxu1 %v3124_v0 }
  0x4c   : > { %2898 = vmatmul.mubr.msk.bf16.vlgmr.msra.gmra.mxu0 %vm256_vm2, %v3186_v6  ;;  %2904 = vmatmul.mubr.msk.bf16.vlgmr.msra.gmra.mxu1 %vm256_vm2, %v3186_v6 }
  0x4d   : > { %2908 = vmatpush3.bf16.msra.mxu0 %v966_v36  ;;  %2914 = vmatpush3.bf16.msra.mxu1 %v1010_v37 }
  0x4e   : > { %2909 = vmatprep.mubr.msk.bf16.mxu0 %vm3125_vm0, %v3124_v0  ;;  %2915 = vmatprep.mubr.msk.bf16.mxu1 %vm3125_vm0, %v3124_v0 }
  0x4f   : > { %2919 = vmatprep.subr.bf16.mxu0 %v3124_v0  ;;  %2925 = vmatprep.subr.bf16.mxu1 %v3124_v0 }
  0x54   : > { %2910 = vmatmul.mubr.msk.bf16.vlgmr.msra.gmra.mxu0 %vm256_vm2, %v3186_v6  ;;  %2916 = vmatmul.mubr.msk.bf16.vlgmr.msra.gmra.mxu1 %vm256_vm2, %v3186_v6 }
  0x55   : > { %2920 = vmatpush3.bf16.msra.mxu0 %v1054_v40  ;;  %2926 = vmatpush3.bf16.msra.mxu1 %v1098_v41 }
  0x56   : > { %2921 = vmatprep.mubr.msk.bf16.mxu0 %vm3125_vm0, %v3124_v0  ;;  %2927 = vmatprep.mubr.msk.bf16.mxu1 %vm3125_vm0, %v3124_v0 }
  0x57   : > { %2931 = vmatprep.subr.bf16.mxu0 %v3124_v0  ;;  %2937 = vmatprep.subr.bf16.mxu1 %v3124_v0 }
  0x5c   : > { %2922 = vmatmul.mubr.msk.bf16.vlgmr.msra.gmra.mxu0 %vm256_vm2, %v3186_v6  ;;  %2928 = vmatmul.mubr.msk.bf16.vlgmr.msra.gmra.mxu1 %vm256_vm2, %v3186_v6 }
  0x5d   : > { %2932 = vmatpush3.bf16.msra.mxu0 %v1142_v44  ;;  %2938 = vmatpush3.bf16.msra.mxu1 %v1186_v45 }
  0x5e   : > { %2933 = vmatprep.mubr.msk.bf16.mxu0 %vm3125_vm0, %v3124_v0  ;;  %2939 = vmatprep.mubr.msk.bf16.mxu1 %vm3125_vm0, %v3124_v0 }
  0x5f   : > { %2943 = vmatprep.subr.bf16.mxu0 %v3124_v0  ;;  %2949 = vmatprep.subr.bf16.mxu1 %v3124_v0 }
  0x64   : > { %2934 = vmatmul.mubr.msk.bf16.vlgmr.msra.gmra.mxu0 %vm256_vm2, %v3186_v6  ;;  %2940 = vmatmul.mubr.msk.bf16.vlgmr.msra.gmra.mxu1 %vm256_vm2, %v3186_v6 }
  0x65   : > { %2944 = vmatpush3.bf16.msra.mxu0 %v1230_v48  ;;  %2950 = vmatpush3.bf16.msra.mxu1 %v1274_v49 }
  0x66   : > { %2945 = vmatprep.mubr.msk.bf16.mxu0 %vm3125_vm0, %v3124_v0  ;;  %2951 = vmatprep.mubr.msk.bf16.mxu1 %vm3125_vm0, %v3124_v0 }
  0x67   : > { %2955 = vmatprep.subr.bf16.mxu0 %v3124_v0  ;;  %2961 = vmatprep.subr.bf16.mxu1 %v3124_v0 }
  0x6c   : > { %2946 = vmatmul.mubr.msk.bf16.vlgmr.msra.gmra.mxu0 %vm256_vm2, %v3186_v6  ;;  %2952 = vmatmul.mubr.msk.bf16.vlgmr.msra.gmra.mxu1 %vm256_vm2, %v3186_v6 }
  0x6d   : > { %2956 = vmatpush3.bf16.msra.mxu0 %v1318_v52  ;;  %2962 = vmatpush3.bf16.msra.mxu1 %v1362_v53 }
  0x6e   : > { %2957 = vmatprep.mubr.msk.bf16.mxu0 %vm3125_vm0, %v3124_v0  ;;  %2963 = vmatprep.mubr.msk.bf16.mxu1 %vm3125_vm0, %v3124_v0 }
  0x6f   : > { %2967 = vmatprep.subr.bf16.mxu0 %v3124_v0  ;;  %2973 = vmatprep.subr.bf16.mxu1 %v3124_v0 }
  0x74   : > { %2958 = vmatmul.mubr.msk.bf16.vlgmr.msra.gmra.mxu0 %vm256_vm2, %v3186_v6  ;;  %2964 = vmatmul.mubr.msk.bf16.vlgmr.msra.gmra.mxu1 %vm256_vm2, %v3186_v6 }
  0x75   : > { %2968 = vmatpush3.bf16.msra.mxu0 %v1406_v56  ;;  %2974 = vmatpush3.bf16.msra.mxu1 %v1450_v57 }
  0x76   : > { %2969 = vmatprep.mubr.msk.bf16.mxu0 %vm3125_vm0, %v3124_v0  ;;  %2975 = vmatprep.mubr.msk.bf16.mxu1 %vm3125_vm0, %v3124_v0 }
  0x77   : > { %2979 = vmatprep.subr.bf16.mxu0 %v3124_v0  ;;  %2985 = vmatprep.subr.bf16.mxu1 %v3124_v0 }
  0x7c   : > { %2970 = vmatmul.mubr.msk.bf16.vlgmr.msra.gmra.mxu0 %vm256_vm2, %v3186_v6  ;;  %2976 = vmatmul.mubr.msk.bf16.vlgmr.msra.gmra.mxu1 %vm256_vm2, %v3186_v6 }
  0x7d   : > { %2980 = vmatpush3.bf16.msra.mxu0 %v1494_v60  ;;  %2986 = vmatpush3.bf16.msra.mxu1 %v1538_v61 }
  0x7e   : > { %2981 = vmatprep.mubr.msk.bf16.mxu0 %vm3125_vm0, %v3124_v0  ;;  %2987 = vmatprep.mubr.msk.bf16.mxu1 %vm3125_vm0, %v3124_v0 }
  0x7f   : > { %2991 = vmatprep.subr.bf16.mxu0 %v3124_v0  ;;  %2997 = vmatprep.subr.bf16.mxu1 %v3124_v0 }
  0x84   : > { %2982 = vmatmul.mubr.msk.bf16.vlgmr.msra.gmra.mxu0 %vm256_vm2, %v3186_v6  ;;  %2988 = vmatmul.mubr.msk.bf16.vlgmr.msra.gmra.mxu1 %vm256_vm2, %v3186_v6 }
  0x85   : > { %2992 = vmatpush3.bf16.msra.mxu0 %v1582_v1  ;;  %2998 = vmatpush3.bf16.msra.mxu1 %v1626_v2 }
  0x86   : > { %2993 = vmatprep.mubr.msk.bf16.mxu0 %vm3125_vm0, %v3124_v0  ;;  %2999 = vmatprep.mubr.msk.bf16.mxu1 %vm3125_vm0, %v3124_v0 }
  0x87   : > { %3071 = vmatprep.subr.msk.bf16.mxu0 %vm260_vm1, %v1701_v3  ;;  %3072 = vmatprep.subr.msk.bf16.mxu1 %vm260_vm1, %v1701_v3 }
  0x8c   : > { %2994 = vmatmul.mubr.msk.bf16.vlgmr.msra.gmra.mxu0 %vm256_vm2, %v3186_v6  ;;  %3000 = vmatmul.mubr.msk.bf16.vlgmr.msra.gmra.mxu1 %vm256_vm2, %v3186_v6 }
  0x8d   : > { %3004 = vmatpush3.bf16.msra.mxu0 %v1799_v4  ;;  %3070 = vmatpush3.bf16.msra.mxu1 %v1799_v4 }
  0xd4   : > { %v298_v5 = vpop.f32.mrf.mxu0  ;;  %v342_v7 = vpop.f32.mrf.mxu1 }
  0xd6   : > { %v2815_v8 = vpop.f32.mrf.mxu0  ;;  %v2821_v9 = vpop.f32.mrf.mxu1 }
  0xd8   : > { %v301_v10 = vpop.f32.mrf.mxu0  ;;  %v345_v0 = vpop.f32.mrf.mxu1 }
  0xd9   : > { %v1669_v11 = vpack.c.bf16 %v301_v10, %v298_v5  ;;  %v1670_v12 = vpack.c.bf16 %v345_v0, %v342_v7 }
  0xda   : > { %v2816_v13 = vpop.f32.mrf.mxu0  ;;  %v2822_v14 = vpop.f32.mrf.mxu1 }
  0xdb   : > { %3005 = vmatprep.mubr.msk.bf16.mxu0 %vm256_vm2, %v1669_v11 }
  0xdc   : > { %v386_v15 = vpop.f32.mrf.mxu0  ;;  %v430_v16 = vpop.f32.mrf.mxu1  ;;  %3006 = vmatmul.mubr.msk.bf16.vlgmr.msra.gmra.mxu0 %vm256_vm2, %v1670_v12 }
  0xde   : > { %v2827_v17 = vpop.f32.mrf.mxu0  ;;  %v2833_v6 = vpop.f32.mrf.mxu1 }
  0xe0   : > { %v389_v18 = vpop.f32.mrf.mxu0  ;;  %v433_v19 = vpop.f32.mrf.mxu1 }
  0xe1   : > { %v1671_v20 = vpack.c.bf16 %v389_v18, %v386_v15  ;;  %v1672_v21 = vpack.c.bf16 %v433_v19, %v430_v16 }
  0xe2   : > { %v2828_v22 = vpop.f32.mrf.mxu0  ;;  %v2834_v23 = vpop.f32.mrf.mxu1 }
  0xe3   : > { %3009 = vmatprep.mubr.msk.bf16.mxu0 %vm256_vm2, %v1671_v20 }
  0xe4   : > { %v474_v24 = vpop.f32.mrf.mxu0  ;;  %v518_v25 = vpop.f32.mrf.mxu1  ;;  %3010 = vmatmul.mubr.msk.bf16.gmra.mxu0 %vm256_vm2, %v1672_v21 }
  0xe6   : > { %v2839_v26 = vpop.f32.mrf.mxu0  ;;  %v2845_v27 = vpop.f32.mrf.mxu1 }
  0xe8   : > { %v477_v28 = vpop.f32.mrf.mxu0  ;;  %v521_v29 = vpop.f32.mrf.mxu1 }
  0xe9   : > { %v1673_v30 = vpack.c.bf16 %v477_v28, %v474_v24  ;;  %v1674_v31 = vpack.c.bf16 %v521_v29, %v518_v25 }
  0xea   : > { %v2840_v32 = vpop.f32.mrf.mxu0  ;;  %v2846_v33 = vpop.f32.mrf.mxu1 }
  0xeb   : > { %3013 = vmatprep.mubr.msk.bf16.mxu0 %vm256_vm2, %v1673_v30 }
  0xec   : > { %v562_v34 = vpop.f32.mrf.mxu0  ;;  %v606_v35 = vpop.f32.mrf.mxu1  ;;  %3014 = vmatmul.mubr.msk.bf16.gmra.mxu0 %vm256_vm2, %v1674_v31 }
  0xee   : > { %v2851_v36 = vpop.f32.mrf.mxu0  ;;  %v2857_v37 = vpop.f32.mrf.mxu1 }
  0xf0   : > { %v565_v38 = vpop.f32.mrf.mxu0  ;;  %v609_v39 = vpop.f32.mrf.mxu1 }
  0xf1   : > { %v1675_v40 = vpack.c.bf16 %v565_v38, %v562_v34  ;;  %v1676_v41 = vpack.c.bf16 %v609_v39, %v606_v35 }
  0xf2   : > { %v2852_v42 = vpop.f32.mrf.mxu0  ;;  %v2858_v43 = vpop.f32.mrf.mxu1 }
  0xf3   : > { %3017 = vmatprep.mubr.msk.bf16.mxu0 %vm256_vm2, %v1675_v40 }
  0xf4   : > { %v650_v44 = vpop.f32.mrf.mxu0  ;;  %v694_v45 = vpop.f32.mrf.mxu1  ;;  %3018 = vmatmul.mubr.msk.bf16.gmra.mxu0 %vm256_vm2, %v1676_v41 }
  0xf6   : > { %v2863_v46 = vpop.f32.mrf.mxu0  ;;  %v2869_v47 = vpop.f32.mrf.mxu1 }
  0xf8   : > { %v653_v48 = vpop.f32.mrf.mxu0  ;;  %v697_v49 = vpop.f32.mrf.mxu1 }
  0xf9   : > { %v1677_v50 = vpack.c.bf16 %v653_v48, %v650_v44  ;;  %v1678_v51 = vpack.c.bf16 %v697_v49, %v694_v45 }
  0xfa   : > { %v2864_v52 = vpop.f32.mrf.mxu0  ;;  %v2870_v53 = vpop.f32.mrf.mxu1 }
  0xfb   : > { %3021 = vmatprep.mubr.msk.bf16.mxu0 %vm256_vm2, %v1677_v50 }
  0xfc   : > { %v738_v54 = vpop.f32.mrf.mxu0  ;;  %v782_v55 = vpop.f32.mrf.mxu1  ;;  %3022 = vmatmul.mubr.msk.bf16.gmra.mxu0 %vm256_vm2, %v1678_v51 }
  0xfe   : > { %v2875_v56 = vpop.f32.mrf.mxu0  ;;  %v2881_v57 = vpop.f32.mrf.mxu1 }
 0x100   : > { %v741_v58 = vpop.f32.mrf.mxu0  ;;  %v785_v59 = vpop.f32.mrf.mxu1 }
 0x101   : > { %v1679_v60 = vpack.c.bf16 %v741_v58, %v738_v54  ;;  %v1680_v61 = vpack.c.bf16 %v785_v59, %v782_v55 }
 0x102   : > { %v2876_v62 = vpop.f32.mrf.mxu0  ;;  %v2882_v63 = vpop.f32.mrf.mxu1 }
 0x103   : > { %3025 = vmatprep.mubr.msk.bf16.mxu0 %vm256_vm2, %v1679_v60 }
 0x104   : > { %v826_v1 = vpop.f32.mrf.mxu0  ;;  %v870_v2 = vpop.f32.mrf.mxu1  ;;  %3026 = vmatmul.mubr.msk.bf16.gmra.mxu0 %vm256_vm2, %v1680_v61 }
 0x106   : > { %v2887_v3 = vpop.f32.mrf.mxu0  ;;  %v2893_v4 = vpop.f32.mrf.mxu1 }
 0x108   : > { %v829_v5 = vpop.f32.mrf.mxu0  ;;  %v873_v7 = vpop.f32.mrf.mxu1 }
 0x109   : > { %v1681_v8 = vpack.c.bf16 %v829_v5, %v826_v1  ;;  %v1682_v9 = vpack.c.bf16 %v873_v7, %v870_v2 }
 0x10a   : > { %v2888_v10 = vpop.f32.mrf.mxu0  ;;  %v2894_v0 = vpop.f32.mrf.mxu1 }
 0x10b   : > { %3029 = vmatprep.mubr.msk.bf16.mxu0 %vm256_vm2, %v1681_v8 }
 0x10c   : > { %v914_v11 = vpop.f32.mrf.mxu0  ;;  %v958_v12 = vpop.f32.mrf.mxu1  ;;  %3030 = vmatmul.mubr.msk.bf16.gmra.mxu0 %vm256_vm2, %v1682_v9 }
 0x10e   : > { %v2899_v13 = vpop.f32.mrf.mxu0  ;;  %v2905_v14 = vpop.f32.mrf.mxu1 }
 0x110   : > { %v917_v15 = vpop.f32.mrf.mxu0  ;;  %v961_v16 = vpop.f32.mrf.mxu1 }
 0x111   : > { %v1683_v17 = vpack.c.bf16 %v917_v15, %v914_v11  ;;  %v1684_v6 = vpack.c.bf16 %v961_v16, %v958_v12 }
 0x112   : > { %v2900_v18 = vpop.f32.mrf.mxu0  ;;  %v2906_v19 = vpop.f32.mrf.mxu1 }
 0x113   : > { %3033 = vmatprep.mubr.msk.bf16.mxu0 %vm256_vm2, %v1683_v17 }
 0x114   : > { %v1002_v20 = vpop.f32.mrf.mxu0  ;;  %v1046_v21 = vpop.f32.mrf.mxu1  ;;  %3034 = vmatmul.mubr.msk.bf16.gmra.mxu0 %vm256_vm2, %v1684_v6 }
 0x116   : > { %v2911_v22 = vpop.f32.mrf.mxu0  ;;  %v2917_v23 = vpop.f32.mrf.mxu1 }
 0x118   : > { %v1005_v24 = vpop.f32.mrf.mxu0  ;;  %v1049_v25 = vpop.f32.mrf.mxu1 }
 0x119   : > { %v1685_v26 = vpack.c.bf16 %v1005_v24, %v1002_v20  ;;  %v1686_v27 = vpack.c.bf16 %v1049_v25, %v1046_v21 }
 0x11a   : > { %v2912_v28 = vpop.f32.mrf.mxu0  ;;  %v2918_v29 = vpop.f32.mrf.mxu1 }
 0x11b   : > { %3037 = vmatprep.mubr.msk.bf16.mxu1 %vm256_vm2, %v1685_v26 }
 0x11c   : > { %v1090_v30 = vpop.f32.mrf.mxu0  ;;  %v1134_v31 = vpop.f32.mrf.mxu1  ;;  %3038 = vmatmul.mubr.msk.bf16.vlgmr.msra.gmra.mxu1 %vm256_vm2, %v1686_v27 }
 0x11e   : > { %v2923_v32 = vpop.f32.mrf.mxu0  ;;  %v2929_v33 = vpop.f32.mrf.mxu1 }
 0x120   : > { %v1093_v34 = vpop.f32.mrf.mxu0  ;;  %v1137_v35 = vpop.f32.mrf.mxu1 }
 0x121   : > { %v1687_v36 = vpack.c.bf16 %v1093_v34, %v1090_v30  ;;  %v1688_v37 = vpack.c.bf16 %v1137_v35, %v1134_v31 }
 0x122   : > { %v2924_v38 = vpop.f32.mrf.mxu0  ;;  %v2930_v39 = vpop.f32.mrf.mxu1 }
 0x123   : > { %3041 = vmatprep.mubr.msk.bf16.mxu1 %vm256_vm2, %v1687_v36 }
 0x124   : > { %v1178_v40 = vpop.f32.mrf.mxu0  ;;  %v1222_v41 = vpop.f32.mrf.mxu1  ;;  %3042 = vmatmul.mubr.msk.bf16.gmra.mxu1 %vm256_vm2, %v1688_v37 }
 0x126   : > { %v2935_v42 = vpop.f32.mrf.mxu0  ;;  %v2941_v43 = vpop.f32.mrf.mxu1 }
 0x128   : > { %v1181_v44 = vpop.f32.mrf.mxu0  ;;  %v1225_v45 = vpop.f32.mrf.mxu1 }
 0x129   : > { %v1689_v46 = vpack.c.bf16 %v1181_v44, %v1178_v40  ;;  %v1690_v47 = vpack.c.bf16 %v1225_v45, %v1222_v41 }
 0x12a   : > { %v2936_v48 = vpop.f32.mrf.mxu0  ;;  %v2942_v49 = vpop.f32.mrf.mxu1 }
 0x12b   : > { %3045 = vmatprep.mubr.msk.bf16.mxu1 %vm256_vm2, %v1689_v46 }
 0x12c   : > { %v1266_v50 = vpop.f32.mrf.mxu0  ;;  %v1310_v51 = vpop.f32.mrf.mxu1  ;;  %3046 = vmatmul.mubr.msk.bf16.gmra.mxu1 %vm256_vm2, %v1690_v47 }
 0x12e   : > { %v2947_v52 = vpop.f32.mrf.mxu0  ;;  %v2953_v53 = vpop.f32.mrf.mxu1 }
 0x130   : > { %v1269_v54 = vpop.f32.mrf.mxu0  ;;  %v1313_v55 = vpop.f32.mrf.mxu1 }
 0x131   : > { %v1691_v56 = vpack.c.bf16 %v1269_v54, %v1266_v50  ;;  %v1692_v57 = vpack.c.bf16 %v1313_v55, %v1310_v51 }
 0x132   : > { %v2948_v58 = vpop.f32.mrf.mxu0  ;;  %v2954_v59 = vpop.f32.mrf.mxu1 }
 0x133   : > { %3049 = vmatprep.mubr.msk.bf16.mxu1 %vm256_vm2, %v1691_v56 }
 0x134   : > { %v1354_v60 = vpop.f32.mrf.mxu0  ;;  %v1398_v61 = vpop.f32.mrf.mxu1  ;;  %3050 = vmatmul.mubr.msk.bf16.gmra.mxu1 %vm256_vm2, %v1692_v57 }
 0x136   : > { %v2959_v62 = vpop.f32.mrf.mxu0  ;;  %v2965_v63 = vpop.f32.mrf.mxu1 }
 0x138   : > { %v1357_v1 = vpop.f32.mrf.mxu0  ;;  %v1401_v2 = vpop.f32.mrf.mxu1 }
 0x139   : > { %v1693_v3 = vpack.c.bf16 %v1357_v1, %v1354_v60  ;;  %v1694_v4 = vpack.c.bf16 %v1401_v2, %v1398_v61 }
 0x13a   : > { %v2960_v5 = vpop.f32.mrf.mxu0  ;;  %v2966_v7 = vpop.f32.mrf.mxu1 }
 0x13b   : > { %3053 = vmatprep.mubr.msk.bf16.mxu1 %vm256_vm2, %v1693_v3 }
 0x13c   : > { %v1442_v8 = vpop.f32.mrf.mxu0  ;;  %v1486_v9 = vpop.f32.mrf.mxu1  ;;  %3054 = vmatmul.mubr.msk.bf16.gmra.mxu1 %vm256_vm2, %v1694_v4 }
 0x13e   : > { %v2971_v10 = vpop.f32.mrf.mxu0  ;;  %v2977_v0 = vpop.f32.mrf.mxu1 }
 0x140   : > { %v1445_v11 = vpop.f32.mrf.mxu0  ;;  %v1489_v12 = vpop.f32.mrf.mxu1 }
 0x141   : > { %v1695_v13 = vpack.c.bf16 %v1445_v11, %v1442_v8  ;;  %v1696_v14 = vpack.c.bf16 %v1489_v12, %v1486_v9 }
 0x142   : > { %v2972_v15 = vpop.f32.mrf.mxu0  ;;  %v2978_v16 = vpop.f32.mrf.mxu1 }
 0x143   : > { %3057 = vmatprep.mubr.msk.bf16.mxu1 %vm256_vm2, %v1695_v13 }
 0x144   : > { %v1530_v17 = vpop.f32.mrf.mxu0  ;;  %v1574_v6 = vpop.f32.mrf.mxu1  ;;  %3058 = vmatmul.mubr.msk.bf16.gmra.mxu1 %vm256_vm2, %v1696_v14 }
 0x146   : > { %v2983_v18 = vpop.f32.mrf.mxu0  ;;  %v2989_v19 = vpop.f32.mrf.mxu1 }
 0x148   : > { %v1533_v20 = vpop.f32.mrf.mxu0  ;;  %v1577_v21 = vpop.f32.mrf.mxu1 }
 0x149   : > { %v1697_v22 = vpack.c.bf16 %v1533_v20, %v1530_v17  ;;  %v1698_v23 = vpack.c.bf16 %v1577_v21, %v1574_v6 }
 0x14a   : > { %v2984_v24 = vpop.f32.mrf.mxu0  ;;  %v2990_v25 = vpop.f32.mrf.mxu1 }
 0x14b   : > { %3061 = vmatprep.mubr.msk.bf16.mxu1 %vm256_vm2, %v1697_v22 }
 0x14c   : > { %v1618_v26 = vpop.f32.mrf.mxu0  ;;  %v1662_v27 = vpop.f32.mrf.mxu1  ;;  %3062 = vmatmul.mubr.msk.bf16.gmra.mxu1 %vm256_vm2, %v1698_v23 }
 0x14e   : > { %v2995_v28 = vpop.f32.mrf.mxu0  ;;  %v3001_v29 = vpop.f32.mrf.mxu1 }
 0x150   : > { %v1621_v30 = vpop.f32.mrf.mxu0  ;;  %v1665_v31 = vpop.f32.mrf.mxu1 }
 0x151   : > { %v1699_v32 = vpack.c.bf16 %v1621_v30, %v1618_v26  ;;  %v1700_v33 = vpack.c.bf16 %v1665_v31, %v1662_v27 }
 0x152   : > { %v2996_v34 = vpop.f32.mrf.mxu0  ;;  %v3002_v35 = vpop.f32.mrf.mxu1 }
 0x153   : > { %3065 = vmatprep.mubr.msk.bf16.mxu1 %vm256_vm2, %v1699_v32 }
 0x154   : > { %3066 = vmatmul.mubr.msk.bf16.gmra.mxu1 %vm256_vm2, %v1700_v33 }
 0x19c   : > { %v3007_v36 = vpop.f32.mrf.mxu0 }
 0x19d   : > { %v2652_v37 = vpack.c.bf16 %v3007_v36, %v3007_v36 }
 0x19e   : > { %v1835_v38 = vpop.f32.mrf.mxu0 }
 0x19f   : > { %2349 = vst.msk [vmem:[%s3443_s27 + $0x8] sm:$0xf] %vm2346_vm3, %v2652_v37  ;;  %v2650_v39 = vpack.c.bf16 %v1835_v38, %v1835_v38 }
 0x1a0   : > { %v3008_v40 = vpop.f32.mrf.mxu0 }
 0x1a1   : > { %2347 = vst.msk [vmem:[%s3443_s27] sm:$0xf] %vm2346_vm3, %v2650_v39  ;;  %v2653_v41 = vpack.c.bf16 %v3008_v40, %v3008_v40 }
 0x1a2   : > { %v1838_v42 = vpop.f32.mrf.mxu0 }
 0x1a3   : > { %2350 = vst.msk [vmem:[%s3443_s27 + $0xc] sm:$0xf] %vm2346_vm3, %v2653_v41  ;;  %v2651_v43 = vpack.c.bf16 %v1838_v42, %v1838_v42 }
 0x1a4   : > { %v3011_v44 = vpop.f32.mrf.mxu0 }
 0x1a5   : > { %2348 = vst.msk [vmem:[%s3443_s27 + $0x4] sm:$0xf] %vm2346_vm3, %v2651_v43  ;;  %v2656_v45 = vpack.c.bf16 %v3011_v44, %v3011_v44 }
 0x1a6   : > { %v1851_v46 = vpop.f32.mrf.mxu0 }
 0x1a7   : > { %2353 = vst.msk [vmem:[%s3443_s27 + $0x18] sm:$0xf] %vm2346_vm3, %v2656_v45  ;;  %v2654_v47 = vpack.c.bf16 %v1851_v46, %v1851_v46 }
 0x1a8   : > { %v3012_v48 = vpop.f32.mrf.mxu0 }
 0x1a9   : > { %2351 = vst.msk [vmem:[%s3443_s27 + $0x10] sm:$0xf] %vm2346_vm3, %v2654_v47  ;;  %v2657_v49 = vpack.c.bf16 %v3012_v48, %v3012_v48 }
 0x1aa   : > { %v1854_v50 = vpop.f32.mrf.mxu0 }
 0x1ab   : > { %2354 = vst.msk [vmem:[%s3443_s27 + $0x1c] sm:$0xf] %vm2346_vm3, %v2657_v49  ;;  %v2655_v51 = vpack.c.bf16 %v1854_v50, %v1854_v50 }
 0x1ac   : > { %v3015_v52 = vpop.f32.mrf.mxu0 }
 0x1ad   : > { %2352 = vst.msk [vmem:[%s3443_s27 + $0x14] sm:$0xf] %vm2346_vm3, %v2655_v51  ;;  %v2660_v53 = vpack.c.bf16 %v3015_v52, %v3015_v52 }
 0x1ae   : > { %v1867_v54 = vpop.f32.mrf.mxu0 }
 0x1af   : > { %2357 = vst.msk [vmem:[%s3443_s27 + $0x28] sm:$0xf] %vm2346_vm3, %v2660_v53  ;;  %v2658_v55 = vpack.c.bf16 %v1867_v54, %v1867_v54 }
 0x1b0   : > { %v3016_v56 = vpop.f32.mrf.mxu0 }
 0x1b1   : > { %2355 = vst.msk [vmem:[%s3443_s27 + $0x20] sm:$0xf] %vm2346_vm3, %v2658_v55  ;;  %v2661_v57 = vpack.c.bf16 %v3016_v56, %v3016_v56 }
 0x1b2   : > { %v1870_v58 = vpop.f32.mrf.mxu0 }
 0x1b3   : > { %2358 = vst.msk [vmem:[%s3443_s27 + $0x2c] sm:$0xf] %vm2346_vm3, %v2661_v57  ;;  %v2659_v59 = vpack.c.bf16 %v1870_v58, %v1870_v58 }
 0x1b4   : > { %v3019_v60 = vpop.f32.mrf.mxu0 }
 0x1b5   : > { %2356 = vst.msk [vmem:[%s3443_s27 + $0x24] sm:$0xf] %vm2346_vm3, %v2659_v59  ;;  %v2664_v61 = vpack.c.bf16 %v3019_v60, %v3019_v60 }
 0x1b6   : > { %v1883_v62 = vpop.f32.mrf.mxu0 }
 0x1b7   : > { %2361 = vst.msk [vmem:[%s3443_s27 + $0x38] sm:$0xf] %vm2346_vm3, %v2664_v61  ;;  %v2662_v63 = vpack.c.bf16 %v1883_v62, %v1883_v62 }
 0x1b8   : > { %v3020_v1 = vpop.f32.mrf.mxu0 }
 0x1b9   : > { %2359 = vst.msk [vmem:[%s3443_s27 + $0x30] sm:$0xf] %vm2346_vm3, %v2662_v63  ;;  %v2665_v2 = vpack.c.bf16 %v3020_v1, %v3020_v1 }
 0x1ba   : > { %v1886_v3 = vpop.f32.mrf.mxu0 }
 0x1bb   : > { %2362 = vst.msk [vmem:[%s3443_s27 + $0x3c] sm:$0xf] %vm2346_vm3, %v2665_v2  ;;  %v2663_v4 = vpack.c.bf16 %v1886_v3, %v1886_v3 }
 0x1bc   : > { %v3023_v5 = vpop.f32.mrf.mxu0 }
 0x1bd   : > { %2360 = vst.msk [vmem:[%s3443_s27 + $0x34] sm:$0xf] %vm2346_vm3, %v2663_v4  ;;  %v2668_v7 = vpack.c.bf16 %v3023_v5, %v3023_v5 }
 0x1be   : > { %v1899_v8 = vpop.f32.mrf.mxu0 }
 0x1bf   : > { %2365 = vst.msk [vmem:[%s3443_s27 + $0x48] sm:$0xf] %vm2346_vm3, %v2668_v7  ;;  %v2666_v9 = vpack.c.bf16 %v1899_v8, %v1899_v8 }
 0x1c0   : > { %v3024_v10 = vpop.f32.mrf.mxu0 }
 0x1c1   : > { %2363 = vst.msk [vmem:[%s3443_s27 + $0x40] sm:$0xf] %vm2346_vm3, %v2666_v9  ;;  %v2669_v0 = vpack.c.bf16 %v3024_v10, %v3024_v10 }
 0x1c2   : > { %v1902_v11 = vpop.f32.mrf.mxu0 }
 0x1c3   : > { %2366 = vst.msk [vmem:[%s3443_s27 + $0x4c] sm:$0xf] %vm2346_vm3, %v2669_v0  ;;  %v2667_v12 = vpack.c.bf16 %v1902_v11, %v1902_v11 }
 0x1c4   : > { %v3027_v13 = vpop.f32.mrf.mxu0 }
 0x1c5   : > { %2364 = vst.msk [vmem:[%s3443_s27 + $0x44] sm:$0xf] %vm2346_vm3, %v2667_v12  ;;  %v2672_v14 = vpack.c.bf16 %v3027_v13, %v3027_v13 }
 0x1c6   : > { %v1915_v15 = vpop.f32.mrf.mxu0 }
 0x1c7   : > { %2369 = vst.msk [vmem:[%s3443_s27 + $0x58] sm:$0xf] %vm2346_vm3, %v2672_v14  ;;  %v2670_v16 = vpack.c.bf16 %v1915_v15, %v1915_v15 }
 0x1c8   : > { %v3028_v17 = vpop.f32.mrf.mxu0 }
 0x1c9   : > { %2367 = vst.msk [vmem:[%s3443_s27 + $0x50] sm:$0xf] %vm2346_vm3, %v2670_v16  ;;  %v2673_v6 = vpack.c.bf16 %v3028_v17, %v3028_v17 }
 0x1ca   : > { %v1918_v18 = vpop.f32.mrf.mxu0 }
 0x1cb   : > { %2370 = vst.msk [vmem:[%s3443_s27 + $0x5c] sm:$0xf] %vm2346_vm3, %v2673_v6  ;;  %v2671_v19 = vpack.c.bf16 %v1918_v18, %v1918_v18 }
 0x1cc   : > { %v3031_v20 = vpop.f32.mrf.mxu0 }
 0x1cd   : > { %2368 = vst.msk [vmem:[%s3443_s27 + $0x54] sm:$0xf] %vm2346_vm3, %v2671_v19  ;;  %v2676_v21 = vpack.c.bf16 %v3031_v20, %v3031_v20 }
 0x1ce   : > { %v1931_v22 = vpop.f32.mrf.mxu0 }
 0x1cf   : > { %2373 = vst.msk [vmem:[%s3443_s27 + $0x68] sm:$0xf] %vm2346_vm3, %v2676_v21  ;;  %v2674_v23 = vpack.c.bf16 %v1931_v22, %v1931_v22 }
 0x1d0   : > { %v3032_v24 = vpop.f32.mrf.mxu0 }
 0x1d1   : > { %2371 = vst.msk [vmem:[%s3443_s27 + $0x60] sm:$0xf] %vm2346_vm3, %v2674_v23  ;;  %v2677_v25 = vpack.c.bf16 %v3032_v24, %v3032_v24 }
 0x1d2   : > { %v1934_v26 = vpop.f32.mrf.mxu0 }
 0x1d3   : > { %2374 = vst.msk [vmem:[%s3443_s27 + $0x6c] sm:$0xf] %vm2346_vm3, %v2677_v25  ;;  %v2675_v27 = vpack.c.bf16 %v1934_v26, %v1934_v26 }
 0x1d4   : > { %v3035_v28 = vpop.f32.mrf.mxu0 }
 0x1d5   : > { %2372 = vst.msk [vmem:[%s3443_s27 + $0x64] sm:$0xf] %vm2346_vm3, %v2675_v27  ;;  %v2680_v29 = vpack.c.bf16 %v3035_v28, %v3035_v28 }
 0x1d6   : > { %v1947_v30 = vpop.f32.mrf.mxu0 }
 0x1d7   : > { %2377 = vst.msk [vmem:[%s3443_s27 + $0x78] sm:$0xf] %vm2346_vm3, %v2680_v29  ;;  %v2678_v31 = vpack.c.bf16 %v1947_v30, %v1947_v30 }
 0x1d8   : > { %v3036_v32 = vpop.f32.mrf.mxu0 }
 0x1d9   : > { %2375 = vst.msk [vmem:[%s3443_s27 + $0x70] sm:$0xf] %vm2346_vm3, %v2678_v31  ;;  %v2681_v33 = vpack.c.bf16 %v3036_v32, %v3036_v32 }
 0x1da   : > { %v1950_v34 = vpop.f32.mrf.mxu0 }
 0x1db   : > { %2378 = vst.msk [vmem:[%s3443_s27 + $0x7c] sm:$0xf] %vm2346_vm3, %v2681_v33  ;;  %v2679_v35 = vpack.c.bf16 %v1950_v34, %v1950_v34 }
 0x1dc   : > { %v3039_v36 = vpop.f32.mrf.mxu1 }
 0x1dd   : > { %2376 = vst.msk [vmem:[%s3443_s27 + $0x74] sm:$0xf] %vm2346_vm3, %v2679_v35  ;;  %v2684_v37 = vpack.c.bf16 %v3039_v36, %v3039_v36 }
 0x1de   : > { %v1963_v38 = vpop.f32.mrf.mxu1 }
 0x1df   : > { %2381 = vst.msk [vmem:[%s3443_s27 + $0x88] sm:$0xf] %vm2346_vm3, %v2684_v37  ;;  %v2682_v39 = vpack.c.bf16 %v1963_v38, %v1963_v38 }
 0x1e0   : > { %v3040_v40 = vpop.f32.mrf.mxu1 }
 0x1e1   : > { %2379 = vst.msk [vmem:[%s3443_s27 + $0x80] sm:$0xf] %vm2346_vm3, %v2682_v39  ;;  %v2685_v41 = vpack.c.bf16 %v3040_v40, %v3040_v40 }
 0x1e2   : > { %v1966_v42 = vpop.f32.mrf.mxu1 }
 0x1e3   : > { %2382 = vst.msk [vmem:[%s3443_s27 + $0x8c] sm:$0xf] %vm2346_vm3, %v2685_v41  ;;  %v2683_v43 = vpack.c.bf16 %v1966_v42, %v1966_v42 }
 0x1e4   : > { %v3043_v44 = vpop.f32.mrf.mxu1 }
 0x1e5   : > { %2380 = vst.msk [vmem:[%s3443_s27 + $0x84] sm:$0xf] %vm2346_vm3, %v2683_v43  ;;  %v2688_v45 = vpack.c.bf16 %v3043_v44, %v3043_v44 }
 0x1e6   : > { %v1979_v46 = vpop.f32.mrf.mxu1 }
 0x1e7   : > { %2385 = vst.msk [vmem:[%s3443_s27 + $0x98] sm:$0xf] %vm2346_vm3, %v2688_v45  ;;  %v2686_v47 = vpack.c.bf16 %v1979_v46, %v1979_v46 }
 0x1e8   : > { %v3044_v48 = vpop.f32.mrf.mxu1 }
 0x1e9   : > { %2383 = vst.msk [vmem:[%s3443_s27 + $0x90] sm:$0xf] %vm2346_vm3, %v2686_v47  ;;  %v2689_v49 = vpack.c.bf16 %v3044_v48, %v3044_v48 }
 0x1ea   : > { %v1982_v50 = vpop.f32.mrf.mxu1 }
 0x1eb   : > { %2386 = vst.msk [vmem:[%s3443_s27 + $0x9c] sm:$0xf] %vm2346_vm3, %v2689_v49  ;;  %v2687_v51 = vpack.c.bf16 %v1982_v50, %v1982_v50 }
 0x1ec   : > { %v3047_v52 = vpop.f32.mrf.mxu1 }
 0x1ed   : > { %2384 = vst.msk [vmem:[%s3443_s27 + $0x94] sm:$0xf] %vm2346_vm3, %v2687_v51  ;;  %v2692_v53 = vpack.c.bf16 %v3047_v52, %v3047_v52 }
 0x1ee   : > { %v1995_v54 = vpop.f32.mrf.mxu1 }
 0x1ef   : > { %2389 = vst.msk [vmem:[%s3443_s27 + $0xa8] sm:$0xf] %vm2346_vm3, %v2692_v53  ;;  %v2690_v55 = vpack.c.bf16 %v1995_v54, %v1995_v54 }
 0x1f0   : > { %v3048_v56 = vpop.f32.mrf.mxu1 }
 0x1f1   : > { %2387 = vst.msk [vmem:[%s3443_s27 + $0xa0] sm:$0xf] %vm2346_vm3, %v2690_v55  ;;  %v2693_v57 = vpack.c.bf16 %v3048_v56, %v3048_v56 }
 0x1f2   : > { %v1998_v58 = vpop.f32.mrf.mxu1 }
 0x1f3   : > { %2390 = vst.msk [vmem:[%s3443_s27 + $0xac] sm:$0xf] %vm2346_vm3, %v2693_v57  ;;  %v2691_v59 = vpack.c.bf16 %v1998_v58, %v1998_v58 }
 0x1f4   : > { %v3051_v60 = vpop.f32.mrf.mxu1 }
 0x1f5   : > { %2388 = vst.msk [vmem:[%s3443_s27 + $0xa4] sm:$0xf] %vm2346_vm3, %v2691_v59  ;;  %v2696_v61 = vpack.c.bf16 %v3051_v60, %v3051_v60 }
 0x1f6   : > { %v2011_v62 = vpop.f32.mrf.mxu1 }
 0x1f7   : > { %2393 = vst.msk [vmem:[%s3443_s27 + $0xb8] sm:$0xf] %vm2346_vm3, %v2696_v61  ;;  %v2694_v63 = vpack.c.bf16 %v2011_v62, %v2011_v62 }
 0x1f8   : > { %v3052_v1 = vpop.f32.mrf.mxu1 }
 0x1f9   : > { %2391 = vst.msk [vmem:[%s3443_s27 + $0xb0] sm:$0xf] %vm2346_vm3, %v2694_v63  ;;  %v2697_v2 = vpack.c.bf16 %v3052_v1, %v3052_v1 }
 0x1fa   : > { %v2014_v3 = vpop.f32.mrf.mxu1 }
 0x1fb   : > { %2394 = vst.msk [vmem:[%s3443_s27 + $0xbc] sm:$0xf] %vm2346_vm3, %v2697_v2  ;;  %v2695_v4 = vpack.c.bf16 %v2014_v3, %v2014_v3 }
 0x1fc   : > { %v3055_v5 = vpop.f32.mrf.mxu1 }
 0x1fd   : > { %2392 = vst.msk [vmem:[%s3443_s27 + $0xb4] sm:$0xf] %vm2346_vm3, %v2695_v4  ;;  %v2700_v7 = vpack.c.bf16 %v3055_v5, %v3055_v5 }
 0x1fe   : > { %v2027_v8 = vpop.f32.mrf.mxu1 }
 0x1ff   : > { %2397 = vst.msk [vmem:[%s3443_s27 + $0xc8] sm:$0xf] %vm2346_vm3, %v2700_v7  ;;  %v2698_v9 = vpack.c.bf16 %v2027_v8, %v2027_v8 }
 0x200   : > { %v3056_v10 = vpop.f32.mrf.mxu1 }
 0x201   : > { %2395 = vst.msk [vmem:[%s3443_s27 + $0xc0] sm:$0xf] %vm2346_vm3, %v2698_v9  ;;  %v2701_v0 = vpack.c.bf16 %v3056_v10, %v3056_v10 }
 0x202   : > { %v2030_v11 = vpop.f32.mrf.mxu1 }
 0x203   : > { %2398 = vst.msk [vmem:[%s3443_s27 + $0xcc] sm:$0xf] %vm2346_vm3, %v2701_v0  ;;  %v2699_v12 = vpack.c.bf16 %v2030_v11, %v2030_v11 }
 0x204   : > { %v3059_v13 = vpop.f32.mrf.mxu1 }
 0x205   : > { %2396 = vst.msk [vmem:[%s3443_s27 + $0xc4] sm:$0xf] %vm2346_vm3, %v2699_v12  ;;  %v2704_v14 = vpack.c.bf16 %v3059_v13, %v3059_v13 }
 0x206   : > { %v2043_v15 = vpop.f32.mrf.mxu1 }
 0x207   : > { %2401 = vst.msk [vmem:[%s3443_s27 + $0xd8] sm:$0xf] %vm2346_vm3, %v2704_v14  ;;  %v2702_v16 = vpack.c.bf16 %v2043_v15, %v2043_v15 }
 0x208   : > { %v3060_v17 = vpop.f32.mrf.mxu1 }
 0x209   : > { %2399 = vst.msk [vmem:[%s3443_s27 + $0xd0] sm:$0xf] %vm2346_vm3, %v2702_v16  ;;  %v2705_v6 = vpack.c.bf16 %v3060_v17, %v3060_v17 }
 0x20a   : > { %v2046_v18 = vpop.f32.mrf.mxu1 }
 0x20b   : > { %2402 = vst.msk [vmem:[%s3443_s27 + $0xdc] sm:$0xf] %vm2346_vm3, %v2705_v6  ;;  %v2703_v19 = vpack.c.bf16 %v2046_v18, %v2046_v18 }
 0x20c   : > { %v3063_v20 = vpop.f32.mrf.mxu1 }
 0x20d   : > { %2400 = vst.msk [vmem:[%s3443_s27 + $0xd4] sm:$0xf] %vm2346_vm3, %v2703_v19  ;;  %v2708_v21 = vpack.c.bf16 %v3063_v20, %v3063_v20 }
 0x20e   : > { %v2059_v22 = vpop.f32.mrf.mxu1 }
 0x20f   : > { %2405 = vst.msk [vmem:[%s3443_s27 + $0xe8] sm:$0xf] %vm2346_vm3, %v2708_v21  ;;  %v2706_v23 = vpack.c.bf16 %v2059_v22, %v2059_v22 }
 0x210   : > { %v3064_v24 = vpop.f32.mrf.mxu1 }
 0x211   : > { %2403 = vst.msk [vmem:[%s3443_s27 + $0xe0] sm:$0xf] %vm2346_vm3, %v2706_v23  ;;  %v2709_v25 = vpack.c.bf16 %v3064_v24, %v3064_v24 }
 0x212   : > { %v2062_v26 = vpop.f32.mrf.mxu1 }
 0x213   : > { %2406 = vst.msk [vmem:[%s3443_s27 + $0xec] sm:$0xf] %vm2346_vm3, %v2709_v25  ;;  %v2707_v27 = vpack.c.bf16 %v2062_v26, %v2062_v26 }
 0x214   : > { %v3067_v28 = vpop.f32.mrf.mxu1 }
 0x215   : > { %2404 = vst.msk [vmem:[%s3443_s27 + $0xe4] sm:$0xf] %vm2346_vm3, %v2707_v27  ;;  %v2712_v29 = vpack.c.bf16 %v3067_v28, %v3067_v28 }
 0x216   : > { %v2075_v30 = vpop.f32.mrf.mxu1 }
 0x217   : > { %2409 = vst.msk [vmem:[%s3443_s27 + $0xf8] sm:$0xf] %vm2346_vm3, %v2712_v29  ;;  %v2710_v31 = vpack.c.bf16 %v2075_v30, %v2075_v30 }
 0x218   : > { %v3068_v32 = vpop.f32.mrf.mxu1 }
 0x219   : > { %2407 = vst.msk [vmem:[%s3443_s27 + $0xf0] sm:$0xf] %vm2346_vm3, %v2710_v31  ;;  %v2713_v33 = vpack.c.bf16 %v3068_v32, %v3068_v32 }
 0x21a   : > { %v2078_v34 = vpop.f32.mrf.mxu1 }
 0x21b   : > { %2410 = vst.msk [vmem:[%s3443_s27 + $0xfc] sm:$0xf] %vm2346_vm3, %v2713_v33  ;;  %v2711_v35 = vpack.c.bf16 %v2078_v34, %v2078_v34 }
 0x21d   : > { %2408 = vst.msk [vmem:[%s3443_s27 + $0xf4] sm:$0xf] %vm2346_vm3, %v2711_v35 }
 0x21e PF: > { %s13_s14 = sadd.s32 1, %s3122_s14   ;;  %s3586_s12 = smov %s3118_s13 }
 0x21f   : > { %p10_p5 = scmp.ge.s32.totalorder %s13_s14, 4   ;;  %s3587_s13 = smov %s3589_s15 }
 0x221   :  { %12 = sbr.rel (!%p10_p5) target bundleno = 2 (0x2), region = 65 }

// kernel: hrnet_forward.13
= control target key start
LH: loop header
LB: loop body
LE: loop exit
PB: predicated region body
PF: predicated region fallthrough
CT: control target
= control target key end

     0   :  { %s1055_s12 = smov 0   ;;  %s1223_s0 = inlined_call_operand.vmem [shape: bf16[512,32], index: 0, kind: input, shape index: {}]   ;;  %s1224_s1 = inlined_call_operand.vmem [shape: bf16[32,8], index: 1, kind: input, shape index: {}]   ;;  %s1225_s2 = inlined_call_operand.vmem [shape: f32[1,8], index: 2, kind: input, shape index: {}]   ;;  %s1226_s3 = inlined_call_operand.vmem [shape: bf16[512,8], index: 3, kind: output, shape index: {}]  }
   0x1 LB: > { %s833_s13 = sadd.s32 4294967295, %s1033_s12   ;;  %p837_p0 = scmp.ge.s32.totalorder %s1033_s12, 1  ;;  %s1033_s12 = sphi %s1055_s12, %s13_s12  }
   0x2   : > { %p138_p1 = scmp.lt.s32.totalorder %s1033_s12, 3 }
   0x4   : > { %p139_p2 = pnand %p837_p0, %p138_p1 }
   0x5   : > { %s838_s16 = sshll.u32 (!%p139_p2), %s833_s13, 5 }
   0x6   : > { %142 = sbr.rel (%p139_p2) target bundleno = 259 (0x103), region = 32  ;;  %p163_p3 = scmp.lt.s32.totalorder (!%p139_p2), %s838_s16, 63 }
   0xb   : > { %v1009_v0 = vld [vmem:[%s1224_s1 + $0x8] sm:$0xff]   ;;  %v1010_v1 = vld [vmem:[%s1224_s1] sm:$0xff]   ;;  %s1228_s16 = smov (!%p163_p3, %s838_s16), 63  ;;  %vm310_vm0 = vcmask 261120   ;;  %vm744_vm2 = vcmask 60416  }
   0xc   : > { %961 = vmatprep.subr.bf16.mxu0 %v1009_v0  ;;  %997 = vmatprep.subr.bf16.mxu1 %v1009_v0  ;;  %s839_s19 = sshll.u32 %s1228_s16, 2  ;;  %v1114_v18 = vld [vmem:[%s1225_s2] ss:$0 sm:$0xff] }
   0xd   : > { %962 = vmatpush3.bf16.msra.mxu0 %v1009_v0  ;;  %999 = vmatpush3.bf16.msra.mxu1 %v1009_v0  ;;  %s1077_s22 = scalar_lea.vmem %s1223_s0, %s839_s19  ;;  %s1125_s27 = scalar_lea.vmem %s1226_s3, %s839_s19 }
   0xe   : > { %963 = vmatprep.subr.bf16.mxu0 %v1010_v1  ;;  %998 = vmatprep.subr.bf16.mxu1 %v1010_v1  ;;  %v1011_v2 = vld [vmem:[%s1077_s22] sm:$0xff]   ;;  %v1013_v4 = vld [vmem:[%s1077_s22 + $0x8] sm:$0xff]   ;;  %v1015_v6 = vld [vmem:[%s1077_s22 + $0x10] sm:$0xff]  }
   0xf   : > { %v1012_v3 = vld [vmem:[%s1077_s22 + $0x40] sm:$0xff]   ;;  %965 = vmatprep.mubr.msk.bf16.mxu0 %vm310_vm0, %v1011_v2  ;;  %v1014_v5 = vld [vmem:[%s1077_s22 + $0x48] sm:$0xff]   ;;  %v1016_v7 = vld [vmem:[%s1077_s22 + $0x50] sm:$0xff]  }
  0x10   : > { %981 = vmatprep.mubr.msk.bf16.mxu1 %vm310_vm0, %v1012_v3  ;;  %v1017_v8 = vld [vmem:[%s1077_s22 + $0x18] sm:$0xff]   ;;  %v1019_v10 = vld [vmem:[%s1077_s22 + $0x20] sm:$0xff]   ;;  %v1021_v12 = vld [vmem:[%s1077_s22 + $0x28] sm:$0xff]  }
  0x11   : > { %964 = vmatpush3.bf16.msra.mxu0 %v1010_v1  ;;  %1000 = vmatpush3.bf16.msra.mxu1 %v1010_v1  ;;  %v1018_v9 = vld [vmem:[%s1077_s22 + $0x58] sm:$0xff]   ;;  %v1020_v11 = vld [vmem:[%s1077_s22 + $0x60] sm:$0xff]   ;;  %v1022_v13 = vld [vmem:[%s1077_s22 + $0x68] sm:$0xff]  }
  0x12   : > { %v1023_v14 = vld [vmem:[%s1077_s22 + $0x30] sm:$0xff]   ;;  %v1025_v16 = vld [vmem:[%s1077_s22 + $0x38] sm:$0xff]  }
  0x13   : > { %v1024_v15 = vld [vmem:[%s1077_s22 + $0x70] sm:$0xff]   ;;  %v1026_v17 = vld [vmem:[%s1077_s22 + $0x78] sm:$0xff]  }
  0x14   : > { %966 = vmatmul.mubr.msk.bf16.vlgmr.msra.gmra.mxu0 %vm310_vm0, %v1013_v4  ;;  %982 = vmatmul.mubr.msk.bf16.vlgmr.msra.gmra.mxu1 %vm310_vm0, %v1014_v5 }
  0x15   : > { %969 = vmatprep.mubr.msk.bf16.mxu0 %vm310_vm0, %v1015_v6  ;;  %985 = vmatprep.mubr.msk.bf16.mxu1 %vm310_vm0, %v1016_v7 }
  0x1c   : > { %970 = vmatmul.mubr.msk.bf16.gmra.mxu0 %vm310_vm0, %v1017_v8  ;;  %986 = vmatmul.mubr.msk.bf16.gmra.mxu1 %vm310_vm0, %v1018_v9 }
  0x1d   : > { %973 = vmatprep.mubr.msk.bf16.mxu0 %vm310_vm0, %v1019_v10  ;;  %989 = vmatprep.mubr.msk.bf16.mxu1 %vm310_vm0, %v1020_v11 }
  0x24   : > { %974 = vmatmul.mubr.msk.bf16.gmra.mxu0 %vm310_vm0, %v1021_v12  ;;  %990 = vmatmul.mubr.msk.bf16.gmra.mxu1 %vm310_vm0, %v1022_v13 }
  0x25   : > { %977 = vmatprep.mubr.msk.bf16.mxu0 %vm310_vm0, %v1023_v14  ;;  %993 = vmatprep.mubr.msk.bf16.mxu1 %vm310_vm0, %v1024_v15 }
  0x2c   : > { %978 = vmatmul.mubr.msk.bf16.gmra.mxu0 %vm310_vm0, %v1025_v16  ;;  %994 = vmatmul.mubr.msk.bf16.gmra.mxu1 %vm310_vm0, %v1026_v17 }
  0xd4   : > { %v967_v19 = vpop.f32.mrf.mxu0  ;;  %v983_v21 = vpop.f32.mrf.mxu1 }
  0xd5   : > { %v402_v20 = vadd.f32 %v967_v19, %v1114_v18  ;;  %v466_v22 = vadd.f32 %v983_v21, %v1114_v18 }
  0xd6   : > { %v393_v23 = vpop.f32.mrf.mxu0  ;;  %v457_v26 = vpop.f32.mrf.mxu1 }
  0xd7   : > { %vm522_vm1 = vcmp.ge.f32.partialorder %v402_v20, 0.0  ;;  %v554_v24 = vmul.f32 0.01, %v402_v20  ;;  %v394_v25 = vadd.f32 %v1114_v18, %v393_v23  ;;  %vm538_vm3 = vcmp.ge.f32.partialorder %v466_v22, 0.0 }
  0xd8   : > { %v570_v27 = vmul.f32 0.01, %v466_v22  ;;  %v458_v28 = vadd.f32 %v1114_v18, %v457_v26  ;;  %v968_v29 = vpop.f32.mrf.mxu0  ;;  %v984_v33 = vpop.f32.mrf.mxu1 }
  0xd9   : > { %v586_v30 = vsel %vm522_vm1, %v402_v20, %v554_v24  ;;  %vm520_vm4 = vcmp.ge.f32.partialorder %v394_v25, 0.0  ;;  %v552_v31 = vmul.f32 0.01, %v394_v25  ;;  %v405_v32 = vadd.f32 %v968_v29, %v1114_v18 }
  0xda   : > { %v913_v34 = vpack.c.bf16 %v586_v30, %v586_v30  ;;  %v602_v35 = vsel %vm538_vm3, %v466_v22, %v570_v27  ;;  %vm536_vm5 = vcmp.ge.f32.partialorder %v458_v28, 0.0  ;;  %v568_v36 = vmul.f32 0.01, %v458_v28  ;;  %v396_v37 = vpop.f32.mrf.mxu0  ;;  %v460_v41 = vpop.f32.mrf.mxu1 }
  0xdb   : > { %v929_v38 = vpack.c.bf16 %v602_v35, %v602_v35  ;;  %v584_v39 = vsel %vm520_vm4, %v394_v25, %v552_v31  ;;  %vm523_vm6 = vcmp.ge.f32.partialorder %v405_v32, 0.0  ;;  %v555_v40 = vmul.f32 0.01, %v405_v32 }
  0xdc   : > { %747 = vst.msk [vmem:[%s1125_s27 + $0x8] sm:$0xf] %vm744_vm2, %v913_v34  ;;  %v911_v42 = vpack.c.bf16 %v584_v39, %v584_v39  ;;  %v600_v43 = vsel %vm536_vm5, %v458_v28, %v568_v36  ;;  %v469_v44 = vadd.f32 %v984_v33, %v1114_v18  ;;  %v397_v45 = vadd.f32 %v1114_v18, %v396_v37  ;;  %v971_v46 = vpop.f32.mrf.mxu0  ;;  %v987_v51 = vpop.f32.mrf.mxu1 }
  0xdd   : > { %763 = vst.msk [vmem:[%s1125_s27 + $0x48] sm:$0xf] %vm744_vm2, %v929_v38  ;;  %v927_v47 = vpack.c.bf16 %v600_v43, %v600_v43  ;;  %v587_v48 = vsel %vm523_vm6, %v405_v32, %v555_v40  ;;  %v461_v49 = vadd.f32 %v1114_v18, %v460_v41  ;;  %v418_v50 = vadd.f32 %v971_v46, %v1114_v18 }
  0xde   : > { %745 = vst.msk [vmem:[%s1125_s27] sm:$0xf] %vm744_vm2, %v911_v42  ;;  %v914_v52 = vpack.c.bf16 %v587_v48, %v587_v48  ;;  %vm539_vm7 = vcmp.ge.f32.partialorder %v469_v44, 0.0  ;;  %v571_v53 = vmul.f32 0.01, %v469_v44  ;;  %vm521_vm8 = vcmp.ge.f32.partialorder %v397_v45, 0.0  ;;  %v409_v54 = vpop.f32.mrf.mxu0  ;;  %v473_v57 = vpop.f32.mrf.mxu1 }
  0xdf   : > { %761 = vst.msk [vmem:[%s1125_s27 + $0x40] sm:$0xf] %vm744_vm2, %v927_v47  ;;  %v553_v55 = vmul.f32 0.01, %v397_v45  ;;  %vm537_vm9 = vcmp.ge.f32.partialorder %v461_v49, 0.0  ;;  %vm526_vm10 = vcmp.ge.f32.partialorder %v418_v50, 0.0  ;;  %v482_v60 = vadd.f32 %v987_v51, %v1114_v18 }
  0xe0   : > { %v569_v56 = vmul.f32 0.01, %v461_v49  ;;  %748 = vst.msk [vmem:[%s1125_s27 + $0xc] sm:$0xf] %vm744_vm2, %v914_v52  ;;  %v603_v58 = vsel %vm539_vm7, %v469_v44, %v571_v53  ;;  %v558_v59 = vmul.f32 0.01, %v418_v50  ;;  %v410_v61 = vadd.f32 %v1114_v18, %v409_v54  ;;  %v972_v62 = vpop.f32.mrf.mxu0  ;;  %v988_v3 = vpop.f32.mrf.mxu1 }
  0xe1   : > { %v930_v63 = vpack.c.bf16 %v603_v58, %v603_v58  ;;  %v585_v0 = vsel %vm521_vm8, %v397_v45, %v553_v55  ;;  %v474_v2 = vadd.f32 %v1114_v18, %v473_v57  ;;  %vm542_vm11 = vcmp.ge.f32.partialorder %v482_v60, 0.0 }
  0xe2   : > { %v601_v1 = vsel %vm537_vm9, %v461_v49, %v569_v56  ;;  %v912_v4 = vpack.c.bf16 %v585_v0, %v585_v0  ;;  %v590_v6 = vsel %vm526_vm10, %v418_v50, %v558_v59  ;;  %v412_v7 = vpop.f32.mrf.mxu0  ;;  %v574_v9 = vmul.f32 0.01, %v482_v60  ;;  %v476_v11 = vpop.f32.mrf.mxu1 }
  0xe3   : > { %v928_v5 = vpack.c.bf16 %v601_v1, %v601_v1  ;;  %764 = vst.msk [vmem:[%s1125_s27 + $0x4c] sm:$0xf] %vm744_vm2, %v930_v63  ;;  %v917_v8 = vpack.c.bf16 %v590_v6, %v590_v6  ;;  %vm524_vm12 = vcmp.ge.f32.partialorder %v410_v61, 0.0  ;;  %v556_v10 = vmul.f32 0.01, %v410_v61 }
  0xe4   : > { %746 = vst.msk [vmem:[%s1125_s27 + $0x4] sm:$0xf] %vm744_vm2, %v912_v4  ;;  %vm540_vm13 = vcmp.ge.f32.partialorder %v474_v2, 0.0  ;;  %v572_v12 = vmul.f32 0.01, %v474_v2  ;;  %v421_v13 = vadd.f32 %v972_v62, %v1114_v18  ;;  %v485_v14 = vadd.f32 %v988_v3, %v1114_v18  ;;  %v975_v15 = vpop.f32.mrf.mxu0  ;;  %v991_v21 = vpop.f32.mrf.mxu1 }
  0xe5   : > { %762 = vst.msk [vmem:[%s1125_s27 + $0x44] sm:$0xf] %vm744_vm2, %v928_v5  ;;  %751 = vst.msk [vmem:[%s1125_s27 + $0x18] sm:$0xf] %vm744_vm2, %v917_v8  ;;  %v606_v16 = vsel %vm542_vm11, %v482_v60, %v574_v9  ;;  %v588_v17 = vsel %vm524_vm12, %v410_v61, %v556_v10  ;;  %v413_v19 = vadd.f32 %v1114_v18, %v412_v7 }
  0xe6   : > { %v477_v20 = vadd.f32 %v1114_v18, %v476_v11  ;;  %v933_v22 = vpack.c.bf16 %v606_v16, %v606_v16  ;;  %v915_v23 = vpack.c.bf16 %v588_v17, %v588_v17  ;;  %v604_v24 = vsel %vm540_vm13, %v474_v2, %v572_v12  ;;  %v425_v25 = vpop.f32.mrf.mxu0  ;;  %v489_v29 = vpop.f32.mrf.mxu1 }
  0xe7   : > { %vm527_vm14 = vcmp.ge.f32.partialorder %v421_v13, 0.0  ;;  %v931_v26 = vpack.c.bf16 %v604_v24, %v604_v24  ;;  %v559_v27 = vmul.f32 0.01, %v421_v13  ;;  %vm543_vm15 = vcmp.ge.f32.partialorder %v485_v14, 0.0 }
  0xe8   : > { %v575_v28 = vmul.f32 0.01, %v485_v14  ;;  %767 = vst.msk [vmem:[%s1125_s27 + $0x58] sm:$0xf] %vm744_vm2, %v933_v22  ;;  %749 = vst.msk [vmem:[%s1125_s27 + $0x10] sm:$0xf] %vm744_vm2, %v915_v23  ;;  %v976_v32 = vpop.f32.mrf.mxu0  ;;  %v434_v35 = vadd.f32 %v975_v15, %v1114_v18  ;;  %v498_v36 = vadd.f32 %v991_v21, %v1114_v18  ;;  %v992_v37 = vpop.f32.mrf.mxu1  ;;  %v426_v48 = vadd.f32 %v1114_v18, %v425_v25 }
  0xe9   : > { %vm525_vm0 = vcmp.ge.f32.partialorder %v413_v19, 0.0  ;;  %v557_v30 = vmul.f32 0.01, %v413_v19  ;;  %vm541_vm1 = vcmp.ge.f32.partialorder %v477_v20, 0.0  ;;  %v573_v31 = vmul.f32 0.01, %v477_v20 }
  0xea   : > { %765 = vst.msk [vmem:[%s1125_s27 + $0x50] sm:$0xf] %vm744_vm2, %v931_v26  ;;  %v591_v33 = vsel %vm527_vm14, %v421_v13, %v559_v27  ;;  %v607_v34 = vsel %vm543_vm15, %v485_v14, %v575_v28  ;;  %v428_v42 = vpop.f32.mrf.mxu0  ;;  %vm530_vm3 = vcmp.ge.f32.partialorder %v434_v35, 0.0  ;;  %v562_v45 = vmul.f32 0.01, %v434_v35  ;;  %v492_v46 = vpop.f32.mrf.mxu1 }
  0xeb   : > { %v918_v38 = vpack.c.bf16 %v591_v33, %v591_v33  ;;  %v934_v39 = vpack.c.bf16 %v607_v34, %v607_v34  ;;  %v589_v40 = vsel %vm525_vm0, %v413_v19, %v557_v30  ;;  %v605_v41 = vsel %vm541_vm1, %v477_v20, %v573_v31 }
  0xec   : > { %v916_v43 = vpack.c.bf16 %v589_v40, %v589_v40  ;;  %v932_v44 = vpack.c.bf16 %v605_v41, %v605_v41  ;;  %vm546_vm4 = vcmp.ge.f32.partialorder %v498_v36, 0.0  ;;  %v578_v47 = vmul.f32 0.01, %v498_v36  ;;  %v979_v50 = vpop.f32.mrf.mxu0  ;;  %v995_v55 = vpop.f32.mrf.mxu1 }
  0xed   : > { %752 = vst.msk [vmem:[%s1125_s27 + $0x1c] sm:$0xf] %vm744_vm2, %v918_v38  ;;  %768 = vst.msk [vmem:[%s1125_s27 + $0x5c] sm:$0xf] %vm744_vm2, %v934_v39  ;;  %v490_v49 = vadd.f32 %v1114_v18, %v489_v29  ;;  %v594_v51 = vsel %vm530_vm3, %v434_v35, %v562_v45  ;;  %v437_v52 = vadd.f32 %v976_v32, %v1114_v18  ;;  %vm528_vm5 = vcmp.ge.f32.partialorder %v426_v48, 0.0 }
  0xee   : > { %750 = vst.msk [vmem:[%s1125_s27 + $0x14] sm:$0xf] %vm744_vm2, %v916_v43  ;;  %766 = vst.msk [vmem:[%s1125_s27 + $0x54] sm:$0xf] %vm744_vm2, %v932_v44  ;;  %v501_v53 = vadd.f32 %v992_v37, %v1114_v18  ;;  %v429_v54 = vadd.f32 %v1114_v18, %v428_v42  ;;  %v921_v56 = vpack.c.bf16 %v594_v51, %v594_v51  ;;  %v560_v58 = vmul.f32 0.01, %v426_v48  ;;  %v441_v61 = vpop.f32.mrf.mxu0  ;;  %v505_v1 = vpop.f32.mrf.mxu1 }
  0xef   : > { %v610_v57 = vsel %vm546_vm4, %v498_v36, %v578_v47  ;;  %vm544_vm6 = vcmp.ge.f32.partialorder %v490_v49, 0.0  ;;  %v576_v60 = vmul.f32 0.01, %v490_v49  ;;  %vm531_vm7 = vcmp.ge.f32.partialorder %v437_v52, 0.0 }
  0xf0   : > { %v937_v59 = vpack.c.bf16 %v610_v57, %v610_v57  ;;  %755 = vst.msk [vmem:[%s1125_s27 + $0x28] sm:$0xf] %vm744_vm2, %v921_v56  ;;  %v592_v62 = vsel %vm528_vm5, %v426_v48, %v560_v58  ;;  %v563_v63 = vmul.f32 0.01, %v437_v52  ;;  %vm547_vm8 = vcmp.ge.f32.partialorder %v501_v53, 0.0  ;;  %v980_v13 = vpop.f32.mrf.mxu0  ;;  %v996_v17 = vpop.f32.mrf.mxu1 }
  0xf1   : > { %v579_v0 = vmul.f32 0.01, %v501_v53  ;;  %v919_v2 = vpack.c.bf16 %v592_v62, %v592_v62  ;;  %v608_v3 = vsel %vm544_vm6, %v490_v49, %v576_v60  ;;  %vm529_vm9 = vcmp.ge.f32.partialorder %v429_v54, 0.0 }
  0xf2   : > { %771 = vst.msk [vmem:[%s1125_s27 + $0x68] sm:$0xf] %vm744_vm2, %v937_v59  ;;  %v561_v4 = vmul.f32 0.01, %v429_v54  ;;  %v935_v5 = vpack.c.bf16 %v608_v3, %v608_v3  ;;  %v595_v6 = vsel %vm531_vm7, %v437_v52, %v563_v63  ;;  %v493_v8 = vadd.f32 %v1114_v18, %v492_v46  ;;  %v444_v28 = vpop.f32.mrf.mxu0  ;;  %v508_v32 = vpop.f32.mrf.mxu1 }
  0xf3   : > { %v611_v7 = vsel %vm547_vm8, %v501_v53, %v579_v0  ;;  %753 = vst.msk [vmem:[%s1125_s27 + $0x20] sm:$0xf] %vm744_vm2, %v919_v2  ;;  %v922_v9 = vpack.c.bf16 %v595_v6, %v595_v6  ;;  %v450_v12 = vadd.f32 %v979_v50, %v1114_v18  ;;  %v514_v16 = vadd.f32 %v995_v55, %v1114_v18 }
  0xf4   : > { %v938_v10 = vpack.c.bf16 %v611_v7, %v611_v7  ;;  %v593_v11 = vsel %vm529_vm9, %v429_v54, %v561_v4  ;;  %769 = vst.msk [vmem:[%s1125_s27 + $0x60] sm:$0xf] %vm744_vm2, %v935_v5  ;;  %vm545_vm10 = vcmp.ge.f32.partialorder %v493_v8, 0.0  ;;  %v577_v15 = vmul.f32 0.01, %v493_v8 }
  0xf5   : > { %v920_v14 = vpack.c.bf16 %v593_v11, %v593_v11  ;;  %756 = vst.msk [vmem:[%s1125_s27 + $0x2c] sm:$0xf] %vm744_vm2, %v922_v9  ;;  %vm534_vm11 = vcmp.ge.f32.partialorder %v450_v12, 0.0  ;;  %v566_v19 = vmul.f32 0.01, %v450_v12  ;;  %v442_v20 = vadd.f32 %v1114_v18, %v441_v61 }
  0xf6   : > { %772 = vst.msk [vmem:[%s1125_s27 + $0x6c] sm:$0xf] %vm744_vm2, %v938_v10  ;;  %v506_v21 = vadd.f32 %v1114_v18, %v505_v1  ;;  %v609_v22 = vsel %vm545_vm10, %v493_v8, %v577_v15  ;;  %vm550_vm12 = vcmp.ge.f32.partialorder %v514_v16, 0.0  ;;  %v582_v23 = vmul.f32 0.01, %v514_v16 }
  0xf7   : > { %754 = vst.msk [vmem:[%s1125_s27 + $0x24] sm:$0xf] %vm744_vm2, %v920_v14  ;;  %v453_v24 = vadd.f32 %v980_v13, %v1114_v18  ;;  %v936_v25 = vpack.c.bf16 %v609_v22, %v609_v22  ;;  %v598_v26 = vsel %vm534_vm11, %v450_v12, %v566_v19  ;;  %vm532_vm13 = vcmp.ge.f32.partialorder %v442_v20, 0.0 }
  0xf8   : > { %v564_v27 = vmul.f32 0.01, %v442_v20  ;;  %v925_v29 = vpack.c.bf16 %v598_v26, %v598_v26  ;;  %v614_v30 = vsel %vm550_vm12, %v514_v16, %v582_v23  ;;  %vm548_vm14 = vcmp.ge.f32.partialorder %v506_v21, 0.0 }
  0xf9   : > { %v580_v31 = vmul.f32 0.01, %v506_v21  ;;  %770 = vst.msk [vmem:[%s1125_s27 + $0x64] sm:$0xf] %vm744_vm2, %v936_v25  ;;  %v941_v33 = vpack.c.bf16 %v614_v30, %v614_v30  ;;  %vm535_vm15 = vcmp.ge.f32.partialorder %v453_v24, 0.0  ;;  %v517_v38 = vadd.f32 %v996_v17, %v1114_v18 }
  0xfa   : > { %v596_v34 = vsel %vm532_vm13, %v442_v20, %v564_v27  ;;  %v567_v35 = vmul.f32 0.01, %v453_v24  ;;  %759 = vst.msk [vmem:[%s1125_s27 + $0x38] sm:$0xf] %vm744_vm2, %v925_v29  ;;  %v445_v39 = vadd.f32 %v1114_v18, %v444_v28  ;;  %v509_v42 = vadd.f32 %v1114_v18, %v508_v32 }
  0xfb   : > { %v923_v36 = vpack.c.bf16 %v596_v34, %v596_v34  ;;  %v612_v37 = vsel %vm548_vm14, %v506_v21, %v580_v31  ;;  %775 = vst.msk [vmem:[%s1125_s27 + $0x78] sm:$0xf] %vm744_vm2, %v941_v33  ;;  %vm551_vm0 = vcmp.ge.f32.partialorder %v517_v38, 0.0  ;;  %v583_v44 = vmul.f32 0.01, %v517_v38 }
  0xfc   : > { %v939_v40 = vpack.c.bf16 %v612_v37, %v612_v37  ;;  %v599_v41 = vsel %vm535_vm15, %v453_v24, %v567_v35  ;;  %vm533_vm1 = vcmp.ge.f32.partialorder %v445_v39, 0.0  ;;  %v565_v45 = vmul.f32 0.01, %v445_v39 }
  0xfd   : > { %757 = vst.msk [vmem:[%s1125_s27 + $0x30] sm:$0xf] %vm744_vm2, %v923_v36  ;;  %v926_v43 = vpack.c.bf16 %v599_v41, %v599_v41  ;;  %vm549_vm3 = vcmp.ge.f32.partialorder %v509_v42, 0.0  ;;  %v581_v46 = vmul.f32 0.01, %v509_v42  ;;  %v615_v47 = vsel %vm551_vm0, %v517_v38, %v583_v44 }
  0xfe   : > { %773 = vst.msk [vmem:[%s1125_s27 + $0x70] sm:$0xf] %vm744_vm2, %v939_v40  ;;  %v942_v48 = vpack.c.bf16 %v615_v47, %v615_v47  ;;  %v597_v49 = vsel %vm533_vm1, %v445_v39, %v565_v45 }
  0xff   : > { %760 = vst.msk [vmem:[%s1125_s27 + $0x3c] sm:$0xf] %vm744_vm2, %v926_v43  ;;  %v613_v18 = vsel %vm549_vm3, %v509_v42, %v581_v46  ;;  %v924_v50 = vpack.c.bf16 %v597_v49, %v597_v49 }
 0x100   : > { %v940_v51 = vpack.c.bf16 %v613_v18, %v613_v18  ;;  %776 = vst.msk [vmem:[%s1125_s27 + $0x7c] sm:$0xf] %vm744_vm2, %v942_v48 }
 0x101   : > { %758 = vst.msk [vmem:[%s1125_s27 + $0x34] sm:$0xf] %vm744_vm2, %v924_v50 }
 0x102   : > { %774 = vst.msk [vmem:[%s1125_s27 + $0x74] sm:$0xf] %vm744_vm2, %v940_v51 }
 0x103 PF: > { %s13_s12 = sadd.s32 1, %s1033_s12  }
 0x104   : > { %p10_p4 = scmp.ge.s32.totalorder %s13_s12, 4  }
 0x106   :  { %12 = sbr.rel (!%p10_p4) target bundleno = 1 (0x1), region = 62 }

// kernel: hrnet_forward.17
= control target key start
LH: loop header
LB: loop body
LE: loop exit
PB: predicated region body
PF: predicated region fallthrough
CT: control target
= control target key end

     0   :  { %s1802_s12 = smov 0   ;;  %s1804_s13 = smov 0   ;;  %s2046_s0 = inlined_call_operand.vmem [shape: bf16[2,16,8,8], index: 0, kind: input, shape index: {}]   ;;  %s2047_s1 = inlined_call_operand.vmem [shape: bf16[16,8], index: 1, kind: input, shape index: {}]   ;;  %s2048_s2 = inlined_call_operand.vmem [shape: bf16[8,16], index: 2, kind: input, shape index: {}]   ;;  %s2049_s3 = inlined_call_operand.vmem [shape: bf16[2,16,16,16], index: 3, kind: output, shape index: {}]  }
   0x1   :  { %s1806_s14 = smov 0  }
   0x2 LB: > { %s25_s15 = sadd.s32 1, %s1774_s13  ;;  %p1440_p0 = scmp.ge.s32.totalorder %s1778_s14, 1  ;;  %s1778_s14 = sphi %s1806_s14, %s13_s14   ;;  %s1774_s13 = sphi %s1804_s13, %s2051_s13   ;;  %s1770_s12 = sphi %s1802_s12, %s2050_s12  }
   0x3   : > { %p27_p1 = scmp.ge.s32.totalorder %s25_s15, 2  ;;  %p162_p2 = scmp.lt.s32.totalorder %s1778_s14, 3 }
   0x5   : > { %s2053_s15 = smov (%p27_p1, %s25_s15), 0  ;;  %p163_p3 = pnand %p1440_p0, %p162_p2 }
   0x6   : > { %p195_p4 = scmp.lt.s32.totalorder (!%p163_p3), %s1770_s12, 1 }
   0x7   : > { %166 = sbr.rel (%p163_p3) target bundleno = 478 (0x1de), region = 32 }
   0xc   : > { %v1780_v0 = vmov 0.0   ;;  %s2055_s12 = smov (!%p195_p4, %s1770_s12), 1  ;;  %vm1781_vm0 = vmmov 0   ;;  %vm244_vm1 = vcmask 1043456   ;;  %v1842_v6 = vld [vmem:[%s2047_s1] sm:$0xff]   ;;  %vm240_vm2 = vcmask 64512  }
   0xd   : > { %1595 = vmatprep.subr.bf16.mxu0 %v1780_v0  ;;  %1601 = vmatprep.subr.bf16.mxu1 %v1780_v0  ;;  %s1512_s16 = sshll.u32 %s2055_s12, 6  ;;  %v965_v34 = vld [vmem:[%s2048_s2] sm:$0xf]  ;;  %s1513_s24 = sshll.u32 %s2055_s12, 7  ;;  %vm1306_vm3 = vcmask 125952  }
   0xe   : > { %1597 = vmatprep.mubr.msk.bf16.mxu0 %vm1781_vm0, %v1780_v0  ;;  %1603 = vmatprep.mubr.msk.bf16.mxu1 %vm1781_vm0, %v1780_v0  ;;  %s1832_s19 = scalar_lea.vmem %s2046_s0, %s1512_s16  ;;  %v1015_v35 = vsel %vm244_vm1, %v965_v34, 0  ;;  %s1971_s27 = scalar_lea.vmem %s2049_s3, %s1513_s24 }
   0xf   : > { %v219_v1 = vld [vmem:[%s1832_s19] sm:$0xf]  ;;  %v220_v2 = vld [vmem:[%s1832_s19 + $0x4] sm:$0xf]  ;;  %v221_v3 = vld [vmem:[%s1832_s19 + $0x8] sm:$0xf] }
  0x10   : > { %v246_v4 = vsel %vm244_vm1, %v219_v1, 0  ;;  %v290_v5 = vsel %vm244_vm1, %v220_v2, 0  ;;  %v222_v7 = vld [vmem:[%s1832_s19 + $0xc] sm:$0xf]  ;;  %v334_v8 = vsel %vm244_vm1, %v221_v3, 0 }
  0x11   : > { %1596 = vmatpush3.bf16.msra.mxu0 %v246_v4  ;;  %1602 = vmatpush3.bf16.msra.mxu1 %v290_v5  ;;  %v378_v9 = vsel %vm244_vm1, %v222_v7, 0  ;;  %v223_v10 = vld [vmem:[%s1832_s19 + $0x10] sm:$0xf]  ;;  %v224_v11 = vld [vmem:[%s1832_s19 + $0x14] sm:$0xf] }
  0x12   : > { %1607 = vmatprep.subr.bf16.mxu0 %v1780_v0  ;;  %1613 = vmatprep.subr.bf16.mxu1 %v1780_v0  ;;  %v422_v12 = vsel %vm244_vm1, %v223_v10, 0  ;;  %v466_v13 = vsel %vm244_vm1, %v224_v11, 0  ;;  %v225_v14 = vld [vmem:[%s1832_s19 + $0x18] sm:$0xf]  ;;  %v226_v15 = vld [vmem:[%s1832_s19 + $0x1c] sm:$0xf] }
  0x13   : > { %v510_v16 = vsel %vm244_vm1, %v225_v14, 0  ;;  %v554_v17 = vsel %vm244_vm1, %v226_v15, 0  ;;  %v227_v18 = vld [vmem:[%s1832_s19 + $0x20] sm:$0xf]  ;;  %v228_v19 = vld [vmem:[%s1832_s19 + $0x24] sm:$0xf] }
  0x14   : > { %1598 = vmatmul.mubr.msk.bf16.vlgmr.msra.gmra.mxu0 %vm240_vm2, %v1842_v6  ;;  %1604 = vmatmul.mubr.msk.bf16.vlgmr.msra.gmra.mxu1 %vm240_vm2, %v1842_v6  ;;  %v598_v20 = vsel %vm244_vm1, %v227_v18, 0  ;;  %v642_v21 = vsel %vm244_vm1, %v228_v19, 0  ;;  %v229_v22 = vld [vmem:[%s1832_s19 + $0x28] sm:$0xf]  ;;  %v230_v23 = vld [vmem:[%s1832_s19 + $0x2c] sm:$0xf] }
  0x15   : > { %1608 = vmatpush3.bf16.msra.mxu0 %v334_v8  ;;  %1614 = vmatpush3.bf16.msra.mxu1 %v378_v9  ;;  %v686_v24 = vsel %vm244_vm1, %v229_v22, 0  ;;  %v730_v25 = vsel %vm244_vm1, %v230_v23, 0  ;;  %v231_v26 = vld [vmem:[%s1832_s19 + $0x30] sm:$0xf]  ;;  %v232_v27 = vld [vmem:[%s1832_s19 + $0x34] sm:$0xf] }
  0x16   : > { %1609 = vmatprep.mubr.msk.bf16.mxu0 %vm1781_vm0, %v1780_v0  ;;  %1615 = vmatprep.mubr.msk.bf16.mxu1 %vm1781_vm0, %v1780_v0  ;;  %v774_v28 = vsel %vm244_vm1, %v231_v26, 0  ;;  %v818_v29 = vsel %vm244_vm1, %v232_v27, 0  ;;  %v233_v30 = vld [vmem:[%s1832_s19 + $0x38] sm:$0xf]  ;;  %v234_v31 = vld [vmem:[%s1832_s19 + $0x3c] sm:$0xf] }
  0x17   : > { %1619 = vmatprep.subr.bf16.mxu0 %v1780_v0  ;;  %1625 = vmatprep.subr.bf16.mxu1 %v1780_v0  ;;  %v862_v32 = vsel %vm244_vm1, %v233_v30, 0  ;;  %v906_v33 = vsel %vm244_vm1, %v234_v31, 0 }
  0x1c   : > { %1610 = vmatmul.mubr.msk.bf16.vlgmr.msra.gmra.mxu0 %vm240_vm2, %v1842_v6  ;;  %1616 = vmatmul.mubr.msk.bf16.vlgmr.msra.gmra.mxu1 %vm240_vm2, %v1842_v6 }
  0x1d   : > { %1620 = vmatpush3.bf16.msra.mxu0 %v422_v12  ;;  %1626 = vmatpush3.bf16.msra.mxu1 %v466_v13 }
  0x1e   : > { %1621 = vmatprep.mubr.msk.bf16.mxu0 %vm1781_vm0, %v1780_v0  ;;  %1627 = vmatprep.mubr.msk.bf16.mxu1 %vm1781_vm0, %v1780_v0 }
  0x1f   : > { %1631 = vmatprep.subr.bf16.mxu0 %v1780_v0  ;;  %1637 = vmatprep.subr.bf16.mxu1 %v1780_v0 }
  0x24   : > { %1622 = vmatmul.mubr.msk.bf16.vlgmr.msra.gmra.mxu0 %vm240_vm2, %v1842_v6  ;;  %1628 = vmatmul.mubr.msk.bf16.vlgmr.msra.gmra.mxu1 %vm240_vm2, %v1842_v6 }
  0x25   : > { %1632 = vmatpush3.bf16.msra.mxu0 %v510_v16  ;;  %1638 = vmatpush3.bf16.msra.mxu1 %v554_v17 }
  0x26   : > { %1633 = vmatprep.mubr.msk.bf16.mxu0 %vm1781_vm0, %v1780_v0  ;;  %1639 = vmatprep.mubr.msk.bf16.mxu1 %vm1781_vm0, %v1780_v0 }
  0x27   : > { %1643 = vmatprep.subr.bf16.mxu0 %v1780_v0  ;;  %1649 = vmatprep.subr.bf16.mxu1 %v1780_v0 }
  0x2c   : > { %1634 = vmatmul.mubr.msk.bf16.vlgmr.msra.gmra.mxu0 %vm240_vm2, %v1842_v6  ;;  %1640 = vmatmul.mubr.msk.bf16.vlgmr.msra.gmra.mxu1 %vm240_vm2, %v1842_v6 }
  0x2d   : > { %1644 = vmatpush3.bf16.msra.mxu0 %v598_v20  ;;  %1650 = vmatpush3.bf16.msra.mxu1 %v642_v21 }
  0x2e   : > { %1645 = vmatprep.mubr.msk.bf16.mxu0 %vm1781_vm0, %v1780_v0  ;;  %1651 = vmatprep.mubr.msk.bf16.mxu1 %vm1781_vm0, %v1780_v0 }
  0x2f   : > { %1655 = vmatprep.subr.bf16.mxu0 %v1780_v0  ;;  %1661 = vmatprep.subr.bf16.mxu1 %v1780_v0 }
  0x34   : > { %1646 = vmatmul.mubr.msk.bf16.vlgmr.msra.gmra.mxu0 %vm240_vm2, %v1842_v6  ;;  %1652 = vmatmul.mubr.msk.bf16.vlgmr.msra.gmra.mxu1 %vm240_vm2, %v1842_v6 }
  0x35   : > { %1656 = vmatpush3.bf16.msra.mxu0 %v686_v24  ;;  %1662 = vmatpush3.bf16.msra.mxu1 %v730_v25 }
  0x36   : > { %1657 = vmatprep.mubr.msk.bf16.mxu0 %vm1781_vm0, %v1780_v0  ;;  %1663 = vmatprep.mubr.msk.bf16.mxu1 %vm1781_vm0, %v1780_v0 }
  0x37   : > { %1667 = vmatprep.subr.bf16.mxu0 %v1780_v0  ;;  %1673 = vmatprep.subr.bf16.mxu1 %v1780_v0 }
  0x3c   : > { %1658 = vmatmul.mubr.msk.bf16.vlgmr.msra.gmra.mxu0 %vm240_vm2, %v1842_v6  ;;  %1664 = vmatmul.mubr.msk.bf16.vlgmr.msra.gmra.mxu1 %vm240_vm2, %v1842_v6 }
  0x3d   : > { %1668 = vmatpush3.bf16.msra.mxu0 %v774_v28  ;;  %1674 = vmatpush3.bf16.msra.mxu1 %v818_v29 }
  0x3e   : > { %1669 = vmatprep.mubr.msk.bf16.mxu0 %vm1781_vm0, %v1780_v0  ;;  %1675 = vmatprep.mubr.msk.bf16.mxu1 %vm1781_vm0, %v1780_v0 }
  0x3f   : > { %1679 = vmatprep.subr.bf16.mxu0 %v1780_v0  ;;  %1685 = vmatprep.subr.bf16.mxu1 %v1780_v0 }
  0x44   : > { %1670 = vmatmul.mubr.msk.bf16.vlgmr.msra.gmra.mxu0 %vm240_vm2, %v1842_v6  ;;  %1676 = vmatmul.mubr.msk.bf16.vlgmr.msra.gmra.mxu1 %vm240_vm2, %v1842_v6 }
  0x45   : > { %1680 = vmatpush3.bf16.msra.mxu0 %v862_v32  ;;  %1686 = vmatpush3.bf16.msra.mxu1 %v906_v33 }
  0x46   : > { %1681 = vmatprep.mubr.msk.bf16.mxu0 %vm1781_vm0, %v1780_v0  ;;  %1687 = vmatprep.mubr.msk.bf16.mxu1 %vm1781_vm0, %v1780_v0 }
  0x47   : > { %1727 = vmatprep.subr.msk.bf16.mxu0 %vm244_vm1, %v965_v34  ;;  %1728 = vmatprep.subr.msk.bf16.mxu1 %vm244_vm1, %v965_v34 }
  0x4c   : > { %1682 = vmatmul.mubr.msk.bf16.vlgmr.msra.gmra.mxu0 %vm240_vm2, %v1842_v6  ;;  %1688 = vmatmul.mubr.msk.bf16.vlgmr.msra.gmra.mxu1 %vm240_vm2, %v1842_v6 }
  0x4d   : > { %1692 = vmatpush3.bf16.msra.mxu0 %v1015_v35  ;;  %1726 = vmatpush3.bf16.msra.mxu1 %v1015_v35 }
  0xd4   : > { %v282_v36 = vpop.f32.mrf.mxu0  ;;  %v326_v37 = vpop.f32.mrf.mxu1 }
  0xd6   : > { %v1599_v38 = vpop.f32.mrf.mxu0  ;;  %v1605_v39 = vpop.f32.mrf.mxu1 }
  0xd8   : > { %v285_v40 = vpop.f32.mrf.mxu0  ;;  %v329_v41 = vpop.f32.mrf.mxu1 }
  0xd9   : > { %v949_v42 = vpack.c.bf16 %v285_v40, %v282_v36  ;;  %v950_v43 = vpack.c.bf16 %v329_v41, %v326_v37 }
  0xda   : > { %v1600_v44 = vpop.f32.mrf.mxu0  ;;  %v1606_v45 = vpop.f32.mrf.mxu1 }
  0xdb   : > { %1693 = vmatprep.mubr.msk.bf16.mxu0 %vm240_vm2, %v949_v42 }
  0xdc   : > { %v370_v46 = vpop.f32.mrf.mxu0  ;;  %v414_v47 = vpop.f32.mrf.mxu1  ;;  %1694 = vmatmul.mubr.msk.bf16.vlgmr.msra.gmra.mxu0 %vm240_vm2, %v950_v43 }
  0xde   : > { %v1611_v48 = vpop.f32.mrf.mxu0  ;;  %v1617_v49 = vpop.f32.mrf.mxu1 }
  0xe0   : > { %v373_v50 = vpop.f32.mrf.mxu0  ;;  %v417_v51 = vpop.f32.mrf.mxu1 }
  0xe1   : > { %v951_v52 = vpack.c.bf16 %v373_v50, %v370_v46  ;;  %v952_v53 = vpack.c.bf16 %v417_v51, %v414_v47 }
  0xe2   : > { %v1612_v54 = vpop.f32.mrf.mxu0  ;;  %v1618_v55 = vpop.f32.mrf.mxu1 }
  0xe3   : > { %1697 = vmatprep.mubr.msk.bf16.mxu0 %vm240_vm2, %v951_v52 }
  0xe4   : > { %v458_v56 = vpop.f32.mrf.mxu0  ;;  %v502_v57 = vpop.f32.mrf.mxu1  ;;  %1698 = vmatmul.mubr.msk.bf16.gmra.mxu0 %vm240_vm2, %v952_v53 }
  0xe6   : > { %v1623_v58 = vpop.f32.mrf.mxu0  ;;  %v1629_v59 = vpop.f32.mrf.mxu1 }
  0xe8   : > { %v461_v60 = vpop.f32.mrf.mxu0  ;;  %v505_v61 = vpop.f32.mrf.mxu1 }
  0xe9   : > { %v953_v62 = vpack.c.bf16 %v461_v60, %v458_v56  ;;  %v954_v63 = vpack.c.bf16 %v505_v61, %v502_v57 }
  0xea   : > { %v1624_v0 = vpop.f32.mrf.mxu0  ;;  %v1630_v1 = vpop.f32.mrf.mxu1 }
  0xeb   : > { %1701 = vmatprep.mubr.msk.bf16.mxu0 %vm240_vm2, %v953_v62 }
  0xec   : > { %v546_v2 = vpop.f32.mrf.mxu0  ;;  %v590_v3 = vpop.f32.mrf.mxu1  ;;  %1702 = vmatmul.mubr.msk.bf16.gmra.mxu0 %vm240_vm2, %v954_v63 }
  0xee   : > { %v1635_v4 = vpop.f32.mrf.mxu0  ;;  %v1641_v5 = vpop.f32.mrf.mxu1 }
  0xf0   : > { %v549_v6 = vpop.f32.mrf.mxu0  ;;  %v593_v7 = vpop.f32.mrf.mxu1 }
  0xf1   : > { %v955_v8 = vpack.c.bf16 %v549_v6, %v546_v2  ;;  %v956_v9 = vpack.c.bf16 %v593_v7, %v590_v3 }
  0xf2   : > { %v1636_v10 = vpop.f32.mrf.mxu0  ;;  %v1642_v11 = vpop.f32.mrf.mxu1 }
  0xf3   : > { %1705 = vmatprep.mubr.msk.bf16.mxu0 %vm240_vm2, %v955_v8 }
  0xf4   : > { %v634_v12 = vpop.f32.mrf.mxu0  ;;  %v678_v13 = vpop.f32.mrf.mxu1  ;;  %1706 = vmatmul.mubr.msk.bf16.gmra.mxu0 %vm240_vm2, %v956_v9 }
  0xf6   : > { %v1647_v14 = vpop.f32.mrf.mxu0  ;;  %v1653_v15 = vpop.f32.mrf.mxu1 }
  0xf8   : > { %v637_v16 = vpop.f32.mrf.mxu0  ;;  %v681_v17 = vpop.f32.mrf.mxu1 }
  0xf9   : > { %v957_v18 = vpack.c.bf16 %v637_v16, %v634_v12  ;;  %v958_v19 = vpack.c.bf16 %v681_v17, %v678_v13 }
  0xfa   : > { %v1648_v20 = vpop.f32.mrf.mxu0  ;;  %v1654_v21 = vpop.f32.mrf.mxu1 }
  0xfb   : > { %1709 = vmatprep.mubr.msk.bf16.mxu1 %vm240_vm2, %v957_v18 }
  0xfc   : > { %v722_v22 = vpop.f32.mrf.mxu0  ;;  %v766_v23 = vpop.f32.mrf.mxu1  ;;  %1710 = vmatmul.mubr.msk.bf16.vlgmr.msra.gmra.mxu1 %vm240_vm2, %v958_v19 }
  0xfe   : > { %v1659_v24 = vpop.f32.mrf.mxu0  ;;  %v1665_v25 = vpop.f32.mrf.mxu1 }
 0x100   : > { %v725_v26 = vpop.f32.mrf.mxu0  ;;  %v769_v27 = vpop.f32.mrf.mxu1 }
 0x101   : > { %v959_v28 = vpack.c.bf16 %v725_v26, %v722_v22  ;;  %v960_v29 = vpack.c.bf16 %v769_v27, %v766_v23 }
 0x102   : > { %v1660_v30 = vpop.f32.mrf.mxu0  ;;  %v1666_v31 = vpop.f32.mrf.mxu1 }
 0x103   : > { %1713 = vmatprep.mubr.msk.bf16.mxu1 %vm240_vm2, %v959_v28 }
 0x104   : > { %v810_v32 = vpop.f32.mrf.mxu0  ;;  %v854_v33 = vpop.f32.mrf.mxu1  ;;  %1714 = vmatmul.mubr.msk.bf16.gmra.mxu1 %vm240_vm2, %v960_v29 }
 0x106   : > { %v1671_v34 = vpop.f32.mrf.mxu0  ;;  %v1677_v35 = vpop.f32.mrf.mxu1 }
 0x108   : > { %v813_v36 = vpop.f32.mrf.mxu0  ;;  %v857_v37 = vpop.f32.mrf.mxu1 }
 0x109   : > { %v961_v38 = vpack.c.bf16 %v813_v36, %v810_v32  ;;  %v962_v39 = vpack.c.bf16 %v857_v37, %v854_v33 }
 0x10a   : > { %v1672_v40 = vpop.f32.mrf.mxu0  ;;  %v1678_v41 = vpop.f32.mrf.mxu1 }
 0x10b   : > { %1717 = vmatprep.mubr.msk.bf16.mxu1 %vm240_vm2, %v961_v38 }
 0x10c   : > { %v898_v42 = vpop.f32.mrf.mxu0  ;;  %v942_v43 = vpop.f32.mrf.mxu1  ;;  %1718 = vmatmul.mubr.msk.bf16.gmra.mxu1 %vm240_vm2, %v962_v39 }
 0x10e   : > { %v1683_v44 = vpop.f32.mrf.mxu0  ;;  %v1689_v45 = vpop.f32.mrf.mxu1 }
 0x110   : > { %v901_v46 = vpop.f32.mrf.mxu0  ;;  %v945_v47 = vpop.f32.mrf.mxu1 }
 0x111   : > { %v963_v48 = vpack.c.bf16 %v901_v46, %v898_v42  ;;  %v964_v49 = vpack.c.bf16 %v945_v47, %v942_v43 }
 0x112   : > { %v1684_v50 = vpop.f32.mrf.mxu0  ;;  %v1690_v51 = vpop.f32.mrf.mxu1 }
 0x113   : > { %1721 = vmatprep.mubr.msk.bf16.mxu1 %vm240_vm2, %v963_v48 }
 0x114   : > { %1722 = vmatmul.mubr.msk.bf16.gmra.mxu1 %vm240_vm2, %v964_v49 }
 0x19c   : > { %v1695_v52 = vpop.f32.mrf.mxu0 }
 0x19d   : > { %v1516_v53 = vpack.c.bf16 %v1695_v52, %v1695_v52 }
 0x19e   : > { %v1051_v54 = vpop.f32.mrf.mxu0 }
 0x19f   : > { %1309 = vst.msk [vmem:[%s1971_s27 + $0x8] sm:$0xf] %vm1306_vm3, %v1516_v53  ;;  %v1514_v55 = vpack.c.bf16 %v1051_v54, %v1051_v54 }
 0x1a0   : > { %v1696_v56 = vpop.f32.mrf.mxu0 }
 0x1a1   : > { %1307 = vst.msk [vmem:[%s1971_s27] sm:$0xf] %vm1306_vm3, %v1514_v55  ;;  %v1517_v57 = vpack.c.bf16 %v1696_v56, %v1696_v56 }
 0x1a2   : > { %v1054_v58 = vpop.f32.mrf.mxu0 }
 0x1a3   : > { %1310 = vst.msk [vmem:[%s1971_s27 + $0xc] sm:$0xf] %vm1306_vm3, %v1517_v57  ;;  %v1515_v59 = vpack.c.bf16 %v1054_v58, %v1054_v58 }
 0x1a4   : > { %v1699_v60 = vpop.f32.mrf.mxu0 }
 0x1a5   : > { %1308 = vst.msk [vmem:[%s1971_s27 + $0x4] sm:$0xf] %vm1306_vm3, %v1515_v59  ;;  %v1520_v61 = vpack.c.bf16 %v1699_v60, %v1699_v60 }
 0x1a6   : > { %v1067_v62 = vpop.f32.mrf.mxu0 }
 0x1a7   : > { %1313 = vst.msk [vmem:[%s1971_s27 + $0x18] sm:$0xf] %vm1306_vm3, %v1520_v61  ;;  %v1518_v63 = vpack.c.bf16 %v1067_v62, %v1067_v62 }
 0x1a8   : > { %v1700_v0 = vpop.f32.mrf.mxu0 }
 0x1a9   : > { %1311 = vst.msk [vmem:[%s1971_s27 + $0x10] sm:$0xf] %vm1306_vm3, %v1518_v63  ;;  %v1521_v1 = vpack.c.bf16 %v1700_v0, %v1700_v0 }
 0x1aa   : > { %v1070_v2 = vpop.f32.mrf.mxu0 }
 0x1ab   : > { %1314 = vst.msk [vmem:[%s1971_s27 + $0x1c] sm:$0xf] %vm1306_vm3, %v1521_v1  ;;  %v1519_v3 = vpack.c.bf16 %v1070_v2, %v1070_v2 }
 0x1ac   : > { %v1703_v4 = vpop.f32.mrf.mxu0 }
 0x1ad   : > { %1312 = vst.msk [vmem:[%s1971_s27 + $0x14] sm:$0xf] %vm1306_vm3, %v1519_v3  ;;  %v1524_v5 = vpack.c.bf16 %v1703_v4, %v1703_v4 }
 0x1ae   : > { %v1083_v6 = vpop.f32.mrf.mxu0 }
 0x1af   : > { %1317 = vst.msk [vmem:[%s1971_s27 + $0x28] sm:$0xf] %vm1306_vm3, %v1524_v5  ;;  %v1522_v7 = vpack.c.bf16 %v1083_v6, %v1083_v6 }
 0x1b0   : > { %v1704_v8 = vpop.f32.mrf.mxu0 }
 0x1b1   : > { %1315 = vst.msk [vmem:[%s1971_s27 + $0x20] sm:$0xf] %vm1306_vm3, %v1522_v7  ;;  %v1525_v9 = vpack.c.bf16 %v1704_v8, %v1704_v8 }
 0x1b2   : > { %v1086_v10 = vpop.f32.mrf.mxu0 }
 0x1b3   : > { %1318 = vst.msk [vmem:[%s1971_s27 + $0x2c] sm:$0xf] %vm1306_vm3, %v1525_v9  ;;  %v1523_v11 = vpack.c.bf16 %v1086_v10, %v1086_v10 }
 0x1b4   : > { %v1707_v12 = vpop.f32.mrf.mxu0 }
 0x1b5   : > { %1316 = vst.msk [vmem:[%s1971_s27 + $0x24] sm:$0xf] %vm1306_vm3, %v1523_v11  ;;  %v1528_v13 = vpack.c.bf16 %v1707_v12, %v1707_v12 }
 0x1b6   : > { %v1099_v14 = vpop.f32.mrf.mxu0 }
 0x1b7   : > { %1321 = vst.msk [vmem:[%s1971_s27 + $0x38] sm:$0xf] %vm1306_vm3, %v1528_v13  ;;  %v1526_v15 = vpack.c.bf16 %v1099_v14, %v1099_v14 }
 0x1b8   : > { %v1708_v16 = vpop.f32.mrf.mxu0 }
 0x1b9   : > { %1319 = vst.msk [vmem:[%s1971_s27 + $0x30] sm:$0xf] %vm1306_vm3, %v1526_v15  ;;  %v1529_v17 = vpack.c.bf16 %v1708_v16, %v1708_v16 }
 0x1ba   : > { %v1102_v18 = vpop.f32.mrf.mxu0 }
 0x1bb   : > { %1322 = vst.msk [vmem:[%s1971_s27 + $0x3c] sm:$0xf] %vm1306_vm3, %v1529_v17  ;;  %v1527_v19 = vpack.c.bf16 %v1102_v18, %v1102_v18 }
 0x1bc   : > { %v1711_v20 = vpop.f32.mrf.mxu1 }
 0x1bd   : > { %1320 = vst.msk [vmem:[%s1971_s27 + $0x34] sm:$0xf] %vm1306_vm3, %v1527_v19  ;;  %v1532_v21 = vpack.c.bf16 %v1711_v20, %v1711_v20 }
 0x1be   : > { %v1115_v22 = vpop.f32.mrf.mxu1 }
 0x1bf   : > { %1325 = vst.msk [vmem:[%s1971_s27 + $0x48] sm:$0xf] %vm1306_vm3, %v1532_v21  ;;  %v1530_v23 = vpack.c.bf16 %v1115_v22, %v1115_v22 }
 0x1c0   : > { %v1712_v24 = vpop.f32.mrf.mxu1 }
 0x1c1   : > { %1323 = vst.msk [vmem:[%s1971_s27 + $0x40] sm:$0xf] %vm1306_vm3, %v1530_v23  ;;  %v1533_v25 = vpack.c.bf16 %v1712_v24, %v1712_v24 }
 0x1c2   : > { %v1118_v26 = vpop.f32.mrf.mxu1 }
 0x1c3   : > { %1326 = vst.msk [vmem:[%s1971_s27 + $0x4c] sm:$0xf] %vm1306_vm3, %v1533_v25  ;;  %v1531_v27 = vpack.c.bf16 %v1118_v26, %v1118_v26 }
 0x1c4   : > { %v1715_v28 = vpop.f32.mrf.mxu1 }
 0x1c5   : > { %1324 = vst.msk [vmem:[%s1971_s27 + $0x44] sm:$0xf] %vm1306_vm3, %v1531_v27  ;;  %v1536_v29 = vpack.c.bf16 %v1715_v28, %v1715_v28 }
 0x1c6   : > { %v1131_v30 = vpop.f32.mrf.mxu1 }
 0x1c7   : > { %1329 = vst.msk [vmem:[%s1971_s27 + $0x58] sm:$0xf] %vm1306_vm3, %v1536_v29  ;;  %v1534_v31 = vpack.c.bf16 %v1131_v30, %v1131_v30 }
 0x1c8   : > { %v1716_v32 = vpop.f32.mrf.mxu1 }
 0x1c9   : > { %1327 = vst.msk [vmem:[%s1971_s27 + $0x50] sm:$0xf] %vm1306_vm3, %v1534_v31  ;;  %v1537_v33 = vpack.c.bf16 %v1716_v32, %v1716_v32 }
 0x1ca   : > { %v1134_v34 = vpop.f32.mrf.mxu1 }
 0x1cb   : > { %1330 = vst.msk [vmem:[%s1971_s27 + $0x5c] sm:$0xf] %vm1306_vm3, %v1537_v33  ;;  %v1535_v35 = vpack.c.bf16 %v1134_v34, %v1134_v34 }
 0x1cc   : > { %v1719_v36 = vpop.f32.mrf.mxu1 }
 0x1cd   : > { %1328 = vst.msk [vmem:[%s1971_s27 + $0x54] sm:$0xf] %vm1306_vm3, %v1535_v35  ;;  %v1540_v37 = vpack.c.bf16 %v1719_v36, %v1719_v36 }
 0x1ce   : > { %v1147_v38 = vpop.f32.mrf.mxu1 }
 0x1cf   : > { %1333 = vst.msk [vmem:[%s1971_s27 + $0x68] sm:$0xf] %vm1306_vm3, %v1540_v37  ;;  %v1538_v39 = vpack.c.bf16 %v1147_v38, %v1147_v38 }
 0x1d0   : > { %v1720_v40 = vpop.f32.mrf.mxu1 }
 0x1d1   : > { %1331 = vst.msk [vmem:[%s1971_s27 + $0x60] sm:$0xf] %vm1306_vm3, %v1538_v39  ;;  %v1541_v41 = vpack.c.bf16 %v1720_v40, %v1720_v40 }
 0x1d2   : > { %v1150_v42 = vpop.f32.mrf.mxu1 }
 0x1d3   : > { %1334 = vst.msk [vmem:[%s1971_s27 + $0x6c] sm:$0xf] %vm1306_vm3, %v1541_v41  ;;  %v1539_v43 = vpack.c.bf16 %v1150_v42, %v1150_v42 }
 0x1d4   : > { %v1723_v44 = vpop.f32.mrf.mxu1 }
 0x1d5   : > { %1332 = vst.msk [vmem:[%s1971_s27 + $0x64] sm:$0xf] %vm1306_vm3, %v1539_v43  ;;  %v1544_v45 = vpack.c.bf16 %v1723_v44, %v1723_v44 }
 0x1d6   : > { %v1163_v46 = vpop.f32.mrf.mxu1 }
 0x1d7   : > { %1337 = vst.msk [vmem:[%s1971_s27 + $0x78] sm:$0xf] %vm1306_vm3, %v1544_v45  ;;  %v1542_v47 = vpack.c.bf16 %v1163_v46, %v1163_v46 }
 0x1d8   : > { %v1724_v48 = vpop.f32.mrf.mxu1 }
 0x1d9   : > { %1335 = vst.msk [vmem:[%s1971_s27 + $0x70] sm:$0xf] %vm1306_vm3, %v1542_v47  ;;  %v1545_v49 = vpack.c.bf16 %v1724_v48, %v1724_v48 }
 0x1da   : > { %v1166_v50 = vpop.f32.mrf.mxu1 }
 0x1db   : > { %1338 = vst.msk [vmem:[%s1971_s27 + $0x7c] sm:$0xf] %vm1306_vm3, %v1545_v49  ;;  %v1543_v51 = vpack.c.bf16 %v1166_v50, %v1166_v50 }
 0x1dd   : > { %1336 = vst.msk [vmem:[%s1971_s27 + $0x74] sm:$0xf] %vm1306_vm3, %v1543_v51 }
 0x1de PF: > { %s13_s14 = sadd.s32 1, %s1778_s14   ;;  %s2050_s12 = smov %s1774_s13 }
 0x1df   : > { %p10_p5 = scmp.ge.s32.totalorder %s13_s14, 4   ;;  %s2051_s13 = smov %s2053_s15 }
 0x1e1   :  { %12 = sbr.rel (!%p10_p5) target bundleno = 2 (0x2), region = 65 }

// kernel: hrnet_forward.21
= control target key start
LH: loop header
LB: loop body
LE: loop exit
PB: predicated region body
PF: predicated region fallthrough
CT: control target
= control target key end

     0   :  { %8 = vsyncpa [#allocation3], 0  ;;  %s892_s0 = inlined_call_operand.vmem [shape: bf16[2,1,16,16], index: 0, kind: input, shape index: {}]   ;;  %s893_s1 = inlined_call_operand.vmem [shape: bf16[64,16], index: 1, kind: input, shape index: {}]   ;;  %s894_s2 = inlined_call_operand.vmem [shape: bf16[16,64], index: 2, kind: input, shape index: {}]   ;;  %s895_s3 = inlined_call_operand.hbm [shape: f32[2,1,64,64], index: 3, kind: output, shape index: {}]  }
   0x1   :  { %10 = vsyncpa [#allocation3 + $0x1], 0  ;;  %s747_s12 = smov 0   ;;  %s749_s13 = smov 0  }
   0x2   :  { %s751_s14 = smov 0   ;;  %s753_s15 = smov 0  }
   0x3   :  { %s755_s16 = smov 0   ;;  %s757_s17 = smov 0  }
   0x4 LB: > { %s523_s18 = sadd.s32 4294967295, %s722_s17   ;;  %s524_s19 = sadd.s32 4294967294, %s722_s17   ;;  %s722_s17 = sphi %s757_s17, %s16_s17   ;;  %s718_s16 = sphi %s755_s16, %s902_s16   ;;  %s714_s15 = sphi %s753_s15, %s901_s15   ;;  %s710_s14 = sphi %s751_s14, %s900_s14   ;;  %s706_s13 = sphi %s749_s13, %s899_s13   ;;  %s702_s12 = sphi %s747_s12, %s898_s12  }
   0x5   : > { %s28_s20 = sadd.s32 1, %s718_s16  ;;  %s110_s21 = sadd.s32 1, %s710_s14 }
   0x6   : > { %p30_p0 = scmp.ge.s32.totalorder %s28_s20, 2  ;;  %p120_p1 = scmp.ne.s32.totalorder %s710_s14, %s706_s13 }
   0x7   : > { %p121_p2 = scmp.eq.s32.totalorder %s523_s18, 1  ;;  %p126_p3 = scmp.ne.s32.totalorder %s706_s13, %s702_s12 }
   0x8   : > { %s904_s20 = smov (%p30_p0, %s28_s20), 0  ;;  %p127_p5 = scmp.eq.s32.totalorder %s524_s19, 1 }
   0x9   : > { %p787_p4 = por %p121_p2, %p120_p1  ;;  %s105_s23 = ssub.s32 %s718_s16, %s904_s20 }
   0xa   : > { %p528_p6 = scmp.ge.s32.totalorder %s722_s17, 1  ;;  %p108_p7 = scmp.eq.s32.totalorder %s105_s23, 0 }
   0xb   : > { %p794_p8 = por %p127_p5, %p126_p3  ;;  %p165_p9 = scmp.lt.s32.totalorder %s722_s17, 3 }
   0xc   : > { %s800_s25 = scalar_select %p108_p7, %s710_s14, %s110_s21  }
   0xd   : > { %p166_p10 = pnand %p528_p6, %p165_p9 }
   0xe   : > { %p194_p11 = scmp.lt.s32.totalorder (!%p166_p10), %s714_s15, 1  ;;  %s191_s21 = sand.u32 (!%p166_p10), 1, %s706_s13  }
   0xf   : > { %169 = sbr.rel (%p166_p10) target bundleno = 452 (0x1c4), region = 32  ;;  %s529_s23 = sshll.u32 (!%p166_p10), %s191_s21, 6 }
  0x10   : > { %s193_s26 = scalar_lea.vmem (!%p166_p10), [#allocation2], %s529_s23  ;;  %s552_s27 = sshll.u32 (!%p166_p10), %s714_s15, 10 }
  0x11   : > { %s841_s4 = scalar_lea.hbm (!%p166_p10), %s895_s3, %s552_s27  ;;  %s724_s6 = smov (!%p166_p10), [#allocation2]  }
  0x12   : > { %s650_s7 = sshll.u32 (!%p166_p10), %s724_s6, 4  ;;  %s651_s7 = int_to_ptr.vmem [resolvable:$false] %s650_s7 }
  0x13   : > { %s652_s8 = scalar_lea.vmem (!%p166_p10), %s651_s7, 2048 }
  0x14   : > { %v641_v0 = vld [vmem:[%s893_s1] sm:$0xff]   ;;  %vm243_vm0 = vcmask 130048   ;;  %s195_s28 = scalar_select %p194_p11, %s714_s15, 1  ;;  %v642_v2 = vld [vmem:[%s893_s1 + $0x8] sm:$0xff]   ;;  %v643_v3 = vld [vmem:[%s893_s1 + $0x10] sm:$0xff]   ;;  %vm410_vm1 = vcmask 523264  }
  0x15   : > { %565 = vmatprep.mubr.msk.bf16.mxu0 %vm243_vm0, %v641_v0  ;;  %v644_v4 = vld [vmem:[%s893_s1 + $0x18] sm:$0xff]   ;;  %v645_v5 = vld [vmem:[%s894_s2] sm:$0xff]   ;;  %s847_s15 = scalar_lea.sflag [#allocation3], %s191_s21 }
  0x16   : > { %s551_s29 = sshll.u32 %s195_s28, 3  ;;  %573 = vmatprep.subr.bf16.mxu1 %v645_v5  ;;  %s435_s28 = sshll.u32 %s193_s26, 4  ;;  %s843_s28 = int_to_ptr.vmem [resolvable:$true] %s435_s28 }
  0x17   : > { %s198_s5 = scalar_lea.vmem %s892_s0, %s551_s29  ;;  %574 = vmatpush3.bf16.msra.mxu1 %v645_v5  ;;  %p653_p1 = scmp.lt.s32.totalorder %s843_s28, %s651_s7 }
  0x18   : > { %v640_v1 = vld [vmem:[%s198_s5] sm:$0xff]   ;;  %s646_s5 = scalar_lea.vmem %s843_s28, 1024 }
  0x19   : > { %563 = vmatprep.subr.bf16.mxu0 %v640_v1  ;;  %p647_p12 = scmp.ne.s32.totalorder %s843_s28, %s646_s5  ;;  %p654_p2 = scmp.lt.s32.totalorder %s652_s8, %s646_s5 }
  0x1a   : > { %564 = vmatpush3.bf16.msra.mxu0 %v640_v1 }
  0x1b   : > { %p648_p13 = pnand %p647_p12, %p787_p4  ;;  %p655_p3 = por %p654_p2, %p653_p1 }
  0x1d   : > { %566 = vmatmul.mubr.msk.bf16.vlgmr.msra.gmra.mxu0 %vm243_vm0, %v642_v2  ;;  %p649_p0 = pneg %p648_p13 }
  0x1e   : > { %569 = vmatprep.mubr.msk.bf16.mxu0 %vm243_vm0, %v643_v3 }
  0x1f   : > { %p656_p5 = pnand %p655_p3, %p649_p0 }
  0x25   : > { %570 = vmatmul.mubr.msk.bf16.gmra.mxu0 %vm243_vm0, %v644_v4 }
  0xdd   : > { %v567_v6 = vpop.f32.mrf.mxu0 }
  0xdf   : > { %v290_v7 = vpop.f32.mrf.mxu0 }
  0xe1   : > { %v568_v8 = vpop.f32.mrf.mxu0 }
  0xe2   : > { %v322_v11 = vpack.c.bf16 %v568_v8, %v567_v6 }
  0xe3   : > { %v293_v9 = vpop.f32.mrf.mxu0 }
  0xe4   : > { %v321_v10 = vpack.c.bf16 %v293_v9, %v290_v7 }
  0xe5   : > { %v571_v12 = vpop.f32.mrf.mxu0 }
  0xe6   : > { %575 = vmatprep.mubr.msk.bf16.mxu1 %vm243_vm0, %v321_v10 }
  0xe7   : > { %v306_v13 = vpop.f32.mrf.mxu0  ;;  %576 = vmatmul.mubr.msk.bf16.vlgmr.msra.gmra.mxu1 %vm243_vm0, %v322_v11 }
  0xe9   : > { %v572_v14 = vpop.f32.mrf.mxu0 }
  0xea   : > { %v324_v17 = vpack.c.bf16 %v572_v14, %v571_v12 }
  0xeb   : > { %v309_v15 = vpop.f32.mrf.mxu0 }
  0xec   : > { %v323_v16 = vpack.c.bf16 %v309_v15, %v306_v13 }
  0xee   : > { %579 = vmatprep.mubr.msk.bf16.mxu1 %vm243_vm0, %v323_v16 }
  0xef   : > { %580 = vmatmul.mubr.msk.bf16.gmra.mxu1 %vm243_vm0, %v324_v17 }
 0x1a7   : > { %v577_v18 = vpop.f32.mrf.mxu1 }
 0x1a8   : > { %413 = vst.msk [vmem:[%s193_s26 + $0x10] sm:$0xff] %vm410_vm1, %v577_v18 }
 0x1a9   : > { %v379_v19 = vpop.f32.mrf.mxu1 }
 0x1aa   : > { %411 = vst.msk [vmem:[%s193_s26] sm:$0xff] %vm410_vm1, %v379_v19 }
 0x1ab   : > { %v578_v20 = vpop.f32.mrf.mxu1 }
 0x1ac   : > { %414 = vst.msk [vmem:[%s193_s26 + $0x18] sm:$0xff] %vm410_vm1, %v578_v20 }
 0x1ad   : > { %v382_v21 = vpop.f32.mrf.mxu1 }
 0x1ae   : > { %412 = vst.msk [vmem:[%s193_s26 + $0x8] sm:$0xff] %vm410_vm1, %v382_v21 }
 0x1af   : > { %v581_v22 = vpop.f32.mrf.mxu1 }
 0x1b0   : > { %417 = vst.msk [vmem:[%s193_s26 + $0x30] sm:$0xff] %vm410_vm1, %v581_v22 }
 0x1b1   : > { %v395_v23 = vpop.f32.mrf.mxu1 }
 0x1b2   : > { %415 = vst.msk [vmem:[%s193_s26 + $0x20] sm:$0xff] %vm410_vm1, %v395_v23 }
 0x1b3   : > { %v582_v24 = vpop.f32.mrf.mxu1 }
 0x1b4   : > { %418 = vst.msk [vmem:[%s193_s26 + $0x38] sm:$0xff] %vm410_vm1, %v582_v24 }
 0x1b5   : > { %v398_v25 = vpop.f32.mrf.mxu1 }
 0x1b6   : > { %416 = vst.msk [vmem:[%s193_s26 + $0x28] sm:$0xff] %vm410_vm1, %v398_v25 }
 0x1b7   : > { %659 = shalt.err (!%p656_p5)
}
 0x1b8   : > { %s660_s9 = scalar_lea.hbm %s841_s4, 1024  ;;  %s664_s18 = scalar_lea.hbm %s895_s3, 2048 }
 0x1b9   : > { %p661_p6 = scmp.ne.s32.totalorder %s841_s4, %s660_s9  ;;  %p665_p10 = scmp.lt.s32.totalorder %s841_s4, %s895_s3 }
 0x1ba   : > { %p666_p11 = scmp.lt.s32.totalorder %s664_s18, %s660_s9 }
 0x1bb   : > { %p662_p7 = pnand %p661_p6, %p787_p4 }
 0x1bc   : > { %p667_p12 = por %p666_p11, %p665_p10 }
 0x1bd   : > { %p663_p9 = pneg %p662_p7 }
 0x1bf   : > { %p668_p13 = pnand %p667_p12, %p663_p9 }
 0x1c1   : > { %671 = shalt.err (!%p668_p13)
}
 0x1c2   : > { %s725_s23 = smov 128   ;;  %s726_s26 = smov 8  }
 0x1c3   : > { %583 = dma.vmem_to_hbm [thread:$0]  (%p787_p4), %s843_s28, 1024, %s841_s4, %s847_s15, %s725_s23, %s725_s23, %s726_s26  }
 0x1c4 PF: > { %p589_p0 = scmp.ge.s32.totalorder %s722_s17, 2  ;;  %s450_s27 = sand.u32 1, %s702_s12  }
 0x1c5   : > { %s451_s29 = scalar_lea.sflag [#allocation3], %s450_s27 }
 0x1c6   : > { %p586_p1 = pnand %p589_p0, %p794_p8 }
 0x1c8   : > { %p587_p2 = pneg %p586_p1 }
 0x1ca   : > { %697 = dma.done.wait (%p587_p2), %s451_s29, 1024  }
 0x1cb   : > { %699 = vsyncadd (%p587_p2), %s451_s29, 4294966272  ;;  %s16_s17 = sadd.s32 1, %s722_s17   ;;  %s898_s12 = smov %s706_s13 }
 0x1cc   : > { %p13_p3 = scmp.ge.s32.totalorder %s16_s17, 4   ;;  %s899_s13 = smov %s710_s14 }
 0x1cd   : > { %s900_s14 = smov %s800_s25  ;;  %s901_s15 = smov %s718_s16 }
 0x1ce   : > { %s902_s16 = smov %s904_s20  ;;  %15 = sbr.rel (!%p13_p3) target bundleno = 4 (0x4), region = 70 }
 0x1d3   :  { %456 = vsyncpa [#allocation3], 1 }
 0x1d4   :  { %458 = vsyncpa [#allocation3 + $0x1], 1 }

// kernel: hrnet_forward.20
= control target key start
LH: loop header
LB: loop body
LE: loop exit
PB: predicated region body
PF: predicated region fallthrough
CT: control target
= control target key end

     0   :  { %s2203_s19 = smov 0   ;;  %s2205_s20 = smov 0   ;;  %s2730_s0 = inlined_call_operand.vmem [shape: bf16[2,8,256], index: 0, kind: input, shape index: {}]   ;;  %s2731_s1 = inlined_call_operand.vmem [shape: bf16[2,16,256], index: 1, kind: input, shape index: {}]   ;;  %s2732_s2 = inlined_call_operand.vmem [shape: bf16[2,32,256], index: 2, kind: input, shape index: {}]   ;;  %s2733_s3 = inlined_call_operand.vmem [shape: bf16[2,64,256], index: 3, kind: input, shape index: {}]   ;;  %s2734_s4 = inlined_call_operand.vmem [shape: bf16[128,8], index: 4, kind: input, shape index: {}]   ;;  %s2735_s5 = inlined_call_operand.vmem [shape: bf16[128,16], index: 5, kind: input, shape index: {}]   ;;  %s2736_s6 = inlined_call_operand.vmem [shape: bf16[128,32], index: 6, kind: input, shape index: {}]   ;;  %s2737_s7 = inlined_call_operand.vmem [shape: bf16[128,64], index: 7, kind: input, shape index: {}]   ;;  %s2738_s8 = inlined_call_operand.vmem [shape: f32[128,1], index: 8, kind: input, shape index: {}]   ;;  %s2739_s9 = inlined_call_operand.vmem [shape: bf16[1,128], index: 9, kind: input, shape index: {}]   ;;  %s2740_s10 = inlined_call_operand.<no memory space> [shape: f32[1,1], index: 10, kind: input, shape index: {}]   ;;  %s2741_s11 = inlined_call_operand.vmem [shape: bf16[2,1,256], index: 11, kind: output, shape index: {}]  }
   0x1   :  { %v16_v0 = vstv %s2740_s10  ;;  %s2207_s21 = smov 0  }
   0x2   :  { %17 = vst [vmem:[#allocation2] sm:$0x1] %v16_v0 }
   0x3 LB: > { %s35_s10 = sadd.s32 1, %s2132_s20  ;;  %p1933_p0 = scmp.ge.s32.totalorder %s2136_s21, 1  ;;  %s2136_s21 = sphi %s2207_s21, %s23_s21   ;;  %s2132_s20 = sphi %s2205_s20, %s2753_s20   ;;  %s2128_s19 = sphi %s2203_s19, %s2752_s19  }
   0x4   : > { %p37_p1 = scmp.ge.s32.totalorder %s35_s10, 2  ;;  %p411_p2 = scmp.lt.s32.totalorder %s2136_s21, 3 }
   0x6   : > { %s2755_s10 = smov (%p37_p1, %s35_s10), 0  ;;  %p412_p3 = pnand %p1933_p0, %p411_p2 }
   0x8   : > { %415 = sbr.rel (%p412_p3) target bundleno = 591 (0x24f), region = 64 }
   0xd   : > { %p486_p4 = scmp.lt.s32.totalorder %s2128_s19, 1  ;;  %v2138_v1 = vmov 0   ;;  %vm828_vm0 = vcmask 1043456   ;;  %v2064_v7 = vld [vmem:[%s2735_s5] sm:$0xff]   ;;  %vm620_vm1 = vcmask 130048   ;;  %vm803_vm2 = vcmask 64512  }
   0xe   : > { %677 = vmatprep.mubr.bf16.mxu0 %v2138_v1  ;;  %867 = vmatprep.mubr.bf16.mxu1 %v2138_v1  ;;  %v2065_v9 = vld [vmem:[%s2734_s4] sm:$0xff]   ;;  %v2066_v14 = vld [vmem:[%s2735_s5 + $0x8] sm:$0xff]   ;;  %v2068_v18 = vld [vmem:[%s2735_s5 + $0x10] sm:$0xff]   ;;  %vm1028_vm3 = vcmask 261120   ;;  %vm1302_vm4 = vcmask 523264  }
   0xf   : > { %s2757_s19 = smov (!%p486_p4, %s2128_s19), 1  ;;  %2057 = vset.pattern.permute.xlu0 %v2138_v1  ;;  %2058 = vset.pattern.permute.xlu1 %v2138_v1  ;;  %v2067_v15 = vld [vmem:[%s2734_s4 + $0x8] sm:$0xff]   ;;  %v2069_v23 = vld [vmem:[%s2734_s4 + $0x10] sm:$0xff]   ;;  %v2070_v26 = vld [vmem:[%s2735_s5 + $0x18] sm:$0xff]  }
  0x10   : > { %s2028_s22 = sshll.u32 %s2757_s19, 4  ;;  %s2027_s23 = sshll.u32 %s2757_s19, 3  ;;  %v2071_v27 = vld [vmem:[%s2734_s4 + $0x18] sm:$0xff]   ;;  %v1486_v28 = vld [vmem:[%s2738_s8 + $0x70] sm:$0xff]  ;;  %v2072_v29 = vld [vmem:[%s2735_s5 + $0x20] sm:$0xff]  }
  0x11   : > { %s503_s26 = scalar_lea.vmem %s2731_s1, %s2028_s22  ;;  %s493_s29 = scalar_lea.vmem %s2730_s0, %s2027_s23  ;;  %1560 = vperm.xlu0 %2057, %v1486_v28   ;;  %v1484_v30 = vld [vmem:[%s2738_s8 + $0x60] sm:$0xff]  ;;  %v1487_v32 = vld [vmem:[%s2738_s8 + $0x78] sm:$0xff]  ;;  %v1485_v33 = vld [vmem:[%s2738_s8 + $0x68] sm:$0xff] }
  0x12   : > { %v2059_v2 = vld [vmem:[%s503_s26 + $0x4] ss:$8 sps:$4 sm:$0xff]   ;;  %v2062_v4 = vld [vmem:[%s503_s26] ss:$8 sps:$4 sm:$0xff]   ;;  %s2029_s30 = sshll.u32 %s2757_s19, 5  ;;  %s2030_s14 = sshll.u32 %s2757_s19, 6  ;;  %1550 = vperm.xlu1 %2058, %v1484_v30  }
  0x13   : > { %v551_v3 = vld [vmem:[%s493_s29] sm:$0xff]  ;;  %659 = vmatprep.subr.bf16.mxu0 %v2059_v2  ;;  %s513_s22 = scalar_lea.vmem %s2732_s2, %s2029_s30  ;;  %s2249_s25 = scalar_lea.vmem %s2733_s3, %s2030_s14  ;;  %v1482_v34 = vld [vmem:[%s2738_s8 + $0x50] sm:$0xff]  ;;  %v1483_v35 = vld [vmem:[%s2738_s8 + $0x58] sm:$0xff] }
  0x14   : > { %v1970_v5 = vcombine.high %v551_v3, %v551_v3  ;;  %v1969_v6 = vcombine.low %v551_v3, %v551_v3  ;;  %660 = vmatpush1.bf16.msra.mxu0 %v2062_v4  ;;  %v2074_v10 = vld [vmem:[%s513_s22 + $0x10] ss:$8 sps:$4 sm:$0xff]   ;;  %v2076_v11 = vld [vmem:[%s513_s22 + $0x14] ss:$8 sps:$4 sm:$0xff]   ;;  %v2084_v16 = vld [vmem:[%s2249_s25 + $0x20] ss:$8 sps:$4 sm:$0xff]  }
  0x15   : > { %v2077_v12 = vld [vmem:[%s2249_s25 + $0x30] ss:$8 sps:$4 sm:$0xff]   ;;  %v2079_v13 = vld [vmem:[%s2249_s25 + $0x34] ss:$8 sps:$4 sm:$0xff]   ;;  %1065 = vmatprep.subr.bf16.mxu0 %v2076_v11  ;;  %v2086_v17 = vld [vmem:[%s2249_s25 + $0x24] ss:$8 sps:$4 sm:$0xff]   ;;  %1565 = vperm.xlu0 %2057, %v1487_v32  }
  0x16   : > { %1971 = vmatprep.subr.msk.bf16.mxu1 %vm828_vm0, %v1970_v5  ;;  %v830_v8 = vsel %vm828_vm0, %v1969_v6, 0  ;;  %v2089_v19 = vld [vmem:[%s2249_s25 + $0x10] ss:$8 sps:$4 sm:$0xff]   ;;  %v2091_v20 = vld [vmem:[%s2249_s25 + $0x14] ss:$8 sps:$4 sm:$0xff]   ;;  %v2073_v31 = vld [vmem:[%s2734_s4 + $0x20] sm:$0xff]   ;;  %1555 = vperm.xlu1 %2058, %v1485_v33  }
  0x17   : > { %850 = vmatpush1.bf16.msra.mxu1 %v830_v8  ;;  %1953 = vmatmul.mubr.msk.bf16.vlgmr.msra.gmra.mxu0 %vm620_vm1, %v2064_v7  ;;  %v2092_v21 = vld [vmem:[%s513_s22] ss:$8 sps:$4 sm:$0xff]   ;;  %v2094_v22 = vld [vmem:[%s513_s22 + $0x4] ss:$8 sps:$4 sm:$0xff]   ;;  %v1478_v40 = vld [vmem:[%s2738_s8 + $0x30] sm:$0xff]  ;;  %s1942_s24 = sshll.u32 %s2757_s19, 1 }
  0x18   : > { %687 = vmatprep.mubr.bf16.mxu0 %v2138_v1  ;;  %1066 = vmatpush1.bf16.msra.mxu0 %v2074_v10  ;;  %v2097_v24 = vld [vmem:[%s2249_s25 + $0x4] ss:$8 sps:$4 sm:$0xff]   ;;  %v2095_v25 = vld [vmem:[%s2249_s25] ss:$8 sps:$4 sm:$0xff]   ;;  %v1479_v41 = vld [vmem:[%s2738_s8 + $0x38] sm:$0xff]  ;;  %s532_s27 = scalar_lea.vmem %s2741_s11, %s1942_s24 }
  0x19   : > { %1335 = vmatprep.subr.bf16.mxu1 %v2079_v13  ;;  %1067 = vmatprep.subr.bf16.mxu0 %v2094_v22  ;;  %v2080_v36 = vld [vmem:[%s2735_s5 + $0x28] sm:$0xff]   ;;  %v1480_v37 = vld [vmem:[%s2738_s8 + $0x40] sm:$0xff]  ;;  %v2082_v42 = vld [vmem:[%s2735_s5 + $0x30] sm:$0xff]  }
  0x1a   : > { %1972 = vmatmul.mubr.msk.bf16.vlgmr.msra.gmra.mxu1 %vm803_vm2, %v2065_v9  ;;  %1540 = vperm.xlu0 %2057, %v1482_v34   ;;  %v2081_v38 = vld [vmem:[%s2734_s4 + $0x28] sm:$0xff]   ;;  %v1476_v43 = vld [vmem:[%s2738_s8 + $0x20] sm:$0xff]  ;;  %v2083_v44 = vld [vmem:[%s2734_s4 + $0x30] sm:$0xff]  }
  0x1b   : > { %877 = vmatprep.mubr.bf16.mxu1 %v2138_v1  ;;  %1336 = vmatpush1.bf16.msra.mxu1 %v2077_v12  ;;  %v1481_v39 = vld [vmem:[%s2738_s8 + $0x48] sm:$0xff]  ;;  %v1474_v46 = vld [vmem:[%s2738_s8 + $0x10] sm:$0xff]  ;;  %v1475_v47 = vld [vmem:[%s2738_s8 + $0x18] sm:$0xff] }
  0x1c   : > { %1337 = vmatprep.subr.bf16.mxu1 %v2086_v17  ;;  %1068 = vmatpush1.bf16.msra.mxu0 %v2092_v21  ;;  %v1477_v45 = vld [vmem:[%s2738_s8 + $0x28] sm:$0xff]  ;;  %v2087_v48 = vld [vmem:[%s2735_s5 + $0x38] sm:$0xff]   ;;  %v1472_v49 = vld [vmem:[%s2738_s8] sm:$0xff] }
  0x1d   : > { %1545 = vperm.xlu1 %2058, %v1483_v35   ;;  %v2088_v50 = vld [vmem:[%s2734_s4 + $0x38] sm:$0xff]   ;;  %v1473_v51 = vld [vmem:[%s2738_s8 + $0x8] sm:$0xff]  ;;  %v2098_v52 = vld [vmem:[%s2736_s6] sm:$0xff]  }
  0x1e   : > { %1530 = vperm.xlu0 %2057, %v1480_v37   ;;  %v2099_v53 = vld [vmem:[%s2737_s7] sm:$0xff]   ;;  %v2100_v55 = vld [vmem:[%s2736_s6 + $0x8] sm:$0xff]   ;;  %v2102_v57 = vld [vmem:[%s2736_s6 + $0x10] sm:$0xff]  }
  0x1f   : > { %1954 = vmatmul.mubr.msk.bf16.gmra.mxu0 %vm620_vm1, %v2066_v14  ;;  %1338 = vmatpush1.bf16.msra.mxu1 %v2084_v16  ;;  %v1713_v54 = vld [vmem:[#allocation2] sm:$0x1]  ;;  %v2101_v56 = vld [vmem:[%s2737_s7 + $0x8] sm:$0xff]   ;;  %v2103_v58 = vld [vmem:[%s2737_s7 + $0x10] sm:$0xff]  }
  0x20   : > { %697 = vmatprep.mubr.bf16.mxu0 %v2138_v1  ;;  %1339 = vmatprep.subr.bf16.mxu1 %v2091_v20  ;;  %v2104_v59 = vld [vmem:[%s2736_s6 + $0x18] sm:$0xff]   ;;  %v2106_v61 = vld [vmem:[%s2736_s6 + $0x20] sm:$0xff]   ;;  %v2108_v63 = vld [vmem:[%s2736_s6 + $0x28] sm:$0xff]  }
  0x21   : > { %1535 = vperm.xlu1 %2058, %v1481_v39   ;;  %v2105_v60 = vld [vmem:[%s2737_s7 + $0x18] sm:$0xff]   ;;  %v2107_v62 = vld [vmem:[%s2737_s7 + $0x20] sm:$0xff]   ;;  %v2109_v0 = vld [vmem:[%s2737_s7 + $0x28] sm:$0xff]  }
  0x22   : > { %1973 = vmatmul.mubr.msk.bf16.gmra.mxu1 %vm803_vm2, %v2067_v15  ;;  %1520 = vperm.xlu0 %2057, %v1478_v40   ;;  %v2110_v2 = vld [vmem:[%s2736_s6 + $0x30] sm:$0xff]   ;;  %v2112_v4 = vld [vmem:[%s2736_s6 + $0x38] sm:$0xff]  }
  0x23   : > { %887 = vmatprep.mubr.bf16.mxu1 %v2138_v1  ;;  %1340 = vmatpush1.bf16.msra.mxu1 %v2089_v19  ;;  %v2111_v3 = vld [vmem:[%s2737_s7 + $0x30] sm:$0xff]   ;;  %v2113_v5 = vld [vmem:[%s2737_s7 + $0x38] sm:$0xff]  }
  0x24   : > { %1341 = vmatprep.subr.bf16.mxu1 %v2097_v24 }
  0x25   : > { %1525 = vperm.xlu1 %2058, %v1479_v41  }
  0x26   : > { %1510 = vperm.xlu0 %2057, %v1476_v43  }
  0x27   : > { %1955 = vmatmul.mubr.msk.bf16.gmra.mxu0 %vm620_vm1, %v2068_v18  ;;  %1342 = vmatpush1.bf16.msra.mxu1 %v2095_v25 }
  0x28   : > { %707 = vmatprep.mubr.bf16.mxu0 %v2138_v1 }
  0x29   : > { %1515 = vperm.xlu1 %2058, %v1477_v45  }
  0x2a   : > { %1974 = vmatmul.mubr.msk.bf16.gmra.mxu1 %vm803_vm2, %v2069_v23  ;;  %1500 = vperm.xlu0 %2057, %v1474_v46  }
  0x2b   : > { %897 = vmatprep.mubr.bf16.mxu1 %v2138_v1 }
  0x2d   : > { %1505 = vperm.xlu1 %2058, %v1475_v47  }
  0x2e   : > { %1490 = vperm.xlu0 %2057, %v1472_v49  }
  0x2f   : > { %1956 = vmatmul.mubr.msk.bf16.gmra.mxu0 %vm620_vm1, %v2070_v26 }
  0x30   : > { %717 = vmatprep.mubr.bf16.mxu0 %v2138_v1 }
  0x31   : > { %1495 = vperm.xlu1 %2058, %v1473_v51  }
  0x32   : > { %1975 = vmatmul.mubr.msk.bf16.gmra.mxu1 %vm803_vm2, %v2071_v27  ;;  %1716 = vperm.xlu0 %2057, %v1713_v54  }
  0x33   : > { %907 = vmatprep.mubr.bf16.mxu1 %v2138_v1 }
  0x37   : > { %1957 = vmatmul.mubr.msk.bf16.gmra.mxu0 %vm620_vm1, %v2072_v29 }
  0x38   : > { %727 = vmatprep.mubr.bf16.mxu0 %v2138_v1 }
  0x3a   : > { %1976 = vmatmul.mubr.msk.bf16.gmra.mxu1 %vm803_vm2, %v2073_v31 }
  0x3b   : > { %917 = vmatprep.mubr.bf16.mxu1 %v2138_v1 }
  0x3f   : > { %1958 = vmatmul.mubr.msk.bf16.gmra.mxu0 %vm620_vm1, %v2080_v36 }
  0x40   : > { %737 = vmatprep.mubr.bf16.mxu0 %v2138_v1 }
  0x42   : > { %1977 = vmatmul.mubr.msk.bf16.gmra.mxu1 %vm803_vm2, %v2081_v38 }
  0x43   : > { %927 = vmatprep.mubr.bf16.mxu1 %v2138_v1 }
  0x47   : > { %1959 = vmatmul.mubr.msk.bf16.gmra.mxu0 %vm620_vm1, %v2082_v42 }
  0x48   : > { %747 = vmatprep.mubr.bf16.mxu0 %v2138_v1 }
  0x4a   : > { %1978 = vmatmul.mubr.msk.bf16.gmra.mxu1 %vm803_vm2, %v2083_v44 }
  0x4b   : > { %937 = vmatprep.mubr.bf16.mxu1 %v2138_v1 }
  0x4f   : > { %1960 = vmatmul.mubr.msk.bf16.gmra.mxu0 %vm620_vm1, %v2087_v48 }
  0x50   : > { %1085 = vmatprep.mubr.bf16.mxu0 %v2138_v1 }
  0x52   : > { %1979 = vmatmul.mubr.msk.bf16.gmra.mxu1 %vm803_vm2, %v2088_v50 }
  0x53   : > { %1359 = vmatprep.mubr.bf16.mxu1 %v2138_v1 }
  0x57   : > { %1992 = vmatmul.mubr.msk.bf16.vlgmr.msra.gmra.mxu0 %vm1028_vm3, %v2098_v52 }
  0x58   : > { %1095 = vmatprep.mubr.bf16.mxu0 %v2138_v1 }
  0x5a   : > { %2016 = vmatmul.mubr.msk.bf16.vlgmr.msra.gmra.mxu1 %vm1302_vm4, %v2099_v53 }
  0x5b   : > { %1369 = vmatprep.mubr.bf16.mxu1 %v2138_v1 }
  0x5f   : > { %1993 = vmatmul.mubr.msk.bf16.gmra.mxu0 %vm1028_vm3, %v2100_v55 }
  0x60   : > { %1105 = vmatprep.mubr.bf16.mxu0 %v2138_v1 }
  0x62   : > { %2017 = vmatmul.mubr.msk.bf16.gmra.mxu1 %vm1302_vm4, %v2101_v56 }
  0x63   : > { %1379 = vmatprep.mubr.bf16.mxu1 %v2138_v1 }
  0x67   : > { %1994 = vmatmul.mubr.msk.bf16.gmra.mxu0 %vm1028_vm3, %v2102_v57 }
  0x68   : > { %1115 = vmatprep.mubr.bf16.mxu0 %v2138_v1 }
  0x6a   : > { %2018 = vmatmul.mubr.msk.bf16.gmra.mxu1 %vm1302_vm4, %v2103_v58 }
  0x6b   : > { %1389 = vmatprep.mubr.bf16.mxu1 %v2138_v1 }
  0x6f   : > { %1995 = vmatmul.mubr.msk.bf16.gmra.mxu0 %vm1028_vm3, %v2104_v59 }
  0x70   : > { %1125 = vmatprep.mubr.bf16.mxu0 %v2138_v1 }
  0x72   : > { %2019 = vmatmul.mubr.msk.bf16.gmra.mxu1 %vm1302_vm4, %v2105_v60 }
  0x73   : > { %1399 = vmatprep.mubr.bf16.mxu1 %v2138_v1 }
  0x77   : > { %1996 = vmatmul.mubr.msk.bf16.gmra.mxu0 %vm1028_vm3, %v2106_v61 }
  0x78   : > { %1135 = vmatprep.mubr.bf16.mxu0 %v2138_v1 }
  0x7a   : > { %2020 = vmatmul.mubr.msk.bf16.gmra.mxu1 %vm1302_vm4, %v2107_v62 }
  0x7b   : > { %1409 = vmatprep.mubr.bf16.mxu1 %v2138_v1 }
  0x7f   : > { %1997 = vmatmul.mubr.msk.bf16.gmra.mxu0 %vm1028_vm3, %v2108_v63 }
  0x80   : > { %1145 = vmatprep.mubr.bf16.mxu0 %v2138_v1 }
  0x82   : > { %2021 = vmatmul.mubr.msk.bf16.gmra.mxu1 %vm1302_vm4, %v2109_v0 }
  0x83   : > { %1419 = vmatprep.mubr.bf16.mxu1 %v2138_v1 }
  0x87   : > { %1998 = vmatmul.mubr.msk.bf16.gmra.mxu0 %vm1028_vm3, %v2110_v2 }
  0x88   : > { %1155 = vmatprep.mubr.bf16.mxu0 %v2138_v1 }
  0x8a   : > { %2022 = vmatmul.mubr.msk.bf16.gmra.mxu1 %vm1302_vm4, %v2111_v3 }
  0x8b   : > { %1429 = vmatprep.mubr.bf16.mxu1 %v2138_v1 }
  0x8c   : > { %v2482_v39 = vpop.permute.xlu0 %1560 }
  0x8d   : > { %2744 = vst [vmem:[#allocation3_spill] sm:$0xff] %v2482_v39  ;;  %v2488_v46 = vpop.permute.xlu1 %1550 }
  0x8f   : > { %1999 = vmatmul.mubr.msk.bf16.gmra.mxu0 %vm1028_vm3, %v2112_v4 }
  0x90   : > { %1755 = vmatprep.mubr.bf16.mxu0 %v2138_v1  ;;  %v2492_v50 = vpop.permute.xlu0 %1565 }
  0x91   : > { %2745 = vst [vmem:[#allocation4_spill] sm:$0xff] %v2492_v50  ;;  %v2498_v57 = vpop.permute.xlu1 %1555 }
  0x92   : > { %2023 = vmatmul.mubr.msk.bf16.gmra.mxu1 %vm1302_vm4, %v2113_v5 }
  0x95   : > { %v2502_v61 = vpop.permute.xlu0 %1540 }
  0x98   : > { %v2508_v5 = vpop.permute.xlu1 %1545 }
  0xd7   : > { %v679_v6 = vpop.f32.mrf.mxu0 }
  0xd9   : > { %v681_v8 = vpop.f32.mrf.mxu0 }
  0xda   : > { %v869_v7 = vpop.f32.mrf.mxu1 }
  0xdb   : > { %v2460_v9 = vadd.f32 %v869_v7, %v679_v6  ;;  %v683_v11 = vpop.f32.mrf.mxu0 }
  0xdc   : > { %v871_v10 = vpop.f32.mrf.mxu1 }
  0xdd   : > { %v2462_v12 = vadd.f32 %v871_v10, %v681_v8  ;;  %v685_v14 = vpop.f32.mrf.mxu0  ;;  %v2512_v10 = vpop.permute.xlu0 %1530 }
  0xde   : > { %v873_v13 = vpop.f32.mrf.mxu1 }
  0xdf   : > { %v2464_v15 = vadd.f32 %v873_v13, %v683_v11  ;;  %v689_v17 = vpop.f32.mrf.mxu0 }
  0xe0   : > { %v875_v16 = vpop.f32.mrf.mxu1 }
  0xe1   : > { %v2466_v18 = vadd.f32 %v875_v16, %v685_v14  ;;  %v691_v19 = vpop.f32.mrf.mxu0 }
  0xe2   : > { %v879_v1 = vpop.f32.mrf.mxu1 }
  0xe3   : > { %v2468_v20 = vadd.f32 %v879_v1, %v689_v17  ;;  %v693_v22 = vpop.f32.mrf.mxu0 }
  0xe4   : > { %v881_v21 = vpop.f32.mrf.mxu1 }
  0xe5   : > { %v2470_v23 = vadd.f32 %v881_v21, %v691_v19  ;;  %v695_v25 = vpop.f32.mrf.mxu0  ;;  %v2518_v19 = vpop.permute.xlu1 %1535 }
  0xe6   : > { %v883_v24 = vpop.f32.mrf.mxu1 }
  0xe7   : > { %v2472_v26 = vadd.f32 %v883_v24, %v693_v22  ;;  %v699_v28 = vpop.f32.mrf.mxu0 }
  0xe8   : > { %v885_v27 = vpop.f32.mrf.mxu1 }
  0xe9   : > { %v2474_v29 = vadd.f32 %v885_v27, %v695_v25  ;;  %v701_v31 = vpop.f32.mrf.mxu0  ;;  %v2522_v25 = vpop.permute.xlu0 %1520 }
  0xea   : > { %v889_v30 = vpop.f32.mrf.mxu1 }
  0xeb   : > { %v2476_v32 = vadd.f32 %v889_v30, %v699_v28  ;;  %v703_v34 = vpop.f32.mrf.mxu0 }
  0xec   : > { %v891_v33 = vpop.f32.mrf.mxu1 }
  0xed   : > { %v2478_v35 = vadd.f32 %v891_v33, %v701_v31  ;;  %v705_v37 = vpop.f32.mrf.mxu0 }
  0xee   : > { %v893_v36 = vpop.f32.mrf.mxu1 }
  0xef   : > { %v2480_v38 = vadd.f32 %v893_v36, %v703_v34  ;;  %v709_v41 = vpop.f32.mrf.mxu0  ;;  %v2528_v36 = vpop.permute.xlu1 %1525 }
  0xf0   : > { %v895_v40 = vpop.f32.mrf.mxu1 }
  0xf1   : > { %v2484_v42 = vadd.f32 %v895_v40, %v705_v37  ;;  %v711_v44 = vpop.f32.mrf.mxu0 }
  0xf2   : > { %v899_v43 = vpop.f32.mrf.mxu1 }
  0xf3   : > { %v2486_v45 = vadd.f32 %v899_v43, %v709_v41  ;;  %v713_v48 = vpop.f32.mrf.mxu0  ;;  %v2532_v43 = vpop.permute.xlu0 %1510 }
  0xf4   : > { %v901_v47 = vpop.f32.mrf.mxu1 }
  0xf5   : > { %v2490_v49 = vadd.f32 %v901_v47, %v711_v44  ;;  %v715_v52 = vpop.f32.mrf.mxu0 }
  0xf6   : > { %v903_v51 = vpop.f32.mrf.mxu1 }
  0xf7   : > { %v2494_v53 = vadd.f32 %v903_v51, %v713_v48  ;;  %v719_v55 = vpop.f32.mrf.mxu0 }
  0xf8   : > { %v905_v54 = vpop.f32.mrf.mxu1 }
  0xf9   : > { %v2496_v56 = vadd.f32 %v905_v54, %v715_v52  ;;  %v721_v59 = vpop.f32.mrf.mxu0 }
  0xfa   : > { %v909_v58 = vpop.f32.mrf.mxu1 }
  0xfb   : > { %v2500_v60 = vadd.f32 %v909_v58, %v719_v55  ;;  %v723_v63 = vpop.f32.mrf.mxu0  ;;  %v2538_v55 = vpop.permute.xlu1 %1515 }
  0xfc   : > { %v911_v62 = vpop.f32.mrf.mxu1 }
  0xfd   : > { %v2504_v0 = vadd.f32 %v911_v62, %v721_v59  ;;  %v725_v3 = vpop.f32.mrf.mxu0 }
  0xfe   : > { %v913_v2 = vpop.f32.mrf.mxu1 }
  0xff   : > { %v2506_v4 = vadd.f32 %v913_v2, %v723_v63  ;;  %v729_v7 = vpop.f32.mrf.mxu0  ;;  %v1501_v63 = vpop.permute.xlu0 %1500 }
 0x100   : > { %v915_v6 = vpop.f32.mrf.mxu1 }
 0x101   : > { %v2510_v8 = vadd.f32 %v915_v6, %v725_v3  ;;  %v731_v13 = vpop.f32.mrf.mxu0 }
 0x102   : > { %v919_v11 = vpop.f32.mrf.mxu1 }
 0x103   : > { %v2514_v14 = vadd.f32 %v919_v11, %v729_v7  ;;  %v733_v17 = vpop.f32.mrf.mxu0 }
 0x104   : > { %v921_v16 = vpop.f32.mrf.mxu1 }
 0x105   : > { %v2516_v1 = vadd.f32 %v921_v16, %v731_v13  ;;  %v735_v22 = vpop.f32.mrf.mxu0  ;;  %v2550_v13 = vpop.permute.xlu1 %1505 }
 0x106   : > { %v923_v21 = vpop.f32.mrf.mxu1 }
 0x107   : > { %v2520_v24 = vadd.f32 %v923_v21, %v733_v17  ;;  %v739_v28 = vpop.f32.mrf.mxu0 }
 0x108   : > { %v925_v27 = vpop.f32.mrf.mxu1 }
 0x109   : > { %v2524_v30 = vadd.f32 %v925_v27, %v735_v22  ;;  %v741_v33 = vpop.f32.mrf.mxu0  ;;  %v1491_v22 = vpop.permute.xlu0 %1490 }
 0x10a   : > { %v929_v31 = vpop.f32.mrf.mxu1 }
 0x10b   : > { %v2526_v34 = vadd.f32 %v929_v31, %v739_v28  ;;  %v743_v40 = vpop.f32.mrf.mxu0 }
 0x10c   : > { %v931_v37 = vpop.f32.mrf.mxu1 }
 0x10d   : > { %v2530_v41 = vadd.f32 %v931_v37, %v741_v33  ;;  %v745_v47 = vpop.f32.mrf.mxu0 }
 0x10e   : > { %v933_v44 = vpop.f32.mrf.mxu1 }
 0x10f   : > { %v2534_v48 = vadd.f32 %v933_v44, %v743_v40  ;;  %v749_v52 = vpop.f32.mrf.mxu0 }
 0x110   : > { %v935_v51 = vpop.f32.mrf.mxu1 }
 0x111   : > { %v2536_v54 = vadd.f32 %v935_v51, %v745_v47  ;;  %v751_v59 = vpop.f32.mrf.mxu0 }
 0x112   : > { %v939_v58 = vpop.f32.mrf.mxu1 }
 0x113   : > { %v2540_v62 = vadd.f32 %v939_v58, %v749_v52  ;;  %v2542_v3 = vpop.f32.mrf.mxu0  ;;  %v1496_v52 = vpop.permute.xlu1 %1495 }
 0x114   : > { %v941_v2 = vpop.f32.mrf.mxu1 }
 0x115   : > { %v2544_v6 = vadd.f32 %v941_v2, %v751_v59  ;;  %v2548_v11 = vpop.f32.mrf.mxu0 }
 0x116   : > { %v2546_v7 = vpop.f32.mrf.mxu1  ;;  %2746 = vst [vmem:[#allocation5_spill] sm:$0xff] %v2548_v11 }
 0x117   : > { %v1087_v17 = vpop.f32.mrf.mxu0 }
 0x118   : > { %v2552_v16 = vpop.f32.mrf.mxu1  ;;  %v1166_v21 = vadd.f32 %v1087_v17, %v2460_v9 }
 0x119   : > { %2747 = vst [vmem:[#allocation6_spill] sm:$0xff] %v2552_v16  ;;  %v1089_v28 = vpop.f32.mrf.mxu0 }
 0x11a   : > { %v1361_v27 = vpop.f32.mrf.mxu1  ;;  %v1167_v33 = vadd.f32 %v1089_v28, %v2462_v12 }
 0x11b   : > { %v1440_v31 = vadd.f32 %v1361_v27, %v1166_v21  ;;  %v1091_v40 = vpop.f32.mrf.mxu0 }
 0x11c   : > { %v1363_v37 = vpop.f32.mrf.mxu1  ;;  %v1168_v51 = vadd.f32 %v1091_v40, %v2464_v15 }
 0x11d   : > { %v1441_v44 = vadd.f32 %v1363_v37, %v1167_v33  ;;  %v1568_v47 = vadd.f32 %v1491_v22, %v1440_v31  ;;  %v1093_v59 = vpop.f32.mrf.mxu0 }
 0x11e   : > { %v1365_v58 = vpop.f32.mrf.mxu1  ;;  %v1169_v39 = vadd.f32 %v1093_v59, %v2466_v18 }
 0x11f   : > { %v1442_v2 = vadd.f32 %v1365_v58, %v1168_v51  ;;  %v1569_v50 = vadd.f32 %v1491_v22, %v1441_v44  ;;  %v1097_v17 = vpop.f32.mrf.mxu0  ;;  %v1632_v16 = vmul.f32 0.01, %v1568_v47  ;;  %vm1600_vm5 = vcmp.ge.f32.partialorder %v1568_v47, 0.0 }
 0x120   : > { %v1367_v9 = vpop.f32.mrf.mxu1  ;;  %v1170_v12 = vadd.f32 %v1097_v17, %v2468_v20 }
 0x121   : > { %v1570_v11 = vadd.f32 %v1496_v52, %v1442_v2  ;;  %v1443_v21 = vadd.f32 %v1367_v9, %v1169_v39  ;;  %v1099_v28 = vpop.f32.mrf.mxu0  ;;  %vm1601_vm7 = vcmp.ge.f32.partialorder %v1569_v50, 0.0  ;;  %v1633_v33 = vmul.f32 0.01, %v1569_v50 }
 0x122   : > { %v1371_v27 = vpop.f32.mrf.mxu1  ;;  %v1171_v15 = vadd.f32 %v1099_v28, %v2470_v23  ;;  %v2560_v44 = vsel %vm1600_vm5, %v1568_v47, %v1632_v16 }
 0x123   : > { %vm1602_vm6 = vcmp.ge.f32.partialorder %v1570_v11, 0.0  ;;  %v1634_v31 = vmul.f32 0.01, %v1570_v11  ;;  %v1571_v37 = vadd.f32 %v1496_v52, %v1443_v21  ;;  %v1444_v22 = vadd.f32 %v1371_v27, %v1170_v12  ;;  %v1101_v18 = vpop.f32.mrf.mxu0 }
 0x124   : > { %v1373_v40 = vpop.f32.mrf.mxu1  ;;  %v1172_v39 = vadd.f32 %v1101_v18, %v2472_v26  ;;  %v2572_v28 = vsel %vm1601_vm7, %v1569_v50, %v1633_v33 }
 0x125   : > { %v2562_v51 = vsel %vm1602_vm6, %v1570_v11, %v1634_v31  ;;  %v1445_v58 = vadd.f32 %v1373_v40, %v1171_v15  ;;  %vm1603_vm8 = vcmp.ge.f32.partialorder %v1571_v37, 0.0  ;;  %v1635_v20 = vmul.f32 0.01, %v1571_v37  ;;  %v1103_v9 = vpop.f32.mrf.mxu0 }
 0x126   : > { %v1697_v59 = vpack.c.bf16 %v2562_v51, %v2560_v44  ;;  %v1572_v2 = vadd.f32 %v1501_v63, %v1444_v22  ;;  %v1375_v23 = vpop.f32.mrf.mxu1  ;;  %v1173_v21 = vadd.f32 %v1103_v9, %v2474_v29 }
 0x127   : > { %v1573_v17 = vadd.f32 %v1501_v63, %v1445_v58  ;;  %v1446_v52 = vadd.f32 %v1375_v23, %v1172_v39  ;;  %v1107_v47 = vpop.f32.mrf.mxu0  ;;  %v2568_v11 = vsel %vm1603_vm8, %v1571_v37, %v1635_v20 }
 0x128   : > { %v1636_v12 = vmul.f32 0.01, %v1572_v2  ;;  %v1377_v16 = vpop.f32.mrf.mxu1  ;;  %vm1604_vm9 = vcmp.ge.f32.partialorder %v1572_v2, 0.0  ;;  %v1174_v15 = vadd.f32 %v1107_v47, %v2476_v32  ;;  %v1698_v29 = vpack.c.bf16 %v2568_v11, %v2572_v28 }
 0x129   : > { %v1574_v26 = vadd.f32 %v2550_v13, %v1446_v52  ;;  %v1447_v27 = vadd.f32 %v1377_v16, %v1173_v21  ;;  %v1637_v31 = vmul.f32 0.01, %v1573_v17  ;;  %v1109_v63 = vpop.f32.mrf.mxu0  ;;  %vm1605_vm11 = vcmp.ge.f32.partialorder %v1573_v17, 0.0 }
 0x12a   : > { %v1381_v22 = vpop.f32.mrf.mxu1  ;;  %v1175_v18 = vadd.f32 %v1109_v63, %v2478_v35  ;;  %v2579_v58 = vsel %vm1604_vm9, %v1572_v2, %v1636_v12 }
 0x12b   : > { %vm1606_vm10 = vcmp.ge.f32.partialorder %v1574_v26, 0.0  ;;  %v1638_v40 = vmul.f32 0.01, %v1574_v26  ;;  %v1575_v37 = vadd.f32 %v2550_v13, %v1447_v27  ;;  %v1448_v39 = vadd.f32 %v1381_v22, %v1174_v15  ;;  %v1111_v33 = vpop.f32.mrf.mxu0 }
 0x12c   : > { %v1383_v50 = vpop.f32.mrf.mxu1  ;;  %v1176_v9 = vadd.f32 %v1111_v33, %v2480_v38  ;;  %v2588_v12 = vsel %vm1605_vm11, %v1573_v17, %v1637_v31 }
 0x12d   : > { %v2581_v20 = vsel %vm1606_vm10, %v1574_v26, %v1638_v40  ;;  %vm1607_vm12 = vcmp.ge.f32.partialorder %v1575_v37, 0.0  ;;  %v1639_v32 = vmul.f32 0.01, %v1575_v37  ;;  %v1449_v23 = vadd.f32 %v1383_v50, %v1175_v18  ;;  %v1113_v21 = vpop.f32.mrf.mxu0 }
 0x12e   : > { %v1385_v52 = vpop.f32.mrf.mxu1  ;;  %v1699_v13 = vpack.c.bf16 %v2581_v20, %v2579_v58  ;;  %v1576_v35 = vadd.f32 %v2532_v43, %v1448_v39  ;;  %v1177_v2 = vadd.f32 %v1113_v21, %v2484_v42  ;;  %v1717_v20 = vpop.permute.xlu0 %1716 }
 0x12f   : > { %v2590_v16 = vsel %vm1607_vm12, %v1575_v37, %v1639_v32  ;;  %v1577_v47 = vadd.f32 %v2532_v43, %v1449_v23  ;;  %v1450_v26 = vadd.f32 %v1385_v52, %v1176_v9  ;;  %v1117_v15 = vpop.f32.mrf.mxu0 }
 0x130   : > { %v1387_v27 = vpop.f32.mrf.mxu1  ;;  %v1700_v38 = vpack.c.bf16 %v2590_v16, %v2588_v12  ;;  %v1178_v63 = vadd.f32 %v1117_v15, %v2486_v45  ;;  %v1640_v42 = vmul.f32 0.01, %v1576_v35  ;;  %vm1608_vm13 = vcmp.ge.f32.partialorder %v1576_v35, 0.0 }
 0x131   : > { %v1451_v22 = vadd.f32 %v1387_v27, %v1177_v2  ;;  %v1578_v40 = vadd.f32 %v2538_v55, %v1450_v26  ;;  %v1119_v39 = vpop.f32.mrf.mxu0  ;;  %v1641_v43 = vmul.f32 0.01, %v1577_v47  ;;  %vm1609_vm0 = vcmp.ge.f32.partialorder %v1577_v47, 0.0 }
 0x132   : > { %v1391_v18 = vpop.f32.mrf.mxu1  ;;  %v1179_v37 = vadd.f32 %v1119_v39, %v2490_v49  ;;  %v2603_v26 = vsel %vm1608_vm13, %v1576_v35, %v1640_v42  ;;  %v1719_v12 = vlaneseq }
 0x133   : > { %v1579_v17 = vadd.f32 %v2538_v55, %v1451_v22  ;;  %v1452_v31 = vadd.f32 %v1391_v18, %v1178_v63  ;;  %vm1610_vm14 = vcmp.ge.f32.partialorder %v1578_v40, 0.0  ;;  %v1642_v50 = vmul.f32 0.01, %v1578_v40  ;;  %v1121_v32 = vpop.f32.mrf.mxu0 }
 0x134   : > { %v1393_v33 = vpop.f32.mrf.mxu1  ;;  %v1180_v21 = vadd.f32 %v1121_v32, %v2494_v53  ;;  %v1720_v16 = vshrl.u32 %v1719_v12, 7 }
 0x135   : > { %vm1611_vm15 = vcmp.ge.f32.partialorder %v1579_v17, 0.0  ;;  %v1643_v23 = vmul.f32 0.01, %v1579_v17  ;;  %v1580_v45 = vadd.f32 %v2522_v25, %v1452_v31  ;;  %v1453_v9 = vadd.f32 %v1393_v33, %v1179_v37  ;;  %v1123_v2 = vpop.f32.mrf.mxu0 }
 0x136   : > { %v2600_v52 = vsel %vm1610_vm14, %v1578_v40, %v1642_v50  ;;  %v1395_v55 = vpop.f32.mrf.mxu1  ;;  %v1181_v27 = vadd.f32 %v1123_v2, %v2496_v56  ;;  %v2611_v37 = vsel %vm1609_vm0, %v1577_v47, %v1641_v43  ;;  %v1721_v58 = vsub.s32 0, %v1720_v16 }
 0x137   : > { %v1581_v49 = vadd.f32 %v2522_v25, %v1453_v9  ;;  %v1454_v15 = vadd.f32 %v1395_v55, %v1180_v21  ;;  %v1127_v63 = vpop.f32.mrf.mxu0  ;;  %v2607_v18 = vsel %vm1611_vm15, %v1579_v17, %v1643_v23  ;;  %v1701_v39 = vpack.c.bf16 %v2600_v52, %v2603_v26  ;;  %v1696_v52 = vld [vmem:[%s2739_s9] sm:$0x1] }
 0x138   : > { %v1397_v22 = vpop.f32.mrf.mxu1  ;;  %v1644_v40 = vmul.f32 0.01, %v1580_v45  ;;  %v1182_v42 = vadd.f32 %v1127_v63, %v2500_v60  ;;  %v1702_v56 = vpack.c.bf16 %v2607_v18, %v2611_v37  ;;  %vm1612_vm1 = vcmp.ge.f32.partialorder %v1580_v45, 0.0 }
 0x139   : > { %v1455_v31 = vadd.f32 %v1397_v22, %v1181_v27  ;;  %v1645_v53 = vmul.f32 0.01, %v1581_v49  ;;  %v1582_v35 = vadd.f32 %v2528_v36, %v1454_v15  ;;  %v1129_v50 = vpop.f32.mrf.mxu0  ;;  %vm1613_vm2 = vcmp.ge.f32.partialorder %v1581_v49, 0.0 }
 0x13a   : > { %v1401_v25 = vpop.f32.mrf.mxu1  ;;  %v1183_v33 = vadd.f32 %v1129_v50, %v2504_v0  ;;  %v2620_v55 = vsel %vm1612_vm1, %v1580_v45, %v1644_v40  ;;  %v1722_v11 = vrot.slane %v1717_v20, %v1721_v58 }
 0x13b   : > { %v1583_v17 = vadd.f32 %v2528_v36, %v1455_v31  ;;  %vm1614_vm3 = vcmp.ge.f32.partialorder %v1582_v35, 0.0  ;;  %v1646_v32 = vmul.f32 0.01, %v1582_v35  ;;  %v1456_v47 = vadd.f32 %v1401_v25, %v1182_v42  ;;  %v1131_v23 = vpop.f32.mrf.mxu0 }
 0x13c   : > { %v1403_v43 = vpop.f32.mrf.mxu1  ;;  %v1184_v60 = vadd.f32 %v1131_v23, %v2506_v4  ;;  %v2626_v0 = vsel %vm1613_vm2, %v1581_v49, %v1645_v53 }
 0x13d   : > { %vm1615_vm4 = vcmp.ge.f32.partialorder %v1583_v17, 0.0  ;;  %v1647_v9 = vmul.f32 0.01, %v1583_v17  ;;  %v1457_v21 = vadd.f32 %v1403_v43, %v1183_v33  ;;  %v2622_v2 = vsel %vm1614_vm3, %v1582_v35, %v1646_v32  ;;  %v1133_v36 = vpop.f32.mrf.mxu0 }
 0x13e   : > { %v1584_v27 = vadd.f32 %v2512_v10, %v1456_v47  ;;  %v1405_v15 = vpop.f32.mrf.mxu1  ;;  %v1185_v31 = vadd.f32 %v1133_v36, %v2510_v8  ;;  %v1703_v35 = vpack.c.bf16 %v2622_v2, %v2620_v55  ;;  %v1791_v55 = vld [vmem:[%s532_s27] sm:$0x3] }
 0x13f   : > { %v1585_v22 = vadd.f32 %v2512_v10, %v1457_v21  ;;  %v1458_v63 = vadd.f32 %v1405_v15, %v1184_v60  ;;  %v2630_v42 = vsel %vm1615_vm4, %v1583_v17, %v1647_v9  ;;  %v1137_v45 = vpop.f32.mrf.mxu0 }
 0x140   : > { %v1648_v25 = vmul.f32 0.01, %v1584_v27  ;;  %v1407_v4 = vpop.f32.mrf.mxu1  ;;  %v1704_v40 = vpack.c.bf16 %v2630_v42, %v2626_v0  ;;  %vm1616_vm5 = vcmp.ge.f32.partialorder %v1584_v27, 0.0  ;;  %v1186_v10 = vadd.f32 %v1137_v45, %v2514_v14 }
 0x141   : > { %v1586_v49 = vadd.f32 %v2518_v19, %v1458_v63  ;;  %v1459_v53 = vadd.f32 %v1407_v4, %v1185_v31  ;;  %v1649_v50 = vmul.f32 0.01, %v1585_v22  ;;  %v1139_v8 = vpop.f32.mrf.mxu0  ;;  %vm1617_vm7 = vcmp.ge.f32.partialorder %v1585_v22, 0.0 }
 0x142   : > { %v1411_v33 = vpop.f32.mrf.mxu1  ;;  %v1187_v47 = vadd.f32 %v1139_v8, %v2516_v1  ;;  %v2640_v43 = vsel %vm1616_vm5, %v1584_v27, %v1648_v25  ;;  %vm1784_vm5 = vcmask 1040384  }
 0x143   : > { %vm1618_vm6 = vcmp.ge.f32.partialorder %v1586_v49, 0.0  ;;  %v1650_v17 = vmul.f32 0.01, %v1586_v49  ;;  %v1587_v32 = vadd.f32 %v2518_v19, %v1459_v53  ;;  %v1460_v23 = vadd.f32 %v1411_v33, %v1186_v10  ;;  %v1141_v21 = vpop.f32.mrf.mxu0 }
 0x144   : > { %v1413_v9 = vpop.f32.mrf.mxu1  ;;  %v1188_v14 = vadd.f32 %v1141_v21, %v2520_v24  ;;  %v2649_v25 = vsel %vm1617_vm7, %v1585_v22, %v1649_v50  ;;  %vm1787_vm7 = vcmask 1041409  }
 0x145   : > { %v2642_v60 = vsel %vm1618_vm6, %v1586_v49, %v1650_v17  ;;  %vm1619_vm8 = vcmp.ge.f32.partialorder %v1587_v32, 0.0  ;;  %v1651_v15 = vmul.f32 0.01, %v1587_v32  ;;  %v1461_v36 = vadd.f32 %v1413_v9, %v1187_v47  ;;  %v1143_v31 = vpop.f32.mrf.mxu0 }
 0x146   : > { %v1415_v63 = vpop.f32.mrf.mxu1  ;;  %v1705_v19 = vpack.c.bf16 %v2642_v60, %v2640_v43  ;;  %v1588_v1 = vadd.f32 %v2502_v61, %v1460_v23  ;;  %v1189_v27 = vadd.f32 %v1143_v31, %v2524_v30  ;;  %vm1785_vm6 = vsmask.f32 256 }
 0x147   : > { %v2651_v4 = vsel %vm1619_vm8, %v1587_v32, %v1651_v15  ;;  %v1589_v45 = vadd.f32 %v2502_v61, %v1461_v36  ;;  %v1462_v49 = vadd.f32 %v1415_v63, %v1188_v14  ;;  %v1147_v10 = vpop.f32.mrf.mxu0  ;;  %vm1788_vm8 = vsmask.f32 1280 }
 0x148   : > { %v1417_v53 = vpop.f32.mrf.mxu1  ;;  %v1706_v24 = vpack.c.bf16 %v2651_v4, %v2649_v25  ;;  %v1190_v8 = vadd.f32 %v1147_v10, %v2526_v34  ;;  %v1652_v30 = vmul.f32 0.01, %v1588_v1  ;;  %vm1620_vm9 = vcmp.ge.f32.partialorder %v1588_v1, 0.0 }
 0x149   : > { %v1463_v33 = vadd.f32 %v1417_v53, %v1189_v27  ;;  %v1590_v17 = vadd.f32 %v2508_v5, %v1462_v49  ;;  %v1149_v23 = vpop.f32.mrf.mxu0  ;;  %v1653_v61 = vmul.f32 0.01, %v1589_v45  ;;  %vm1621_vm12 = vcmp.ge.f32.partialorder %v1589_v45, 0.0 }
 0x14a   : > { %v1421_v47 = vpop.f32.mrf.mxu1  ;;  %v1191_v32 = vadd.f32 %v1149_v23, %v2530_v41  ;;  %v2664_v49 = vsel %vm1620_vm9, %v1588_v1, %v1652_v30  ;;  %vm1786_vm9 = vmand %vm1784_vm5, %vm1785_vm6 }
 0x14b   : > { %v1591_v22 = vadd.f32 %v2508_v5, %v1463_v33  ;;  %v1464_v50 = vadd.f32 %v1421_v47, %v1190_v8  ;;  %vm1622_vm10 = vcmp.ge.f32.partialorder %v1590_v17, 0.0  ;;  %v1654_v9 = vmul.f32 0.01, %v1590_v17  ;;  %v1151_v15 = vpop.f32.mrf.mxu0 }
 0x14c   : > { %v1423_v21 = vpop.f32.mrf.mxu1  ;;  %v1192_v31 = vadd.f32 %v1151_v15, %v2534_v48 }
 0x14d   : > { %vm1623_vm11 = vcmp.ge.f32.partialorder %v1591_v22, 0.0  ;;  %v1655_v36 = vmul.f32 0.01, %v1591_v22  ;;  %v1592_v34 = vadd.f32 %v2488_v46, %v1464_v50  ;;  %v1465_v14 = vadd.f32 %v1423_v21, %v1191_v32  ;;  %v1153_v27 = vpop.f32.mrf.mxu0 }
 0x14e   : > { %v2661_v63 = vsel %vm1622_vm10, %v1590_v17, %v1654_v9  ;;  %v1425_v5 = vpop.f32.mrf.mxu1  ;;  %v1193_v53 = vadd.f32 %v1153_v27, %v2536_v54  ;;  %v944_v17 = vadd.f32 %v2546_v7, %v2542_v3  ;;  %v1685_v32 = vsel %vm1621_vm12, %v1589_v45, %v1653_v61  ;;  %v2749_v3 = vld [vmem:[#allocation6_spill] sm:$0xff]  ;;  %vm1789_vm10 = vmand %vm1787_vm7, %vm1788_vm8 }
 0x14f   : > { %v1593_v41 = vadd.f32 %v2488_v46, %v1465_v14  ;;  %v1466_v10 = vadd.f32 %v1425_v5, %v1192_v31  ;;  %v1157_v8 = vpop.f32.mrf.mxu0  ;;  %v1687_v47 = vsel %vm1623_vm11, %v1591_v22, %v1655_v36  ;;  %v1707_v23 = vpack.c.bf16 %v2661_v63, %v2664_v49  ;;  %v2748_v36 = vld [vmem:[#allocation5_spill] sm:$0xff]  ;;  %vm1790_vm11 = vmor %vm1789_vm10, %vm1786_vm9 }
 0x150   : > { %v1427_v33 = vpop.f32.mrf.mxu1  ;;  %v1656_v50 = vmul.f32 0.01, %v1592_v34  ;;  %v1194_v46 = vadd.f32 %v1157_v8, %v2540_v62  ;;  %v1708_v21 = vpack.c.bf16 %v1687_v47, %v1685_v32  ;;  %vm1624_vm13 = vcmp.ge.f32.partialorder %v1592_v34, 0.0 }
 0x151   : > { %v1467_v48 = vadd.f32 %v1427_v33, %v1193_v53  ;;  %v1657_v1 = vmul.f32 0.01, %v1593_v41  ;;  %v1594_v30 = vadd.f32 %v2498_v57, %v1466_v10  ;;  %v1159_v9 = vpop.f32.mrf.mxu0  ;;  %vm1625_vm14 = vcmp.ge.f32.partialorder %v1593_v41, 0.0  ;;  %v2750_v53 = vld [vmem:[#allocation3_spill] sm:$0xff] }
 0x152   : > { %v1431_v54 = vpop.f32.mrf.mxu1  ;;  %v1195_v15 = vadd.f32 %v1159_v9, %v2544_v6  ;;  %v946_v7 = vadd.f32 %v2749_v3, %v2748_v36  ;;  %v1688_v27 = vsel %vm1624_vm13, %v1592_v34, %v1656_v50  ;;  %v2751_v3 = vld [vmem:[#allocation4_spill] sm:$0xff] }
 0x153   : > { %v1595_v22 = vadd.f32 %v2498_v57, %v1467_v48  ;;  %vm1626_vm15 = vcmp.ge.f32.partialorder %v1594_v30, 0.0  ;;  %v1658_v14 = vmul.f32 0.01, %v1594_v30  ;;  %v1468_v45 = vadd.f32 %v1431_v54, %v1194_v46  ;;  %v1161_v63 = vpop.f32.mrf.mxu0 }
 0x154   : > { %v1433_v61 = vpop.f32.mrf.mxu1  ;;  %v1196_v5 = vadd.f32 %v1161_v63, %v944_v17  ;;  %v1689_v6 = vsel %vm1625_vm14, %v1593_v41, %v1657_v1 }
 0x155   : > { %vm1627_vm0 = vcmp.ge.f32.partialorder %v1595_v22, 0.0  ;;  %v1659_v31 = vmul.f32 0.01, %v1595_v22  ;;  %v1469_v62 = vadd.f32 %v1433_v61, %v1195_v15  ;;  %v1690_v49 = vsel %vm1626_vm15, %v1594_v30, %v1658_v14  ;;  %v1163_v57 = vpop.f32.mrf.mxu0 }
 0x156   : > { %v1596_v10 = vadd.f32 %v2750_v53, %v1468_v45  ;;  %v1435_v33 = vpop.f32.mrf.mxu1  ;;  %v1197_v48 = vadd.f32 %v1163_v57, %v946_v7  ;;  %v1709_v9 = vpack.c.bf16 %v1690_v49, %v1688_v27 }
 0x157   : > { %v1597_v8 = vadd.f32 %v2750_v53, %v1469_v62  ;;  %v1470_v47 = vadd.f32 %v1435_v33, %v1196_v5  ;;  %v1691_v32 = vsel %vm1627_vm0, %v1595_v22, %v1659_v31 }
 0x158   : > { %v1437_v46 = vpop.f32.mrf.mxu1  ;;  %v1710_v54 = vpack.c.bf16 %v1691_v32, %v1689_v6  ;;  %v1660_v36 = vmul.f32 0.01, %v1596_v10  ;;  %vm1628_vm1 = vcmp.ge.f32.partialorder %v1596_v10, 0.0 }
 0x159   : > { %v1598_v15 = vadd.f32 %v2751_v3, %v1470_v47  ;;  %v1471_v17 = vadd.f32 %v1437_v46, %v1197_v48  ;;  %v1661_v34 = vmul.f32 0.01, %v1597_v8  ;;  %vm1629_vm3 = vcmp.ge.f32.partialorder %v1597_v8, 0.0 }
 0x15a   : > { %v1692_v41 = vsel %vm1628_vm1, %v1596_v10, %v1660_v36 }
 0x15b   : > { %vm1630_vm2 = vcmp.ge.f32.partialorder %v1598_v15, 0.0  ;;  %v1662_v50 = vmul.f32 0.01, %v1598_v15  ;;  %v1599_v30 = vadd.f32 %v2751_v3, %v1471_v17  ;;  %v1693_v22 = vsel %vm1629_vm3, %v1597_v8, %v1661_v34 }
 0x15d   : > { %v1694_v1 = vsel %vm1630_vm2, %v1598_v15, %v1662_v50  ;;  %vm1631_vm4 = vcmp.ge.f32.partialorder %v1599_v30, 0.0  ;;  %v1663_v14 = vmul.f32 0.01, %v1599_v30 }
 0x15e   : > { %v1711_v7 = vpack.c.bf16 %v1694_v1, %v1692_v41 }
 0x15f   : > { %v1695_v45 = vsel %vm1631_vm4, %v1599_v30, %v1663_v14 }
 0x160   : > { %v1712_v61 = vpack.c.bf16 %v1695_v45, %v1693_v22 }
 0x162   : > { %1723 = vmatprep.subr.bf16.mxu0 %v1712_v61 }
 0x163   : > { %1724 = vmatpush1.bf16.msra.mxu0 %v1711_v7 }
 0x164   : > { %1725 = vmatprep.subr.bf16.mxu0 %v1710_v54 }
 0x167   : > { %1726 = vmatpush1.bf16.msra.mxu0 %v1709_v9 }
 0x168   : > { %1727 = vmatprep.subr.bf16.mxu0 %v1708_v21 }
 0x16b   : > { %1728 = vmatpush1.bf16.msra.mxu0 %v1707_v23 }
 0x16c   : > { %1729 = vmatprep.subr.bf16.mxu0 %v1706_v24 }
 0x16f   : > { %1730 = vmatpush1.bf16.msra.mxu0 %v1705_v19 }
 0x170   : > { %1731 = vmatprep.subr.bf16.mxu0 %v1704_v40 }
 0x173   : > { %1732 = vmatpush1.bf16.msra.mxu0 %v1703_v35 }
 0x174   : > { %1733 = vmatprep.subr.bf16.mxu0 %v1702_v56 }
 0x177   : > { %1734 = vmatpush1.bf16.msra.mxu0 %v1701_v39 }
 0x178   : > { %1735 = vmatprep.subr.bf16.mxu0 %v1700_v38  ;;  %v2139_v38 = vmov 1966171168  }
 0x179   : > { %v1770_v26 = vunpack.c.l.s4 %v2139_v38 }
 0x17b   : > { %1736 = vmatpush1.bf16.msra.mxu0 %v1699_v13  ;;  %v1771_v13 = vunpack.c.0.s8 %v1770_v26 }
 0x17c   : > { %1737 = vmatprep.subr.bf16.mxu0 %v1698_v29 }
 0x17f   : > { %1738 = vmatpush1.bf16.msra.mxu0 %v1697_v59  ;;  %v1774_v59 = vsub.s32 %v1771_v13, %v1720_v16 }
 0x182   : > { %1756 = vmatmul.mubr.bf16.vlgmr.msra.gmra.mxu0 %v1696_v52 }
 0x242   : > { %v1757_v18 = vpop.f32.mrf.mxu0 }
 0x243   : > { %v1758_v44 = vadd.f32 %v1757_v18, %v1722_v11 }
 0x244   : > { %v1759_v28 = vpop.f32.mrf.mxu0 }
 0x245   : > { %v1760_v51 = vadd.f32 %v1759_v28, %v1722_v11 }
 0x246   : > { %v1761_v29 = vpop.f32.mrf.mxu0 }
 0x247   : > { %v2024_v39 = vpack.c.bf16 %v1760_v51, %v1758_v44 }
 0x248   : > { %v1762_v37 = vpop.f32.mrf.mxu0 }
 0x249   : > { %v1775_v56 = vrot.slane %v2024_v39, %v1774_v59 }
 0x24b   : > { %v1782_v2 = vrot.slane %v1775_v56, %v1774_v59 }
 0x24d   : > { %v1792_v0 = vsel %vm1790_vm11, %v1782_v2, %v1791_v55 }
 0x24e   : > { %1793 = vst [vmem:[%s532_s27] sm:$0x3] %v1792_v0 }
 0x24f PF: > { %s23_s21 = sadd.s32 1, %s2136_s21   ;;  %s2752_s19 = smov %s2132_s20 }
 0x250   : > { %p20_p5 = scmp.ge.s32.totalorder %s23_s21, 4   ;;  %s2753_s20 = smov %s2755_s10 }
 0x252   :  { %22 = sbr.rel (!%p20_p5) target bundleno = 3 (0x3), region = 103 }

</bundles_post_ra>
